<compile_context>
chip_gen: v5e
topology: v5e:2x2
jax: 0.10.0
libtpu: 0.0.40
codegen_flags: <defaults>
</compile_context>

<pallas_src>
import functools

import jax
import jax.numpy as jnp
from jax.experimental import pallas as pl
from jax.experimental.pallas import tpu as pltpu

BN_EPS = 1e-5
LEAKY_SLOPE = 0.01          # PyTorch nn.LeakyReLU() default


def _round_up(x, m):
    return (x + m - 1) // m * m


def _tpu_vmem_capacity_bytes():
    """Physical per-core VMEM; falls back to the smallest (v7x) if unknown."""
    try:
        info = pltpu.get_tpu_info()
        for name in ("vmem_capacity_bytes", "vmem_bytes", "vmem_size_bytes"):
            v = getattr(info, name, None)
            if isinstance(v, int) and v > 0:
                return v
    except Exception:
        pass
    return 64 * 1024 * 1024


_VMEM_PHYSICAL = _tpu_vmem_capacity_bytes()
# Headroom for double-buffering / compiler scratch:
#   ~76 MiB on v5e/v6e (128 MiB physical), ~38 MiB on v7x (64 MiB physical).
VMEM_BUDGET = min(int(_VMEM_PHYSICAL * 0.6), 96 * 1024 * 1024)


def _pick_tile_m(K):
    """Row tile so the double-buffered bf16 x tile is ~4 MB (256..1024)."""
    t = (4 * 1024 * 1024) // max(1, 4 * K)
    return max(256, min(1024, (t // 256) * 256))


def _apply_act(y, act):
    if act == "leaky_relu":
        return jnp.where(y > 0, y, LEAKY_SLOPE * y)
    if act == "sigmoid":
        return jax.nn.sigmoid(y)
    return y


def _compiler_params(sem):
    return pltpu.CompilerParams(dimension_semantics=sem,
                                vmem_limit_bytes=VMEM_BUDGET)


# ----------------------------------------------------------------------------
# Kernel bodies
# ----------------------------------------------------------------------------
def _fused_matmul_bn_act_kernel(x_ref, w_ref, g_ref, b_ref, o_ref, *, inv_m, act):
    """Single block: y = act(BN(x @ w)); exact global BN over all M rows.
    Centered (two-pass) variance in f32 for better cancellation behaviour."""
    y = jnp.dot(x_ref[...], w_ref[...], preferred_element_type=jnp.float32)
    mean = jnp.sum(y, axis=0, keepdims=True) * inv_m
    yc = y - mean
    var = jnp.sum(yc * yc, axis=0, keepdims=True) * inv_m
    scale = g_ref[...] * jax.lax.rsqrt(var + BN_EPS)
    o_ref[...] = _apply_act(yc * scale + b_ref[...], act).astype(o_ref.dtype)


def _merged_matmul_bn_act_kernel(x_ref, w_ref, g_ref, b_ref, o_ref,
                                 y_scr, stats_scr, *, m_true, tile_m, act):
    """One call, two phases over grid=(2, n_tiles).
    phase 0: matmul tile -> VMEM scratch, accumulate global sum / sumsq.
    phase 1: normalize with global stats + activation, stream tiles out."""
    p = pl.program_id(0)
    i = pl.program_id(1)

    @pl.when(p == 0)
    def _pass_a():
        @pl.when(i == 0)
        def _():
            stats_scr[...] = jnp.zeros_like(stats_scr)
        y = jnp.dot(x_ref[...], w_ref[...], preferred_element_type=jnp.float32)
        # Mask tail-block rows (no host-side padding of x) before the stats sums.
        row = i * tile_m + jax.lax.broadcasted_iota(jnp.int32, y.shape, 0)
        y = jnp.where(row < m_true, y, 0.0)
        y_scr[i] = y.astype(y_scr.dtype)
        stats_scr[...] += jnp.concatenate(
            [jnp.sum(y, axis=0, keepdims=True),
             jnp.sum(y * y, axis=0, keepdims=True)], axis=0)

    @pl.when(p == 1)
    def _pass_b():
        inv_m = 1.0 / m_true
        mean = stats_scr[0:1, :] * inv_m
        var = jnp.maximum(stats_scr[1:2, :] * inv_m - mean * mean, 0.0)
        scale = g_ref[...] * jax.lax.rsqrt(var + BN_EPS)
        shift = b_ref[...] - mean * scale
        y = y_scr[i].astype(jnp.float32)
        o_ref[...] = _apply_act(y * scale + shift, act).astype(o_ref.dtype)


def _matmul_stats_kernel(x_ref, w_ref, y_ref, stats_ref, *, m_true, tile_m):
    """HBM two-pass fallback, pass A: y tile (stored bf16) + global stats."""
    i = pl.program_id(0)

    @pl.when(i == 0)
    def _():
        stats_ref[...] = jnp.zeros_like(stats_ref)

    y = jnp.dot(x_ref[...], w_ref[...], preferred_element_type=jnp.float32)
    row = i * tile_m + jax.lax.broadcasted_iota(jnp.int32, y.shape, 0)
    y = jnp.where(row < m_true, y, 0.0)
    y_ref[...] = y.astype(y_ref.dtype)
    stats_ref[...] += jnp.concatenate(
        [jnp.sum(y, axis=0, keepdims=True),
         jnp.sum(y * y, axis=0, keepdims=True)], axis=0)


def _bn_act_kernel(y_ref, stats_ref, g_ref, b_ref, o_ref, *, m_true, act):
    """HBM two-pass fallback, pass B: normalize with global stats + activation."""
    inv_m = 1.0 / m_true
    mean = stats_ref[0:1, :] * inv_m
    var = jnp.maximum(stats_ref[1:2, :] * inv_m - mean * mean, 0.0)
    scale = g_ref[...] * jax.lax.rsqrt(var + BN_EPS)
    shift = b_ref[...] - mean * scale
    y = y_ref[...].astype(jnp.float32)
    o_ref[...] = _apply_act(y * scale + shift, act).astype(o_ref.dtype)


def _linear_bias_kernel(x_ref, w_ref, b_ref, o_ref):
    """nn.Linear: y = x @ w + b (no BN, no activation)."""
    y = jnp.dot(x_ref[...], w_ref[...], preferred_element_type=jnp.float32)
    o_ref[...] = (y + b_ref[...]).astype(o_ref.dtype)


def _final_dot_sigmoid_kernel(x_ref, w_ref, o_ref):
    """conv5 (Cout=1) as a per-row VPU dot-reduce + sigmoid."""
    p = x_ref[...].astype(jnp.float32) * w_ref[...].astype(jnp.float32)
    o_ref[...] = jax.nn.sigmoid(jnp.sum(p, axis=-1, keepdims=True))


# ----------------------------------------------------------------------------
# Wrappers
# ----------------------------------------------------------------------------
def matmul_bn_act(x, w, gamma, beta, *, act="leaky_relu", force_path=None):
    """act(BN(x @ w)) with training-mode (global, biased-variance) BatchNorm.

    x: (M, K) any float dtype (cast to bf16); w: (K, Cout).
    Returns (M, Cout) bf16.
    """
    M, K = x.shape
    Cout = w.shape[1]
    x = x.astype(jnp.bfloat16)
    w = w.astype(jnp.bfloat16)
    gamma = jnp.asarray(gamma).reshape(1, Cout).astype(jnp.float32)
    beta = jnp.asarray(beta).reshape(1, Cout).astype(jnp.float32)

    tile_m = _pick_tile_m(K)
    n_tiles = int(pl.cdiv(M, tile_m))

    # ---- VMEM-aware path selection (v5e/v6e budget > v7x budget) ----
    path = force_path
    if path is None:
        fused_bytes = 2 * M * K + 2 * K * Cout + 8 * M * Cout
        if fused_bytes <= VMEM_BUDGET // 2:
            path = "fused"
        else:
            merged_bytes = (2 * n_tiles * tile_m * Cout
                            + 2 * (2 * tile_m * K + 2 * K * Cout + 2 * tile_m * Cout))
            path = "merged" if merged_bytes <= (3 * VMEM_BUDGET) // 4 else "twopass"

    cost = pl.CostEstimate(
        flops=2 * M * K * Cout, transcendentals=Cout,
        bytes_accessed=2 * M * K + 2 * K * Cout + 2 * M * Cout)

    if path == "fused":
        # Single block: whole x / y / out resident in VMEM (no pad, no intermediate).
        kern = functools.partial(_fused_matmul_bn_act_kernel, inv_m=1.0 / M, act=act)
        return pl.pallas_call(
            kern,
            out_shape=jax.ShapeDtypeStruct((M, Cout), jnp.bfloat16),
            grid=(1,),
            in_specs=[pl.BlockSpec((M, K), lambda i: (0, 0)),
                      pl.BlockSpec((K, Cout), lambda i: (0, 0)),
                      pl.BlockSpec((1, Cout), lambda i: (0, 0)),
                      pl.BlockSpec((1, Cout), lambda i: (0, 0))],
            out_specs=pl.BlockSpec((M, Cout), lambda i: (0, 0)),
            compiler_params=_compiler_params(("arbitrary",)),
            cost_estimate=cost,
        )(x, w, gamma, beta)

    if path == "merged":
        # One call, two phases; y lives in a VMEM scratch (never touches HBM).
        # x index_map pins a single block during phase 1; out index_map pins
        # block 0 during phase 0 so no garbage writebacks happen.
        kern = functools.partial(_merged_matmul_bn_act_kernel,
                                 m_true=M, tile_m=tile_m, act=act)
        return pl.pallas_call(
            kern,
            out_shape=jax.ShapeDtypeStruct((M, Cout), jnp.bfloat16),
            grid=(2, n_tiles),
            in_specs=[pl.BlockSpec((tile_m, K), lambda p, i: (i * (1 - p), 0)),
                      pl.BlockSpec((K, Cout), lambda p, i: (0, 0)),
                      pl.BlockSpec((1, Cout), lambda p, i: (0, 0)),
                      pl.BlockSpec((1, Cout), lambda p, i: (0, 0))],
            out_specs=pl.BlockSpec((tile_m, Cout), lambda p, i: (i * p, 0)),
            scratch_shapes=[pltpu.VMEM((n_tiles, tile_m, Cout), jnp.bfloat16),
                            pltpu.VMEM((2, Cout), jnp.float32)],
            compiler_params=_compiler_params(("arbitrary", "arbitrary")),
            cost_estimate=cost,
        )(x, w, gamma, beta)

    # ---- HBM two-pass fallback (very large M only); intermediate in bf16 ----
    kern_a = functools.partial(_matmul_stats_kernel, m_true=M, tile_m=tile_m)
    y, stats = pl.pallas_call(
        kern_a,
        out_shape=(jax.ShapeDtypeStruct((M, Cout), jnp.bfloat16),
                   jax.ShapeDtypeStruct((2, Cout), jnp.float32)),
        grid=(n_tiles,),
        in_specs=[pl.BlockSpec((tile_m, K), lambda i: (i, 0)),
                  pl.BlockSpec((K, Cout), lambda i: (0, 0))],
        out_specs=(pl.BlockSpec((tile_m, Cout), lambda i: (i, 0)),
                   pl.BlockSpec((2, Cout), lambda i: (0, 0))),   # resident accumulator
        compiler_params=_compiler_params(("arbitrary",)),
        cost_estimate=cost,
    )(x, w)

    kern_b = functools.partial(_bn_act_kernel, m_true=M, act=act)
    return pl.pallas_call(
        kern_b,
        out_shape=jax.ShapeDtypeStruct((M, Cout), jnp.bfloat16),
        grid=(n_tiles,),
        in_specs=[pl.BlockSpec((tile_m, Cout), lambda i: (i, 0)),
                  pl.BlockSpec((2, Cout), lambda i: (0, 0)),
                  pl.BlockSpec((1, Cout), lambda i: (0, 0)),
                  pl.BlockSpec((1, Cout), lambda i: (0, 0))],
        out_specs=pl.BlockSpec((tile_m, Cout), lambda i: (i, 0)),
        compiler_params=_compiler_params(("parallel",)),
        cost_estimate=pl.CostEstimate(flops=4 * M * Cout, transcendentals=Cout,
                                      bytes_accessed=6 * M * Cout),
    )(y, stats, gamma, beta)


def linear_bias(x, w_t, b):
    """nn.Linear(10, 784): x (N,10) @ w_t (10,784) + b -> (N,784) f32."""
    N, Kin = x.shape
    Kout = w_t.shape[1]
    Mp = _round_up(max(N, 16), 16)          # tiny; pad cost negligible
    xp = jnp.pad(x.astype(jnp.bfloat16), ((0, Mp - N), (0, 0)))
    out = pl.pallas_call(
        _linear_bias_kernel,
        out_shape=jax.ShapeDtypeStruct((Mp, Kout), jnp.float32),
        grid=(1,),
        in_specs=[pl.BlockSpec((Mp, Kin), lambda i: (0, 0)),
                  pl.BlockSpec((Kin, Kout), lambda i: (0, 0)),
                  pl.BlockSpec((1, Kout), lambda i: (0, 0))],
        out_specs=pl.BlockSpec((Mp, Kout), lambda i: (0, 0)),
        compiler_params=_compiler_params(("arbitrary",)),
    )(xp, w_t.astype(jnp.bfloat16), b)
    return out[:N]


def final_dot_sigmoid(feat, w_vec):
    """conv5 + sigmoid: per-sample dot over 3*3*512 features -> (N,) in [0,1]."""
    N, K = feat.shape
    Mp = _round_up(max(N, 16), 16)          # tiny; pad cost negligible
    xp = jnp.pad(feat.astype(jnp.bfloat16), ((0, Mp - N), (0, 0)))
    out = pl.pallas_call(
        _final_dot_sigmoid_kernel,
        out_shape=jax.ShapeDtypeStruct((Mp, 1), jnp.float32),
        grid=(1,),
        in_specs=[pl.BlockSpec((Mp, K), lambda i: (0, 0)),
                  pl.BlockSpec((1, K), lambda i: (0, 0))],
        out_specs=pl.BlockSpec((Mp, 1), lambda i: (0, 0)),
        compiler_params=_compiler_params(("arbitrary",)),
    )(xp, w_vec.astype(jnp.bfloat16))
    return out[:N, 0]


# ----------------------------------------------------------------------------
# Conv driver (NHWC, XLA-native patch extraction)
# ----------------------------------------------------------------------------
def conv_bn_act(x_nhwc, w_mat, gamma, beta, *, k, stride, pad, act="leaky_relu"):
    """Conv2d(bias=False) + BatchNorm2d(training) + activation.

    x_nhwc: (N, H, W, C); w_mat: (C*k*k, Cout) flattened in (Cin, kh, kw) order.
    Returns (N, OH, OW, Cout) bf16.
    """
    N = x_nhwc.shape[0]
    Cout = w_mat.shape[1]
    patches = jax.lax.conv_general_dilated_patches(
        x_nhwc.astype(jnp.bfloat16),
        filter_shape=(k, k),
        window_strides=(stride, stride),
        padding=((pad, pad), (pad, pad)),
        dimension_numbers=("NHWC", "HWIO", "NHWC"))
    _, OH, OW, K = patches.shape
    y = matmul_bn_act(patches.reshape(N * OH * OW, K), w_mat, gamma, beta, act=act)
    return y.reshape(N, OH, OW, Cout)


# ----------------------------------------------------------------------------
# Dnet forward (NHWC internally; semantics match the PyTorch module)
# ----------------------------------------------------------------------------
def dnet_forward(params, inp, lable):
    N = inp.shape[0]
    img = inp.reshape(N, 28, 28, 1).astype(jnp.float32)
    lab = linear_bias(lable, params["lin_w_t"], params["lin_b"])      # (N, 784)
    lab = lab.reshape(N, 28, 28, 1)
    out = jnp.concatenate([img, lab], axis=-1)                        # (N,28,28,2)

    out = conv_bn_act(out, params["w1_mat"], params["g1"], params["b1"],
                      k=3, stride=2, pad=1)                           # (N,14,14,64)
    out = conv_bn_act(out, params["w2_mat"], params["g2"], params["b2"],
                      k=3, stride=2, pad=1)                           # (N,7,7,128)
    out = conv_bn_act(out, params["w3_mat"], params["g3"], params["b3"],
                      k=3, stride=1, pad=0)                           # (N,5,5,256)
    out = conv_bn_act(out, params["w4_mat"], params["g4"], params["b4"],
                      k=3, stride=1, pad=0)                           # (N,3,3,512)
    # conv5: 3x3 kernel on a 3x3 map, no pad -> one scalar per sample.
    feat = out.reshape(N, 3 * 3 * 512)                                # (kh,kw,Cin) order
    return final_dot_sigmoid(feat, params["w5_vec"])                  # (N,)


# ----------------------------------------------------------------------------
# Parameters: raw (PyTorch layout) init + one-time preprocessing (hoisted)
# ----------------------------------------------------------------------------
def init_raw_params(key):
    ks = jax.random.split(key, 12)
    p = {}
    p["lin_w"] = jax.random.normal(ks[0], (784, 10), jnp.float32) * 0.05   # (out, in)
    p["lin_b"] = jax.random.normal(ks[1], (784,), jnp.float32) * 0.05
    shapes = [(64, 2), (128, 64), (256, 128), (512, 256), (1, 512)]
    for idx, (co, ci) in enumerate(shapes, start=1):
        p[f"w{idx}"] = jax.random.normal(ks[1 + idx], (co, ci, 3, 3), jnp.float32) * 0.05
    for idx, c in enumerate([64, 128, 256, 512], start=1):
        p[f"g{idx}"] = 1.0 + 0.1 * jax.random.normal(ks[6 + idx], (c,), jnp.float32)
        p[f"b{idx}"] = 0.1 * jax.random.normal(ks[7 + idx], (c,), jnp.float32)
    return p


def prepare_params(raw):
    """One-time weight preprocessing (kept out of the jitted hot path)."""
    p = {}
    p["lin_w_t"] = raw["lin_w"].T.astype(jnp.bfloat16)                       # (10, 784)
    p["lin_b"] = raw["lin_b"].reshape(1, 784).astype(jnp.float32)
    for i in range(1, 5):
        w = raw[f"w{i}"]                                                     # (Co, Ci, 3, 3)
        co = w.shape[0]
        p[f"w{i}_mat"] = w.reshape(co, -1).T.astype(jnp.bfloat16)            # (Ci*9, Co), (Ci,kh,kw)
        p[f"g{i}"] = raw[f"g{i}"].reshape(1, co).astype(jnp.float32)
        p[f"b{i}"] = raw[f"b{i}"].reshape(1, co).astype(jnp.float32)
    # conv5 weight flattened in (kh, kw, Cin) order to match NHWC feature flatten.
    p["w5_vec"] = jnp.transpose(raw["w5"], (0, 2, 3, 1)).reshape(1, -1).astype(jnp.bfloat16)
    return p


# ----------------------------------------------------------------------------
# Startup correctness checks
# ----------------------------------------------------------------------------
def _check_patch_order():
    """Pin the (Cin, kh, kw) feature order of conv_general_dilated_patches."""
    kx, kw = jax.random.split(jax.random.PRNGKey(1))
    x = jax.random.normal(kx, (2, 6, 6, 3), jnp.float32)
    w = jax.random.normal(kw, (4, 3, 3, 3), jnp.float32)          # torch (Co,Ci,kh,kw)
    ref = jax.lax.conv_general_dilated(
        x, jnp.transpose(w, (2, 3, 1, 0)), window_strides=(2, 2),
        padding=((1, 1), (1, 1)), dimension_numbers=("NHWC", "HWIO", "NHWC"))
    patches = jax.lax.conv_general_dilated_patches(
        x, filter_shape=(3, 3), window_strides=(2, 2),
        padding=((1, 1), (1, 1)), dimension_numbers=("NHWC", "HWIO", "NHWC"))
    got = (patches.reshape(-1, patches.shape[-1]) @ w.reshape(4, -1).T).reshape(ref.shape)
    assert bool(jnp.allclose(ref, got, rtol=1e-3, atol=1e-3)), \
        "im2col feature order mismatch"


if __name__ == "__main__":
    key = jax.random.PRNGKey(0)
    kp, ki, kl, kt1, kt2 = jax.random.split(key, 5)
    params = prepare_params(init_raw_params(kp))

    # Pin the im2col feature order against a reference convolution.
    _check_patch_order()

    # Cross-check the three matmul+BN+act lowerings on a non-tile-aligned M
    # (exercises the merged VMEM-scratch path and the HBM two-pass fallback,
    # including in-kernel tail masking).
    xt = jax.random.normal(kt1, (1500, 256), jnp.float32)
    wt = jax.random.normal(kt2, (256, 128), jnp.float32) * 0.05
    g = jnp.ones((128,), jnp.float32)
    b = jnp.zeros((128,), jnp.float32)
    ref = matmul_bn_act(xt, wt, g, b, force_path="fused")
    ref = jax.block_until_ready(ref).astype(jnp.float32)
    for pth in ("merged", "twopass"):
        got = matmul_bn_act(xt, wt, g, b, force_path=pth)
        got = jax.block_until_ready(got).astype(jnp.float32)
        diff = float(jnp.max(jnp.abs(got - ref)))
        assert diff < 0.2, (pth, diff)

    batch = 2
    inp = jax.random.normal(ki, (batch, 784), jnp.float32)     # flattened 28x28 images
    lable = jax.random.normal(kl, (batch, 10), jnp.float32)    # label embeddings

    out = jax.jit(dnet_forward)(params, inp, lable)
    out = jax.block_until_ready(out)
    assert out.shape == (batch,)
    assert bool(jnp.all(jnp.isfinite(out)))
    assert bool(jnp.all((out >= 0.0) & (out <= 1.0)))
    print("KERNEL_OK")
</pallas_src>

<mosaic_0001>
module attributes {stable_mosaic.version = 11 : i64} {
  func.func @_fused_matmul_bn_act_kernel(%arg0: i32, %arg1: memref<1500x256xbf16, #tpu.memory_space<vmem>>, %arg2: memref<256x128xbf16, #tpu.memory_space<vmem>>, %arg3: memref<1x128xf32, #tpu.memory_space<vmem>>, %arg4: memref<1x128xf32, #tpu.memory_space<vmem>>, %arg5: memref<1500x128xbf16, #tpu.memory_space<vmem>>) attributes {dimension_semantics = [#tpu.dimension_semantics<arbitrary>], iteration_bounds = array<i64: 1>, scalar_prefetch = 0 : i64, scratch_operands = 0 : i64, tpu.core_type = #tpu.core_type<tc>, window_params = [{pipeline_mode = #tpu.pipeline_mode<synchronous>, transform_indices = @transform_0, window_bounds = array<i64: 1500, 256>}, {pipeline_mode = #tpu.pipeline_mode<synchronous>, transform_indices = @transform_1, window_bounds = array<i64: 256, 128>}, {pipeline_mode = #tpu.pipeline_mode<synchronous>, transform_indices = @transform_2, window_bounds = array<i64: 1, 128>}, {pipeline_mode = #tpu.pipeline_mode<synchronous>, transform_indices = @transform_3, window_bounds = array<i64: 1, 128>}, {pipeline_mode = #tpu.pipeline_mode<synchronous>, transform_indices = @transform_4, window_bounds = array<i64: 1500, 128>}]} {
    %c0 = arith.constant 0 : index
    %c0_0 = arith.constant 0 : index
    %0 = vector.load %arg1[%c0, %c0_0] : memref<1500x256xbf16, #tpu.memory_space<vmem>>, vector<1500x256xbf16>
    %c0_1 = arith.constant 0 : index
    %c0_2 = arith.constant 0 : index
    %1 = vector.load %arg2[%c0_1, %c0_2] : memref<256x128xbf16, #tpu.memory_space<vmem>>, vector<256x128xbf16>
    %cst = arith.constant dense<0.000000e+00> : vector<1500x128xf32>
    %2 = tpu.matmul %0, %1, %cst {dimension_numbers = #tpu.dot_dimension_numbers<[1], [0], [0], [1], [0, 0, 1, 1], [], []>} : vector<1500x256xbf16>, vector<256x128xbf16>, vector<1500x128xf32> -> vector<1500x128xf32>
    %cst_3 = arith.constant dense<0.000000e+00> : vector<128xf32>
    %3 = vector.multi_reduction <add>, %2, %cst_3 [0] : vector<1500x128xf32> to vector<128xf32>
    %4 = vector.shape_cast %3 : vector<128xf32> to vector<1x128xf32>
    %cst_4 = arith.constant 6.66666659E-4 : f32
    %5 = vector.broadcast %cst_4 : f32 to vector<1x128xf32>
    %6 = arith.mulf %4, %5 : vector<1x128xf32>
    %7 = vector.broadcast %6 : vector<1x128xf32> to vector<1500x128xf32>
    %8 = arith.subf %2, %7 : vector<1500x128xf32>
    %9 = arith.mulf %8, %8 : vector<1500x128xf32>
    %cst_5 = arith.constant dense<0.000000e+00> : vector<128xf32>
    %10 = vector.multi_reduction <add>, %9, %cst_5 [0] : vector<1500x128xf32> to vector<128xf32>
    %11 = vector.shape_cast %10 : vector<128xf32> to vector<1x128xf32>
    %cst_6 = arith.constant 6.66666659E-4 : f32
    %12 = vector.broadcast %cst_6 : f32 to vector<1x128xf32>
    %13 = arith.mulf %11, %12 : vector<1x128xf32>
    %c0_7 = arith.constant 0 : index
    %c0_8 = arith.constant 0 : index
    %14 = vector.load %arg3[%c0_7, %c0_8] : memref<1x128xf32, #tpu.memory_space<vmem>>, vector<1x128xf32>
    %cst_9 = arith.constant 9.99999974E-6 : f32
    %15 = vector.broadcast %cst_9 : f32 to vector<1x128xf32>
    %16 = arith.addf %13, %15 : vector<1x128xf32>
    %17 = math.rsqrt %16 : vector<1x128xf32>
    %18 = arith.mulf %14, %17 : vector<1x128xf32>
    %19 = vector.broadcast %18 : vector<1x128xf32> to vector<1500x128xf32>
    %20 = arith.mulf %8, %19 : vector<1500x128xf32>
    %c0_10 = arith.constant 0 : index
    %c0_11 = arith.constant 0 : index
    %21 = vector.load %arg4[%c0_10, %c0_11] : memref<1x128xf32, #tpu.memory_space<vmem>>, vector<1x128xf32>
    %22 = vector.broadcast %21 : vector<1x128xf32> to vector<1500x128xf32>
    %23 = arith.addf %20, %22 : vector<1500x128xf32>
    %cst_12 = arith.constant 0.000000e+00 : f32
    %24 = vector.broadcast %cst_12 : f32 to vector<1500x128xf32>
    %25 = arith.cmpf ogt, %23, %24 : vector<1500x128xf32>
    %cst_13 = arith.constant 0.00999999977 : f32
    %26 = vector.broadcast %cst_13 : f32 to vector<1500x128xf32>
    %27 = arith.mulf %26, %23 : vector<1500x128xf32>
    %28 = arith.select %25, %23, %27 : vector<1500x128xi1>, vector<1500x128xf32>
    %29 = arith.truncf %28 : vector<1500x128xf32> to vector<1500x128xbf16>
    %c0_14 = arith.constant 0 : index
    %c0_15 = arith.constant 0 : index
    %30 = vector.load %arg5[%c0_14, %c0_15] : memref<1500x128xbf16, #tpu.memory_space<vmem>>, vector<1500x128xbf16>
    tpu.vector_store %arg5[%c0_14, %c0_15], %29 {strides = array<i32>} : memref<1500x128xbf16, #tpu.memory_space<vmem>>, vector<1500x128xbf16>,
    return
  }
  func.func @transform_0(%arg0: i32) -> (i32, i32) {
    %c0_i32 = arith.constant 0 : i32
    %c0_i32_0 = arith.constant 0 : i32
    %c0_i32_1 = arith.constant 0 : i32
    return %c0_i32, %c0_i32_0 : i32, i32
  }
  func.func @transform_1(%arg0: i32) -> (i32, i32) {
    %c0_i32 = arith.constant 0 : i32
    %c0_i32_0 = arith.constant 0 : i32
    %c0_i32_1 = arith.constant 0 : i32
    return %c0_i32, %c0_i32_0 : i32, i32
  }
  func.func @transform_2(%arg0: i32) -> (i32, i32) {
    %c0_i32 = arith.constant 0 : i32
    %c0_i32_0 = arith.constant 0 : i32
    %c0_i32_1 = arith.constant 0 : i32
    return %c0_i32, %c0_i32_0 : i32, i32
  }
  func.func @transform_3(%arg0: i32) -> (i32, i32) {
    %c0_i32 = arith.constant 0 : i32
    %c0_i32_0 = arith.constant 0 : i32
    %c0_i32_1 = arith.constant 0 : i32
    return %c0_i32, %c0_i32_0 : i32, i32
  }
  func.func @transform_4(%arg0: i32) -> (i32, i32) {
    %c0_i32 = arith.constant 0 : i32
    %c0_i32_0 = arith.constant 0 : i32
    %c0_i32_1 = arith.constant 0 : i32
    return %c0_i32, %c0_i32_0 : i32, i32
  }
}

</mosaic_0001>

<bundles_post_ra>
// kernel: tpu_custom_call.1
= control target key start
LH: loop header
LB: loop body
LE: loop exit
PB: predicated region body
PF: predicated region fallthrough
CT: control target
= control target key end

     0   :  { %9 = vsyncpa [#allocation3], 0  ;;  %s10790_s0 = inlined_call_operand.hbm [shape: bf16[1500,256], index: 0, kind: input, shape index: {}]   ;;  %s10791_s1 = inlined_call_operand.hbm [shape: bf16[256,128], index: 1, kind: input, shape index: {}]   ;;  %s10792_s2 = inlined_call_operand.vmem [shape: f32[1,128], index: 2, kind: input, shape index: {}]   ;;  %s10793_s3 = inlined_call_operand.vmem [shape: f32[1,128], index: 3, kind: input, shape index: {}]   ;;  %s10794_s4 = inlined_call_operand.hbm [shape: bf16[1500,128], index: 4, kind: output, shape index: {}]  }
   0x1   :  { %10 = vsyncpa [#allocation6], 0 }
   0x2   :  { %11 = vsyncpa [#allocation4], 0  ;;  %s16_s17 = sshll.u32 %s10790_s0, 4  ;;  %s6068_s18 = smov [#allocation2]   ;;  %s17_s17 = int_to_ptr.hbm [resolvable:$true] %s16_s17 }
   0x3   :  { %s18_s19 = sshll.u32 %s6068_s18, 4  ;;  %s29_s22 = sshll.u32 %s10791_s1, 4  ;;  %s19_s19 = int_to_ptr.vmem [resolvable:$true] %s18_s19  ;;  %s30_s22 = int_to_ptr.hbm [resolvable:$true] %s29_s22 }
   0x4   :  { %s6069_s23 = smov 128   ;;  %s6070_s24 = smov 8  }
   0x5   :  { %24 = dma.hbm_to_vmem [thread:$0]  %s17_s17, 24064, %s19_s19, [#allocation3], %s6069_s23, %s6069_s23, %s6070_s24  }
   0x6   :  { %s6071_s25 = smov [#allocation5]   ;;  %s6072_s27 = smov 64  }
   0x7   :  { %s31_s26 = sshll.u32 %s6071_s25, 4  ;;  %s6073_s28 = smov 4   ;;  %s32_s26 = int_to_ptr.vmem [resolvable:$true] %s31_s26 }
   0x8   :  { %37 = dma.hbm_to_vmem [thread:$0]  %s30_s22, 2048, %s32_s26, [#allocation6], %s6072_s27, %s6072_s27, %s6073_s28  }
   0x9   :  { %6062 = dma.done.wait [#allocation3], 24064  }
   0xa   :  { %6063 = vsyncadd [#allocation3], 4294943232 }
   0xb   :  { %6064 = dma.done.wait [#allocation6], 2048  }
   0xc   :  { %6065 = vsyncadd [#allocation6], 4294965248  ;;  %v5398_v0 = vld [vmem:[#allocation5 + $0x38] sm:$0xff]  ;;  %v5397_v2 = vld [vmem:[#allocation5 + $0x30] sm:$0xff]  ;;  %vm2450_vm0 = vcmask 1043456   ;;  %s4373_s7 = sshll.u32 %s10794_s4, 4  ;;  %s4374_s7 = int_to_ptr.hbm [resolvable:$true] %s4373_s7 }
   0xd   :  { %v5406_v1 = vld [vmem:[#allocation5 + $0x78] sm:$0xff]  ;;  %1306 = vmatpush.bf16.msra.mxu0 %v5398_v0  ;;  %v5405_v3 = vld [vmem:[#allocation5 + $0x70] sm:$0xff]  ;;  %5964 = vmatpush.bf16.msra.mxu2 %v5398_v0  ;;  %v5396_v4 = vld [vmem:[#allocation5 + $0x28] sm:$0xff] }
   0xe   :  { %1785 = vmatpush.bf16.msra.mxu1 %v5406_v1  ;;  %5972 = vmatpush.bf16.msra.mxu3 %v5406_v1  ;;  %v5404_v5 = vld [vmem:[#allocation5 + $0x68] sm:$0xff]  ;;  %v5395_v6 = vld [vmem:[#allocation5 + $0x20] sm:$0xff]  ;;  %v5394_v8 = vld [vmem:[#allocation5 + $0x18] sm:$0xff] }
   0xf   :  { %v5403_v7 = vld [vmem:[#allocation5 + $0x60] sm:$0xff]  ;;  %v5402_v9 = vld [vmem:[#allocation5 + $0x58] sm:$0xff]  ;;  %v5393_v10 = vld [vmem:[#allocation5 + $0x10] sm:$0xff] }
  0x10   :  { %v5401_v11 = vld [vmem:[#allocation5 + $0x50] sm:$0xff]  ;;  %v5392_v12 = vld [vmem:[#allocation5 + $0x8] sm:$0xff]  ;;  %v5391_v14 = vld [vmem:[#allocation5] sm:$0xff] }
  0x11   :  { %1307 = vmatpush.bf16.msra.mxu0 %v5397_v2  ;;  %5965 = vmatpush.bf16.msra.mxu2 %v5397_v2  ;;  %v5400_v13 = vld [vmem:[#allocation5 + $0x48] sm:$0xff]  ;;  %v5399_v15 = vld [vmem:[#allocation5 + $0x40] sm:$0xff]  ;;  %v4397_v22 = vld [vmem:[#allocation2 + $0x10] sm:$0xf] }
  0x12   :  { %1786 = vmatpush.bf16.msra.mxu1 %v5405_v3  ;;  %5973 = vmatpush.bf16.msra.mxu3 %v5405_v3  ;;  %v4389_v16 = vld [vmem:[#allocation2] sm:$0xf]  ;;  %v5204_v17 = vld [vmem:[#allocation2 + $0x4] sm:$0xf0]  ;;  %v5203_v18 = vld [vmem:[#allocation2 + $0x4] sm:$0xf] }
  0x13   :  { %v4391_v19 = vld [vmem:[#allocation2 + $0x8] sm:$0xf0]  ;;  %v4390_v20 = vor.u32 %v5204_v17, %v4389_v16  ;;  %v5206_v23 = vld [vmem:[#allocation2 + $0x14] sm:$0xf0]  ;;  %v5205_v24 = vld [vmem:[#allocation2 + $0x14] sm:$0xf] }
  0x14   :  { %v4394_v21 = vor.u32 %v5203_v18, %v4391_v19  ;;  %v4399_v25 = vld [vmem:[#allocation2 + $0x18] sm:$0xf0]  ;;  %v4398_v26 = vor.u32 %v5206_v23, %v4397_v22  ;;  %v4405_v28 = vld [vmem:[#allocation2 + $0x20] sm:$0xf]  ;;  %v5208_v29 = vld [vmem:[#allocation2 + $0x24] sm:$0xf0] }
  0x15   :  { %1308 = vmatpush.bf16.msra.mxu0 %v5396_v4  ;;  %5966 = vmatpush.bf16.msra.mxu2 %v5396_v4  ;;  %v4402_v27 = vor.u32 %v5205_v24, %v4399_v25  ;;  %v5207_v30 = vld [vmem:[#allocation2 + $0x24] sm:$0xf]  ;;  %v4407_v31 = vld [vmem:[#allocation2 + $0x28] sm:$0xf0]  ;;  %v4406_v32 = vor.u32 %v5208_v29, %v4405_v28  ;;  %v4413_v34 = vld [vmem:[#allocation2 + $0x30] sm:$0xf] }
  0x16   :  { %1787 = vmatpush.bf16.msra.mxu1 %v5404_v5  ;;  %5974 = vmatpush.bf16.msra.mxu3 %v5404_v5  ;;  %v4410_v33 = vor.u32 %v5207_v30, %v4407_v31  ;;  %v5210_v35 = vld [vmem:[#allocation2 + $0x34] sm:$0xf0]  ;;  %v5209_v36 = vld [vmem:[#allocation2 + $0x34] sm:$0xf]  ;;  %v4415_v37 = vld [vmem:[#allocation2 + $0x38] sm:$0xf0] }
  0x17   :  { %v4414_v38 = vor.u32 %v5210_v35, %v4413_v34  ;;  %v4418_v39 = vor.u32 %v5209_v36, %v4415_v37  ;;  %v4421_v40 = vld [vmem:[#allocation2 + $0x40] sm:$0xf]  ;;  %v5212_v41 = vld [vmem:[#allocation2 + $0x44] sm:$0xf0]  ;;  %v5211_v42 = vld [vmem:[#allocation2 + $0x44] sm:$0xf] }
  0x18   :  { %v4423_v43 = vld [vmem:[#allocation2 + $0x48] sm:$0xf0]  ;;  %v4422_v44 = vor.u32 %v5212_v41, %v4421_v40  ;;  %v4429_v46 = vld [vmem:[#allocation2 + $0x50] sm:$0xf]  ;;  %v5214_v47 = vld [vmem:[#allocation2 + $0x54] sm:$0xf0] }
  0x19   :  { %1309 = vmatpush.bf16.msra.mxu0 %v5395_v6  ;;  %5967 = vmatpush.bf16.msra.mxu2 %v5395_v6  ;;  %v4426_v45 = vor.u32 %v5211_v42, %v4423_v43  ;;  %v5213_v48 = vld [vmem:[#allocation2 + $0x54] sm:$0xf]  ;;  %v4431_v49 = vld [vmem:[#allocation2 + $0x58] sm:$0xf0]  ;;  %v4430_v50 = vor.u32 %v5214_v47, %v4429_v46  ;;  %v4437_v52 = vld [vmem:[#allocation2 + $0x60] sm:$0xf] }
  0x1a   :  { %1788 = vmatpush.bf16.msra.mxu1 %v5403_v7  ;;  %5975 = vmatpush.bf16.msra.mxu3 %v5403_v7  ;;  %v4434_v51 = vor.u32 %v5213_v48, %v4431_v49  ;;  %v5216_v53 = vld [vmem:[#allocation2 + $0x64] sm:$0xf0]  ;;  %v5215_v54 = vld [vmem:[#allocation2 + $0x64] sm:$0xf]  ;;  %v4439_v55 = vld [vmem:[#allocation2 + $0x68] sm:$0xf0] }
  0x1b   :  { %v4438_v56 = vor.u32 %v5216_v53, %v4437_v52  ;;  %v4442_v57 = vor.u32 %v5215_v54, %v4439_v55  ;;  %v4445_v58 = vld [vmem:[#allocation2 + $0x70] sm:$0xf]  ;;  %v5218_v59 = vld [vmem:[#allocation2 + $0x74] sm:$0xf0]  ;;  %v5217_v60 = vld [vmem:[#allocation2 + $0x74] sm:$0xf] }
  0x1c   :  { %v4447_v61 = vld [vmem:[#allocation2 + $0x78] sm:$0xf0]  ;;  %v4446_v62 = vor.u32 %v5218_v59, %v4445_v58  ;;  %v4453_v0 = vld [vmem:[#allocation2 + $0x80] sm:$0xf]  ;;  %v5220_v1 = vld [vmem:[#allocation2 + $0x84] sm:$0xf0] }
  0x1d   :  { %1310 = vmatpush.bf16.msra.mxu0 %v5394_v8  ;;  %5968 = vmatpush.bf16.msra.mxu2 %v5394_v8  ;;  %v4450_v63 = vor.u32 %v5217_v60, %v4447_v61  ;;  %v5219_v2 = vld [vmem:[#allocation2 + $0x84] sm:$0xf]  ;;  %v4455_v3 = vld [vmem:[#allocation2 + $0x88] sm:$0xf0]  ;;  %v4454_v4 = vor.u32 %v5220_v1, %v4453_v0  ;;  %v4765_v16 = vld [vmem:[#allocation2 + $0x2f0] sm:$0xf] }
  0x1e   :  { %1789 = vmatpush.bf16.msra.mxu1 %v5402_v9  ;;  %5976 = vmatpush.bf16.msra.mxu3 %v5402_v9  ;;  %v4458_v5 = vor.u32 %v5219_v2, %v4455_v3  ;;  %v5298_v17 = vld [vmem:[#allocation2 + $0x2f4] sm:$0xf0]  ;;  %v5297_v18 = vld [vmem:[#allocation2 + $0x2f4] sm:$0xf]  ;;  %v4469_v30 = vld [vmem:[#allocation2 + $0xa0] sm:$0xf] }
  0x1f   :  { %v4766_v19 = vor.u32 %v5298_v17, %v4765_v16  ;;  %v5224_v31 = vld [vmem:[#allocation2 + $0xa4] sm:$0xf0]  ;;  %v4773_v34 = vld [vmem:[#allocation2 + $0x300] sm:$0xf]  ;;  %v5299_v36 = vld [vmem:[#allocation2 + $0x304] sm:$0xf] }
  0x20   :  { %v5300_v35 = vld [vmem:[#allocation2 + $0x304] sm:$0xf0]  ;;  %v4477_v48 = vld [vmem:[#allocation2 + $0xb0] sm:$0xf]  ;;  %v5226_v49 = vld [vmem:[#allocation2 + $0xb4] sm:$0xf0] }
  0x21   :  { %1311 = vmatpush.bf16.msra.mxu0 %v5393_v10  ;;  %5969 = vmatpush.bf16.msra.mxu2 %v5393_v10  ;;  %v4774_v37 = vor.u32 %v5300_v35, %v4773_v34  ;;  %v4781_v52 = vld [vmem:[#allocation2 + $0x310] sm:$0xf]  ;;  %v5302_v53 = vld [vmem:[#allocation2 + $0x314] sm:$0xf0]  ;;  %v5301_v54 = vld [vmem:[#allocation2 + $0x314] sm:$0xf] }
  0x22   :  { %1790 = vmatpush.bf16.msra.mxu1 %v5401_v11  ;;  %5977 = vmatpush.bf16.msra.mxu3 %v5401_v11  ;;  %v4782_v55 = vor.u32 %v5302_v53, %v4781_v52  ;;  %v4485_v2 = vld [vmem:[#allocation2 + $0xc0] sm:$0xf]  ;;  %v5228_v3 = vld [vmem:[#allocation2 + $0xc4] sm:$0xf0]  ;;  %v4807_v52 = vld [vmem:[#allocation2 + $0x348] sm:$0xf0] }
  0x25   :  { %1312 = vmatpush.bf16.msra.mxu0 %v5392_v12  ;;  %5970 = vmatpush.bf16.msra.mxu2 %v5392_v12  ;;  %v4461_v12 = vld [vmem:[#allocation2 + $0x90] sm:$0xf] }
  0x26   :  { %1791 = vmatpush.bf16.msra.mxu1 %v5400_v13  ;;  %5978 = vmatpush.bf16.msra.mxu3 %v5400_v13  ;;  %v5222_v13 = vld [vmem:[#allocation2 + $0x94] sm:$0xf0] }
  0x29   :  { %1313 = vmatpush.bf16.msra.mxu0 %v5391_v14  ;;  %5971 = vmatpush.bf16.msra.mxu2 %v5391_v14  ;;  %v5221_v14 = vld [vmem:[#allocation2 + $0x94] sm:$0xf] }
  0x2a   :  { %1792 = vmatpush.bf16.msra.mxu1 %v5399_v15  ;;  %5979 = vmatpush.bf16.msra.mxu3 %v5399_v15  ;;  %v4463_v15 = vld [vmem:[#allocation2 + $0x98] sm:$0xf0] }
  0x2b   :  { %v4466_v22 = vor.u32 %v5221_v14, %v4463_v15 }
  0x2c   :  { %1314 = vmatmul.bf16.vlgmr.msra.gmra.mxu0 %v4390_v20  ;;  %v4767_v20 = vld [vmem:[#allocation2 + $0x2f8] sm:$0xf0]  ;;  %1549 = vmatmul.bf16.vlgmr.msra.gmra.mxu2 %v4766_v19 }
  0x2d   :  { %1793 = vmatmul.bf16.vlgmr.msra.gmra.mxu1 %v4394_v21  ;;  %v4462_v21 = vor.u32 %v5222_v13, %v4461_v12  ;;  %v4770_v23 = vor.u32 %v5297_v18, %v4767_v20  ;;  %v4791_v12 = vld [vmem:[#allocation2 + $0x328] sm:$0xf0]  ;;  %v4486_v13 = vor.u32 %v5228_v3, %v4485_v2  ;;  %v5233_v2 = vld [vmem:[#allocation2 + $0xf4] sm:$0xf]  ;;  %v4511_v3 = vld [vmem:[#allocation2 + $0xf8] sm:$0xf0] }
  0x2f   :  { %2028 = vmatmul.bf16.vlgmr.msra.gmra.mxu3 %v4770_v23  ;;  %v5230_v23 = vld [vmem:[#allocation2 + $0xd4] sm:$0xf0] }
  0x3c   :  { %1319 = vmatmul.bf16.gmra.mxu0 %v4398_v26  ;;  %1554 = vmatmul.bf16.gmra.mxu2 %v4774_v37 }
  0x3d   :  { %1798 = vmatmul.bf16.gmra.mxu1 %v4402_v27 }
  0x4c   :  { %1324 = vmatmul.bf16.gmra.mxu0 %v4406_v32  ;;  %v5223_v32 = vld [vmem:[#allocation2 + $0xa4] sm:$0xf]  ;;  %1559 = vmatmul.bf16.gmra.mxu2 %v4782_v55 }
  0x4d   :  { %1803 = vmatmul.bf16.gmra.mxu1 %v4410_v33  ;;  %v4471_v33 = vld [vmem:[#allocation2 + $0xa8] sm:$0xf0] }
  0x4e   :  { %v4474_v40 = vor.u32 %v5223_v32, %v4471_v33  ;;  %v4799_v32 = vld [vmem:[#allocation2 + $0x338] sm:$0xf0] }
  0x5c   :  { %1329 = vmatmul.bf16.gmra.mxu0 %v4414_v38  ;;  %v4775_v38 = vld [vmem:[#allocation2 + $0x308] sm:$0xf0] }
  0x5d   :  { %1808 = vmatmul.bf16.gmra.mxu1 %v4418_v39  ;;  %v4470_v39 = vor.u32 %v5224_v31, %v4469_v30  ;;  %v4778_v41 = vor.u32 %v5299_v36, %v4775_v38  ;;  %v5305_v30 = vld [vmem:[#allocation2 + $0x334] sm:$0xf] }
  0x5e   :  { %v4802_v35 = vor.u32 %v5305_v30, %v4799_v32  ;;  %v5311_v30 = vld [vmem:[#allocation2 + $0x364] sm:$0xf]  ;;  %v4823_v32 = vld [vmem:[#allocation2 + $0x368] sm:$0xf0] }
  0x5f   :  { %2033 = vmatmul.bf16.gmra.mxu3 %v4778_v41 }
  0x6c   :  { %1334 = vmatmul.bf16.gmra.mxu0 %v4422_v44 }
  0x6d   :  { %1813 = vmatmul.bf16.gmra.mxu1 %v4426_v45 }
  0x7c   :  { %1339 = vmatmul.bf16.gmra.mxu0 %v4430_v50  ;;  %v5225_v50 = vld [vmem:[#allocation2 + $0xb4] sm:$0xf] }
  0x7d   :  { %1818 = vmatmul.bf16.gmra.mxu1 %v4434_v51  ;;  %v4479_v51 = vld [vmem:[#allocation2 + $0xb8] sm:$0xf0] }
  0x7e   :  { %v4482_v58 = vor.u32 %v5225_v50, %v4479_v51  ;;  %v5307_v50 = vld [vmem:[#allocation2 + $0x344] sm:$0xf] }
  0x7f   :  { %v4810_v55 = vor.u32 %v5307_v50, %v4807_v52  ;;  %v4829_v50 = vld [vmem:[#allocation2 + $0x370] sm:$0xf]  ;;  %v5313_v52 = vld [vmem:[#allocation2 + $0x374] sm:$0xf] }
  0x8c   :  { %1344 = vmatmul.bf16.gmra.mxu0 %v4438_v56  ;;  %v4783_v56 = vld [vmem:[#allocation2 + $0x318] sm:$0xf0] }
  0x8d   :  { %1823 = vmatmul.bf16.gmra.mxu1 %v4442_v57  ;;  %v4478_v57 = vor.u32 %v5226_v49, %v4477_v48  ;;  %v4786_v59 = vor.u32 %v5301_v54, %v4783_v56  ;;  %v4805_v48 = vld [vmem:[#allocation2 + $0x340] sm:$0xf]  ;;  %v5308_v49 = vld [vmem:[#allocation2 + $0x344] sm:$0xf0] }
  0x8e   :  { %v4806_v51 = vor.u32 %v5308_v49, %v4805_v48  ;;  %v5237_v48 = vld [vmem:[#allocation2 + $0x114] sm:$0xf]  ;;  %v4527_v49 = vld [vmem:[#allocation2 + $0x118] sm:$0xf0] }
  0x8f   :  { %2038 = vmatmul.bf16.gmra.mxu3 %v4786_v59 }
  0x9c   :  { %1349 = vmatmul.bf16.gmra.mxu0 %v4446_v62 }
  0x9d   :  { %1828 = vmatmul.bf16.gmra.mxu1 %v4450_v63 }
  0xa9   :  { %v1315_v6 = vpop.f32.mrf.mxu0 }
  0xaa   :  { %v1794_v7 = vpop.f32.mrf.mxu1 }
  0xab   :  { %v6109_v8 = vadd.f32 %v1794_v7, %v1315_v6  ;;  %v4789_v6 = vld [vmem:[#allocation2 + $0x320] sm:$0xf]  ;;  %v5304_v7 = vld [vmem:[#allocation2 + $0x324] sm:$0xf0] }
  0xac   :  { %1354 = vmatmul.bf16.gmra.mxu0 %v4454_v4  ;;  %v5227_v4 = vld [vmem:[#allocation2 + $0xc4] sm:$0xf] }
  0xad   :  { %11255 = vst [vmem:[#allocation11_spill] sm:$0xff] %v6109_v8  ;;  %1833 = vmatmul.bf16.gmra.mxu1 %v4458_v5  ;;  %v4487_v5 = vld [vmem:[#allocation2 + $0xc8] sm:$0xf0] }
  0xae   :  { %v4490_v14 = vor.u32 %v5227_v4, %v4487_v5  ;;  %v4813_v4 = vld [vmem:[#allocation2 + $0x350] sm:$0xf]  ;;  %v5310_v5 = vld [vmem:[#allocation2 + $0x354] sm:$0xf0] }
  0xb1   :  { %v1317_v9 = vpop.f32.mrf.mxu0 }
  0xb2   :  { %v1796_v10 = vpop.f32.mrf.mxu1 }
  0xb3   :  { %v6111_v11 = vadd.f32 %v1796_v10, %v1317_v9  ;;  %v5303_v9 = vld [vmem:[#allocation2 + $0x324] sm:$0xf]  ;;  %v4790_v10 = vor.u32 %v5304_v7, %v4789_v6  ;;  %v5309_v6 = vld [vmem:[#allocation2 + $0x354] sm:$0xf]  ;;  %v4814_v7 = vor.u32 %v5310_v5, %v4813_v4 }
  0xb4   :  { %v4794_v15 = vor.u32 %v5303_v9, %v4791_v12  ;;  %v4815_v9 = vld [vmem:[#allocation2 + $0x358] sm:$0xf0]  ;;  %v4514_v12 = vor.u32 %v5233_v2, %v4511_v3  ;;  %v2029_v2 = vpop.f32.mrf.mxu3 }
  0xb5   :  { %11256 = vst [vmem:[#allocation12_spill] sm:$0xff] %v6111_v11  ;;  %1564 = vmatmul.bf16.gmra.mxu2 %v4790_v10 }
  0xb6   :  { %2043 = vmatmul.bf16.gmra.mxu3 %v4794_v15 }
  0xb9   :  { %v1320_v24 = vpop.f32.mrf.mxu0 }
  0xba   :  { %v1799_v25 = vpop.f32.mrf.mxu1 }
  0xbb   :  { %v6113_v26 = vadd.f32 %v1799_v25, %v1320_v24  ;;  %v5229_v24 = vld [vmem:[#allocation2 + $0xd4] sm:$0xf]  ;;  %v4495_v25 = vld [vmem:[#allocation2 + $0xd8] sm:$0xf0] }
  0xbc   :  { %1359 = vmatmul.bf16.gmra.mxu0 %v4462_v21  ;;  %v4498_v34 = vor.u32 %v5229_v24, %v4495_v25  ;;  %v5235_v24 = vld [vmem:[#allocation2 + $0x104] sm:$0xf]  ;;  %v4519_v25 = vld [vmem:[#allocation2 + $0x108] sm:$0xf0] }
  0xbd   :  { %11257 = vst [vmem:[#allocation13_spill] sm:$0xff] %v6113_v26  ;;  %1838 = vmatmul.bf16.gmra.mxu1 %v4466_v22  ;;  %v4493_v22 = vld [vmem:[#allocation2 + $0xd0] sm:$0xf] }
  0xbe   :  { %v4494_v33 = vor.u32 %v5230_v23, %v4493_v22  ;;  %v4517_v22 = vld [vmem:[#allocation2 + $0x100] sm:$0xf]  ;;  %v5236_v23 = vld [vmem:[#allocation2 + $0x104] sm:$0xf0] }
  0xc1   :  { %v1322_v27 = vpop.f32.mrf.mxu0 }
  0xc2   :  { %v1801_v28 = vpop.f32.mrf.mxu1 }
  0xc3   :  { %v6115_v29 = vadd.f32 %v1801_v28, %v1322_v27  ;;  %v4797_v27 = vld [vmem:[#allocation2 + $0x330] sm:$0xf]  ;;  %v5306_v28 = vld [vmem:[#allocation2 + $0x334] sm:$0xf0] }
  0xc4   :  { %v4798_v31 = vor.u32 %v5306_v28, %v4797_v27  ;;  %v4821_v27 = vld [vmem:[#allocation2 + $0x360] sm:$0xf]  ;;  %v5312_v28 = vld [vmem:[#allocation2 + $0x364] sm:$0xf0] }
  0xc5   :  { %11258 = vst [vmem:[#allocation14_spill] sm:$0xff] %v6115_v29 }
  0xc6   :  { %1569 = vmatmul.bf16.gmra.mxu2 %v4798_v31  ;;  %2048 = vmatmul.bf16.gmra.mxu3 %v4802_v35  ;;  %v4822_v31 = vor.u32 %v5312_v28, %v4821_v27  ;;  %v4826_v35 = vor.u32 %v5311_v30, %v4823_v32 }
  0xc9   :  { %v1325_v42 = vpop.f32.mrf.mxu0 }
  0xca   :  { %v1804_v43 = vpop.f32.mrf.mxu1 }
  0xcb   :  { %v6117_v44 = vadd.f32 %v1804_v43, %v1325_v42  ;;  %v4501_v42 = vld [vmem:[#allocation2 + $0xe0] sm:$0xf]  ;;  %v5232_v43 = vld [vmem:[#allocation2 + $0xe4] sm:$0xf0] }
  0xcc   :  { %1364 = vmatmul.bf16.gmra.mxu0 %v4470_v39  ;;  %v4502_v53 = vor.u32 %v5232_v43, %v4501_v42 }
  0xcd   :  { %11259 = vst [vmem:[#allocation15_spill] sm:$0xff] %v6117_v44  ;;  %1843 = vmatmul.bf16.gmra.mxu1 %v4474_v40 }
  0xd1   :  { %v1327_v45 = vpop.f32.mrf.mxu0 }
  0xd2   :  { %v1806_v46 = vpop.f32.mrf.mxu1 }
  0xd3   :  { %v6119_v47 = vadd.f32 %v1806_v46, %v1327_v45  ;;  %v5231_v45 = vld [vmem:[#allocation2 + $0xe4] sm:$0xf]  ;;  %v4503_v46 = vld [vmem:[#allocation2 + $0xe8] sm:$0xf0] }
  0xd4   :  { %v4506_v54 = vor.u32 %v5231_v45, %v4503_v46  ;;  %v4525_v45 = vld [vmem:[#allocation2 + $0x110] sm:$0xf]  ;;  %v5238_v46 = vld [vmem:[#allocation2 + $0x114] sm:$0xf0] }
  0xd5   :  { %11260 = vst [vmem:[#allocation16_spill] sm:$0xff] %v6119_v47 }
  0xd6   :  { %1574 = vmatmul.bf16.gmra.mxu2 %v4806_v51  ;;  %2053 = vmatmul.bf16.gmra.mxu3 %v4810_v55  ;;  %v5314_v51 = vld [vmem:[#allocation2 + $0x374] sm:$0xf0]  ;;  %v4526_v55 = vor.u32 %v5238_v46, %v4525_v45 }
  0xd7   :  { %v5242_v46 = vld [vmem:[#allocation2 + $0x134] sm:$0xf0] }
  0xd9   :  { %v1330_v60 = vpop.f32.mrf.mxu0 }
  0xda   :  { %v1809_v61 = vpop.f32.mrf.mxu1 }
  0xdb   :  { %v6121_v62 = vadd.f32 %v1809_v61, %v1330_v60 }
  0xdc   :  { %1369 = vmatmul.bf16.gmra.mxu0 %v4478_v57 }
  0xdd   :  { %1848 = vmatmul.bf16.gmra.mxu1 %v4482_v58 }
  0xe1   :  { %v1332_v63 = vpop.f32.mrf.mxu0 }
  0xe2   :  { %v1811_v0 = vpop.f32.mrf.mxu1 }
  0xe3   :  { %v6123_v1 = vadd.f32 %v1811_v0, %v1332_v63  ;;  %v4509_v63 = vld [vmem:[#allocation2 + $0xf0] sm:$0xf]  ;;  %v5234_v0 = vld [vmem:[#allocation2 + $0xf4] sm:$0xf0] }
  0xe4   :  { %v4510_v10 = vor.u32 %v5234_v0, %v4509_v63  ;;  %v1550_v0 = vpop.f32.mrf.mxu2 }
  0xe5   :  { %v6147_v3 = vadd.f32 %v2029_v2, %v1550_v0 }
  0xe6   :  { %1579 = vmatmul.bf16.gmra.mxu2 %v4814_v7  ;;  %v4533_v7 = vld [vmem:[#allocation2 + $0x120] sm:$0xf] }
  0xe7   :  { %11268 = vst [vmem:[#allocation24_spill] sm:$0xff] %v6147_v3 }
  0xe9   :  { %v1335_v16 = vpop.f32.mrf.mxu0 }
  0xea   :  { %v1814_v17 = vpop.f32.mrf.mxu1 }
  0xeb   :  { %v6125_v18 = vadd.f32 %v1814_v17, %v1335_v16 }
  0xec   :  { %1374 = vmatmul.bf16.gmra.mxu0 %v4486_v13  ;;  %v4818_v13 = vor.u32 %v5309_v6, %v4815_v9  ;;  %v1552_v9 = vpop.f32.mrf.mxu2 }
  0xed   :  { %1853 = vmatmul.bf16.gmra.mxu1 %v4490_v14 }
  0xee   :  { %2058 = vmatmul.bf16.gmra.mxu3 %v4818_v13  ;;  %v4535_v13 = vld [vmem:[#allocation2 + $0x128] sm:$0xf0] }
  0xf1   :  { %v1337_v19 = vpop.f32.mrf.mxu0 }
  0xf2   :  { %v1816_v20 = vpop.f32.mrf.mxu1 }
  0xf3   :  { %v6127_v21 = vadd.f32 %v1816_v20, %v1337_v19 }
  0xf6   :  { %1584 = vmatmul.bf16.gmra.mxu2 %v4822_v31 }
  0xf9   :  { %v1340_v36 = vpop.f32.mrf.mxu0 }
  0xfa   :  { %v1819_v37 = vpop.f32.mrf.mxu1 }
  0xfb   :  { %v6129_v38 = vadd.f32 %v1819_v37, %v1340_v36 }
  0xfc   :  { %1379 = vmatmul.bf16.gmra.mxu0 %v4494_v33  ;;  %v4518_v33 = vor.u32 %v5236_v23, %v4517_v22  ;;  %v5315_v22 = vld [vmem:[#allocation2 + $0x384] sm:$0xf] }
  0xfd   :  { %11261 = vst [vmem:[#allocation17_spill] sm:$0xff] %v6129_v38  ;;  %1858 = vmatmul.bf16.gmra.mxu1 %v4498_v34  ;;  %v4522_v34 = vor.u32 %v5235_v24, %v4519_v25  ;;  %v4839_v24 = vld [vmem:[#allocation2 + $0x388] sm:$0xf0] }
  0xfe   :  { %2063 = vmatmul.bf16.gmra.mxu3 %v4826_v35  ;;  %v4842_v28 = vor.u32 %v5315_v22, %v4839_v24  ;;  %v5243_v22 = vld [vmem:[#allocation2 + $0x144] sm:$0xf] }
 0x101   :  { %v1342_v39 = vpop.f32.mrf.mxu0 }
 0x102   :  { %v1821_v40 = vpop.f32.mrf.mxu1 }
 0x103   :  { %v6131_v41 = vadd.f32 %v1821_v40, %v1342_v39 }
 0x105   :  { %11262 = vst [vmem:[#allocation18_spill] sm:$0xff] %v6131_v41 }
 0x109   :  { %v1345_v56 = vpop.f32.mrf.mxu0 }
 0x10a   :  { %v1824_v57 = vpop.f32.mrf.mxu1 }
 0x10b   :  { %v6133_v58 = vadd.f32 %v1824_v57, %v1345_v56  ;;  %v4530_v56 = vor.u32 %v5237_v48, %v4527_v49  ;;  %v5241_v48 = vld [vmem:[#allocation2 + $0x134] sm:$0xf]  ;;  %v4543_v49 = vld [vmem:[#allocation2 + $0x138] sm:$0xf0] }
 0x10c   :  { %1384 = vmatmul.bf16.gmra.mxu0 %v4502_v53  ;;  %v4830_v53 = vor.u32 %v5314_v51, %v4829_v50 }
 0x10d   :  { %11263 = vst [vmem:[#allocation19_spill] sm:$0xff] %v6133_v58  ;;  %1863 = vmatmul.bf16.gmra.mxu1 %v4506_v54  ;;  %v4831_v54 = vld [vmem:[#allocation2 + $0x378] sm:$0xf0] }
 0x10e   :  { %v4834_v57 = vor.u32 %v5313_v52, %v4831_v54  ;;  %1589 = vmatmul.bf16.gmra.mxu2 %v4830_v53  ;;  %v4845_v52 = vld [vmem:[#allocation2 + $0x390] sm:$0xf]  ;;  %v5318_v53 = vld [vmem:[#allocation2 + $0x394] sm:$0xf0]  ;;  %v5317_v54 = vld [vmem:[#allocation2 + $0x394] sm:$0xf] }
 0x110   :  { %2068 = vmatmul.bf16.gmra.mxu3 %v4834_v57 }
 0x111   :  { %v1347_v59 = vpop.f32.mrf.mxu0 }
 0x112   :  { %v1826_v60 = vpop.f32.mrf.mxu1 }
 0x113   :  { %v6135_v61 = vadd.f32 %v1826_v60, %v1347_v59 }
 0x115   :  { %11264 = vst [vmem:[#allocation20_spill] sm:$0xff] %v6135_v61 }
 0x119   :  { %v1350_v14 = vpop.f32.mrf.mxu0 }
 0x11a   :  { %v1829_v15 = vpop.f32.mrf.mxu1 }
 0x11b   :  { %v6137_v16 = vadd.f32 %v1829_v15, %v1350_v14  ;;  %v2031_v14 = vpop.f32.mrf.mxu3 }
 0x11c   :  { %1389 = vmatmul.bf16.gmra.mxu0 %v4510_v10  ;;  %v5240_v10 = vld [vmem:[#allocation2 + $0x124] sm:$0xf0]  ;;  %v6151_v15 = vadd.f32 %v2031_v14, %v1552_v9  ;;  %v4549_v14 = vld [vmem:[#allocation2 + $0x140] sm:$0xf] }
 0x11d   :  { %1868 = vmatmul.bf16.gmra.mxu1 %v4514_v12  ;;  %v5239_v12 = vld [vmem:[#allocation2 + $0x124] sm:$0xf]  ;;  %v4534_v25 = vor.u32 %v5240_v10, %v4533_v7 }
 0x11e   :  { %11270 = vst [vmem:[#allocation26_spill] sm:$0xff] %v6151_v15  ;;  %v4538_v27 = vor.u32 %v5239_v12, %v4535_v13 }
 0x120   :  { %2073 = vmatmul.bf16.gmra.mxu3 %v4842_v28  ;;  %v5320_v28 = vld [vmem:[#allocation2 + $0x3a4] sm:$0xf0] }
 0x121   :  { %v1352_v17 = vpop.f32.mrf.mxu0 }
 0x122   :  { %v1831_v19 = vpop.f32.mrf.mxu1 }
 0x123   :  { %v6139_v20 = vadd.f32 %v1831_v19, %v1352_v17  ;;  %v4837_v17 = vld [vmem:[#allocation2 + $0x380] sm:$0xf]  ;;  %v5316_v19 = vld [vmem:[#allocation2 + $0x384] sm:$0xf0] }
 0x124   :  { %v4838_v23 = vor.u32 %v5316_v19, %v4837_v17  ;;  %v5244_v19 = vld [vmem:[#allocation2 + $0x144] sm:$0xf0] }
 0x126   :  { %1594 = vmatmul.bf16.gmra.mxu2 %v4838_v23  ;;  %v4551_v23 = vld [vmem:[#allocation2 + $0x148] sm:$0xf0] }
 0x129   :  { %v1355_v36 = vpop.f32.mrf.mxu0 }
 0x12a   :  { %v1834_v37 = vpop.f32.mrf.mxu1 }
 0x12b   :  { %v6141_v39 = vadd.f32 %v1834_v37, %v1355_v36 }
 0x12c   :  { %1394 = vmatmul.bf16.gmra.mxu0 %v4518_v33  ;;  %v1555_v33 = vpop.f32.mrf.mxu2 }
 0x12d   :  { %11265 = vst [vmem:[#allocation21_spill] sm:$0xff] %v6141_v39  ;;  %1873 = vmatmul.bf16.gmra.mxu1 %v4522_v34  ;;  %v2034_v34 = vpop.f32.mrf.mxu3 }
 0x12e   :  { %v6155_v35 = vadd.f32 %v2034_v34, %v1555_v33  ;;  %v4855_v33 = vld [vmem:[#allocation2 + $0x3a8] sm:$0xf0]  ;;  %v4550_v34 = vor.u32 %v5244_v19, %v4549_v14  ;;  %v4863_v14 = vld [vmem:[#allocation2 + $0x3b8] sm:$0xf0] }
 0x130   :  { %11272 = vst [vmem:[#allocation28_spill] sm:$0xff] %v6155_v35 }
 0x131   :  { %v1357_v40 = vpop.f32.mrf.mxu0 }
 0x132   :  { %v1836_v42 = vpop.f32.mrf.mxu1 }
 0x133   :  { %v6143_v43 = vadd.f32 %v1836_v42, %v1357_v40  ;;  %v4541_v42 = vld [vmem:[#allocation2 + $0x130] sm:$0xf] }
 0x134   :  { %v1557_v45 = vpop.f32.mrf.mxu2  ;;  %v4542_v57 = vor.u32 %v5242_v46, %v4541_v42 }
 0x135   :  { %11266 = vst [vmem:[#allocation22_spill] sm:$0xff] %v6143_v43  ;;  %v2036_v50 = vpop.f32.mrf.mxu3 }
 0x136   :  { %v6159_v51 = vadd.f32 %v2036_v50, %v1557_v45 }
 0x138   :  { %11274 = vst [vmem:[#allocation30_spill] sm:$0xff] %v6159_v51 }
 0x139   :  { %v1360_v59 = vpop.f32.mrf.mxu0 }
 0x13a   :  { %v1839_v60 = vpop.f32.mrf.mxu1 }
 0x13b   :  { %v6145_v63 = vadd.f32 %v1839_v60, %v1360_v59  ;;  %v4546_v59 = vor.u32 %v5241_v48, %v4543_v49 }
 0x13c   :  { %1399 = vmatmul.bf16.gmra.mxu0 %v4526_v55  ;;  %v4846_v55 = vor.u32 %v5318_v53, %v4845_v52 }
 0x13d   :  { %11267 = vst [vmem:[#allocation23_spill] sm:$0xff] %v6145_v63  ;;  %1878 = vmatmul.bf16.gmra.mxu1 %v4530_v56  ;;  %v4847_v56 = vld [vmem:[#allocation2 + $0x398] sm:$0xf0]  ;;  %v2039_v7 = vpop.f32.mrf.mxu3 }
 0x13e   :  { %v4850_v60 = vor.u32 %v5317_v54, %v4847_v56  ;;  %1599 = vmatmul.bf16.gmra.mxu2 %v4846_v55  ;;  %v4557_v55 = vld [vmem:[#allocation2 + $0x150] sm:$0xf] }
 0x140   :  { %2078 = vmatmul.bf16.gmra.mxu3 %v4850_v60  ;;  %v4559_v60 = vld [vmem:[#allocation2 + $0x158] sm:$0xf0] }
 0x141   :  { %v1362_v4 = vpop.f32.mrf.mxu0 }
 0x142   :  { %v1841_v5 = vpop.f32.mrf.mxu1 }
 0x143   :  { %v6149_v6 = vadd.f32 %v1841_v5, %v1362_v4  ;;  %v1560_v5 = vpop.f32.mrf.mxu2 }
 0x144   :  { %v6163_v9 = vadd.f32 %v2039_v7, %v1560_v5  ;;  %v4861_v5 = vld [vmem:[#allocation2 + $0x3b0] sm:$0xf]  ;;  %v5322_v7 = vld [vmem:[#allocation2 + $0x3b4] sm:$0xf0] }
 0x145   :  { %11269 = vst [vmem:[#allocation25_spill] sm:$0xff] %v6149_v6  ;;  %v2041_v24 = vpop.f32.mrf.mxu3 }
 0x146   :  { %11276 = vst [vmem:[#allocation32_spill] sm:$0xff] %v6163_v9 }
 0x149   :  { %v1365_v30 = vpop.f32.mrf.mxu0 }
 0x14a   :  { %v1844_v31 = vpop.f32.mrf.mxu1 }
 0x14b   :  { %v6153_v32 = vadd.f32 %v1844_v31, %v1365_v30  ;;  %v1562_v17 = vpop.f32.mrf.mxu2  ;;  %v5319_v30 = vld [vmem:[#allocation2 + $0x3a4] sm:$0xf] }
 0x14c   :  { %1404 = vmatmul.bf16.gmra.mxu0 %v4534_v25  ;;  %v6167_v25 = vadd.f32 %v2041_v24, %v1562_v17 }
 0x14d   :  { %11271 = vst [vmem:[#allocation27_spill] sm:$0xff] %v6153_v32  ;;  %1883 = vmatmul.bf16.gmra.mxu1 %v4538_v27  ;;  %v4853_v27 = vld [vmem:[#allocation2 + $0x3a0] sm:$0xf]  ;;  %v2044_v49 = vpop.f32.mrf.mxu3 }
 0x14e   :  { %11278 = vst [vmem:[#allocation34_spill] sm:$0xff] %v6167_v25  ;;  %v4854_v31 = vor.u32 %v5320_v28, %v4853_v27 }
 0x150   :  { %1604 = vmatmul.bf16.gmra.mxu2 %v4854_v31 }
 0x151   :  { %v1367_v36 = vpop.f32.mrf.mxu0 }
 0x152   :  { %v1846_v37 = vpop.f32.mrf.mxu1 }
 0x153   :  { %v6157_v40 = vadd.f32 %v1846_v37, %v1367_v36  ;;  %v4554_v36 = vor.u32 %v5243_v22, %v4551_v23  ;;  %v4858_v37 = vor.u32 %v5319_v30, %v4855_v33  ;;  %v1565_v48 = vpop.f32.mrf.mxu2 }
 0x154   :  { %v6171_v50 = vadd.f32 %v2044_v49, %v1565_v48  ;;  %v5247_v48 = vld [vmem:[#allocation2 + $0x164] sm:$0xf]  ;;  %v4567_v49 = vld [vmem:[#allocation2 + $0x168] sm:$0xf0] }
 0x155   :  { %11273 = vst [vmem:[#allocation29_spill] sm:$0xff] %v6157_v40  ;;  %2083 = vmatmul.bf16.gmra.mxu3 %v4858_v37  ;;  %v4565_v37 = vld [vmem:[#allocation2 + $0x160] sm:$0xf] }
 0x156   :  { %11280 = vst [vmem:[#allocation36_spill] sm:$0xff] %v6171_v50 }
 0x159   :  { %v1370_v0 = vpop.f32.mrf.mxu0 }
 0x15a   :  { %v1849_v2 = vpop.f32.mrf.mxu1 }
 0x15b   :  { %v6161_v4 = vadd.f32 %v1849_v2, %v1370_v0  ;;  %v1567_v56 = vpop.f32.mrf.mxu2  ;;  %v2046_v0 = vpop.f32.mrf.mxu3 }
 0x15c   :  { %1409 = vmatmul.bf16.gmra.mxu0 %v4542_v57  ;;  %v5246_v57 = vld [vmem:[#allocation2 + $0x154] sm:$0xf0]  ;;  %v6175_v2 = vadd.f32 %v2046_v0, %v1567_v56  ;;  %v5324_v56 = vld [vmem:[#allocation2 + $0x3c4] sm:$0xf0] }
 0x15d   :  { %11275 = vst [vmem:[#allocation31_spill] sm:$0xff] %v6161_v4  ;;  %1888 = vmatmul.bf16.gmra.mxu1 %v4546_v59  ;;  %v5245_v59 = vld [vmem:[#allocation2 + $0x154] sm:$0xf]  ;;  %v4558_v17 = vor.u32 %v5246_v57, %v4557_v55  ;;  %v4869_v55 = vld [vmem:[#allocation2 + $0x3c0] sm:$0xf] }
 0x15e   :  { %11282 = vst [vmem:[#allocation38_spill] sm:$0xff] %v6175_v2  ;;  %v4562_v19 = vor.u32 %v5245_v59, %v4559_v60  ;;  %v5323_v57 = vld [vmem:[#allocation2 + $0x3c4] sm:$0xf]  ;;  %v4870_v59 = vor.u32 %v5324_v56, %v4869_v55  ;;  %v4871_v60 = vld [vmem:[#allocation2 + $0x3c8] sm:$0xf0] }
 0x15f   :  { %v5325_v55 = vld [vmem:[#allocation2 + $0x3d4] sm:$0xf] }
 0x161   :  { %v1372_v10 = vpop.f32.mrf.mxu0 }
 0x162   :  { %v1851_v12 = vpop.f32.mrf.mxu1 }
 0x163   :  { %v6165_v13 = vadd.f32 %v1851_v12, %v1372_v10  ;;  %v5321_v10 = vld [vmem:[#allocation2 + $0x3b4] sm:$0xf]  ;;  %v4862_v12 = vor.u32 %v5322_v7, %v4861_v5  ;;  %v1570_v28 = vpop.f32.mrf.mxu2  ;;  %v2049_v30 = vpop.f32.mrf.mxu3  ;;  %v4570_v5 = vor.u32 %v5247_v48, %v4567_v49  ;;  %v4874_v7 = vor.u32 %v5323_v57, %v4871_v60  ;;  %v4877_v49 = vld [vmem:[#allocation2 + $0x3d0] sm:$0xf]  ;;  %v4879_v57 = vld [vmem:[#allocation2 + $0x3d8] sm:$0xf0] }
 0x164   :  { %v4866_v22 = vor.u32 %v5321_v10, %v4863_v14  ;;  %v6179_v31 = vadd.f32 %v2049_v30, %v1570_v28  ;;  %v4573_v30 = vld [vmem:[#allocation2 + $0x170] sm:$0xf] }
 0x165   :  { %11277 = vst [vmem:[#allocation33_spill] sm:$0xff] %v6165_v13  ;;  %1609 = vmatmul.bf16.gmra.mxu2 %v4862_v12 }
 0x166   :  { %2088 = vmatmul.bf16.gmra.mxu3 %v4866_v22  ;;  %11284 = vst [vmem:[#allocation40_spill] sm:$0xff] %v6179_v31 }
 0x169   :  { %v1375_v42 = vpop.f32.mrf.mxu0 }
 0x16a   :  { %v1854_v45 = vpop.f32.mrf.mxu1 }
 0x16b   :  { %v6169_v46 = vadd.f32 %v1854_v45, %v1375_v42  ;;  %v1572_v42 = vpop.f32.mrf.mxu2  ;;  %v5248_v45 = vld [vmem:[#allocation2 + $0x164] sm:$0xf0] }
 0x16c   :  { %1414 = vmatmul.bf16.gmra.mxu0 %v4550_v34  ;;  %v4566_v0 = vor.u32 %v5248_v45, %v4565_v37  ;;  %v5249_v37 = vld [vmem:[#allocation2 + $0x174] sm:$0xf] }
 0x16d   :  { %11279 = vst [vmem:[#allocation35_spill] sm:$0xff] %v6169_v46  ;;  %1893 = vmatmul.bf16.gmra.mxu1 %v4554_v36 }
 0x171   :  { %v1377_v52 = vpop.f32.mrf.mxu0 }
 0x172   :  { %v1856_v53 = vpop.f32.mrf.mxu1 }
 0x173   :  { %v6173_v54 = vadd.f32 %v1856_v53, %v1377_v52  ;;  %v2051_v52 = vpop.f32.mrf.mxu3 }
 0x174   :  { %v6183_v53 = vadd.f32 %v2051_v52, %v1572_v42  ;;  %v4575_v42 = vld [vmem:[#allocation2 + $0x178] sm:$0xf0]  ;;  %v5326_v52 = vld [vmem:[#allocation2 + $0x3d4] sm:$0xf0] }
 0x175   :  { %11281 = vst [vmem:[#allocation37_spill] sm:$0xff] %v6173_v54  ;;  %1614 = vmatmul.bf16.gmra.mxu2 %v4870_v59  ;;  %v4878_v56 = vor.u32 %v5326_v52, %v4877_v49  ;;  %v4578_v60 = vor.u32 %v5249_v37, %v4575_v42  ;;  %v5251_v37 = vld [vmem:[#allocation2 + $0x184] sm:$0xf]  ;;  %v4583_v42 = vld [vmem:[#allocation2 + $0x188] sm:$0xf0] }
 0x176   :  { %11286 = vst [vmem:[#allocation42_spill] sm:$0xff] %v6183_v53  ;;  %2093 = vmatmul.bf16.gmra.mxu3 %v4874_v7 }
 0x179   :  { %v1380_v23 = vpop.f32.mrf.mxu0 }
 0x17a   :  { %v1859_v24 = vpop.f32.mrf.mxu1 }
 0x17b   :  { %v6177_v27 = vadd.f32 %v1859_v24, %v1380_v23 }
 0x17c   :  { %1419 = vmatmul.bf16.gmra.mxu0 %v4558_v17  ;;  %v1575_v17 = vpop.f32.mrf.mxu2 }
 0x17d   :  { %11283 = vst [vmem:[#allocation39_spill] sm:$0xff] %v6177_v27  ;;  %1898 = vmatmul.bf16.gmra.mxu1 %v4562_v19  ;;  %v2054_v19 = vpop.f32.mrf.mxu3 }
 0x17e   :  { %v6187_v22 = vadd.f32 %v2054_v19, %v1575_v17 }
 0x180   :  { %11288 = vst [vmem:[#allocation44_spill] sm:$0xff] %v6187_v22 }
 0x181   :  { %v1382_v33 = vpop.f32.mrf.mxu0 }
 0x182   :  { %v1861_v34 = vpop.f32.mrf.mxu1 }
 0x183   :  { %v6181_v36 = vadd.f32 %v1861_v34, %v1382_v33  ;;  %v5250_v34 = vld [vmem:[#allocation2 + $0x174] sm:$0xf0] }
 0x184   :  { %v1577_v33 = vpop.f32.mrf.mxu2  ;;  %v4574_v59 = vor.u32 %v5250_v34, %v4573_v30  ;;  %v5252_v34 = vld [vmem:[#allocation2 + $0x184] sm:$0xf0] }
 0x185   :  { %11285 = vst [vmem:[#allocation41_spill] sm:$0xff] %v6181_v36  ;;  %v2056_v45 = vpop.f32.mrf.mxu3  ;;  %1619 = vmatmul.bf16.gmra.mxu2 %v4878_v56  ;;  %v5328_v56 = vld [vmem:[#allocation2 + $0x3e4] sm:$0xf0] }
 0x186   :  { %v6191_v48 = vadd.f32 %v2056_v45, %v1577_v33  ;;  %v4581_v45 = vld [vmem:[#allocation2 + $0x180] sm:$0xf] }
 0x188   :  { %11290 = vst [vmem:[#allocation46_spill] sm:$0xff] %v6191_v48 }
 0x189   :  { %v1385_v10 = vpop.f32.mrf.mxu0 }
 0x18a   :  { %v1864_v12 = vpop.f32.mrf.mxu1 }
 0x18b   :  { %v6185_v14 = vadd.f32 %v1864_v12, %v1385_v10 }
 0x18c   :  { %1424 = vmatmul.bf16.gmra.mxu0 %v4566_v0  ;;  %v4882_v0 = vor.u32 %v5325_v55, %v4879_v57  ;;  %v1580_v12 = vpop.f32.mrf.mxu2  ;;  %v4885_v55 = vld [vmem:[#allocation2 + $0x3e0] sm:$0xf]  ;;  %v5327_v57 = vld [vmem:[#allocation2 + $0x3e4] sm:$0xf] }
 0x18d   :  { %11287 = vst [vmem:[#allocation43_spill] sm:$0xff] %v6185_v14  ;;  %1903 = vmatmul.bf16.gmra.mxu1 %v4570_v5  ;;  %v2059_v17 = vpop.f32.mrf.mxu3 }
 0x18e   :  { %2098 = vmatmul.bf16.gmra.mxu3 %v4882_v0  ;;  %v6195_v19 = vadd.f32 %v2059_v17, %v1580_v12  ;;  %v4582_v0 = vor.u32 %v5252_v34, %v4581_v45  ;;  %v5254_v34 = vld [vmem:[#allocation2 + $0x194] sm:$0xf0] }
 0x190   :  { %11292 = vst [vmem:[#allocation48_spill] sm:$0xff] %v6195_v19 }
 0x191   :  { %v1387_v23 = vpop.f32.mrf.mxu0 }
 0x192   :  { %v1866_v24 = vpop.f32.mrf.mxu1 }
 0x193   :  { %v6189_v28 = vadd.f32 %v1866_v24, %v1387_v23 }
 0x194   :  { %v1582_v30 = vpop.f32.mrf.mxu2 }
 0x195   :  { %11289 = vst [vmem:[#allocation45_spill] sm:$0xff] %v6189_v28  ;;  %v2061_v49 = vpop.f32.mrf.mxu3 }
 0x196   :  { %v6199_v52 = vadd.f32 %v2061_v49, %v1582_v30 }
 0x198   :  { %11294 = vst [vmem:[#allocation50_spill] sm:$0xff] %v6199_v52 }
 0x199   :  { %v1390_v5 = vpop.f32.mrf.mxu0 }
 0x19a   :  { %v1869_v7 = vpop.f32.mrf.mxu1 }
 0x19b   :  { %v6193_v10 = vadd.f32 %v1869_v7, %v1390_v5  ;;  %v4586_v5 = vor.u32 %v5251_v37, %v4583_v42  ;;  %v5253_v37 = vld [vmem:[#allocation2 + $0x194] sm:$0xf]  ;;  %v4591_v42 = vld [vmem:[#allocation2 + $0x198] sm:$0xf0] }
 0x19c   :  { %1429 = vmatmul.bf16.gmra.mxu0 %v4574_v59  ;;  %v4886_v59 = vor.u32 %v5328_v56, %v4885_v55  ;;  %v4589_v55 = vld [vmem:[#allocation2 + $0x190] sm:$0xf] }
 0x19d   :  { %11291 = vst [vmem:[#allocation47_spill] sm:$0xff] %v6193_v10  ;;  %1908 = vmatmul.bf16.gmra.mxu1 %v4578_v60  ;;  %v4887_v60 = vld [vmem:[#allocation2 + $0x3e8] sm:$0xf0]  ;;  %v2064_v19 = vpop.f32.mrf.mxu3 }
 0x19e   :  { %v4890_v7 = vor.u32 %v5327_v57, %v4887_v60  ;;  %1624 = vmatmul.bf16.gmra.mxu2 %v4886_v59  ;;  %v4893_v59 = vld [vmem:[#allocation2 + $0x3f0] sm:$0xf]  ;;  %v5330_v60 = vld [vmem:[#allocation2 + $0x3f4] sm:$0xf0] }
 0x1a0   :  { %2103 = vmatmul.bf16.gmra.mxu3 %v4890_v7  ;;  %v4895_v7 = vld [vmem:[#allocation2 + $0x3f8] sm:$0xf0] }
 0x1a1   :  { %v1392_v23 = vpop.f32.mrf.mxu0 }
 0x1a2   :  { %v1871_v24 = vpop.f32.mrf.mxu1 }
 0x1a3   :  { %v6197_v33 = vadd.f32 %v1871_v24, %v1392_v23  ;;  %v1585_v24 = vpop.f32.mrf.mxu2 }
 0x1a4   :  { %v6203_v30 = vadd.f32 %v2064_v19, %v1585_v24  ;;  %v4594_v19 = vor.u32 %v5253_v37, %v4591_v42  ;;  %v5255_v37 = vld [vmem:[#allocation2 + $0x1a4] sm:$0xf]  ;;  %v4599_v42 = vld [vmem:[#allocation2 + $0x1a8] sm:$0xf0] }
 0x1a5   :  { %11293 = vst [vmem:[#allocation49_spill] sm:$0xff] %v6197_v33  ;;  %v2066_v56 = vpop.f32.mrf.mxu3 }
 0x1a6   :  { %11296 = vst [vmem:[#allocation52_spill] sm:$0xff] %v6203_v30 }
 0x1a9   :  { %v1395_v12 = vpop.f32.mrf.mxu0 }
 0x1aa   :  { %v1874_v17 = vpop.f32.mrf.mxu1 }
 0x1ab   :  { %v6201_v23 = vadd.f32 %v1874_v17, %v1395_v12  ;;  %v1587_v45 = vpop.f32.mrf.mxu2  ;;  %v4590_v12 = vor.u32 %v5254_v34, %v4589_v55  ;;  %v5256_v34 = vld [vmem:[#allocation2 + $0x1a4] sm:$0xf0] }
 0x1ac   :  { %1434 = vmatmul.bf16.gmra.mxu0 %v4582_v0  ;;  %v6207_v57 = vadd.f32 %v2066_v56, %v1587_v45  ;;  %v5329_v0 = vld [vmem:[#allocation2 + $0x3f4] sm:$0xf] }
 0x1ad   :  { %11295 = vst [vmem:[#allocation51_spill] sm:$0xff] %v6201_v23  ;;  %1913 = vmatmul.bf16.gmra.mxu1 %v4586_v5  ;;  %v4894_v5 = vor.u32 %v5330_v60, %v4893_v59  ;;  %v4898_v17 = vor.u32 %v5329_v0, %v4895_v7  ;;  %v2069_v22 = vpop.f32.mrf.mxu3  ;;  %v4597_v59 = vld [vmem:[#allocation2 + $0x1a0] sm:$0xf]  ;;  %v5331_v7 = vld [vmem:[#allocation2 + $0x404] sm:$0xf] }
 0x1ae   :  { %11298 = vst [vmem:[#allocation54_spill] sm:$0xff] %v6207_v57 }
 0x1af   :  { %1629 = vmatmul.bf16.gmra.mxu2 %v4894_v5  ;;  %v5332_v5 = vld [vmem:[#allocation2 + $0x404] sm:$0xf0] }
 0x1b0   :  { %2108 = vmatmul.bf16.gmra.mxu3 %v4898_v17  ;;  %v4598_v17 = vor.u32 %v5256_v34, %v4597_v59  ;;  %v5258_v34 = vld [vmem:[#allocation2 + $0x1b4] sm:$0xf0] }
 0x1b1   :  { %v1397_v49 = vpop.f32.mrf.mxu0 }
 0x1b2   :  { %v1876_v52 = vpop.f32.mrf.mxu1 }
 0x1b3   :  { %v6205_v48 = vadd.f32 %v1876_v52, %v1397_v49  ;;  %v1590_v49 = vpop.f32.mrf.mxu2 }
 0x1b4   :  { %v6211_v45 = vadd.f32 %v2069_v22, %v1590_v49  ;;  %v4602_v22 = vor.u32 %v5255_v37, %v4599_v42  ;;  %v5257_v37 = vld [vmem:[#allocation2 + $0x1b4] sm:$0xf]  ;;  %v4607_v42 = vld [vmem:[#allocation2 + $0x1b8] sm:$0xf0] }
 0x1b5   :  { %11297 = vst [vmem:[#allocation53_spill] sm:$0xff] %v6205_v48  ;;  %v2071_v60 = vpop.f32.mrf.mxu3 }
 0x1b6   :  { %11300 = vst [vmem:[#allocation56_spill] sm:$0xff] %v6211_v45 }
 0x1b9   :  { %v1400_v24 = vpop.f32.mrf.mxu0 }
 0x1ba   :  { %v1879_v30 = vpop.f32.mrf.mxu1 }
 0x1bb   :  { %v6209_v52 = vadd.f32 %v1879_v30, %v1400_v24  ;;  %v1592_v55 = vpop.f32.mrf.mxu2  ;;  %v4901_v30 = vld [vmem:[#allocation2 + $0x400] sm:$0xf] }
 0x1bc   :  { %1439 = vmatmul.bf16.gmra.mxu0 %v4590_v12  ;;  %v6215_v0 = vadd.f32 %v2071_v60, %v1592_v55  ;;  %v4902_v12 = vor.u32 %v5332_v5, %v4901_v30  ;;  %v4605_v30 = vld [vmem:[#allocation2 + $0x1b0] sm:$0xf] }
 0x1bd   :  { %11299 = vst [vmem:[#allocation55_spill] sm:$0xff] %v6209_v52  ;;  %1918 = vmatmul.bf16.gmra.mxu1 %v4594_v19  ;;  %v4903_v19 = vld [vmem:[#allocation2 + $0x408] sm:$0xf0]  ;;  %v2074_v31 = vpop.f32.mrf.mxu3 }
 0x1be   :  { %11302 = vst [vmem:[#allocation58_spill] sm:$0xff] %v6215_v0  ;;  %v4906_v24 = vor.u32 %v5331_v7, %v4903_v19  ;;  %v5333_v19 = vld [vmem:[#allocation2 + $0x414] sm:$0xf] }
 0x1bf   :  { %1634 = vmatmul.bf16.gmra.mxu2 %v4902_v12  ;;  %v5334_v12 = vld [vmem:[#allocation2 + $0x414] sm:$0xf0] }
 0x1c0   :  { %2113 = vmatmul.bf16.gmra.mxu3 %v4906_v24  ;;  %v4606_v24 = vor.u32 %v5258_v34, %v4605_v30  ;;  %v5260_v34 = vld [vmem:[#allocation2 + $0x1c4] sm:$0xf0] }
 0x1c1   :  { %v1402_v56 = vpop.f32.mrf.mxu0 }
 0x1c2   :  { %v1881_v57 = vpop.f32.mrf.mxu1 }
 0x1c3   :  { %v6213_v53 = vadd.f32 %v1881_v57, %v1402_v56  ;;  %v1595_v56 = vpop.f32.mrf.mxu2 }
 0x1c4   :  { %v6219_v55 = vadd.f32 %v2074_v31, %v1595_v56  ;;  %v4610_v31 = vor.u32 %v5257_v37, %v4607_v42  ;;  %v5259_v37 = vld [vmem:[#allocation2 + $0x1c4] sm:$0xf]  ;;  %v4615_v42 = vld [vmem:[#allocation2 + $0x1c8] sm:$0xf0] }
 0x1c5   :  { %11301 = vst [vmem:[#allocation57_spill] sm:$0xff] %v6213_v53  ;;  %v2076_v5 = vpop.f32.mrf.mxu3 }
 0x1c6   :  { %11304 = vst [vmem:[#allocation60_spill] sm:$0xff] %v6219_v55 }
 0x1c9   :  { %v1405_v49 = vpop.f32.mrf.mxu0 }
 0x1ca   :  { %v1884_v45 = vpop.f32.mrf.mxu1 }
 0x1cb   :  { %v6217_v57 = vadd.f32 %v1884_v45, %v1405_v49  ;;  %v1597_v59 = vpop.f32.mrf.mxu2  ;;  %v4909_v45 = vld [vmem:[#allocation2 + $0x410] sm:$0xf] }
 0x1cc   :  { %1444 = vmatmul.bf16.gmra.mxu0 %v4598_v17  ;;  %v6223_v7 = vadd.f32 %v2076_v5, %v1597_v59  ;;  %v4910_v17 = vor.u32 %v5334_v12, %v4909_v45  ;;  %v4613_v45 = vld [vmem:[#allocation2 + $0x1c0] sm:$0xf] }
 0x1cd   :  { %11303 = vst [vmem:[#allocation59_spill] sm:$0xff] %v6217_v57  ;;  %1923 = vmatmul.bf16.gmra.mxu1 %v4602_v22  ;;  %v4911_v22 = vld [vmem:[#allocation2 + $0x418] sm:$0xf0]  ;;  %v2079_v50 = vpop.f32.mrf.mxu3 }
 0x1ce   :  { %11306 = vst [vmem:[#allocation62_spill] sm:$0xff] %v6223_v7  ;;  %v4914_v49 = vor.u32 %v5333_v19, %v4911_v22  ;;  %v5335_v22 = vld [vmem:[#allocation2 + $0x424] sm:$0xf] }
 0x1cf   :  { %1639 = vmatmul.bf16.gmra.mxu2 %v4910_v17  ;;  %v5336_v17 = vld [vmem:[#allocation2 + $0x424] sm:$0xf0] }
 0x1d0   :  { %2118 = vmatmul.bf16.gmra.mxu3 %v4914_v49  ;;  %v4614_v49 = vor.u32 %v5260_v34, %v4613_v45  ;;  %v5262_v34 = vld [vmem:[#allocation2 + $0x1d4] sm:$0xf0] }
 0x1d1   :  { %v1407_v60 = vpop.f32.mrf.mxu0 }
 0x1d2   :  { %v1886_v0 = vpop.f32.mrf.mxu1 }
 0x1d3   :  { %v6221_v2 = vadd.f32 %v1886_v0, %v1407_v60  ;;  %v1600_v60 = vpop.f32.mrf.mxu2 }
 0x1d4   :  { %v6227_v59 = vadd.f32 %v2079_v50, %v1600_v60  ;;  %v4618_v50 = vor.u32 %v5259_v37, %v4615_v42  ;;  %v5261_v37 = vld [vmem:[#allocation2 + $0x1d4] sm:$0xf]  ;;  %v4623_v42 = vld [vmem:[#allocation2 + $0x1d8] sm:$0xf0] }
 0x1d5   :  { %11305 = vst [vmem:[#allocation61_spill] sm:$0xff] %v6221_v2  ;;  %v2081_v12 = vpop.f32.mrf.mxu3 }
 0x1d6   :  { %11308 = vst [vmem:[#allocation64_spill] sm:$0xff] %v6227_v59 }
 0x1d9   :  { %v1410_v56 = vpop.f32.mrf.mxu0 }
 0x1da   :  { %v1889_v55 = vpop.f32.mrf.mxu1 }
 0x1db   :  { %v6225_v0 = vadd.f32 %v1889_v55, %v1410_v56  ;;  %v1602_v30 = vpop.f32.mrf.mxu2  ;;  %v4917_v55 = vld [vmem:[#allocation2 + $0x420] sm:$0xf] }
 0x1dc   :  { %1449 = vmatmul.bf16.gmra.mxu0 %v4606_v24  ;;  %v6231_v19 = vadd.f32 %v2081_v12, %v1602_v30  ;;  %v4918_v24 = vor.u32 %v5336_v17, %v4917_v55  ;;  %v4621_v55 = vld [vmem:[#allocation2 + $0x1d0] sm:$0xf] }
 0x1dd   :  { %11307 = vst [vmem:[#allocation63_spill] sm:$0xff] %v6225_v0  ;;  %1928 = vmatmul.bf16.gmra.mxu1 %v4610_v31  ;;  %v4919_v31 = vld [vmem:[#allocation2 + $0x428] sm:$0xf0]  ;;  %v2084_v9 = vpop.f32.mrf.mxu3 }
 0x1de   :  { %11310 = vst [vmem:[#allocation66_spill] sm:$0xff] %v6231_v19  ;;  %v4922_v56 = vor.u32 %v5335_v22, %v4919_v31  ;;  %v5337_v31 = vld [vmem:[#allocation2 + $0x434] sm:$0xf] }
 0x1df   :  { %1644 = vmatmul.bf16.gmra.mxu2 %v4918_v24  ;;  %v5338_v24 = vld [vmem:[#allocation2 + $0x434] sm:$0xf0] }
 0x1e0   :  { %2123 = vmatmul.bf16.gmra.mxu3 %v4922_v56  ;;  %v4622_v56 = vor.u32 %v5262_v34, %v4621_v55  ;;  %v5264_v34 = vld [vmem:[#allocation2 + $0x1e4] sm:$0xf0] }
 0x1e1   :  { %v1412_v5 = vpop.f32.mrf.mxu0 }
 0x1e2   :  { %v1891_v7 = vpop.f32.mrf.mxu1 }
 0x1e3   :  { %v6229_v25 = vadd.f32 %v1891_v7, %v1412_v5  ;;  %v1605_v5 = vpop.f32.mrf.mxu2 }
 0x1e4   :  { %v6235_v30 = vadd.f32 %v2084_v9, %v1605_v5  ;;  %v4626_v9 = vor.u32 %v5261_v37, %v4623_v42  ;;  %v5263_v37 = vld [vmem:[#allocation2 + $0x1e4] sm:$0xf]  ;;  %v4631_v42 = vld [vmem:[#allocation2 + $0x1e8] sm:$0xf0] }
 0x1e5   :  { %11309 = vst [vmem:[#allocation65_spill] sm:$0xff] %v6229_v25  ;;  %v2086_v17 = vpop.f32.mrf.mxu3 }
 0x1e6   :  { %11312 = vst [vmem:[#allocation68_spill] sm:$0xff] %v6235_v30 }
 0x1e9   :  { %v1415_v60 = vpop.f32.mrf.mxu0 }
 0x1ea   :  { %v1894_v59 = vpop.f32.mrf.mxu1 }
 0x1eb   :  { %v6233_v7 = vadd.f32 %v1894_v59, %v1415_v60  ;;  %v1607_v45 = vpop.f32.mrf.mxu2  ;;  %v4925_v59 = vld [vmem:[#allocation2 + $0x430] sm:$0xf] }
 0x1ec   :  { %1454 = vmatmul.bf16.gmra.mxu0 %v4614_v49  ;;  %v6239_v22 = vadd.f32 %v2086_v17, %v1607_v45  ;;  %v4926_v49 = vor.u32 %v5338_v24, %v4925_v59  ;;  %v4629_v59 = vld [vmem:[#allocation2 + $0x1e0] sm:$0xf] }
 0x1ed   :  { %11311 = vst [vmem:[#allocation67_spill] sm:$0xff] %v6233_v7  ;;  %1933 = vmatmul.bf16.gmra.mxu1 %v4618_v50  ;;  %v4927_v50 = vld [vmem:[#allocation2 + $0x438] sm:$0xf0]  ;;  %v2089_v35 = vpop.f32.mrf.mxu3 }
 0x1ee   :  { %11314 = vst [vmem:[#allocation70_spill] sm:$0xff] %v6239_v22  ;;  %v4930_v60 = vor.u32 %v5337_v31, %v4927_v50  ;;  %v5339_v50 = vld [vmem:[#allocation2 + $0x444] sm:$0xf] }
 0x1ef   :  { %1649 = vmatmul.bf16.gmra.mxu2 %v4926_v49  ;;  %v5340_v49 = vld [vmem:[#allocation2 + $0x444] sm:$0xf0] }
 0x1f0   :  { %2128 = vmatmul.bf16.gmra.mxu3 %v4930_v60  ;;  %v4630_v60 = vor.u32 %v5264_v34, %v4629_v59  ;;  %v5266_v34 = vld [vmem:[#allocation2 + $0x1f4] sm:$0xf0] }
 0x1f1   :  { %v1417_v12 = vpop.f32.mrf.mxu0 }
 0x1f2   :  { %v1896_v19 = vpop.f32.mrf.mxu1 }
 0x1f3   :  { %v6237_v51 = vadd.f32 %v1896_v19, %v1417_v12  ;;  %v1610_v12 = vpop.f32.mrf.mxu2 }
 0x1f4   :  { %v6243_v45 = vadd.f32 %v2089_v35, %v1610_v12  ;;  %v4634_v35 = vor.u32 %v5263_v37, %v4631_v42  ;;  %v5265_v37 = vld [vmem:[#allocation2 + $0x1f4] sm:$0xf]  ;;  %v4639_v42 = vld [vmem:[#allocation2 + $0x1f8] sm:$0xf0] }
 0x1f5   :  { %11313 = vst [vmem:[#allocation69_spill] sm:$0xff] %v6237_v51  ;;  %v2091_v24 = vpop.f32.mrf.mxu3 }
 0x1f6   :  { %11316 = vst [vmem:[#allocation72_spill] sm:$0xff] %v6243_v45 }
 0x1f9   :  { %v1420_v5 = vpop.f32.mrf.mxu0 }
 0x1fa   :  { %v1899_v30 = vpop.f32.mrf.mxu1 }
 0x1fb   :  { %v6241_v19 = vadd.f32 %v1899_v30, %v1420_v5  ;;  %v1612_v55 = vpop.f32.mrf.mxu2  ;;  %v4933_v30 = vld [vmem:[#allocation2 + $0x440] sm:$0xf] }
 0x1fc   :  { %1459 = vmatmul.bf16.gmra.mxu0 %v4622_v56  ;;  %v6247_v31 = vadd.f32 %v2091_v24, %v1612_v55  ;;  %v4934_v56 = vor.u32 %v5340_v49, %v4933_v30  ;;  %v4637_v30 = vld [vmem:[#allocation2 + $0x1f0] sm:$0xf] }
 0x1fd   :  { %11315 = vst [vmem:[#allocation71_spill] sm:$0xff] %v6241_v19  ;;  %1938 = vmatmul.bf16.gmra.mxu1 %v4626_v9  ;;  %v4935_v9 = vld [vmem:[#allocation2 + $0x448] sm:$0xf0]  ;;  %v2094_v3 = vpop.f32.mrf.mxu3 }
 0x1fe   :  { %11318 = vst [vmem:[#allocation74_spill] sm:$0xff] %v6247_v31  ;;  %v4938_v5 = vor.u32 %v5339_v50, %v4935_v9  ;;  %v5341_v9 = vld [vmem:[#allocation2 + $0x454] sm:$0xf] }
 0x1ff   :  { %1654 = vmatmul.bf16.gmra.mxu2 %v4934_v56  ;;  %v5342_v56 = vld [vmem:[#allocation2 + $0x454] sm:$0xf0] }
 0x200   :  { %2133 = vmatmul.bf16.gmra.mxu3 %v4938_v5  ;;  %v4638_v5 = vor.u32 %v5266_v34, %v4637_v30  ;;  %v5268_v34 = vld [vmem:[#allocation2 + $0x204] sm:$0xf0] }
 0x201   :  { %v1422_v17 = vpop.f32.mrf.mxu0 }
 0x202   :  { %v1901_v22 = vpop.f32.mrf.mxu1 }
 0x203   :  { %v6245_v15 = vadd.f32 %v1901_v22, %v1422_v17  ;;  %v1615_v17 = vpop.f32.mrf.mxu2 }
 0x204   :  { %v6251_v55 = vadd.f32 %v2094_v3, %v1615_v17  ;;  %v4642_v3 = vor.u32 %v5265_v37, %v4639_v42  ;;  %v5267_v37 = vld [vmem:[#allocation2 + $0x204] sm:$0xf]  ;;  %v4647_v42 = vld [vmem:[#allocation2 + $0x208] sm:$0xf0] }
 0x205   :  { %11317 = vst [vmem:[#allocation73_spill] sm:$0xff] %v6245_v15  ;;  %v2096_v49 = vpop.f32.mrf.mxu3 }
 0x206   :  { %11320 = vst [vmem:[#allocation76_spill] sm:$0xff] %v6251_v55 }
 0x209   :  { %v1425_v12 = vpop.f32.mrf.mxu0 }
 0x20a   :  { %v1904_v45 = vpop.f32.mrf.mxu1 }
 0x20b   :  { %v6249_v22 = vadd.f32 %v1904_v45, %v1425_v12  ;;  %v1617_v59 = vpop.f32.mrf.mxu2  ;;  %v4941_v45 = vld [vmem:[#allocation2 + $0x450] sm:$0xf] }
 0x20c   :  { %1464 = vmatmul.bf16.gmra.mxu0 %v4630_v60  ;;  %v6255_v50 = vadd.f32 %v2096_v49, %v1617_v59  ;;  %v4942_v60 = vor.u32 %v5342_v56, %v4941_v45  ;;  %v4645_v45 = vld [vmem:[#allocation2 + $0x200] sm:$0xf] }
 0x20d   :  { %11319 = vst [vmem:[#allocation75_spill] sm:$0xff] %v6249_v22  ;;  %1943 = vmatmul.bf16.gmra.mxu1 %v4634_v35  ;;  %v4943_v35 = vld [vmem:[#allocation2 + $0x458] sm:$0xf0] }
 0x20e   :  { %11322 = vst [vmem:[#allocation78_spill] sm:$0xff] %v6255_v50  ;;  %v4946_v12 = vor.u32 %v5341_v9, %v4943_v35  ;;  %v5343_v35 = vld [vmem:[#allocation2 + $0x464] sm:$0xf] }
 0x20f   :  { %1659 = vmatmul.bf16.gmra.mxu2 %v4942_v60  ;;  %v5344_v60 = vld [vmem:[#allocation2 + $0x464] sm:$0xf0] }
 0x210   :  { %2138 = vmatmul.bf16.gmra.mxu3 %v4946_v12  ;;  %v4646_v12 = vor.u32 %v5268_v34, %v4645_v45  ;;  %v5270_v34 = vld [vmem:[#allocation2 + $0x214] sm:$0xf0] }
 0x211   :  { %v1427_v24 = vpop.f32.mrf.mxu0 }
 0x212   :  { %v1906_v31 = vpop.f32.mrf.mxu1 }
 0x213   :  { %v6253_v15 = vadd.f32 %v1906_v31, %v1427_v24  ;;  %v1620_v24 = vpop.f32.mrf.mxu2 }
 0x215   :  { %11321 = vst [vmem:[#allocation77_spill] sm:$0xff] %v6253_v15  ;;  %v2099_v15 = vpop.f32.mrf.mxu3 }
 0x216   :  { %v6259_v59 = vadd.f32 %v2099_v15, %v1620_v24  ;;  %v4650_v15 = vor.u32 %v5267_v37, %v4647_v42  ;;  %v5269_v37 = vld [vmem:[#allocation2 + $0x214] sm:$0xf]  ;;  %v4655_v42 = vld [vmem:[#allocation2 + $0x218] sm:$0xf0] }
 0x218   :  { %11324 = vst [vmem:[#allocation80_spill] sm:$0xff] %v6259_v59 }
 0x219   :  { %v1430_v17 = vpop.f32.mrf.mxu0 }
 0x21a   :  { %v1909_v55 = vpop.f32.mrf.mxu1 }
 0x21b   :  { %v6257_v31 = vadd.f32 %v1909_v55, %v1430_v17  ;;  %v1622_v30 = vpop.f32.mrf.mxu2  ;;  %v4949_v55 = vld [vmem:[#allocation2 + $0x460] sm:$0xf] }
 0x21c   :  { %1469 = vmatmul.bf16.gmra.mxu0 %v4638_v5  ;;  %v4950_v5 = vor.u32 %v5344_v60, %v4949_v55  ;;  %v4653_v55 = vld [vmem:[#allocation2 + $0x210] sm:$0xf] }
 0x21d   :  { %11323 = vst [vmem:[#allocation79_spill] sm:$0xff] %v6257_v31  ;;  %1948 = vmatmul.bf16.gmra.mxu1 %v4642_v3  ;;  %v2101_v56 = vpop.f32.mrf.mxu3  ;;  %v4951_v3 = vld [vmem:[#allocation2 + $0x468] sm:$0xf0] }
 0x21e   :  { %v6263_v9 = vadd.f32 %v2101_v56, %v1622_v30  ;;  %v4954_v17 = vor.u32 %v5343_v35, %v4951_v3  ;;  %v5345_v3 = vld [vmem:[#allocation2 + $0x474] sm:$0xf] }
 0x21f   :  { %1664 = vmatmul.bf16.gmra.mxu2 %v4950_v5  ;;  %v5346_v5 = vld [vmem:[#allocation2 + $0x474] sm:$0xf0] }
 0x220   :  { %11326 = vst [vmem:[#allocation82_spill] sm:$0xff] %v6263_v9  ;;  %2143 = vmatmul.bf16.gmra.mxu3 %v4954_v17  ;;  %v4654_v17 = vor.u32 %v5270_v34, %v4653_v55  ;;  %v5272_v34 = vld [vmem:[#allocation2 + $0x224] sm:$0xf0] }
 0x221   :  { %v1432_v49 = vpop.f32.mrf.mxu0 }
 0x222   :  { %v1911_v50 = vpop.f32.mrf.mxu1 }
 0x223   :  { %v6261_v22 = vadd.f32 %v1911_v50, %v1432_v49  ;;  %v1625_v49 = vpop.f32.mrf.mxu2 }
 0x225   :  { %11325 = vst [vmem:[#allocation81_spill] sm:$0xff] %v6261_v22  ;;  %v2104_v22 = vpop.f32.mrf.mxu3 }
 0x226   :  { %v6267_v30 = vadd.f32 %v2104_v22, %v1625_v49  ;;  %v4658_v22 = vor.u32 %v5269_v37, %v4655_v42  ;;  %v5271_v37 = vld [vmem:[#allocation2 + $0x224] sm:$0xf]  ;;  %v4663_v42 = vld [vmem:[#allocation2 + $0x228] sm:$0xf0] }
 0x228   :  { %11328 = vst [vmem:[#allocation84_spill] sm:$0xff] %v6267_v30 }
 0x229   :  { %v1435_v24 = vpop.f32.mrf.mxu0 }
 0x22a   :  { %v1914_v59 = vpop.f32.mrf.mxu1 }
 0x22b   :  { %v6265_v50 = vadd.f32 %v1914_v59, %v1435_v24  ;;  %v1627_v45 = vpop.f32.mrf.mxu2  ;;  %v4957_v59 = vld [vmem:[#allocation2 + $0x470] sm:$0xf] }
 0x22c   :  { %1474 = vmatmul.bf16.gmra.mxu0 %v4646_v12  ;;  %v4958_v12 = vor.u32 %v5346_v5, %v4957_v59  ;;  %v4661_v59 = vld [vmem:[#allocation2 + $0x220] sm:$0xf] }
 0x22d   :  { %11327 = vst [vmem:[#allocation83_spill] sm:$0xff] %v6265_v50  ;;  %1953 = vmatmul.bf16.gmra.mxu1 %v4650_v15  ;;  %v2106_v60 = vpop.f32.mrf.mxu3  ;;  %v4959_v15 = vld [vmem:[#allocation2 + $0x478] sm:$0xf0] }
 0x22e   :  { %v6271_v35 = vadd.f32 %v2106_v60, %v1627_v45  ;;  %v4962_v24 = vor.u32 %v5345_v3, %v4959_v15  ;;  %v5347_v15 = vld [vmem:[#allocation2 + $0x484] sm:$0xf] }
 0x22f   :  { %1669 = vmatmul.bf16.gmra.mxu2 %v4958_v12  ;;  %v5348_v12 = vld [vmem:[#allocation2 + $0x484] sm:$0xf0] }
 0x230   :  { %11330 = vst [vmem:[#allocation86_spill] sm:$0xff] %v6271_v35  ;;  %2148 = vmatmul.bf16.gmra.mxu3 %v4962_v24  ;;  %v4662_v24 = vor.u32 %v5272_v34, %v4661_v59  ;;  %v5274_v34 = vld [vmem:[#allocation2 + $0x234] sm:$0xf0] }
 0x231   :  { %v1437_v56 = vpop.f32.mrf.mxu0 }
 0x232   :  { %v1916_v9 = vpop.f32.mrf.mxu1 }
 0x233   :  { %v6269_v31 = vadd.f32 %v1916_v9, %v1437_v56  ;;  %v1630_v56 = vpop.f32.mrf.mxu2 }
 0x235   :  { %11329 = vst [vmem:[#allocation85_spill] sm:$0xff] %v6269_v31  ;;  %v2109_v31 = vpop.f32.mrf.mxu3 }
 0x236   :  { %v6275_v45 = vadd.f32 %v2109_v31, %v1630_v56  ;;  %v4666_v31 = vor.u32 %v5271_v37, %v4663_v42  ;;  %v5273_v37 = vld [vmem:[#allocation2 + $0x234] sm:$0xf]  ;;  %v4671_v42 = vld [vmem:[#allocation2 + $0x238] sm:$0xf0] }
 0x238   :  { %11332 = vst [vmem:[#allocation88_spill] sm:$0xff] %v6275_v45 }
 0x239   :  { %v1440_v49 = vpop.f32.mrf.mxu0 }
 0x23a   :  { %v1919_v30 = vpop.f32.mrf.mxu1 }
 0x23b   :  { %v6273_v9 = vadd.f32 %v1919_v30, %v1440_v49  ;;  %v1632_v55 = vpop.f32.mrf.mxu2  ;;  %v4965_v30 = vld [vmem:[#allocation2 + $0x480] sm:$0xf] }
 0x23c   :  { %1479 = vmatmul.bf16.gmra.mxu0 %v4654_v17  ;;  %v4966_v17 = vor.u32 %v5348_v12, %v4965_v30  ;;  %v4669_v30 = vld [vmem:[#allocation2 + $0x230] sm:$0xf] }
 0x23d   :  { %11331 = vst [vmem:[#allocation87_spill] sm:$0xff] %v6273_v9  ;;  %1958 = vmatmul.bf16.gmra.mxu1 %v4658_v22  ;;  %v2111_v5 = vpop.f32.mrf.mxu3  ;;  %v4967_v22 = vld [vmem:[#allocation2 + $0x488] sm:$0xf0] }
 0x23e   :  { %v6279_v3 = vadd.f32 %v2111_v5, %v1632_v55  ;;  %v4970_v49 = vor.u32 %v5347_v15, %v4967_v22  ;;  %v5349_v22 = vld [vmem:[#allocation2 + $0x494] sm:$0xf] }
 0x23f   :  { %1674 = vmatmul.bf16.gmra.mxu2 %v4966_v17  ;;  %v5350_v17 = vld [vmem:[#allocation2 + $0x494] sm:$0xf0] }
 0x240   :  { %11334 = vst [vmem:[#allocation90_spill] sm:$0xff] %v6279_v3  ;;  %2153 = vmatmul.bf16.gmra.mxu3 %v4970_v49  ;;  %v4670_v49 = vor.u32 %v5274_v34, %v4669_v30  ;;  %v5276_v34 = vld [vmem:[#allocation2 + $0x244] sm:$0xf0] }
 0x241   :  { %v1442_v60 = vpop.f32.mrf.mxu0 }
 0x242   :  { %v1921_v35 = vpop.f32.mrf.mxu1 }
 0x243   :  { %v6277_v50 = vadd.f32 %v1921_v35, %v1442_v60  ;;  %v1635_v60 = vpop.f32.mrf.mxu2 }
 0x245   :  { %11333 = vst [vmem:[#allocation89_spill] sm:$0xff] %v6277_v50  ;;  %v2114_v50 = vpop.f32.mrf.mxu3 }
 0x246   :  { %v6283_v55 = vadd.f32 %v2114_v50, %v1635_v60  ;;  %v4674_v50 = vor.u32 %v5273_v37, %v4671_v42  ;;  %v5275_v37 = vld [vmem:[#allocation2 + $0x244] sm:$0xf]  ;;  %v4679_v42 = vld [vmem:[#allocation2 + $0x248] sm:$0xf0] }
 0x248   :  { %11336 = vst [vmem:[#allocation92_spill] sm:$0xff] %v6283_v55 }
 0x249   :  { %v1445_v56 = vpop.f32.mrf.mxu0 }
 0x24a   :  { %v1924_v45 = vpop.f32.mrf.mxu1 }
 0x24b   :  { %v6281_v35 = vadd.f32 %v1924_v45, %v1445_v56  ;;  %v1637_v59 = vpop.f32.mrf.mxu2  ;;  %v4973_v45 = vld [vmem:[#allocation2 + $0x490] sm:$0xf] }
 0x24c   :  { %1484 = vmatmul.bf16.gmra.mxu0 %v4662_v24  ;;  %v4974_v24 = vor.u32 %v5350_v17, %v4973_v45  ;;  %v4677_v45 = vld [vmem:[#allocation2 + $0x240] sm:$0xf] }
 0x24d   :  { %11335 = vst [vmem:[#allocation91_spill] sm:$0xff] %v6281_v35  ;;  %1963 = vmatmul.bf16.gmra.mxu1 %v4666_v31  ;;  %v2116_v12 = vpop.f32.mrf.mxu3  ;;  %v4975_v31 = vld [vmem:[#allocation2 + $0x498] sm:$0xf0] }
 0x24e   :  { %v6287_v15 = vadd.f32 %v2116_v12, %v1637_v59  ;;  %v4978_v56 = vor.u32 %v5349_v22, %v4975_v31  ;;  %v5351_v31 = vld [vmem:[#allocation2 + $0x4a4] sm:$0xf] }
 0x24f   :  { %1679 = vmatmul.bf16.gmra.mxu2 %v4974_v24  ;;  %v5352_v24 = vld [vmem:[#allocation2 + $0x4a4] sm:$0xf0] }
 0x250   :  { %11338 = vst [vmem:[#allocation94_spill] sm:$0xff] %v6287_v15  ;;  %2158 = vmatmul.bf16.gmra.mxu3 %v4978_v56  ;;  %v4678_v56 = vor.u32 %v5276_v34, %v4677_v45  ;;  %v5278_v34 = vld [vmem:[#allocation2 + $0x254] sm:$0xf0] }
 0x251   :  { %v1447_v5 = vpop.f32.mrf.mxu0 }
 0x252   :  { %v1926_v3 = vpop.f32.mrf.mxu1 }
 0x253   :  { %v6285_v9 = vadd.f32 %v1926_v3, %v1447_v5  ;;  %v1640_v5 = vpop.f32.mrf.mxu2 }
 0x255   :  { %11337 = vst [vmem:[#allocation93_spill] sm:$0xff] %v6285_v9  ;;  %v2119_v9 = vpop.f32.mrf.mxu3 }
 0x256   :  { %v6291_v59 = vadd.f32 %v2119_v9, %v1640_v5  ;;  %v4682_v9 = vor.u32 %v5275_v37, %v4679_v42  ;;  %v5277_v37 = vld [vmem:[#allocation2 + $0x254] sm:$0xf]  ;;  %v4687_v42 = vld [vmem:[#allocation2 + $0x258] sm:$0xf0] }
 0x258   :  { %11340 = vst [vmem:[#allocation96_spill] sm:$0xff] %v6291_v59 }
 0x259   :  { %v1450_v60 = vpop.f32.mrf.mxu0 }
 0x25a   :  { %v1929_v55 = vpop.f32.mrf.mxu1 }
 0x25b   :  { %v6289_v3 = vadd.f32 %v1929_v55, %v1450_v60  ;;  %v1642_v30 = vpop.f32.mrf.mxu2  ;;  %v4981_v55 = vld [vmem:[#allocation2 + $0x4a0] sm:$0xf] }
 0x25c   :  { %1489 = vmatmul.bf16.gmra.mxu0 %v4670_v49  ;;  %v4982_v49 = vor.u32 %v5352_v24, %v4981_v55  ;;  %v4685_v55 = vld [vmem:[#allocation2 + $0x250] sm:$0xf] }
 0x25d   :  { %11339 = vst [vmem:[#allocation95_spill] sm:$0xff] %v6289_v3  ;;  %1968 = vmatmul.bf16.gmra.mxu1 %v4674_v50  ;;  %v2121_v17 = vpop.f32.mrf.mxu3  ;;  %v4983_v50 = vld [vmem:[#allocation2 + $0x4a8] sm:$0xf0] }
 0x25e   :  { %v6295_v22 = vadd.f32 %v2121_v17, %v1642_v30  ;;  %v4986_v60 = vor.u32 %v5351_v31, %v4983_v50  ;;  %v5353_v50 = vld [vmem:[#allocation2 + $0x4b4] sm:$0xf] }
 0x25f   :  { %1684 = vmatmul.bf16.gmra.mxu2 %v4982_v49  ;;  %v5354_v49 = vld [vmem:[#allocation2 + $0x4b4] sm:$0xf0] }
 0x260   :  { %11342 = vst [vmem:[#allocation98_spill] sm:$0xff] %v6295_v22  ;;  %2163 = vmatmul.bf16.gmra.mxu3 %v4986_v60  ;;  %v4686_v60 = vor.u32 %v5278_v34, %v4685_v55  ;;  %v5280_v34 = vld [vmem:[#allocation2 + $0x264] sm:$0xf0] }
 0x261   :  { %v1452_v12 = vpop.f32.mrf.mxu0 }
 0x262   :  { %v1931_v15 = vpop.f32.mrf.mxu1 }
 0x263   :  { %v6293_v35 = vadd.f32 %v1931_v15, %v1452_v12  ;;  %v1645_v12 = vpop.f32.mrf.mxu2 }
 0x265   :  { %11341 = vst [vmem:[#allocation97_spill] sm:$0xff] %v6293_v35  ;;  %v2124_v35 = vpop.f32.mrf.mxu3 }
 0x266   :  { %v6299_v30 = vadd.f32 %v2124_v35, %v1645_v12  ;;  %v4690_v35 = vor.u32 %v5277_v37, %v4687_v42  ;;  %v5279_v37 = vld [vmem:[#allocation2 + $0x264] sm:$0xf]  ;;  %v4695_v42 = vld [vmem:[#allocation2 + $0x268] sm:$0xf0] }
 0x268   :  { %11344 = vst [vmem:[#allocation100_spill] sm:$0xff] %v6299_v30 }
 0x269   :  { %v1455_v5 = vpop.f32.mrf.mxu0 }
 0x26a   :  { %v1934_v59 = vpop.f32.mrf.mxu1 }
 0x26b   :  { %v6297_v15 = vadd.f32 %v1934_v59, %v1455_v5  ;;  %v1647_v45 = vpop.f32.mrf.mxu2  ;;  %v4989_v59 = vld [vmem:[#allocation2 + $0x4b0] sm:$0xf] }
 0x26c   :  { %1494 = vmatmul.bf16.gmra.mxu0 %v4678_v56  ;;  %v4990_v56 = vor.u32 %v5354_v49, %v4989_v59  ;;  %v4693_v59 = vld [vmem:[#allocation2 + $0x260] sm:$0xf] }
 0x26d   :  { %11343 = vst [vmem:[#allocation99_spill] sm:$0xff] %v6297_v15  ;;  %1973 = vmatmul.bf16.gmra.mxu1 %v4682_v9  ;;  %v2126_v24 = vpop.f32.mrf.mxu3  ;;  %v4991_v9 = vld [vmem:[#allocation2 + $0x4b8] sm:$0xf0] }
 0x26e   :  { %v6303_v31 = vadd.f32 %v2126_v24, %v1647_v45  ;;  %v4994_v5 = vor.u32 %v5353_v50, %v4991_v9  ;;  %v5355_v9 = vld [vmem:[#allocation2 + $0x4c4] sm:$0xf] }
 0x26f   :  { %1689 = vmatmul.bf16.gmra.mxu2 %v4990_v56  ;;  %v5356_v56 = vld [vmem:[#allocation2 + $0x4c4] sm:$0xf0] }
 0x270   :  { %11346 = vst [vmem:[#allocation102_spill] sm:$0xff] %v6303_v31  ;;  %2168 = vmatmul.bf16.gmra.mxu3 %v4994_v5  ;;  %v4694_v5 = vor.u32 %v5280_v34, %v4693_v59  ;;  %v5282_v34 = vld [vmem:[#allocation2 + $0x274] sm:$0xf0] }
 0x271   :  { %v1457_v17 = vpop.f32.mrf.mxu0 }
 0x272   :  { %v1936_v22 = vpop.f32.mrf.mxu1 }
 0x273   :  { %v6301_v3 = vadd.f32 %v1936_v22, %v1457_v17  ;;  %v1650_v17 = vpop.f32.mrf.mxu2 }
 0x275   :  { %11345 = vst [vmem:[#allocation101_spill] sm:$0xff] %v6301_v3  ;;  %v2129_v3 = vpop.f32.mrf.mxu3 }
 0x276   :  { %v6307_v45 = vadd.f32 %v2129_v3, %v1650_v17  ;;  %v4698_v3 = vor.u32 %v5279_v37, %v4695_v42  ;;  %v5281_v37 = vld [vmem:[#allocation2 + $0x274] sm:$0xf]  ;;  %v4703_v42 = vld [vmem:[#allocation2 + $0x278] sm:$0xf0] }
 0x278   :  { %11348 = vst [vmem:[#allocation104_spill] sm:$0xff] %v6307_v45 }
 0x279   :  { %v1460_v12 = vpop.f32.mrf.mxu0 }
 0x27a   :  { %v1939_v30 = vpop.f32.mrf.mxu1 }
 0x27b   :  { %v6305_v22 = vadd.f32 %v1939_v30, %v1460_v12  ;;  %v1652_v55 = vpop.f32.mrf.mxu2  ;;  %v4997_v30 = vld [vmem:[#allocation2 + $0x4c0] sm:$0xf] }
 0x27c   :  { %1499 = vmatmul.bf16.gmra.mxu0 %v4686_v60  ;;  %v4998_v60 = vor.u32 %v5356_v56, %v4997_v30  ;;  %v4701_v30 = vld [vmem:[#allocation2 + $0x270] sm:$0xf] }
 0x27d   :  { %11347 = vst [vmem:[#allocation103_spill] sm:$0xff] %v6305_v22  ;;  %1978 = vmatmul.bf16.gmra.mxu1 %v4690_v35  ;;  %v2131_v49 = vpop.f32.mrf.mxu3  ;;  %v4999_v35 = vld [vmem:[#allocation2 + $0x4c8] sm:$0xf0] }
 0x27e   :  { %v6311_v50 = vadd.f32 %v2131_v49, %v1652_v55  ;;  %v5002_v12 = vor.u32 %v5355_v9, %v4999_v35  ;;  %v5357_v35 = vld [vmem:[#allocation2 + $0x4d4] sm:$0xf] }
 0x27f   :  { %1694 = vmatmul.bf16.gmra.mxu2 %v4998_v60  ;;  %v5358_v60 = vld [vmem:[#allocation2 + $0x4d4] sm:$0xf0] }
 0x280   :  { %11350 = vst [vmem:[#allocation106_spill] sm:$0xff] %v6311_v50  ;;  %2173 = vmatmul.bf16.gmra.mxu3 %v5002_v12  ;;  %v4702_v12 = vor.u32 %v5282_v34, %v4701_v30  ;;  %v5284_v34 = vld [vmem:[#allocation2 + $0x284] sm:$0xf0] }
 0x281   :  { %v1462_v24 = vpop.f32.mrf.mxu0 }
 0x282   :  { %v1941_v31 = vpop.f32.mrf.mxu1 }
 0x283   :  { %v6309_v15 = vadd.f32 %v1941_v31, %v1462_v24  ;;  %v1655_v24 = vpop.f32.mrf.mxu2 }
 0x285   :  { %11349 = vst [vmem:[#allocation105_spill] sm:$0xff] %v6309_v15  ;;  %v2134_v15 = vpop.f32.mrf.mxu3 }
 0x286   :  { %v6315_v55 = vadd.f32 %v2134_v15, %v1655_v24  ;;  %v4706_v15 = vor.u32 %v5281_v37, %v4703_v42  ;;  %v5283_v37 = vld [vmem:[#allocation2 + $0x284] sm:$0xf]  ;;  %v4711_v42 = vld [vmem:[#allocation2 + $0x288] sm:$0xf0] }
 0x288   :  { %11352 = vst [vmem:[#allocation108_spill] sm:$0xff] %v6315_v55 }
 0x289   :  { %v1465_v17 = vpop.f32.mrf.mxu0 }
 0x28a   :  { %v1944_v45 = vpop.f32.mrf.mxu1 }
 0x28b   :  { %v6313_v31 = vadd.f32 %v1944_v45, %v1465_v17  ;;  %v1657_v59 = vpop.f32.mrf.mxu2  ;;  %v5005_v45 = vld [vmem:[#allocation2 + $0x4d0] sm:$0xf] }
 0x28c   :  { %1504 = vmatmul.bf16.gmra.mxu0 %v4694_v5  ;;  %v5006_v5 = vor.u32 %v5358_v60, %v5005_v45  ;;  %v4709_v45 = vld [vmem:[#allocation2 + $0x280] sm:$0xf] }
 0x28d   :  { %11351 = vst [vmem:[#allocation107_spill] sm:$0xff] %v6313_v31  ;;  %1983 = vmatmul.bf16.gmra.mxu1 %v4698_v3  ;;  %v2136_v56 = vpop.f32.mrf.mxu3  ;;  %v5007_v3 = vld [vmem:[#allocation2 + $0x4d8] sm:$0xf0] }
 0x28e   :  { %v6319_v9 = vadd.f32 %v2136_v56, %v1657_v59  ;;  %v5010_v17 = vor.u32 %v5357_v35, %v5007_v3  ;;  %v5359_v3 = vld [vmem:[#allocation2 + $0x4e4] sm:$0xf] }
 0x28f   :  { %1699 = vmatmul.bf16.gmra.mxu2 %v5006_v5  ;;  %v5360_v5 = vld [vmem:[#allocation2 + $0x4e4] sm:$0xf0] }
 0x290   :  { %11354 = vst [vmem:[#allocation110_spill] sm:$0xff] %v6319_v9  ;;  %2178 = vmatmul.bf16.gmra.mxu3 %v5010_v17  ;;  %v4710_v17 = vor.u32 %v5284_v34, %v4709_v45  ;;  %v5286_v34 = vld [vmem:[#allocation2 + $0x294] sm:$0xf0] }
 0x291   :  { %v1467_v49 = vpop.f32.mrf.mxu0 }
 0x292   :  { %v1946_v50 = vpop.f32.mrf.mxu1 }
 0x293   :  { %v6317_v22 = vadd.f32 %v1946_v50, %v1467_v49  ;;  %v1660_v49 = vpop.f32.mrf.mxu2 }
 0x295   :  { %11353 = vst [vmem:[#allocation109_spill] sm:$0xff] %v6317_v22  ;;  %v2139_v22 = vpop.f32.mrf.mxu3 }
 0x296   :  { %v6323_v59 = vadd.f32 %v2139_v22, %v1660_v49  ;;  %v4714_v22 = vor.u32 %v5283_v37, %v4711_v42  ;;  %v5285_v37 = vld [vmem:[#allocation2 + $0x294] sm:$0xf]  ;;  %v4719_v42 = vld [vmem:[#allocation2 + $0x298] sm:$0xf0] }
 0x298   :  { %11356 = vst [vmem:[#allocation112_spill] sm:$0xff] %v6323_v59 }
 0x299   :  { %v1470_v24 = vpop.f32.mrf.mxu0 }
 0x29a   :  { %v1949_v55 = vpop.f32.mrf.mxu1 }
 0x29b   :  { %v6321_v50 = vadd.f32 %v1949_v55, %v1470_v24  ;;  %v1662_v30 = vpop.f32.mrf.mxu2  ;;  %v5013_v55 = vld [vmem:[#allocation2 + $0x4e0] sm:$0xf] }
 0x29c   :  { %1509 = vmatmul.bf16.gmra.mxu0 %v4702_v12  ;;  %v5014_v12 = vor.u32 %v5360_v5, %v5013_v55  ;;  %v4717_v55 = vld [vmem:[#allocation2 + $0x290] sm:$0xf] }
 0x29d   :  { %11355 = vst [vmem:[#allocation111_spill] sm:$0xff] %v6321_v50  ;;  %1988 = vmatmul.bf16.gmra.mxu1 %v4706_v15  ;;  %v2141_v60 = vpop.f32.mrf.mxu3  ;;  %v5015_v15 = vld [vmem:[#allocation2 + $0x4e8] sm:$0xf0] }
 0x29e   :  { %v6327_v35 = vadd.f32 %v2141_v60, %v1662_v30  ;;  %v5018_v24 = vor.u32 %v5359_v3, %v5015_v15  ;;  %v5361_v15 = vld [vmem:[#allocation2 + $0x4f4] sm:$0xf] }
 0x29f   :  { %1704 = vmatmul.bf16.gmra.mxu2 %v5014_v12  ;;  %v5362_v12 = vld [vmem:[#allocation2 + $0x4f4] sm:$0xf0] }
 0x2a0   :  { %11358 = vst [vmem:[#allocation114_spill] sm:$0xff] %v6327_v35  ;;  %2183 = vmatmul.bf16.gmra.mxu3 %v5018_v24  ;;  %v4718_v24 = vor.u32 %v5286_v34, %v4717_v55  ;;  %v5288_v34 = vld [vmem:[#allocation2 + $0x2a4] sm:$0xf0] }
 0x2a1   :  { %v1472_v56 = vpop.f32.mrf.mxu0 }
 0x2a2   :  { %v1951_v9 = vpop.f32.mrf.mxu1 }
 0x2a3   :  { %v6325_v31 = vadd.f32 %v1951_v9, %v1472_v56  ;;  %v1665_v56 = vpop.f32.mrf.mxu2 }
 0x2a5   :  { %11357 = vst [vmem:[#allocation113_spill] sm:$0xff] %v6325_v31  ;;  %v2144_v31 = vpop.f32.mrf.mxu3 }
 0x2a6   :  { %v6331_v30 = vadd.f32 %v2144_v31, %v1665_v56  ;;  %v4722_v31 = vor.u32 %v5285_v37, %v4719_v42  ;;  %v5287_v37 = vld [vmem:[#allocation2 + $0x2a4] sm:$0xf]  ;;  %v4727_v42 = vld [vmem:[#allocation2 + $0x2a8] sm:$0xf0] }
 0x2a8   :  { %11360 = vst [vmem:[#allocation116_spill] sm:$0xff] %v6331_v30 }
 0x2a9   :  { %v1475_v49 = vpop.f32.mrf.mxu0 }
 0x2aa   :  { %v1954_v59 = vpop.f32.mrf.mxu1 }
 0x2ab   :  { %v6329_v9 = vadd.f32 %v1954_v59, %v1475_v49  ;;  %v1667_v45 = vpop.f32.mrf.mxu2  ;;  %v5021_v59 = vld [vmem:[#allocation2 + $0x4f0] sm:$0xf] }
 0x2ac   :  { %1514 = vmatmul.bf16.gmra.mxu0 %v4710_v17  ;;  %v5022_v17 = vor.u32 %v5362_v12, %v5021_v59  ;;  %v4725_v59 = vld [vmem:[#allocation2 + $0x2a0] sm:$0xf] }
 0x2ad   :  { %11359 = vst [vmem:[#allocation115_spill] sm:$0xff] %v6329_v9  ;;  %1993 = vmatmul.bf16.gmra.mxu1 %v4714_v22  ;;  %v2146_v5 = vpop.f32.mrf.mxu3  ;;  %v5023_v22 = vld [vmem:[#allocation2 + $0x4f8] sm:$0xf0] }
 0x2ae   :  { %v6335_v3 = vadd.f32 %v2146_v5, %v1667_v45  ;;  %v5026_v49 = vor.u32 %v5361_v15, %v5023_v22  ;;  %v5363_v22 = vld [vmem:[#allocation2 + $0x504] sm:$0xf] }
 0x2af   :  { %1709 = vmatmul.bf16.gmra.mxu2 %v5022_v17  ;;  %v5364_v17 = vld [vmem:[#allocation2 + $0x504] sm:$0xf0] }
 0x2b0   :  { %11362 = vst [vmem:[#allocation118_spill] sm:$0xff] %v6335_v3  ;;  %2188 = vmatmul.bf16.gmra.mxu3 %v5026_v49  ;;  %v4726_v49 = vor.u32 %v5288_v34, %v4725_v59  ;;  %v5290_v34 = vld [vmem:[#allocation2 + $0x2b4] sm:$0xf0] }
 0x2b1   :  { %v1477_v60 = vpop.f32.mrf.mxu0 }
 0x2b2   :  { %v1956_v35 = vpop.f32.mrf.mxu1 }
 0x2b3   :  { %v6333_v50 = vadd.f32 %v1956_v35, %v1477_v60  ;;  %v1670_v60 = vpop.f32.mrf.mxu2 }
 0x2b5   :  { %11361 = vst [vmem:[#allocation117_spill] sm:$0xff] %v6333_v50  ;;  %v2149_v50 = vpop.f32.mrf.mxu3 }
 0x2b6   :  { %v6339_v45 = vadd.f32 %v2149_v50, %v1670_v60  ;;  %v4730_v50 = vor.u32 %v5287_v37, %v4727_v42  ;;  %v5289_v37 = vld [vmem:[#allocation2 + $0x2b4] sm:$0xf]  ;;  %v4735_v42 = vld [vmem:[#allocation2 + $0x2b8] sm:$0xf0] }
 0x2b8   :  { %11364 = vst [vmem:[#allocation120_spill] sm:$0xff] %v6339_v45 }
 0x2b9   :  { %v1480_v56 = vpop.f32.mrf.mxu0 }
 0x2ba   :  { %v1959_v30 = vpop.f32.mrf.mxu1 }
 0x2bb   :  { %v6337_v35 = vadd.f32 %v1959_v30, %v1480_v56  ;;  %v1672_v55 = vpop.f32.mrf.mxu2  ;;  %v5029_v30 = vld [vmem:[#allocation2 + $0x500] sm:$0xf] }
 0x2bc   :  { %1519 = vmatmul.bf16.gmra.mxu0 %v4718_v24  ;;  %v5030_v24 = vor.u32 %v5364_v17, %v5029_v30  ;;  %v4733_v30 = vld [vmem:[#allocation2 + $0x2b0] sm:$0xf] }
 0x2bd   :  { %11363 = vst [vmem:[#allocation119_spill] sm:$0xff] %v6337_v35  ;;  %1998 = vmatmul.bf16.gmra.mxu1 %v4722_v31  ;;  %v2151_v12 = vpop.f32.mrf.mxu3  ;;  %v5031_v31 = vld [vmem:[#allocation2 + $0x508] sm:$0xf0] }
 0x2be   :  { %v6343_v15 = vadd.f32 %v2151_v12, %v1672_v55  ;;  %v5034_v56 = vor.u32 %v5363_v22, %v5031_v31  ;;  %v5365_v31 = vld [vmem:[#allocation2 + $0x514] sm:$0xf] }
 0x2bf   :  { %1714 = vmatmul.bf16.gmra.mxu2 %v5030_v24  ;;  %v5366_v24 = vld [vmem:[#allocation2 + $0x514] sm:$0xf0] }
 0x2c0   :  { %11366 = vst [vmem:[#allocation122_spill] sm:$0xff] %v6343_v15  ;;  %2193 = vmatmul.bf16.gmra.mxu3 %v5034_v56  ;;  %v4734_v56 = vor.u32 %v5290_v34, %v4733_v30 }
 0x2c1   :  { %v1482_v5 = vpop.f32.mrf.mxu0 }
 0x2c2   :  { %v1961_v3 = vpop.f32.mrf.mxu1 }
 0x2c3   :  { %v6341_v9 = vadd.f32 %v1961_v3, %v1482_v5  ;;  %v1675_v5 = vpop.f32.mrf.mxu2 }
 0x2c5   :  { %11365 = vst [vmem:[#allocation121_spill] sm:$0xff] %v6341_v9  ;;  %v2154_v9 = vpop.f32.mrf.mxu3 }
 0x2c6   :  { %v6347_v55 = vadd.f32 %v2154_v9, %v1675_v5  ;;  %v4738_v9 = vor.u32 %v5289_v37, %v4735_v42 }
 0x2c8   :  { %11367 = vst [vmem:[#allocation123_spill] sm:$0xff] %v6347_v55 }
 0x2c9   :  { %v1485_v60 = vpop.f32.mrf.mxu0 }
 0x2ca   :  { %v1964_v45 = vpop.f32.mrf.mxu1 }
 0x2cb   :  { %v6345_v3 = vadd.f32 %v1964_v45, %v1485_v60  ;;  %v1677_v59 = vpop.f32.mrf.mxu2  ;;  %v5037_v45 = vld [vmem:[#allocation2 + $0x510] sm:$0xf] }
 0x2cc   :  { %1524 = vmatmul.bf16.gmra.mxu0 %v4726_v49  ;;  %v5038_v49 = vor.u32 %v5366_v24, %v5037_v45 }
 0x2cd   :  { %2003 = vmatmul.bf16.gmra.mxu1 %v4730_v50  ;;  %v2156_v17 = vpop.f32.mrf.mxu3  ;;  %v5039_v50 = vld [vmem:[#allocation2 + $0x518] sm:$0xf0] }
 0x2ce   :  { %v6351_v22 = vadd.f32 %v2156_v17, %v1677_v59  ;;  %v5042_v60 = vor.u32 %v5365_v31, %v5039_v50  ;;  %v4741_v31 = vld [vmem:[#allocation2 + $0x2c0] sm:$0xf]  ;;  %v5292_v50 = vld [vmem:[#allocation2 + $0x2c4] sm:$0xf0] }
 0x2cf   :  { %1719 = vmatmul.bf16.gmra.mxu2 %v5038_v49 }
 0x2d0   :  { %11369 = vst [vmem:[#allocation125_spill] sm:$0xff] %v6351_v22  ;;  %2198 = vmatmul.bf16.gmra.mxu3 %v5042_v60 }
 0x2d1   :  { %v1487_v12 = vpop.f32.mrf.mxu0 }
 0x2d2   :  { %v1966_v15 = vpop.f32.mrf.mxu1 }
 0x2d3   :  { %v6349_v35 = vadd.f32 %v1966_v15, %v1487_v12  ;;  %v2264_v12 = vadd.f32 %v6111_v11, %v6109_v8  ;;  %v1680_v59 = vpop.f32.mrf.mxu2 }
 0x2d5   :  { %11368 = vst [vmem:[#allocation124_spill] sm:$0xff] %v6349_v35  ;;  %v2159_v17 = vpop.f32.mrf.mxu3  ;;  %v2265_v22 = vadd.f32 %v2264_v12, %v6113_v26  ;;  %v5047_v26 = vld [vmem:[#allocation2 + $0x528] sm:$0xf0] }
 0x2d6   :  { %v6358_v45 = vadd.f32 %v2159_v17, %v1680_v59  ;;  %v5045_v59 = vld [vmem:[#allocation2 + $0x520] sm:$0xf]  ;;  %v5367_v17 = vld [vmem:[#allocation2 + $0x524] sm:$0xf] }
 0x2d7   :  { %v2266_v30 = vadd.f32 %v2265_v22, %v6115_v29  ;;  %v5368_v22 = vld [vmem:[#allocation2 + $0x524] sm:$0xf0] }
 0x2d8   :  { %v5046_v29 = vor.u32 %v5368_v22, %v5045_v59  ;;  %v5293_v22 = vld [vmem:[#allocation2 + $0x2d4] sm:$0xf] }
 0x2d9   :  { %v1490_v5 = vpop.f32.mrf.mxu0  ;;  %v2267_v42 = vadd.f32 %v2266_v30, %v6117_v44 }
 0x2da   :  { %v1969_v55 = vpop.f32.mrf.mxu1 }
 0x2db   :  { %v6353_v15 = vadd.f32 %v1969_v55, %v1490_v5  ;;  %v2268_v24 = vadd.f32 %v2267_v42, %v6119_v47  ;;  %v1682_v49 = vpop.f32.mrf.mxu2  ;;  %v5050_v42 = vor.u32 %v5367_v17, %v5047_v26  ;;  %v4751_v17 = vld [vmem:[#allocation2 + $0x2d8] sm:$0xf0] }
 0x2dc   :  { %1529 = vmatmul.bf16.gmra.mxu0 %v4734_v56  ;;  %v5291_v56 = vld [vmem:[#allocation2 + $0x2c4] sm:$0xf] }
 0x2dd   :  { %11370 = vst [vmem:[#allocation126_spill] sm:$0xff] %v6353_v15  ;;  %2008 = vmatmul.bf16.gmra.mxu1 %v4738_v9  ;;  %v4743_v9 = vld [vmem:[#allocation2 + $0x2c8] sm:$0xf0]  ;;  %v2161_v60 = vpop.f32.mrf.mxu3  ;;  %v2269_v5 = vadd.f32 %v2268_v24, %v6121_v62 }
 0x2de   :  { %v6366_v12 = vadd.f32 %v2161_v60, %v1682_v49 }
 0x2df   :  { %v2270_v30 = vadd.f32 %v2269_v5, %v6123_v1  ;;  %1724 = vmatmul.bf16.gmra.mxu2 %v5046_v29 }
 0x2e0   :  { %2203 = vmatmul.bf16.gmra.mxu3 %v5050_v42  ;;  %v5053_v42 = vld [vmem:[#allocation2 + $0x530] sm:$0xf] }
 0x2e1   :  { %v1492_v34 = vpop.f32.mrf.mxu0  ;;  %v2271_v11 = vadd.f32 %v2270_v30, %v6125_v18 }
 0x2e2   :  { %v1971_v37 = vpop.f32.mrf.mxu1 }
 0x2e3   :  { %v6362_v55 = vadd.f32 %v1971_v37, %v1492_v34  ;;  %v4742_v34 = vor.u32 %v5292_v50, %v4741_v31  ;;  %v4746_v37 = vor.u32 %v5291_v56, %v4743_v9  ;;  %v2272_v24 = vadd.f32 %v2271_v11, %v6127_v21  ;;  %v1685_v49 = vpop.f32.mrf.mxu2  ;;  %v5294_v9 = vld [vmem:[#allocation2 + $0x2d4] sm:$0xf0] }
 0x2e5   :  { %v2164_v60 = vpop.f32.mrf.mxu3  ;;  %v2273_v59 = vadd.f32 %v2272_v24, %v6129_v38  ;;  %v5370_v24 = vld [vmem:[#allocation2 + $0x534] sm:$0xf0] }
 0x2e6   :  { %v6374_v5 = vadd.f32 %v2164_v60, %v1685_v49  ;;  %v5369_v49 = vld [vmem:[#allocation2 + $0x534] sm:$0xf]  ;;  %v5054_v60 = vor.u32 %v5370_v24, %v5053_v42 }
 0x2e7   :  { %v2274_v26 = vadd.f32 %v2273_v59, %v6131_v41  ;;  %v5055_v59 = vld [vmem:[#allocation2 + $0x538] sm:$0xf0] }
 0x2e8   :  { %11372 = vst [vmem:[#allocation128_spill] sm:$0xff] %v6374_v5 }
 0x2e9   :  { %v1495_v47 = vpop.f32.mrf.mxu0  ;;  %v2275_v29 = vadd.f32 %v2274_v26, %v6133_v58 }
 0x2ea   :  { %v1974_v44 = vpop.f32.mrf.mxu1 }
 0x2eb   :  { %v6370_v8 = vadd.f32 %v1974_v44, %v1495_v47  ;;  %v2276_v44 = vadd.f32 %v2275_v29, %v6135_v61  ;;  %v4749_v47 = vld [vmem:[#allocation2 + $0x2d0] sm:$0xf]  ;;  %v1687_v11 = vpop.f32.mrf.mxu2  ;;  %v5058_v29 = vor.u32 %v5369_v49, %v5055_v59  ;;  %v5296_v49 = vld [vmem:[#allocation2 + $0x2e4] sm:$0xf0]  ;;  %v4759_v59 = vld [vmem:[#allocation2 + $0x2e8] sm:$0xf0] }
 0x2ec   :  { %1534 = vmatmul.bf16.gmra.mxu0 %v4742_v34 }
 0x2ed   :  { %11371 = vst [vmem:[#allocation127_spill] sm:$0xff] %v6370_v8  ;;  %2013 = vmatmul.bf16.gmra.mxu1 %v4746_v37  ;;  %v2166_v30 = vpop.f32.mrf.mxu3  ;;  %v2277_v34 = vadd.f32 %v2276_v44, %v6137_v16 }
 0x2ee   :  { %v6382_v37 = vadd.f32 %v2166_v30, %v1687_v11 }
 0x2ef   :  { %v2278_v26 = vadd.f32 %v2277_v34, %v6139_v20  ;;  %1729 = vmatmul.bf16.gmra.mxu2 %v5054_v60  ;;  %v5295_v60 = vld [vmem:[#allocation2 + $0x2e4] sm:$0xf] }
 0x2f0   :  { %11374 = vst [vmem:[#allocation130_spill] sm:$0xff] %v6382_v37  ;;  %2208 = vmatmul.bf16.gmra.mxu3 %v5058_v29  ;;  %v5061_v29 = vld [vmem:[#allocation2 + $0x540] sm:$0xf] }
 0x2f1   :  { %v1497_v31 = vpop.f32.mrf.mxu0  ;;  %v2279_v41 = vadd.f32 %v2278_v26, %v6141_v39 }
 0x2f2   :  { %v1976_v50 = vpop.f32.mrf.mxu1 }
 0x2f3   :  { %v6378_v56 = vadd.f32 %v1976_v50, %v1497_v31  ;;  %v4750_v31 = vor.u32 %v5294_v9, %v4749_v47  ;;  %v4754_v50 = vor.u32 %v5293_v22, %v4751_v17  ;;  %v2280_v44 = vadd.f32 %v2279_v41, %v6143_v43  ;;  %v1690_v11 = vpop.f32.mrf.mxu2 }
 0x2f5   :  { %11373 = vst [vmem:[#allocation129_spill] sm:$0xff] %v6378_v56  ;;  %v2169_v30 = vpop.f32.mrf.mxu3  ;;  %v2281_v42 = vadd.f32 %v2280_v44, %v6145_v63  ;;  %v5372_v44 = vld [vmem:[#allocation2 + $0x544] sm:$0xf0] }
 0x2f6   :  { %v6390_v34 = vadd.f32 %v2169_v30, %v1690_v11  ;;  %v5371_v11 = vld [vmem:[#allocation2 + $0x544] sm:$0xf]  ;;  %v5062_v30 = vor.u32 %v5372_v44, %v5061_v29 }
 0x2f7   :  { %v2282_v47 = vadd.f32 %v2281_v42, %v6149_v6  ;;  %v5063_v42 = vld [vmem:[#allocation2 + $0x548] sm:$0xf0] }
 0x2f9   :  { %v1500_v61 = vpop.f32.mrf.mxu0  ;;  %v2283_v17 = vadd.f32 %v2282_v47, %v6153_v32 }
 0x2fa   :  { %v1979_v58 = vpop.f32.mrf.mxu1 }
 0x2fb   :  { %v6386_v38 = vadd.f32 %v1979_v58, %v1500_v61  ;;  %v2284_v58 = vadd.f32 %v2283_v17, %v6157_v40  ;;  %v4757_v61 = vld [vmem:[#allocation2 + $0x2e0] sm:$0xf]  ;;  %v1692_v41 = vpop.f32.mrf.mxu2  ;;  %v5066_v17 = vor.u32 %v5371_v11, %v5063_v42  ;;  %v5069_v42 = vld [vmem:[#allocation2 + $0x550] sm:$0xf] }
 0x2fc   :  { %1539 = vmatmul.bf16.gmra.mxu0 %v4750_v31 }
 0x2fd   :  { %11375 = vst [vmem:[#allocation131_spill] sm:$0xff] %v6386_v38  ;;  %2018 = vmatmul.bf16.gmra.mxu1 %v4754_v50  ;;  %v2171_v26 = vpop.f32.mrf.mxu3  ;;  %v2285_v31 = vadd.f32 %v2284_v58, %v6161_v4 }
 0x2fe   :  { %v6398_v50 = vadd.f32 %v2171_v26, %v1692_v41 }
 0x2ff   :  { %v2286_v47 = vadd.f32 %v2285_v31, %v6165_v13  ;;  %1734 = vmatmul.bf16.gmra.mxu2 %v5062_v30 }
 0x300   :  { %2213 = vmatmul.bf16.gmra.mxu3 %v5066_v17  ;;  %v5071_v17 = vld [vmem:[#allocation2 + $0x558] sm:$0xf0] }
 0x301   :  { %v1502_v9 = vpop.f32.mrf.mxu0  ;;  %v2287_v6 = vadd.f32 %v2286_v47, %v6169_v46  ;;  %v5374_v47 = vld [vmem:[#allocation2 + $0x554] sm:$0xf0] }
 0x302   :  { %v1981_v22 = vpop.f32.mrf.mxu1 }
 0x303   :  { %v6394_v24 = vadd.f32 %v1981_v22, %v1502_v9  ;;  %v4758_v9 = vor.u32 %v5296_v49, %v4757_v61  ;;  %v4762_v22 = vor.u32 %v5295_v60, %v4759_v59  ;;  %v2288_v58 = vadd.f32 %v2287_v6, %v6173_v54  ;;  %v1695_v41 = vpop.f32.mrf.mxu2  ;;  %v5101_v54 = vld [vmem:[#allocation2 + $0x590] sm:$0xf] }
 0x305   :  { %11376 = vst [vmem:[#allocation132_spill] sm:$0xff] %v6394_v24  ;;  %v2174_v26 = vpop.f32.mrf.mxu3  ;;  %v2289_v29 = vadd.f32 %v2288_v58, %v6177_v27 }
 0x306   :  { %v6406_v31 = vadd.f32 %v2174_v26, %v1695_v41 }
 0x307   :  { %v2290_v61 = vadd.f32 %v2289_v29, %v6181_v36 }
 0x309   :  { %v1505_v40 = vpop.f32.mrf.mxu0  ;;  %v2291_v59 = vadd.f32 %v2290_v61, %v6185_v14 }
 0x30a   :  { %v1984_v32 = vpop.f32.mrf.mxu1 }
 0x30b   :  { %v6402_v63 = vadd.f32 %v1984_v32, %v1505_v40  ;;  %v2292_v32 = vadd.f32 %v2291_v59, %v6189_v28  ;;  %v1697_v40 = vpop.f32.mrf.mxu2 }
 0x30c   :  { %1544 = vmatmul.bf16.gmra.mxu0 %v4758_v9  ;;  %v5373_v9 = vld [vmem:[#allocation2 + $0x554] sm:$0xf] }
 0x30d   :  { %2023 = vmatmul.bf16.gmra.mxu1 %v4762_v22  ;;  %v2176_v6 = vpop.f32.mrf.mxu3  ;;  %v2293_v11 = vadd.f32 %v2292_v32, %v6193_v10  ;;  %v5070_v22 = vor.u32 %v5374_v47, %v5069_v42  ;;  %v5074_v41 = vor.u32 %v5373_v9, %v5071_v17 }
 0x30e   :  { %v6414_v30 = vadd.f32 %v2176_v6, %v1697_v40 }
 0x30f   :  { %v2294_v58 = vadd.f32 %v2293_v11, %v6197_v33  ;;  %1739 = vmatmul.bf16.gmra.mxu2 %v5070_v22 }
 0x310   :  { %11377 = vst [vmem:[#allocation133_spill] sm:$0xff] %v6414_v30  ;;  %2218 = vmatmul.bf16.gmra.mxu3 %v5074_v41 }
 0x311   :  { %v1507_v49 = vpop.f32.mrf.mxu0  ;;  %v2295_v61 = vadd.f32 %v2294_v58, %v6201_v23 }
 0x312   :  { %v1986_v60 = vpop.f32.mrf.mxu1 }
 0x313   :  { %v6410_v44 = vadd.f32 %v1986_v60, %v1507_v49  ;;  %v2296_v60 = vadd.f32 %v2295_v61, %v6205_v48  ;;  %v1700_v59 = vpop.f32.mrf.mxu2  ;;  %v5077_v61 = vld [vmem:[#allocation2 + $0x560] sm:$0xf] }
 0x315   :  { %v2179_v32 = vpop.f32.mrf.mxu3  ;;  %v2297_v40 = vadd.f32 %v2296_v60, %v6209_v52  ;;  %v5376_v60 = vld [vmem:[#allocation2 + $0x564] sm:$0xf0]  ;;  %v5079_v52 = vld [vmem:[#allocation2 + $0x568] sm:$0xf0] }
 0x316   :  { %v6422_v6 = vadd.f32 %v2179_v32, %v1700_v59  ;;  %v5375_v59 = vld [vmem:[#allocation2 + $0x564] sm:$0xf]  ;;  %v5078_v32 = vor.u32 %v5376_v60, %v5077_v61 }
 0x317   :  { %v2298_v42 = vadd.f32 %v2297_v40, %v6213_v53  ;;  %v5082_v53 = vor.u32 %v5375_v59, %v5079_v52  ;;  %v11381_v61 = vld [vmem:[#allocation73_spill] sm:$0xff]  ;;  %v11382_v59 = vld [vmem:[#allocation75_spill] sm:$0xff] }
 0x318   :  { %11378 = vst [vmem:[#allocation134_spill] sm:$0xff] %v6422_v6 }
 0x319   :  { %v1510_v26 = vpop.f32.mrf.mxu0  ;;  %v2299_v9 = vadd.f32 %v2298_v42, %v6217_v57 }
 0x31a   :  { %v1989_v29 = vpop.f32.mrf.mxu1 }
 0x31b   :  { %v6418_v49 = vadd.f32 %v1989_v29, %v1510_v26  ;;  %v2300_v17 = vadd.f32 %v2299_v9, %v6221_v2  ;;  %v1702_v58 = vpop.f32.mrf.mxu2  ;;  %v5085_v2 = vld [vmem:[#allocation2 + $0x570] sm:$0xf] }
 0x31d   :  { %v2181_v41 = vpop.f32.mrf.mxu3  ;;  %v2301_v26 = vadd.f32 %v2300_v17, %v6225_v0 }
 0x31e   :  { %v6430_v29 = vadd.f32 %v2181_v41, %v1702_v58 }
 0x31f   :  { %v2302_v40 = vadd.f32 %v2301_v26, %v6229_v25  ;;  %1744 = vmatmul.bf16.gmra.mxu2 %v5078_v32 }
 0x320   :  { %2223 = vmatmul.bf16.gmra.mxu3 %v5082_v53 }
 0x321   :  { %v1512_v11 = vpop.f32.mrf.mxu0 }
 0x322   :  { %v1991_v47 = vpop.f32.mrf.mxu1 }
 0x323   :  { %v6426_v22 = vadd.f32 %v1991_v47, %v1512_v11  ;;  %v2303_v11 = vadd.f32 %v2302_v40, %v6233_v7  ;;  %v1705_v17 = vpop.f32.mrf.mxu2  ;;  %v11384_v40 = vld [vmem:[#allocation77_spill] sm:$0xff]  ;;  %v11385_v7 = vld [vmem:[#allocation79_spill] sm:$0xff] }
 0x325   :  { %11379 = vst [vmem:[#allocation135_spill] sm:$0xff] %v6426_v22  ;;  %v2304_v9 = vadd.f32 %v2303_v11, %v6237_v51  ;;  %v2184_v58 = vpop.f32.mrf.mxu3 }
 0x326   :  { %v6438_v0 = vadd.f32 %v2184_v58, %v1705_v17  ;;  %v5377_v17 = vld [vmem:[#allocation2 + $0x574] sm:$0xf] }
 0x327   :  { %v2305_v41 = vadd.f32 %v2304_v9, %v6241_v19  ;;  %v5378_v9 = vld [vmem:[#allocation2 + $0x574] sm:$0xf0]  ;;  %v5087_v19 = vld [vmem:[#allocation2 + $0x578] sm:$0xf0] }
 0x328   :  { %v5086_v58 = vor.u32 %v5378_v9, %v5085_v2  ;;  %v5090_v57 = vor.u32 %v5377_v17, %v5087_v19  ;;  %v11392_v2 = vld [vmem:[#allocation89_spill] sm:$0xff]  ;;  %v11393_v17 = vld [vmem:[#allocation91_spill] sm:$0xff] }
 0x329   :  { %v1515_v48 = vpop.f32.mrf.mxu0  ;;  %v2306_v60 = vadd.f32 %v2305_v41, %v11381_v61  ;;  %v11386_v41 = vld [vmem:[#allocation81_spill] sm:$0xff] }
 0x32a   :  { %v1994_v42 = vpop.f32.mrf.mxu1 }
 0x32b   :  { %v6434_v47 = vadd.f32 %v1994_v42, %v1515_v48  ;;  %v2307_v25 = vadd.f32 %v2306_v60, %v11382_v59  ;;  %v1707_v42 = vpop.f32.mrf.mxu2 }
 0x32d   :  { %11380 = vst [vmem:[#allocation136_spill] sm:$0xff] %v6434_v47  ;;  %v2308_v48 = vadd.f32 %v2307_v25, %v11384_v40  ;;  %v2186_v53 = vpop.f32.mrf.mxu3  ;;  %v11389_v40 = vld [vmem:[#allocation85_spill] sm:$0xff] }
 0x32e   :  { %v6446_v51 = vadd.f32 %v2186_v53, %v1707_v42 }
 0x32f   :  { %v2309_v11 = vadd.f32 %v2308_v48, %v11385_v7  ;;  %1749 = vmatmul.bf16.gmra.mxu2 %v5086_v58  ;;  %v11390_v7 = vld [vmem:[#allocation87_spill] sm:$0xff] }
 0x330   :  { %2228 = vmatmul.bf16.gmra.mxu3 %v5090_v57 }
 0x331   :  { %v1517_v26 = vpop.f32.mrf.mxu0  ;;  %v2310_v61 = vadd.f32 %v2309_v11, %v11386_v41  ;;  %v5093_v41 = vld [vmem:[#allocation2 + $0x580] sm:$0xf] }
 0x332   :  { %v1996_v52 = vpop.f32.mrf.mxu1 }
 0x333   :  { %v6442_v32 = vadd.f32 %v1996_v52, %v1517_v26  ;;  %v11387_v26 = vld [vmem:[#allocation83_spill] sm:$0xff]  ;;  %v1710_v42 = vpop.f32.mrf.mxu2 }
 0x334   :  { %v2311_v52 = vadd.f32 %v2310_v61, %v11387_v26  ;;  %v11394_v61 = vld [vmem:[#allocation93_spill] sm:$0xff]  ;;  %v11395_v26 = vld [vmem:[#allocation95_spill] sm:$0xff] }
 0x335   :  { %11383 = vst [vmem:[#allocation137_spill] sm:$0xff] %v6442_v32  ;;  %v2189_v53 = vpop.f32.mrf.mxu3 }
 0x336   :  { %v2312_v48 = vadd.f32 %v2311_v52, %v11389_v40  ;;  %v6454_v33 = vadd.f32 %v2189_v53, %v1710_v42  ;;  %v5379_v42 = vld [vmem:[#allocation2 + $0x584] sm:$0xf] }
 0x338   :  { %v2313_v59 = vadd.f32 %v2312_v48, %v11390_v7  ;;  %11391 = vst [vmem:[#allocation139_spill] sm:$0xff] %v6454_v33  ;;  %v5380_v48 = vld [vmem:[#allocation2 + $0x584] sm:$0xf0]  ;;  %v5095_v7 = vld [vmem:[#allocation2 + $0x588] sm:$0xf0] }
 0x339   :  { %v1520_v23 = vpop.f32.mrf.mxu0  ;;  %v5094_v53 = vor.u32 %v5380_v48, %v5093_v41  ;;  %v5098_v10 = vor.u32 %v5379_v42, %v5095_v7  ;;  %v11401_v41 = vld [vmem:[#allocation105_spill] sm:$0xff]  ;;  %v11402_v42 = vld [vmem:[#allocation107_spill] sm:$0xff] }
 0x33a   :  { %v1999_v60 = vpop.f32.mrf.mxu1  ;;  %v2314_v9 = vadd.f32 %v2313_v59, %v11392_v2  ;;  %v11397_v59 = vld [vmem:[#allocation97_spill] sm:$0xff] }
 0x33b   :  { %v6450_v25 = vadd.f32 %v1999_v60, %v1520_v23  ;;  %v1712_v60 = vpop.f32.mrf.mxu2 }
 0x33c   :  { %v2315_v58 = vadd.f32 %v2314_v9, %v11393_v17  ;;  %v11398_v9 = vld [vmem:[#allocation99_spill] sm:$0xff] }
 0x33d   :  { %11388 = vst [vmem:[#allocation138_spill] sm:$0xff] %v6450_v25  ;;  %v2191_v57 = vpop.f32.mrf.mxu3 }
 0x33e   :  { %v2316_v23 = vadd.f32 %v2315_v58, %v11394_v61  ;;  %v6464_v40 = vadd.f32 %v2191_v57, %v1712_v60  ;;  %v11399_v61 = vld [vmem:[#allocation101_spill] sm:$0xff] }
 0x33f   :  { %1754 = vmatmul.bf16.gmra.mxu2 %v5094_v53  ;;  %v11403_v53 = vld [vmem:[#allocation109_spill] sm:$0xff] }
 0x340   :  { %v2317_v52 = vadd.f32 %v2316_v23, %v11395_v26  ;;  %11396 = vst [vmem:[#allocation140_spill] sm:$0xff] %v6464_v40  ;;  %2233 = vmatmul.bf16.gmra.mxu3 %v5098_v10  ;;  %v11400_v26 = vld [vmem:[#allocation103_spill] sm:$0xff] }
 0x341   :  { %v6457_v11 = vpop.f32.mrf.mxu0 }
 0x342   :  { %v6459_v19 = vpop.f32.mrf.mxu1  ;;  %v2318_v2 = vadd.f32 %v2317_v52, %v11397_v59 }
 0x343   :  { %v1715_v60 = vpop.f32.mrf.mxu2 }
 0x344   :  { %v2319_v58 = vadd.f32 %v2318_v2, %v11398_v9  ;;  %v11404_v9 = vld [vmem:[#allocation111_spill] sm:$0xff] }
 0x345   :  { %v2194_v57 = vpop.f32.mrf.mxu3 }
 0x346   :  { %v2320_v23 = vadd.f32 %v2319_v58, %v11399_v61  ;;  %v6474_v36 = vadd.f32 %v2194_v57, %v1715_v60  ;;  %v5381_v60 = vld [vmem:[#allocation2 + $0x594] sm:$0xf] }
 0x348   :  { %v2321_v17 = vadd.f32 %v2320_v23, %v11400_v26  ;;  %v5382_v23 = vld [vmem:[#allocation2 + $0x594] sm:$0xf0]  ;;  %v5103_v26 = vld [vmem:[#allocation2 + $0x598] sm:$0xf0] }
 0x349   :  { %v6467_v28 = vpop.f32.mrf.mxu0  ;;  %v5102_v57 = vor.u32 %v5382_v23, %v5101_v54  ;;  %v5106_v46 = vor.u32 %v5381_v60, %v5103_v26  ;;  %v11410_v54 = vld [vmem:[#allocation121_spill] sm:$0xff] }
 0x34a   :  { %v6469_v14 = vpop.f32.mrf.mxu1  ;;  %v2322_v48 = vadd.f32 %v2321_v17, %v11401_v41  ;;  %v11405_v17 = vld [vmem:[#allocation113_spill] sm:$0xff] }
 0x34b   :  { %v1717_v2 = vpop.f32.mrf.mxu2 }
 0x34c   :  { %v2323_v59 = vadd.f32 %v2322_v48, %v11402_v42 }
 0x34d   :  { %v2196_v10 = vpop.f32.mrf.mxu3 }
 0x34e   :  { %v2324_v27 = vadd.f32 %v2323_v59, %v11403_v53  ;;  %v6484_v61 = vadd.f32 %v2196_v10, %v1717_v2  ;;  %v11406_v59 = vld [vmem:[#allocation115_spill] sm:$0xff]  ;;  %v11407_v53 = vld [vmem:[#allocation117_spill] sm:$0xff] }
 0x34f   :  { %1759 = vmatmul.bf16.gmra.mxu2 %v5102_v57 }
 0x350   :  { %v2325_v58 = vadd.f32 %v2324_v27, %v11404_v9  ;;  %2238 = vmatmul.bf16.gmra.mxu3 %v5106_v46  ;;  %v11408_v9 = vld [vmem:[#allocation119_spill] sm:$0xff] }
 0x351   :  { %v6477_v52 = vpop.f32.mrf.mxu0 }
 0x352   :  { %v6479_v7 = vpop.f32.mrf.mxu1  ;;  %v2326_v41 = vadd.f32 %v2325_v58, %v11405_v17 }
 0x353   :  { %v1720_v2 = vpop.f32.mrf.mxu2 }
 0x354   :  { %v2327_v48 = vadd.f32 %v2326_v41, %v11406_v59  ;;  %v5383_v59 = vld [vmem:[#allocation2 + $0x5a4] sm:$0xf] }
 0x355   :  { %v2199_v10 = vpop.f32.mrf.mxu3 }
 0x356   :  { %v2328_v27 = vadd.f32 %v2327_v48, %v11407_v53  ;;  %v6494_v43 = vadd.f32 %v2199_v10, %v1720_v2  ;;  %v5109_v48 = vld [vmem:[#allocation2 + $0x5a0] sm:$0xf]  ;;  %v5384_v53 = vld [vmem:[#allocation2 + $0x5a4] sm:$0xf0]  ;;  %v5111_v2 = vld [vmem:[#allocation2 + $0x5a8] sm:$0xf0] }
 0x358   :  { %v2329_v42 = vadd.f32 %v2328_v27, %v11408_v9  ;;  %11409 = vst [vmem:[#allocation141_spill] sm:$0xff] %v6494_v43  ;;  %v5110_v27 = vor.u32 %v5384_v53, %v5109_v48 }
 0x359   :  { %v6487_v13 = vpop.f32.mrf.mxu0 }
 0x35a   :  { %v6489_v4 = vpop.f32.mrf.mxu1  ;;  %v2330_v23 = vadd.f32 %v2329_v42, %v11410_v54  ;;  %v5114_v42 = vor.u32 %v5383_v59, %v5111_v2 }
 0x35b   :  { %v1722_v57 = vpop.f32.mrf.mxu2 }
 0x35c   :  { %v2331_v60 = vadd.f32 %v2330_v23, %v6345_v3 }
 0x35d   :  { %v2201_v39 = vpop.f32.mrf.mxu3 }
 0x35e   :  { %v2332_v17 = vadd.f32 %v2331_v60, %v6349_v35  ;;  %v6500_v41 = vadd.f32 %v2201_v39, %v1722_v57 }
 0x35f   :  { %1764 = vmatmul.bf16.gmra.mxu2 %v5110_v27 }
 0x360   :  { %v2333_v46 = vadd.f32 %v2332_v17, %v6353_v15  ;;  %11411 = vst [vmem:[#allocation142_spill] sm:$0xff] %v6500_v41  ;;  %2243 = vmatmul.bf16.gmra.mxu3 %v5114_v42 }
 0x361   :  { %v1532_v58 = vpop.f32.mrf.mxu0 }
 0x362   :  { %v2011_v26 = vpop.f32.mrf.mxu1  ;;  %v2334_v10 = vadd.f32 %v2333_v46, %v6362_v55 }
 0x363   :  { %v1725_v35 = vpop.f32.mrf.mxu2 }
 0x364   :  { %v2335_v23 = vadd.f32 %v2334_v10, %v6370_v8  ;;  %v5385_v8 = vld [vmem:[#allocation2 + $0x5b4] sm:$0xf] }
 0x365   :  { %v2204_v17 = vpop.f32.mrf.mxu3 }
 0x366   :  { %v2336_v60 = vadd.f32 %v2335_v23, %v6378_v56  ;;  %v6506_v57 = vadd.f32 %v2204_v17, %v1725_v35  ;;  %v5117_v23 = vld [vmem:[#allocation2 + $0x5b0] sm:$0xf]  ;;  %v5386_v56 = vld [vmem:[#allocation2 + $0x5b4] sm:$0xf0]  ;;  %v5119_v35 = vld [vmem:[#allocation2 + $0x5b8] sm:$0xf0] }
 0x368   :  { %v2337_v39 = vadd.f32 %v2336_v60, %v6386_v38  ;;  %v5118_v60 = vor.u32 %v5386_v56, %v5117_v23  ;;  %v6529_v23 = vadd.f32 %v6479_v7, %v6477_v52 }
 0x369   :  { %v1535_v54 = vpop.f32.mrf.mxu0 }
 0x36a   :  { %v2014_v9 = vpop.f32.mrf.mxu1  ;;  %v2338_v53 = vadd.f32 %v2337_v39, %v6394_v24  ;;  %v5122_v39 = vor.u32 %v5385_v8, %v5119_v35  ;;  %11414 = vst [vmem:[#allocation145_spill] sm:$0xff] %v6529_v23 }
 0x36b   :  { %v1727_v27 = vpop.f32.mrf.mxu2  ;;  %v6542_v52 = vadd.f32 %v2014_v9, %v1535_v54 }
 0x36c   :  { %v2339_v59 = vadd.f32 %v2338_v53, %v6402_v63 }
 0x36d   :  { %v2206_v2 = vpop.f32.mrf.mxu3  ;;  %11418 = vst [vmem:[#allocation149_spill] sm:$0xff] %v6542_v52 }
 0x36e   :  { %v2340_v46 = vadd.f32 %v2339_v59, %v6410_v44  ;;  %v6512_v42 = vadd.f32 %v2206_v2, %v1727_v27 }
 0x36f   :  { %1769 = vmatmul.bf16.gmra.mxu2 %v5118_v60 }
 0x370   :  { %v2341_v10 = vadd.f32 %v2340_v46, %v6418_v49  ;;  %2248 = vmatmul.bf16.gmra.mxu3 %v5122_v39  ;;  %v6519_v46 = vadd.f32 %v6459_v19, %v6457_v11  ;;  %v6534_v11 = vadd.f32 %v6489_v4, %v6487_v13  ;;  %v6537_v39 = vadd.f32 %v2011_v26, %v1532_v58  ;;  %v5127_v4 = vld [vmem:[#allocation2 + $0x5c8] sm:$0xf0] }
 0x371   :  { %v1537_v48 = vpop.f32.mrf.mxu0 }
 0x372   :  { %v2016_v15 = vpop.f32.mrf.mxu1  ;;  %v2342_v17 = vadd.f32 %v2341_v10, %v6426_v22  ;;  %11412 = vst [vmem:[#allocation143_spill] sm:$0xff] %v6519_v46  ;;  %v6524_v10 = vadd.f32 %v6469_v14, %v6467_v28  ;;  %v11471_v22 = vld [vmem:[#allocation108_spill] sm:$0xff] }
 0x373   :  { %v1730_v27 = vpop.f32.mrf.mxu2  ;;  %11415 = vst [vmem:[#allocation146_spill] sm:$0xff] %v6534_v11 }
 0x374   :  { %v2343_v53 = vadd.f32 %v2342_v17, %v6434_v47  ;;  %11413 = vst [vmem:[#allocation144_spill] sm:$0xff] %v6524_v10 }
 0x375   :  { %v2209_v2 = vpop.f32.mrf.mxu3  ;;  %11416 = vst [vmem:[#allocation147_spill] sm:$0xff] %v6537_v39 }
 0x376   :  { %v2344_v59 = vadd.f32 %v2343_v53, %v6442_v32  ;;  %v6539_v28 = vadd.f32 %v2209_v2, %v1730_v27 }
 0x378   :  { %v2345_v56 = vadd.f32 %v2344_v59, %v6450_v25  ;;  %11417 = vst [vmem:[#allocation148_spill] sm:$0xff] %v6539_v28 }
 0x379   :  { %v1540_v24 = vpop.f32.mrf.mxu0 }
 0x37a   :  { %v2019_v38 = vpop.f32.mrf.mxu1  ;;  %v2346_v8 = vadd.f32 %v2345_v56, %v6519_v46  ;;  %v5125_v56 = vld [vmem:[#allocation2 + $0x5c0] sm:$0xf] }
 0x37b   :  { %v1732_v14 = vpop.f32.mrf.mxu2 }
 0x37c   :  { %v2347_v17 = vadd.f32 %v2346_v8, %v6524_v10  ;;  %v5388_v8 = vld [vmem:[#allocation2 + $0x5c4] sm:$0xf0]  ;;  %v5387_v10 = vld [vmem:[#allocation2 + $0x5c4] sm:$0xf] }
 0x37d   :  { %v2211_v53 = vpop.f32.mrf.mxu3  ;;  %v5126_v46 = vor.u32 %v5388_v8, %v5125_v56  ;;  %v5130_v58 = vor.u32 %v5387_v10, %v5127_v4 }
 0x37e   :  { %v2348_v19 = vadd.f32 %v2347_v17, %v6529_v23  ;;  %v6544_v7 = vadd.f32 %v2211_v53, %v1732_v14  ;;  %v6547_v17 = vadd.f32 %v2016_v15, %v1537_v48 }
 0x37f   :  { %1774 = vmatmul.bf16.gmra.mxu2 %v5126_v46 }
 0x380   :  { %v2349_v59 = vadd.f32 %v2348_v19, %v6534_v11  ;;  %11419 = vst [vmem:[#allocation150_spill] sm:$0xff] %v6544_v7  ;;  %v6550_v19 = vadd.f32 %v2019_v38, %v1540_v24  ;;  %2253 = vmatmul.bf16.gmra.mxu3 %v5130_v58 }
 0x381   :  { %v1542_v60 = vpop.f32.mrf.mxu0  ;;  %11420 = vst [vmem:[#allocation151_spill] sm:$0xff] %v6547_v17 }
 0x382   :  { %v2021_v35 = vpop.f32.mrf.mxu1  ;;  %v2350_v13 = vadd.f32 %v2349_v59, %v6537_v39  ;;  %11421 = vst [vmem:[#allocation152_spill] sm:$0xff] %v6550_v19 }
 0x383   :  { %v6553_v54 = vadd.f32 %v2021_v35, %v1542_v60  ;;  %v1735_v14 = vpop.f32.mrf.mxu2  ;;  %v11426_v35 = vld [vmem:[#allocation24_spill] sm:$0xff] }
 0x384   :  { %v2351_v2 = vadd.f32 %v2350_v13, %v6542_v52  ;;  %v11433_v52 = vld [vmem:[#allocation38_spill] sm:$0xff] }
 0x385   :  { %11422 = vst [vmem:[#allocation153_spill] sm:$0xff] %v6553_v54  ;;  %v2214_v53 = vpop.f32.mrf.mxu3 }
 0x386   :  { %v2352_v9 = vadd.f32 %v2351_v2, %v6547_v17  ;;  %v6563_v4 = vadd.f32 %v2214_v53, %v1735_v14  ;;  %v5389_v2 = vld [vmem:[#allocation2 + $0x5d4] sm:$0xf] }
 0x388   :  { %v2353_v56 = vadd.f32 %v2352_v9, %v6550_v19  ;;  %11425 = vst [vmem:[#allocation156_spill] sm:$0xff] %v6563_v4 }
 0x389   :  { %v1545_v26 = vpop.f32.mrf.mxu0 }
 0x38a   :  { %v2024_v27 = vpop.f32.mrf.mxu1  ;;  %v2354_v15 = vadd.f32 %v2353_v56, %v6553_v54  ;;  %v5135_v56 = vld [vmem:[#allocation2 + $0x5d8] sm:$0x30]  ;;  %v11427_v54 = vld [vmem:[#allocation26_spill] sm:$0xff] }
 0x38b   :  { %v6556_v59 = vadd.f32 %v2024_v27, %v1545_v26  ;;  %v1737_v24 = vpop.f32.mrf.mxu2  ;;  %v5133_v26 = vld [vmem:[#allocation2 + $0x5d0] sm:$0xf]  ;;  %v5390_v27 = vld [vmem:[#allocation2 + $0x5d4] sm:$0x30] }
 0x38c   :  { %v5134_v9 = vor.u32 %v5390_v27, %v5133_v26 }
 0x38d   :  { %11423 = vst [vmem:[#allocation154_spill] sm:$0xff] %v6556_v59  ;;  %v2355_v46 = vadd.f32 %v2354_v15, %v6556_v59  ;;  %v2216_v60 = vpop.f32.mrf.mxu3  ;;  %v5138_v15 = vor.u32 %v5389_v2, %v5135_v56  ;;  %v11430_v59 = vld [vmem:[#allocation32_spill] sm:$0xff]  ;;  %v11436_v56 = vld [vmem:[#allocation42_spill] sm:$0xff] }
 0x38e   :  { %v6566_v58 = vadd.f32 %v2216_v60, %v1737_v24  ;;  %v11431_v24 = vld [vmem:[#allocation34_spill] sm:$0xff]  ;;  %v11434_v2 = vld [vmem:[#allocation40_spill] sm:$0xff] }
 0x38f   :  { %1779 = vmatmul.bf16.gmra.mxu2 %v5134_v9 }
 0x390   :  { %2258 = vmatmul.bf16.gmra.mxu3 %v5138_v15 }
 0x391   :  { %v1547_v48 = vpop.f32.mrf.mxu0 }
 0x392   :  { %v2026_v10 = vpop.f32.mrf.mxu1 }
 0x393   :  { %v6560_v8 = vadd.f32 %v2026_v10, %v1547_v48  ;;  %v11428_v48 = vld [vmem:[#allocation28_spill] sm:$0xff]  ;;  %v1740_v53 = vpop.f32.mrf.mxu2 }
 0x395   :  { %11424 = vst [vmem:[#allocation155_spill] sm:$0xff] %v6560_v8  ;;  %v2356_v38 = vadd.f32 %v2355_v46, %v6560_v8  ;;  %v11429_v46 = vld [vmem:[#allocation30_spill] sm:$0xff]  ;;  %v2219_v8 = vpop.f32.mrf.mxu3 }
 0x396   :  { %v6575_v39 = vadd.f32 %v2219_v8, %v1740_v53  ;;  %v11442_v53 = vld [vmem:[#allocation54_spill] sm:$0xff] }
 0x397   :  { %v2357_v13 = vadd.f32 %v2356_v38, %v11426_v35  ;;  %v11432_v35 = vld [vmem:[#allocation36_spill] sm:$0xff] }
 0x399   :  { %v2358_v19 = vadd.f32 %v2357_v13, %v11427_v54 }
 0x39b   :  { %v2359_v10 = vadd.f32 %v2358_v19, %v11428_v48  ;;  %v1742_v27 = vpop.f32.mrf.mxu2  ;;  %v11438_v48 = vld [vmem:[#allocation46_spill] sm:$0xff] }
 0x39d   :  { %v2360_v14 = vadd.f32 %v2359_v10, %v11429_v46  ;;  %v2221_v13 = vpop.f32.mrf.mxu3  ;;  %v11437_v10 = vld [vmem:[#allocation44_spill] sm:$0xff] }
 0x39e   :  { %v6578_v19 = vadd.f32 %v2221_v13, %v1742_v27  ;;  %v11444_v13 = vld [vmem:[#allocation56_spill] sm:$0xff] }
 0x39f   :  { %v2361_v38 = vadd.f32 %v2360_v14, %v11430_v59 }
 0x3a0   :  { %11435 = vst [vmem:[#allocation157_spill] sm:$0xff] %v6578_v19 }
 0x3a1   :  { %v2362_v60 = vadd.f32 %v2361_v38, %v11431_v24  ;;  %v11439_v24 = vld [vmem:[#allocation48_spill] sm:$0xff] }
 0x3a3   :  { %v2363_v17 = vadd.f32 %v2362_v60, %v11432_v35  ;;  %v1745_v59 = vpop.f32.mrf.mxu2  ;;  %v11440_v35 = vld [vmem:[#allocation50_spill] sm:$0xff] }
 0x3a5   :  { %v2364_v26 = vadd.f32 %v2363_v17, %v11433_v52  ;;  %v2224_v38 = vpop.f32.mrf.mxu3  ;;  %v11441_v52 = vld [vmem:[#allocation52_spill] sm:$0xff] }
 0x3a7   :  { %v2365_v9 = vadd.f32 %v2364_v26, %v11434_v2  ;;  %v6587_v26 = vadd.f32 %v2224_v38, %v1745_v59  ;;  %v11447_v2 = vld [vmem:[#allocation62_spill] sm:$0xff] }
 0x3a8   :  { %v11451_v38 = vld [vmem:[#allocation70_spill] sm:$0xff] }
 0x3a9   :  { %v2366_v15 = vadd.f32 %v2365_v9, %v11436_v56  ;;  %11443 = vst [vmem:[#allocation158_spill] sm:$0xff] %v6587_v26 }
 0x3ab   :  { %v2367_v46 = vadd.f32 %v2366_v15, %v11437_v10  ;;  %v1747_v11 = vpop.f32.mrf.mxu2  ;;  %v11445_v15 = vld [vmem:[#allocation58_spill] sm:$0xff] }
 0x3ad   :  { %v2368_v14 = vadd.f32 %v2367_v46, %v11438_v48  ;;  %v2226_v27 = vpop.f32.mrf.mxu3  ;;  %v11446_v48 = vld [vmem:[#allocation60_spill] sm:$0xff] }
 0x3ae   :  { %v6590_v56 = vadd.f32 %v2226_v27, %v1747_v11  ;;  %v11452_v27 = vld [vmem:[#allocation72_spill] sm:$0xff] }
 0x3af   :  { %v2369_v60 = vadd.f32 %v2368_v14, %v11439_v24 }
 0x3b1   :  { %v2370_v17 = vadd.f32 %v2369_v60, %v11440_v35  ;;  %v11448_v35 = vld [vmem:[#allocation64_spill] sm:$0xff] }
 0x3b3   :  { %v2371_v8 = vadd.f32 %v2370_v17, %v11441_v52  ;;  %v1750_v24 = vpop.f32.mrf.mxu2  ;;  %v11449_v52 = vld [vmem:[#allocation66_spill] sm:$0xff] }
 0x3b5   :  { %v2372_v54 = vadd.f32 %v2371_v8, %v11442_v53  ;;  %v2229_v60 = vpop.f32.mrf.mxu3  ;;  %v11450_v53 = vld [vmem:[#allocation68_spill] sm:$0xff] }
 0x3b7   :  { %v2373_v9 = vadd.f32 %v2372_v54, %v11444_v13  ;;  %v6599_v54 = vadd.f32 %v2229_v60, %v1750_v24  ;;  %v11456_v13 = vld [vmem:[#allocation78_spill] sm:$0xff] }
 0x3b9   :  { %v2374_v46 = vadd.f32 %v2373_v9, %v11445_v15 }
 0x3bb   :  { %v2375_v10 = vadd.f32 %v2374_v46, %v11446_v48  ;;  %v1752_v25 = vpop.f32.mrf.mxu2  ;;  %v11454_v46 = vld [vmem:[#allocation74_spill] sm:$0xff] }
 0x3bd   :  { %v2376_v14 = vadd.f32 %v2375_v10, %v11447_v2  ;;  %v2231_v11 = vpop.f32.mrf.mxu3  ;;  %v11455_v2 = vld [vmem:[#allocation76_spill] sm:$0xff] }
 0x3be   :  { %v6602_v15 = vadd.f32 %v2231_v11, %v1752_v25  ;;  %v11461_v25 = vld [vmem:[#allocation88_spill] sm:$0xff]  ;;  %v11462_v11 = vld [vmem:[#allocation90_spill] sm:$0xff] }
 0x3bf   :  { %v2377_v17 = vadd.f32 %v2376_v14, %v11448_v35  ;;  %v11457_v35 = vld [vmem:[#allocation80_spill] sm:$0xff] }
 0x3c0   :  { %11453 = vst [vmem:[#allocation159_spill] sm:$0xff] %v6602_v15 }
 0x3c1   :  { %v2378_v8 = vadd.f32 %v2377_v17, %v11449_v52  ;;  %v11458_v52 = vld [vmem:[#allocation82_spill] sm:$0xff] }
 0x3c3   :  { %v2379_v59 = vadd.f32 %v2378_v8, %v11450_v53  ;;  %v11459_v53 = vld [vmem:[#allocation84_spill] sm:$0xff]  ;;  %v1755_v60 = vpop.f32.mrf.mxu2 }
 0x3c5   :  { %v2380_v23 = vadd.f32 %v2379_v59, %v11451_v38  ;;  %v11460_v38 = vld [vmem:[#allocation86_spill] sm:$0xff]  ;;  %v2234_v32 = vpop.f32.mrf.mxu3 }
 0x3c6   :  { %v6611_v47 = vadd.f32 %v2234_v32, %v1755_v60  ;;  %v11470_v32 = vld [vmem:[#allocation106_spill] sm:$0xff] }
 0x3c7   :  { %v2381_v9 = vadd.f32 %v2380_v23, %v11452_v27 }
 0x3c9   :  { %v2382_v10 = vadd.f32 %v2381_v9, %v11454_v46  ;;  %v11463_v46 = vld [vmem:[#allocation92_spill] sm:$0xff] }
 0x3cb   :  { %v2383_v48 = vadd.f32 %v2382_v10, %v11455_v2  ;;  %v11464_v2 = vld [vmem:[#allocation94_spill] sm:$0xff] }
 0x3cd   :  { %v2384_v14 = vadd.f32 %v2383_v48, %v11456_v13  ;;  %v11465_v13 = vld [vmem:[#allocation96_spill] sm:$0xff] }
 0x3cf   :  { %v2385_v17 = vadd.f32 %v2384_v14, %v11457_v35  ;;  %v11466_v35 = vld [vmem:[#allocation98_spill] sm:$0xff] }
 0x3d1   :  { %v2386_v8 = vadd.f32 %v2385_v17, %v11458_v52  ;;  %v11467_v52 = vld [vmem:[#allocation100_spill] sm:$0xff] }
 0x3d3   :  { %v2387_v59 = vadd.f32 %v2386_v8, %v11459_v53  ;;  %v11468_v53 = vld [vmem:[#allocation102_spill] sm:$0xff] }
 0x3d5   :  { %v2388_v24 = vadd.f32 %v2387_v59, %v11460_v38  ;;  %v11469_v38 = vld [vmem:[#allocation104_spill] sm:$0xff] }
 0x3d7   :  { %v2389_v23 = vadd.f32 %v2388_v24, %v11461_v25  ;;  %v11472_v25 = vld [vmem:[#allocation110_spill] sm:$0xff] }
 0x3d9   :  { %v2390_v9 = vadd.f32 %v2389_v23, %v11462_v11  ;;  %v11473_v11 = vld [vmem:[#allocation112_spill] sm:$0xff] }
 0x3db   :  { %v2391_v10 = vadd.f32 %v2390_v9, %v11463_v46  ;;  %v11474_v46 = vld [vmem:[#allocation114_spill] sm:$0xff] }
 0x3dd   :  { %v2392_v48 = vadd.f32 %v2391_v10, %v11464_v2  ;;  %v11475_v2 = vld [vmem:[#allocation116_spill] sm:$0xff] }
 0x3df   :  { %v2393_v14 = vadd.f32 %v2392_v48, %v11465_v13  ;;  %v11476_v13 = vld [vmem:[#allocation118_spill] sm:$0xff] }
 0x3e1   :  { %v2394_v17 = vadd.f32 %v2393_v14, %v11466_v35  ;;  %v11477_v35 = vld [vmem:[#allocation120_spill] sm:$0xff] }
 0x3e3   :  { %v2395_v8 = vadd.f32 %v2394_v17, %v11467_v52  ;;  %v11478_v52 = vld [vmem:[#allocation122_spill] sm:$0xff] }
 0x3e5   :  { %v2396_v59 = vadd.f32 %v2395_v8, %v11468_v53  ;;  %v11479_v53 = vld [vmem:[#allocation123_spill] sm:$0xff] }
 0x3e7   :  { %v2397_v27 = vadd.f32 %v2396_v59, %v11469_v38  ;;  %v11480_v38 = vld [vmem:[#allocation125_spill] sm:$0xff] }
 0x3e9   :  { %v2398_v60 = vadd.f32 %v2397_v27, %v11470_v32 }
 0x3eb   :  { %v2399_v24 = vadd.f32 %v2398_v60, %v11471_v22 }
 0x3ed   :  { %v2400_v23 = vadd.f32 %v2399_v24, %v11472_v25 }
 0x3ef   :  { %v2401_v9 = vadd.f32 %v2400_v23, %v11473_v11  ;;  %v1757_v11 = vpop.f32.mrf.mxu2 }
 0x3f1   :  { %v2402_v10 = vadd.f32 %v2401_v9, %v11474_v46  ;;  %v2236_v9 = vpop.f32.mrf.mxu3 }
 0x3f3   :  { %v2403_v48 = vadd.f32 %v2402_v10, %v11475_v2 }
 0x3f5   :  { %v2404_v14 = vadd.f32 %v2403_v48, %v11476_v13 }
 0x3f7   :  { %v2405_v17 = vadd.f32 %v2404_v14, %v11477_v35 }
 0x3f9   :  { %v2406_v8 = vadd.f32 %v2405_v17, %v11478_v52 }
 0x3fb   :  { %v2407_v59 = vadd.f32 %v2406_v8, %v11479_v53  ;;  %v1760_v53 = vpop.f32.mrf.mxu2 }
 0x3fd   :  { %v2408_v27 = vadd.f32 %v2407_v59, %v11480_v38  ;;  %v2239_v59 = vpop.f32.mrf.mxu3 }
 0x3ff   :  { %v2409_v60 = vadd.f32 %v2408_v27, %v6358_v45 }
 0x401   :  { %v2410_v24 = vadd.f32 %v2409_v60, %v6366_v12 }
 0x403   :  { %v2411_v23 = vadd.f32 %v2410_v24, %v6374_v5 }
 0x405   :  { %v2412_v10 = vadd.f32 %v2411_v23, %v6382_v37  ;;  %v1762_v37 = vpop.f32.mrf.mxu2 }
 0x407   :  { %v2413_v48 = vadd.f32 %v2412_v10, %v6390_v34  ;;  %v2241_v10 = vpop.f32.mrf.mxu3 }
 0x409   :  { %v2414_v14 = vadd.f32 %v2413_v48, %v6398_v50 }
 0x40b   :  { %v2415_v17 = vadd.f32 %v2414_v14, %v6406_v31 }
 0x40d   :  { %v2416_v8 = vadd.f32 %v2415_v17, %v6414_v30 }
 0x40f   :  { %v2417_v27 = vadd.f32 %v2416_v8, %v6422_v6  ;;  %v1765_v6 = vpop.f32.mrf.mxu2 }
 0x411   :  { %v2418_v60 = vadd.f32 %v2417_v27, %v6430_v29  ;;  %v2244_v27 = vpop.f32.mrf.mxu3 }
 0x413   :  { %v2419_v24 = vadd.f32 %v2418_v60, %v6438_v0 }
 0x415   :  { %v2420_v5 = vadd.f32 %v2419_v24, %v6446_v51 }
 0x417   :  { %v2421_v23 = vadd.f32 %v2420_v5, %v6454_v33 }
 0x419   :  { %v2422_v48 = vadd.f32 %v2421_v23, %v6464_v40  ;;  %v1767_v40 = vpop.f32.mrf.mxu2 }
 0x41b   :  { %v2423_v14 = vadd.f32 %v2422_v48, %v6474_v36  ;;  %v2246_v48 = vpop.f32.mrf.mxu3 }
 0x41d   :  { %v2424_v17 = vadd.f32 %v2423_v14, %v6484_v61 }
 0x41f   :  { %v2425_v30 = vadd.f32 %v2424_v17, %v6494_v43 }
 0x421   :  { %v2426_v8 = vadd.f32 %v2425_v30, %v6500_v41  ;;  %v1770_v43 = vpop.f32.mrf.mxu2 }
 0x423   :  { %v2427_v60 = vadd.f32 %v2426_v8, %v6506_v57  ;;  %v2249_v8 = vpop.f32.mrf.mxu3 }
 0x425   :  { %v2428_v24 = vadd.f32 %v2427_v60, %v6512_v42 }
 0x427   :  { %v2429_v5 = vadd.f32 %v2428_v24, %v6539_v28  ;;  %v6664_v28 = vadd.f32 %v2236_v9, %v1757_v11  ;;  %v6676_v11 = vadd.f32 %v2246_v48, %v1767_v40 }
 0x429   :  { %v2430_v33 = vadd.f32 %v2429_v5, %v6544_v7  ;;  %v1772_v7 = vpop.f32.mrf.mxu2 }
 0x42b   :  { %v2431_v23 = vadd.f32 %v2430_v33, %v6563_v4  ;;  %v2251_v33 = vpop.f32.mrf.mxu3 }
 0x42d   :  { %v2432_v14 = vadd.f32 %v2431_v23, %v6566_v58 }
 0x42f   :  { %v2433_v17 = vadd.f32 %v2432_v14, %v6575_v39  ;;  %v6667_v14 = vadd.f32 %v2239_v59, %v1760_v53  ;;  %v6679_v53 = vadd.f32 %v2249_v8, %v1770_v43  ;;  %v6682_v59 = vadd.f32 %v2251_v33, %v1772_v7 }
 0x431   :  { %v2434_v30 = vadd.f32 %v2433_v17, %v6578_v19  ;;  %v1775_v17 = vpop.f32.mrf.mxu2  ;;  %v6670_v19 = vadd.f32 %v2241_v10, %v1762_v37 }
 0x433   :  { %v2435_v41 = vadd.f32 %v2434_v30, %v6587_v26  ;;  %v2254_v30 = vpop.f32.mrf.mxu3 }
 0x435   :  { %v2436_v60 = vadd.f32 %v2435_v41, %v6590_v56 }
 0x437   :  { %v2437_v24 = vadd.f32 %v2436_v60, %v6599_v54  ;;  %v6673_v60 = vadd.f32 %v2244_v27, %v1765_v6  ;;  %v6685_v6 = vadd.f32 %v2254_v30, %v1775_v17 }
 0x439   :  { %v2438_v5 = vadd.f32 %v2437_v24, %v6602_v15  ;;  %v1777_v15 = vpop.f32.mrf.mxu2 }
 0x43b   :  { %v2439_v4 = vadd.f32 %v2438_v5, %v6611_v47  ;;  %v2256_v5 = vpop.f32.mrf.mxu3 }
 0x43d   :  { %v2440_v23 = vadd.f32 %v2439_v4, %v6664_v28 }
 0x43f   :  { %v2441_v26 = vadd.f32 %v2440_v23, %v6667_v14  ;;  %v6688_v23 = vadd.f32 %v2256_v5, %v1777_v15 }
 0x441   :  { %v2442_v41 = vadd.f32 %v2441_v26, %v6670_v19  ;;  %v1780_v37 = vpop.f32.mrf.mxu2 }
 0x443   :  { %v2443_v24 = vadd.f32 %v2442_v41, %v6673_v60  ;;  %v2259_v10 = vpop.f32.mrf.mxu3 }
 0x444   :  { %v2260_v43 = vadd.f32 %v2259_v10, %v1780_v37  ;;  %v11481_v37 = vld [vmem:[#allocation11_spill] sm:$0xff] }
 0x445   :  { %v2444_v4 = vadd.f32 %v2443_v24, %v6676_v11 }
 0x447   :  { %v2445_v9 = vadd.f32 %v2444_v4, %v6679_v53 }
 0x449   :  { %v2446_v26 = vadd.f32 %v2445_v9, %v6682_v59  ;;  %v1782_v48 = vpop.f32.mrf.mxu2 }
 0x44b   :  { %v2447_v27 = vadd.f32 %v2446_v26, %v6685_v6  ;;  %v2261_v41 = vpop.f32.mrf.mxu3 }
 0x44c   :  { %v6691_v8 = vadd.f32 %v2261_v41, %v1782_v48  ;;  %v11484_v41 = vld [vmem:[#allocation13_spill] sm:$0xff] }
 0x44d   :  { %v2448_v40 = vadd.f32 %v2447_v27, %v6688_v23 }
 0x44e   :  { %v2451_v7 = vsel %vm2450_vm0, %v6691_v8, 0.0 }
 0x44f   :  { %v2449_v24 = vadd.f32 %v2448_v40, %v2260_v43  ;;  %v11482_v40 = vld [vmem:[#allocation12_spill] sm:$0xff] }
 0x451   :  { %v2452_v33 = vadd.f32 %v2451_v7, %v2449_v24 }
 0x453   :  { %v2453_v4 = vrot.slane %v2452_v33, 4 }
 0x455   :  { %v2454_v17 = vadd.f32 %v2453_v4, %v2452_v33 }
 0x457   :  { %v2455_v30 = vrot.slane %v2454_v17, 2 }
 0x459   :  { %v2456_v9 = vadd.f32 %v2455_v30, %v2454_v17  ;;  %v11487_v17 = vld [vmem:[#allocation15_spill] sm:$0xff] }
 0x45b   :  { %v2457_v26 = vrot.slane %v2456_v9, 1 }
 0x45d   :  { %v2458_v15 = vadd.f32 %v2457_v26, %v2456_v9 }
 0x45f   :  { %v6695_v5 = vmul.f32 0.00066666666, %v2458_v15  ;;  %v11488_v15 = vld [vmem:[#allocation16_spill] sm:$0xff] }
 0x461   :  { %v6698_v27 = vsub.f32 %v2260_v43, %v6695_v5  ;;  %v6702_v10 = vsub.f32 %v11481_v37, %v6695_v5  ;;  %v6706_v48 = vsub.f32 %v11482_v40, %v6695_v5  ;;  %v6710_v24 = vsub.f32 %v11484_v41, %v6695_v5  ;;  %v11486_v43 = vld [vmem:[#allocation14_spill] sm:$0xff] }
 0x462   :  { %v6718_v4 = vsub.f32 %v11486_v43, %v6695_v5  ;;  %v6722_v30 = vsub.f32 %v11487_v17, %v6695_v5  ;;  %v6728_v37 = vsub.f32 %v11488_v15, %v6695_v5  ;;  %v6734_v43 = vsub.f32 %v6121_v62, %v6695_v5 }
 0x463   :  { %11483 = vst [vmem:[#allocation106_spill] sm:$0xff] %v6706_v48  ;;  %v2648_v7 = vmul.f32 %v6702_v10, %v6702_v10  ;;  %v2649_v33 = vmul.f32 %v6706_v48, %v6706_v48  ;;  %v2650_v9 = vmul.f32 %v6710_v24, %v6710_v24  ;;  %v6746_v15 = vsub.f32 %v6125_v18, %v6695_v5 }
 0x464   :  { %11485 = vst [vmem:[#allocation108_spill] sm:$0xff] %v6710_v24  ;;  %v2651_v40 = vmul.f32 %v6718_v4, %v6718_v4  ;;  %v2652_v17 = vmul.f32 %v6722_v30, %v6722_v30  ;;  %v6740_v24 = vsub.f32 %v6123_v1, %v6695_v5  ;;  %v2654_v62 = vmul.f32 %v6734_v43, %v6734_v43 }
 0x465   :  { %v2836_v26 = vadd.f32 %v2649_v33, %v2648_v7  ;;  %11489 = vst [vmem:[#allocation110_spill] sm:$0xff] %v6728_v37  ;;  %v2653_v7 = vmul.f32 %v6728_v37, %v6728_v37  ;;  %v2656_v18 = vmul.f32 %v6746_v15, %v6746_v15 }
 0x466   :  { %11490 = vst [vmem:[#allocation114_spill] sm:$0xff] %v6734_v43  ;;  %v2655_v1 = vmul.f32 %v6740_v24, %v6740_v24 }
 0x467   :  { %v2837_v41 = vadd.f32 %v2836_v26, %v2650_v9  ;;  %11491 = vst [vmem:[#allocation116_spill] sm:$0xff] %v6740_v24  ;;  %v6752_v26 = vsub.f32 %v6127_v21, %v6695_v5 }
 0x468   :  { %11492 = vst [vmem:[#allocation118_spill] sm:$0xff] %v6746_v15 }
 0x469   :  { %v2838_v48 = vadd.f32 %v2837_v41, %v2651_v40  ;;  %v11493_v41 = vld [vmem:[#allocation17_spill] sm:$0xff]  ;;  %v2657_v21 = vmul.f32 %v6752_v26, %v6752_v26 }
 0x46a   :  { %v6758_v37 = vsub.f32 %v11493_v41, %v6695_v5  ;;  %v11498_v41 = vld [vmem:[#allocation20_spill] sm:$0xff] }
 0x46b   :  { %v2839_v33 = vadd.f32 %v2838_v48, %v2652_v17  ;;  %v11494_v17 = vld [vmem:[#allocation18_spill] sm:$0xff]  ;;  %v6776_v15 = vsub.f32 %v11498_v41, %v6695_v5  ;;  %v11502_v41 = vld [vmem:[#allocation21_spill] sm:$0xff] }
 0x46c   :  { %v6764_v43 = vsub.f32 %v11494_v17, %v6695_v5  ;;  %v6782_v17 = vsub.f32 %v6137_v16, %v6695_v5 }
 0x46d   :  { %v2840_v9 = vadd.f32 %v2839_v33, %v2653_v7  ;;  %v11496_v33 = vld [vmem:[#allocation19_spill] sm:$0xff]  ;;  %11499 = vst [vmem:[#allocation125_spill] sm:$0xff] %v6776_v15 }
 0x46e   :  { %11495 = vst [vmem:[#allocation120_spill] sm:$0xff] %v6764_v43  ;;  %v6770_v24 = vsub.f32 %v11496_v33, %v6695_v5  ;;  %v6788_v33 = vsub.f32 %v6139_v20, %v6695_v5  ;;  %v2662_v16 = vmul.f32 %v6782_v17, %v6782_v17 }
 0x46f   :  { %v2841_v40 = vadd.f32 %v2840_v9, %v2654_v62  ;;  %v2658_v62 = vmul.f32 %v6758_v37, %v6758_v37  ;;  %11500 = vst [vmem:[#allocation11_spill] sm:$0xff] %v6782_v17 }
 0x470   :  { %11497 = vst [vmem:[#allocation122_spill] sm:$0xff] %v6770_v24  ;;  %v2663_v20 = vmul.f32 %v6788_v33, %v6788_v33 }
 0x471   :  { %v2842_v48 = vadd.f32 %v2841_v40, %v2655_v1  ;;  %v2659_v1 = vmul.f32 %v6764_v43, %v6764_v43  ;;  %11501 = vst [vmem:[#allocation12_spill] sm:$0xff] %v6788_v33  ;;  %v6794_v43 = vsub.f32 %v11502_v41, %v6695_v5  ;;  %v11508_v41 = vld [vmem:[#allocation25_spill] sm:$0xff] }
 0x472   :  { %v6812_v17 = vsub.f32 %v11508_v41, %v6695_v5  ;;  %v11514_v41 = vld [vmem:[#allocation31_spill] sm:$0xff] }
 0x473   :  { %v2843_v7 = vadd.f32 %v2842_v48, %v2656_v18  ;;  %v2660_v18 = vmul.f32 %v6770_v24, %v6770_v24  ;;  %11503 = vst [vmem:[#allocation13_spill] sm:$0xff] %v6794_v43 }
 0x474   :  { %11509 = vst [vmem:[#allocation16_spill] sm:$0xff] %v6812_v17 }
 0x475   :  { %v2844_v9 = vadd.f32 %v2843_v7, %v2657_v21  ;;  %v2661_v21 = vmul.f32 %v6776_v15, %v6776_v15 }
 0x477   :  { %v2845_v40 = vadd.f32 %v2844_v9, %v2658_v62  ;;  %v11504_v9 = vld [vmem:[#allocation22_spill] sm:$0xff] }
 0x478   :  { %v6800_v24 = vsub.f32 %v11504_v9, %v6695_v5  ;;  %v11510_v9 = vld [vmem:[#allocation27_spill] sm:$0xff] }
 0x479   :  { %v2846_v48 = vadd.f32 %v2845_v40, %v2659_v1  ;;  %v11506_v40 = vld [vmem:[#allocation23_spill] sm:$0xff]  ;;  %v6818_v33 = vsub.f32 %v11510_v9, %v6695_v5  ;;  %v11516_v9 = vld [vmem:[#allocation33_spill] sm:$0xff] }
 0x47a   :  { %11505 = vst [vmem:[#allocation14_spill] sm:$0xff] %v6800_v24  ;;  %v6806_v15 = vsub.f32 %v11506_v40, %v6695_v5  ;;  %v11512_v40 = vld [vmem:[#allocation29_spill] sm:$0xff] }
 0x47b   :  { %v2847_v7 = vadd.f32 %v2846_v48, %v2660_v18  ;;  %v2664_v18 = vmul.f32 %v6794_v43, %v6794_v43  ;;  %11511 = vst [vmem:[#allocation17_spill] sm:$0xff] %v6818_v33  ;;  %v6824_v43 = vsub.f32 %v11512_v40, %v6695_v5  ;;  %v11518_v40 = vld [vmem:[#allocation35_spill] sm:$0xff] }
 0x47c   :  { %11507 = vst [vmem:[#allocation15_spill] sm:$0xff] %v6806_v15 }
 0x47d   :  { %v2848_v62 = vadd.f32 %v2847_v7, %v2661_v21  ;;  %v2665_v21 = vmul.f32 %v6800_v24, %v6800_v24  ;;  %11513 = vst [vmem:[#allocation18_spill] sm:$0xff] %v6824_v43  ;;  %v6830_v24 = vsub.f32 %v11514_v41, %v6695_v5  ;;  %v11520_v41 = vld [vmem:[#allocation37_spill] sm:$0xff] }
 0x47f   :  { %v2849_v1 = vadd.f32 %v2848_v62, %v2662_v16  ;;  %v2666_v16 = vmul.f32 %v6806_v15, %v6806_v15  ;;  %11515 = vst [vmem:[#allocation19_spill] sm:$0xff] %v6830_v24  ;;  %v6836_v15 = vsub.f32 %v11516_v9, %v6695_v5  ;;  %v11522_v9 = vld [vmem:[#allocation39_spill] sm:$0xff] }
 0x481   :  { %v2850_v48 = vadd.f32 %v2849_v1, %v2663_v20  ;;  %v2667_v20 = vmul.f32 %v6812_v17, %v6812_v17  ;;  %11517 = vst [vmem:[#allocation20_spill] sm:$0xff] %v6836_v15  ;;  %v6842_v17 = vsub.f32 %v11518_v40, %v6695_v5  ;;  %v11524_v40 = vld [vmem:[#allocation41_spill] sm:$0xff] }
 0x483   :  { %v2851_v7 = vadd.f32 %v2850_v48, %v2664_v18  ;;  %v2668_v18 = vmul.f32 %v6818_v33, %v6818_v33  ;;  %11519 = vst [vmem:[#allocation21_spill] sm:$0xff] %v6842_v17  ;;  %v6848_v33 = vsub.f32 %v11520_v41, %v6695_v5  ;;  %v11526_v41 = vld [vmem:[#allocation43_spill] sm:$0xff] }
 0x485   :  { %v2852_v62 = vadd.f32 %v2851_v7, %v2665_v21  ;;  %v2669_v21 = vmul.f32 %v6824_v43, %v6824_v43  ;;  %11521 = vst [vmem:[#allocation22_spill] sm:$0xff] %v6848_v33  ;;  %v6854_v43 = vsub.f32 %v11522_v9, %v6695_v5  ;;  %v11528_v9 = vld [vmem:[#allocation45_spill] sm:$0xff] }
 0x487   :  { %v2853_v1 = vadd.f32 %v2852_v62, %v2666_v16  ;;  %v2670_v16 = vmul.f32 %v6830_v24, %v6830_v24  ;;  %11523 = vst [vmem:[#allocation23_spill] sm:$0xff] %v6854_v43  ;;  %v6860_v24 = vsub.f32 %v11524_v40, %v6695_v5  ;;  %v11530_v40 = vld [vmem:[#allocation47_spill] sm:$0xff] }
 0x489   :  { %v2854_v48 = vadd.f32 %v2853_v1, %v2667_v20  ;;  %v2671_v20 = vmul.f32 %v6836_v15, %v6836_v15  ;;  %11525 = vst [vmem:[#allocation25_spill] sm:$0xff] %v6860_v24  ;;  %v6866_v15 = vsub.f32 %v11526_v41, %v6695_v5  ;;  %v11532_v41 = vld [vmem:[#allocation49_spill] sm:$0xff] }
 0x48b   :  { %v2855_v7 = vadd.f32 %v2854_v48, %v2668_v18  ;;  %v2672_v18 = vmul.f32 %v6842_v17, %v6842_v17  ;;  %11527 = vst [vmem:[#allocation27_spill] sm:$0xff] %v6866_v15  ;;  %v6872_v17 = vsub.f32 %v11528_v9, %v6695_v5  ;;  %v11534_v9 = vld [vmem:[#allocation51_spill] sm:$0xff] }
 0x48d   :  { %v2856_v62 = vadd.f32 %v2855_v7, %v2669_v21  ;;  %v2673_v21 = vmul.f32 %v6848_v33, %v6848_v33  ;;  %11529 = vst [vmem:[#allocation29_spill] sm:$0xff] %v6872_v17  ;;  %v6878_v33 = vsub.f32 %v11530_v40, %v6695_v5  ;;  %v11536_v40 = vld [vmem:[#allocation53_spill] sm:$0xff] }
 0x48f   :  { %v2857_v1 = vadd.f32 %v2856_v62, %v2670_v16  ;;  %v2674_v16 = vmul.f32 %v6854_v43, %v6854_v43  ;;  %11531 = vst [vmem:[#allocation31_spill] sm:$0xff] %v6878_v33  ;;  %v6884_v43 = vsub.f32 %v11532_v41, %v6695_v5  ;;  %v11538_v41 = vld [vmem:[#allocation55_spill] sm:$0xff] }
 0x491   :  { %v2858_v48 = vadd.f32 %v2857_v1, %v2671_v20  ;;  %v2675_v20 = vmul.f32 %v6860_v24, %v6860_v24  ;;  %11533 = vst [vmem:[#allocation33_spill] sm:$0xff] %v6884_v43  ;;  %v6890_v24 = vsub.f32 %v11534_v9, %v6695_v5  ;;  %v11540_v9 = vld [vmem:[#allocation57_spill] sm:$0xff] }
 0x493   :  { %v2859_v7 = vadd.f32 %v2858_v48, %v2672_v18  ;;  %v2676_v18 = vmul.f32 %v6866_v15, %v6866_v15  ;;  %11535 = vst [vmem:[#allocation35_spill] sm:$0xff] %v6890_v24  ;;  %v6896_v15 = vsub.f32 %v11536_v40, %v6695_v5  ;;  %v11542_v40 = vld [vmem:[#allocation59_spill] sm:$0xff] }
 0x495   :  { %v2860_v62 = vadd.f32 %v2859_v7, %v2673_v21  ;;  %v2677_v21 = vmul.f32 %v6872_v17, %v6872_v17  ;;  %11537 = vst [vmem:[#allocation37_spill] sm:$0xff] %v6896_v15  ;;  %v6902_v17 = vsub.f32 %v11538_v41, %v6695_v5  ;;  %v11544_v41 = vld [vmem:[#allocation61_spill] sm:$0xff] }
 0x497   :  { %v2861_v1 = vadd.f32 %v2860_v62, %v2674_v16  ;;  %v2678_v16 = vmul.f32 %v6878_v33, %v6878_v33  ;;  %11539 = vst [vmem:[#allocation39_spill] sm:$0xff] %v6902_v17  ;;  %v6908_v33 = vsub.f32 %v11540_v9, %v6695_v5  ;;  %v11546_v9 = vld [vmem:[#allocation63_spill] sm:$0xff] }
 0x499   :  { %v2862_v48 = vadd.f32 %v2861_v1, %v2675_v20  ;;  %v2679_v20 = vmul.f32 %v6884_v43, %v6884_v43  ;;  %11541 = vst [vmem:[#allocation41_spill] sm:$0xff] %v6908_v33  ;;  %v6914_v43 = vsub.f32 %v11542_v40, %v6695_v5  ;;  %v11548_v40 = vld [vmem:[#allocation65_spill] sm:$0xff] }
 0x49b   :  { %v2863_v7 = vadd.f32 %v2862_v48, %v2676_v18  ;;  %v2680_v18 = vmul.f32 %v6890_v24, %v6890_v24  ;;  %11543 = vst [vmem:[#allocation43_spill] sm:$0xff] %v6914_v43  ;;  %v6920_v24 = vsub.f32 %v11544_v41, %v6695_v5  ;;  %v11550_v41 = vld [vmem:[#allocation67_spill] sm:$0xff] }
 0x49d   :  { %v2864_v62 = vadd.f32 %v2863_v7, %v2677_v21  ;;  %v2681_v21 = vmul.f32 %v6896_v15, %v6896_v15  ;;  %11545 = vst [vmem:[#allocation45_spill] sm:$0xff] %v6920_v24  ;;  %v6926_v15 = vsub.f32 %v11546_v9, %v6695_v5  ;;  %v11552_v9 = vld [vmem:[#allocation69_spill] sm:$0xff] }
 0x49f   :  { %v2865_v1 = vadd.f32 %v2864_v62, %v2678_v16  ;;  %v2682_v16 = vmul.f32 %v6902_v17, %v6902_v17  ;;  %11547 = vst [vmem:[#allocation47_spill] sm:$0xff] %v6926_v15  ;;  %v6932_v17 = vsub.f32 %v11548_v40, %v6695_v5  ;;  %v11554_v40 = vld [vmem:[#allocation71_spill] sm:$0xff] }
 0x4a1   :  { %v2866_v48 = vadd.f32 %v2865_v1, %v2679_v20  ;;  %v2683_v20 = vmul.f32 %v6908_v33, %v6908_v33  ;;  %11549 = vst [vmem:[#allocation49_spill] sm:$0xff] %v6932_v17  ;;  %v6938_v33 = vsub.f32 %v11550_v41, %v6695_v5  ;;  %v11556_v41 = vld [vmem:[#allocation73_spill] sm:$0xff] }
 0x4a3   :  { %v2867_v7 = vadd.f32 %v2866_v48, %v2680_v18  ;;  %v2684_v18 = vmul.f32 %v6914_v43, %v6914_v43  ;;  %11551 = vst [vmem:[#allocation51_spill] sm:$0xff] %v6938_v33  ;;  %v6944_v43 = vsub.f32 %v11552_v9, %v6695_v5  ;;  %v11558_v9 = vld [vmem:[#allocation75_spill] sm:$0xff] }
 0x4a5   :  { %v2868_v62 = vadd.f32 %v2867_v7, %v2681_v21  ;;  %v2685_v21 = vmul.f32 %v6920_v24, %v6920_v24  ;;  %11553 = vst [vmem:[#allocation53_spill] sm:$0xff] %v6944_v43  ;;  %v6950_v24 = vsub.f32 %v11554_v40, %v6695_v5  ;;  %v11560_v40 = vld [vmem:[#allocation77_spill] sm:$0xff] }
 0x4a7   :  { %v2869_v1 = vadd.f32 %v2868_v62, %v2682_v16  ;;  %v2686_v16 = vmul.f32 %v6926_v15, %v6926_v15  ;;  %11555 = vst [vmem:[#allocation55_spill] sm:$0xff] %v6950_v24  ;;  %v6956_v15 = vsub.f32 %v11556_v41, %v6695_v5  ;;  %v11562_v41 = vld [vmem:[#allocation79_spill] sm:$0xff] }
 0x4a9   :  { %v2870_v48 = vadd.f32 %v2869_v1, %v2683_v20  ;;  %v2687_v20 = vmul.f32 %v6932_v17, %v6932_v17  ;;  %11557 = vst [vmem:[#allocation57_spill] sm:$0xff] %v6956_v15  ;;  %v6962_v17 = vsub.f32 %v11558_v9, %v6695_v5  ;;  %v11564_v9 = vld [vmem:[#allocation81_spill] sm:$0xff] }
 0x4ab   :  { %v2871_v7 = vadd.f32 %v2870_v48, %v2684_v18  ;;  %v2688_v18 = vmul.f32 %v6938_v33, %v6938_v33  ;;  %11559 = vst [vmem:[#allocation59_spill] sm:$0xff] %v6962_v17  ;;  %v6968_v33 = vsub.f32 %v11560_v40, %v6695_v5  ;;  %v11566_v40 = vld [vmem:[#allocation83_spill] sm:$0xff] }
 0x4ad   :  { %v2872_v62 = vadd.f32 %v2871_v7, %v2685_v21  ;;  %v2689_v21 = vmul.f32 %v6944_v43, %v6944_v43  ;;  %11561 = vst [vmem:[#allocation61_spill] sm:$0xff] %v6968_v33  ;;  %v6974_v43 = vsub.f32 %v11562_v41, %v6695_v5  ;;  %v11568_v41 = vld [vmem:[#allocation85_spill] sm:$0xff] }
 0x4af   :  { %v2873_v1 = vadd.f32 %v2872_v62, %v2686_v16  ;;  %v2690_v16 = vmul.f32 %v6950_v24, %v6950_v24  ;;  %11563 = vst [vmem:[#allocation63_spill] sm:$0xff] %v6974_v43  ;;  %v6980_v24 = vsub.f32 %v11564_v9, %v6695_v5  ;;  %v11570_v9 = vld [vmem:[#allocation87_spill] sm:$0xff] }
 0x4b1   :  { %v2874_v48 = vadd.f32 %v2873_v1, %v2687_v20  ;;  %v2691_v20 = vmul.f32 %v6956_v15, %v6956_v15  ;;  %11565 = vst [vmem:[#allocation65_spill] sm:$0xff] %v6980_v24  ;;  %v6986_v15 = vsub.f32 %v11566_v40, %v6695_v5  ;;  %v11572_v40 = vld [vmem:[#allocation89_spill] sm:$0xff] }
 0x4b3   :  { %v2875_v7 = vadd.f32 %v2874_v48, %v2688_v18  ;;  %v2692_v18 = vmul.f32 %v6962_v17, %v6962_v17  ;;  %11567 = vst [vmem:[#allocation67_spill] sm:$0xff] %v6986_v15  ;;  %v6992_v17 = vsub.f32 %v11568_v41, %v6695_v5  ;;  %v11574_v41 = vld [vmem:[#allocation91_spill] sm:$0xff] }
 0x4b5   :  { %v2876_v62 = vadd.f32 %v2875_v7, %v2689_v21  ;;  %v2693_v21 = vmul.f32 %v6968_v33, %v6968_v33  ;;  %11569 = vst [vmem:[#allocation69_spill] sm:$0xff] %v6992_v17  ;;  %v6998_v33 = vsub.f32 %v11570_v9, %v6695_v5  ;;  %v11576_v9 = vld [vmem:[#allocation93_spill] sm:$0xff] }
 0x4b7   :  { %v2877_v1 = vadd.f32 %v2876_v62, %v2690_v16  ;;  %v2694_v16 = vmul.f32 %v6974_v43, %v6974_v43  ;;  %11571 = vst [vmem:[#allocation71_spill] sm:$0xff] %v6998_v33  ;;  %v7004_v43 = vsub.f32 %v11572_v40, %v6695_v5  ;;  %v11578_v40 = vld [vmem:[#allocation95_spill] sm:$0xff] }
 0x4b9   :  { %v2878_v48 = vadd.f32 %v2877_v1, %v2691_v20  ;;  %v2695_v20 = vmul.f32 %v6980_v24, %v6980_v24  ;;  %11573 = vst [vmem:[#allocation73_spill] sm:$0xff] %v7004_v43  ;;  %v7010_v24 = vsub.f32 %v11574_v41, %v6695_v5  ;;  %v11580_v41 = vld [vmem:[#allocation97_spill] sm:$0xff] }
 0x4bb   :  { %v2879_v7 = vadd.f32 %v2878_v48, %v2692_v18  ;;  %v2696_v18 = vmul.f32 %v6986_v15, %v6986_v15  ;;  %11575 = vst [vmem:[#allocation75_spill] sm:$0xff] %v7010_v24  ;;  %v7016_v15 = vsub.f32 %v11576_v9, %v6695_v5  ;;  %v11582_v9 = vld [vmem:[#allocation99_spill] sm:$0xff] }
 0x4bd   :  { %v2880_v62 = vadd.f32 %v2879_v7, %v2693_v21  ;;  %v2697_v21 = vmul.f32 %v6992_v17, %v6992_v17  ;;  %11577 = vst [vmem:[#allocation77_spill] sm:$0xff] %v7016_v15  ;;  %v7022_v17 = vsub.f32 %v11578_v40, %v6695_v5  ;;  %v11584_v40 = vld [vmem:[#allocation101_spill] sm:$0xff] }
 0x4bf   :  { %v2881_v1 = vadd.f32 %v2880_v62, %v2694_v16  ;;  %v2698_v16 = vmul.f32 %v6998_v33, %v6998_v33  ;;  %11579 = vst [vmem:[#allocation79_spill] sm:$0xff] %v7022_v17  ;;  %v7028_v33 = vsub.f32 %v11580_v41, %v6695_v5  ;;  %v11586_v41 = vld [vmem:[#allocation103_spill] sm:$0xff] }
 0x4c1   :  { %v2882_v48 = vadd.f32 %v2881_v1, %v2695_v20  ;;  %v2699_v20 = vmul.f32 %v7004_v43, %v7004_v43  ;;  %11581 = vst [vmem:[#allocation81_spill] sm:$0xff] %v7028_v33  ;;  %v7034_v43 = vsub.f32 %v11582_v9, %v6695_v5  ;;  %v11588_v9 = vld [vmem:[#allocation105_spill] sm:$0xff] }
 0x4c3   :  { %v2883_v7 = vadd.f32 %v2882_v48, %v2696_v18  ;;  %v2700_v18 = vmul.f32 %v7010_v24, %v7010_v24  ;;  %11583 = vst [vmem:[#allocation83_spill] sm:$0xff] %v7034_v43  ;;  %v7040_v24 = vsub.f32 %v11584_v40, %v6695_v5  ;;  %v11590_v40 = vld [vmem:[#allocation107_spill] sm:$0xff] }
 0x4c5   :  { %v2884_v62 = vadd.f32 %v2883_v7, %v2697_v21  ;;  %v2701_v21 = vmul.f32 %v7016_v15, %v7016_v15  ;;  %11585 = vst [vmem:[#allocation85_spill] sm:$0xff] %v7040_v24  ;;  %v7046_v15 = vsub.f32 %v11586_v41, %v6695_v5  ;;  %v11592_v41 = vld [vmem:[#allocation109_spill] sm:$0xff] }
 0x4c7   :  { %v2885_v1 = vadd.f32 %v2884_v62, %v2698_v16  ;;  %v2702_v16 = vmul.f32 %v7022_v17, %v7022_v17  ;;  %11587 = vst [vmem:[#allocation87_spill] sm:$0xff] %v7046_v15  ;;  %v7052_v17 = vsub.f32 %v11588_v9, %v6695_v5  ;;  %v11594_v9 = vld [vmem:[#allocation111_spill] sm:$0xff] }
 0x4c9   :  { %v2886_v48 = vadd.f32 %v2885_v1, %v2699_v20  ;;  %v2703_v20 = vmul.f32 %v7028_v33, %v7028_v33  ;;  %11589 = vst [vmem:[#allocation89_spill] sm:$0xff] %v7052_v17  ;;  %v7058_v33 = vsub.f32 %v11590_v40, %v6695_v5  ;;  %v11596_v40 = vld [vmem:[#allocation113_spill] sm:$0xff] }
 0x4cb   :  { %v2887_v7 = vadd.f32 %v2886_v48, %v2700_v18  ;;  %v2704_v18 = vmul.f32 %v7034_v43, %v7034_v43  ;;  %11591 = vst [vmem:[#allocation91_spill] sm:$0xff] %v7058_v33  ;;  %v7064_v43 = vsub.f32 %v11592_v41, %v6695_v5  ;;  %v11597_v41 = vld [vmem:[#allocation115_spill] sm:$0xff] }
 0x4cd   :  { %v2888_v62 = vadd.f32 %v2887_v7, %v2701_v21  ;;  %v2705_v21 = vmul.f32 %v7040_v24, %v7040_v24  ;;  %11593 = vst [vmem:[#allocation93_spill] sm:$0xff] %v7064_v43  ;;  %v7070_v24 = vsub.f32 %v11594_v9, %v6695_v5  ;;  %v11599_v9 = vld [vmem:[#allocation117_spill] sm:$0xff] }
 0x4cf   :  { %v2889_v1 = vadd.f32 %v2888_v62, %v2702_v16  ;;  %v2706_v16 = vmul.f32 %v7046_v15, %v7046_v15  ;;  %11595 = vst [vmem:[#allocation95_spill] sm:$0xff] %v7070_v24  ;;  %v7076_v15 = vsub.f32 %v11596_v40, %v6695_v5  ;;  %v11601_v40 = vld [vmem:[#allocation119_spill] sm:$0xff] }
 0x4d1   :  { %v2890_v48 = vadd.f32 %v2889_v1, %v2703_v20  ;;  %v2707_v20 = vmul.f32 %v7052_v17, %v7052_v17  ;;  %v7082_v17 = vsub.f32 %v11597_v41, %v6695_v5  ;;  %v11602_v41 = vld [vmem:[#allocation121_spill] sm:$0xff] }
 0x4d3   :  { %v2891_v7 = vadd.f32 %v2890_v48, %v2704_v18  ;;  %v2708_v18 = vmul.f32 %v7058_v33, %v7058_v33  ;;  %11598 = vst [vmem:[#allocation97_spill] sm:$0xff] %v7082_v17  ;;  %v7088_v33 = vsub.f32 %v11599_v9, %v6695_v5  ;;  %v7106_v9 = vsub.f32 %v6345_v3, %v6695_v5 }
 0x4d5   :  { %v2892_v62 = vadd.f32 %v2891_v7, %v2705_v21  ;;  %v2709_v21 = vmul.f32 %v7064_v43, %v7064_v43  ;;  %11600 = vst [vmem:[#allocation99_spill] sm:$0xff] %v7088_v33  ;;  %v7094_v43 = vsub.f32 %v11601_v40, %v6695_v5  ;;  %v11605_v40 = vld [vmem:[#allocation124_spill] sm:$0xff]  ;;  %v2716_v3 = vmul.f32 %v7106_v9, %v7106_v9 }
 0x4d6   :  { %11604 = vst [vmem:[#allocation103_spill] sm:$0xff] %v7106_v9 }
 0x4d7   :  { %v2893_v1 = vadd.f32 %v2892_v62, %v2706_v16  ;;  %v2710_v16 = vmul.f32 %v7070_v24, %v7070_v24  ;;  %v7100_v24 = vsub.f32 %v11602_v41, %v6695_v5  ;;  %v11607_v41 = vld [vmem:[#allocation126_spill] sm:$0xff] }
 0x4d9   :  { %v2894_v48 = vadd.f32 %v2893_v1, %v2707_v20  ;;  %v2711_v20 = vmul.f32 %v7076_v15, %v7076_v15  ;;  %11603 = vst [vmem:[#allocation101_spill] sm:$0xff] %v7100_v24 }
 0x4db   :  { %v2895_v7 = vadd.f32 %v2894_v48, %v2708_v18  ;;  %v2712_v18 = vmul.f32 %v7082_v17, %v7082_v17  ;;  %v7112_v17 = vsub.f32 %v11605_v40, %v6695_v5  ;;  %v11609_v40 = vld [vmem:[#allocation127_spill] sm:$0xff] }
 0x4dd   :  { %v2896_v62 = vadd.f32 %v2895_v7, %v2709_v21  ;;  %v2713_v21 = vmul.f32 %v7088_v33, %v7088_v33  ;;  %11606 = vst [vmem:[#allocation105_spill] sm:$0xff] %v7112_v17  ;;  %v7118_v33 = vsub.f32 %v11607_v41, %v6695_v5  ;;  %v11610_v41 = vld [vmem:[#allocation129_spill] sm:$0xff] }
 0x4de   :  { %v7136_v9 = vsub.f32 %v11610_v41, %v6695_v5  ;;  %v7154_v41 = vsub.f32 %v6402_v63, %v6695_v5 }
 0x4df   :  { %v2897_v1 = vadd.f32 %v2896_v62, %v2710_v16  ;;  %v2714_v16 = vmul.f32 %v7094_v43, %v7094_v43  ;;  %11608 = vst [vmem:[#allocation107_spill] sm:$0xff] %v7118_v33 }
 0x4e0   :  { %11615 = vst [vmem:[#allocation113_spill] sm:$0xff] %v7154_v41  ;;  %v2724_v63 = vmul.f32 %v7154_v41, %v7154_v41 }
 0x4e1   :  { %v2898_v48 = vadd.f32 %v2897_v1, %v2711_v20  ;;  %v2715_v20 = vmul.f32 %v7100_v24, %v7100_v24  ;;  %v7130_v24 = vsub.f32 %v11609_v40, %v6695_v5  ;;  %v11613_v40 = vld [vmem:[#allocation132_spill] sm:$0xff] }
 0x4e3   :  { %v2899_v7 = vadd.f32 %v2898_v48, %v2712_v18  ;;  %v7124_v48 = vsub.f32 %v6362_v55, %v6695_v5 }
 0x4e5   :  { %v2900_v62 = vadd.f32 %v2899_v7, %v2713_v21  ;;  %v2717_v21 = vmul.f32 %v7112_v17, %v7112_v17  ;;  %v2719_v55 = vmul.f32 %v7124_v48, %v7124_v48 }
 0x4e7   :  { %v2901_v1 = vadd.f32 %v2900_v62, %v2714_v16  ;;  %v2718_v16 = vmul.f32 %v7118_v33, %v7118_v33  ;;  %v7148_v33 = vsub.f32 %v11613_v40, %v6695_v5  ;;  %v7166_v40 = vsub.f32 %v6418_v49, %v6695_v5 }
 0x4e9   :  { %v2902_v18 = vadd.f32 %v2901_v1, %v2715_v20  ;;  %v11611_v1 = vld [vmem:[#allocation131_spill] sm:$0xff]  ;;  %11614 = vst [vmem:[#allocation111_spill] sm:$0xff] %v7148_v33  ;;  %v2726_v49 = vmul.f32 %v7166_v40, %v7166_v40 }
 0x4ea   :  { %v7142_v17 = vsub.f32 %v11611_v1, %v6695_v5  ;;  %v7160_v1 = vsub.f32 %v6410_v44, %v6695_v5  ;;  %11617 = vst [vmem:[#allocation117_spill] sm:$0xff] %v7166_v40 }
 0x4eb   :  { %v2903_v7 = vadd.f32 %v2902_v18, %v2716_v3  ;;  %v2720_v3 = vmul.f32 %v7130_v24, %v7130_v24 }
 0x4ec   :  { %11612 = vst [vmem:[#allocation109_spill] sm:$0xff] %v7142_v17  ;;  %v2725_v44 = vmul.f32 %v7160_v1, %v7160_v1 }
 0x4ed   :  { %v2904_v62 = vadd.f32 %v2903_v7, %v2717_v21  ;;  %v2721_v21 = vmul.f32 %v7136_v9, %v7136_v9  ;;  %11616 = vst [vmem:[#allocation115_spill] sm:$0xff] %v7160_v1 }
 0x4ef   :  { %v2905_v20 = vadd.f32 %v2904_v62, %v2718_v16  ;;  %v2722_v16 = vmul.f32 %v7142_v17, %v7142_v17 }
 0x4f1   :  { %v2906_v18 = vadd.f32 %v2905_v20, %v2719_v55  ;;  %v2723_v55 = vmul.f32 %v7148_v33, %v7148_v33 }
 0x4f3   :  { %v2907_v7 = vadd.f32 %v2906_v18, %v2720_v3  ;;  %v11618_v18 = vld [vmem:[#allocation135_spill] sm:$0xff] }
 0x4f4   :  { %v7172_v17 = vsub.f32 %v11618_v18, %v6695_v5  ;;  %v11624_v18 = vld [vmem:[#allocation138_spill] sm:$0xff] }
 0x4f5   :  { %v2908_v62 = vadd.f32 %v2907_v7, %v2721_v21  ;;  %v11620_v7 = vld [vmem:[#allocation136_spill] sm:$0xff]  ;;  %v7190_v1 = vsub.f32 %v11624_v18, %v6695_v5  ;;  %v11630_v18 = vld [vmem:[#allocation145_spill] sm:$0xff] }
 0x4f6   :  { %11619 = vst [vmem:[#allocation119_spill] sm:$0xff] %v7172_v17  ;;  %v7178_v33 = vsub.f32 %v11620_v7, %v6695_v5  ;;  %v11626_v7 = vld [vmem:[#allocation143_spill] sm:$0xff] }
 0x4f7   :  { %v2909_v20 = vadd.f32 %v2908_v62, %v2722_v16  ;;  %v11622_v62 = vld [vmem:[#allocation137_spill] sm:$0xff]  ;;  %11625 = vst [vmem:[#allocation126_spill] sm:$0xff] %v7190_v1  ;;  %v7196_v40 = vsub.f32 %v11626_v7, %v6695_v5  ;;  %v11632_v7 = vld [vmem:[#allocation146_spill] sm:$0xff] }
 0x4f8   :  { %11621 = vst [vmem:[#allocation121_spill] sm:$0xff] %v7178_v33  ;;  %v7184_v41 = vsub.f32 %v11622_v62, %v6695_v5  ;;  %v11628_v62 = vld [vmem:[#allocation144_spill] sm:$0xff] }
 0x4f9   :  { %v2910_v3 = vadd.f32 %v2909_v20, %v2723_v55  ;;  %v2727_v55 = vmul.f32 %v7172_v17, %v7172_v17  ;;  %11627 = vst [vmem:[#allocation127_spill] sm:$0xff] %v7196_v40  ;;  %v7202_v17 = vsub.f32 %v11628_v62, %v6695_v5  ;;  %v11634_v62 = vld [vmem:[#allocation147_spill] sm:$0xff] }
 0x4fa   :  { %11623 = vst [vmem:[#allocation124_spill] sm:$0xff] %v7184_v41 }
 0x4fb   :  { %v2911_v21 = vadd.f32 %v2910_v3, %v2724_v63  ;;  %v2728_v63 = vmul.f32 %v7178_v33, %v7178_v33  ;;  %11629 = vst [vmem:[#allocation129_spill] sm:$0xff] %v7202_v17  ;;  %v7208_v33 = vsub.f32 %v11630_v18, %v6695_v5  ;;  %v11636_v18 = vld [vmem:[#allocation149_spill] sm:$0xff] }
 0x4fd   :  { %v2912_v16 = vadd.f32 %v2911_v21, %v2725_v44  ;;  %v2729_v44 = vmul.f32 %v7184_v41, %v7184_v41  ;;  %11631 = vst [vmem:[#allocation131_spill] sm:$0xff] %v7208_v33  ;;  %v7214_v41 = vsub.f32 %v11632_v7, %v6695_v5  ;;  %v11638_v7 = vld [vmem:[#allocation151_spill] sm:$0xff] }
 0x4ff   :  { %v2913_v20 = vadd.f32 %v2912_v16, %v2726_v49  ;;  %v2730_v49 = vmul.f32 %v7190_v1, %v7190_v1  ;;  %11633 = vst [vmem:[#allocation132_spill] sm:$0xff] %v7214_v41  ;;  %v7220_v1 = vsub.f32 %v11634_v62, %v6695_v5  ;;  %v11640_v62 = vld [vmem:[#allocation152_spill] sm:$0xff] }
 0x501   :  { %v2914_v3 = vadd.f32 %v2913_v20, %v2727_v55  ;;  %v2731_v55 = vmul.f32 %v7196_v40, %v7196_v40  ;;  %11635 = vst [vmem:[#allocation135_spill] sm:$0xff] %v7220_v1  ;;  %v7226_v40 = vsub.f32 %v11636_v18, %v6695_v5  ;;  %v11642_v18 = vld [vmem:[#allocation153_spill] sm:$0xff] }
 0x503   :  { %v2915_v21 = vadd.f32 %v2914_v3, %v2728_v63  ;;  %v2732_v63 = vmul.f32 %v7202_v17, %v7202_v17  ;;  %11637 = vst [vmem:[#allocation136_spill] sm:$0xff] %v7226_v40  ;;  %v7232_v17 = vsub.f32 %v11638_v7, %v6695_v5  ;;  %v11644_v7 = vld [vmem:[#allocation154_spill] sm:$0xff] }
 0x505   :  { %v2916_v16 = vadd.f32 %v2915_v21, %v2729_v44  ;;  %v2733_v44 = vmul.f32 %v7208_v33, %v7208_v33  ;;  %11639 = vst [vmem:[#allocation137_spill] sm:$0xff] %v7232_v17  ;;  %v7238_v33 = vsub.f32 %v11640_v62, %v6695_v5  ;;  %v11646_v62 = vld [vmem:[#allocation155_spill] sm:$0xff] }
 0x507   :  { %v2917_v20 = vadd.f32 %v2916_v16, %v2730_v49  ;;  %v2734_v49 = vmul.f32 %v7214_v41, %v7214_v41  ;;  %11641 = vst [vmem:[#allocation138_spill] sm:$0xff] %v7238_v33  ;;  %v7244_v41 = vsub.f32 %v11642_v18, %v6695_v5  ;;  %v11648_v18 = vld [vmem:[#allocation24_spill] sm:$0xff] }
 0x509   :  { %v2918_v3 = vadd.f32 %v2917_v20, %v2731_v55  ;;  %v2735_v55 = vmul.f32 %v7220_v1, %v7220_v1  ;;  %11643 = vst [vmem:[#allocation143_spill] sm:$0xff] %v7244_v41  ;;  %v7250_v1 = vsub.f32 %v11644_v7, %v6695_v5  ;;  %v11650_v7 = vld [vmem:[#allocation26_spill] sm:$0xff] }
 0x50b   :  { %v2919_v21 = vadd.f32 %v2918_v3, %v2732_v63  ;;  %v2736_v63 = vmul.f32 %v7226_v40, %v7226_v40  ;;  %11645 = vst [vmem:[#allocation144_spill] sm:$0xff] %v7250_v1  ;;  %v7256_v40 = vsub.f32 %v11646_v62, %v6695_v5  ;;  %v11652_v62 = vld [vmem:[#allocation28_spill] sm:$0xff] }
 0x50d   :  { %v2920_v16 = vadd.f32 %v2919_v21, %v2733_v44  ;;  %v2737_v44 = vmul.f32 %v7232_v17, %v7232_v17  ;;  %11647 = vst [vmem:[#allocation145_spill] sm:$0xff] %v7256_v40  ;;  %v7262_v17 = vsub.f32 %v11648_v18, %v6695_v5  ;;  %v11654_v18 = vld [vmem:[#allocation30_spill] sm:$0xff] }
 0x50f   :  { %v2921_v20 = vadd.f32 %v2920_v16, %v2734_v49  ;;  %v2738_v49 = vmul.f32 %v7238_v33, %v7238_v33  ;;  %11649 = vst [vmem:[#allocation146_spill] sm:$0xff] %v7262_v17  ;;  %v7268_v33 = vsub.f32 %v11650_v7, %v6695_v5  ;;  %v11656_v7 = vld [vmem:[#allocation32_spill] sm:$0xff] }
 0x511   :  { %v2922_v3 = vadd.f32 %v2921_v20, %v2735_v55  ;;  %v2739_v55 = vmul.f32 %v7244_v41, %v7244_v41  ;;  %11651 = vst [vmem:[#allocation147_spill] sm:$0xff] %v7268_v33  ;;  %v7274_v41 = vsub.f32 %v11652_v62, %v6695_v5  ;;  %v11658_v62 = vld [vmem:[#allocation34_spill] sm:$0xff] }
 0x513   :  { %v2923_v21 = vadd.f32 %v2922_v3, %v2736_v63  ;;  %v2740_v63 = vmul.f32 %v7250_v1, %v7250_v1  ;;  %11653 = vst [vmem:[#allocation149_spill] sm:$0xff] %v7274_v41  ;;  %v7280_v1 = vsub.f32 %v11654_v18, %v6695_v5  ;;  %v11660_v18 = vld [vmem:[#allocation36_spill] sm:$0xff] }
 0x515   :  { %v2924_v16 = vadd.f32 %v2923_v21, %v2737_v44  ;;  %v2741_v44 = vmul.f32 %v7256_v40, %v7256_v40  ;;  %11655 = vst [vmem:[#allocation151_spill] sm:$0xff] %v7280_v1  ;;  %v7286_v40 = vsub.f32 %v11656_v7, %v6695_v5  ;;  %v11662_v7 = vld [vmem:[#allocation38_spill] sm:$0xff] }
 0x517   :  { %v2925_v20 = vadd.f32 %v2924_v16, %v2738_v49  ;;  %v2742_v49 = vmul.f32 %v7262_v17, %v7262_v17  ;;  %11657 = vst [vmem:[#allocation152_spill] sm:$0xff] %v7286_v40  ;;  %v7292_v17 = vsub.f32 %v11658_v62, %v6695_v5  ;;  %v11664_v62 = vld [vmem:[#allocation40_spill] sm:$0xff] }
 0x519   :  { %v2926_v3 = vadd.f32 %v2925_v20, %v2739_v55  ;;  %v2743_v55 = vmul.f32 %v7268_v33, %v7268_v33  ;;  %11659 = vst [vmem:[#allocation153_spill] sm:$0xff] %v7292_v17  ;;  %v7298_v33 = vsub.f32 %v11660_v18, %v6695_v5  ;;  %v11666_v18 = vld [vmem:[#allocation42_spill] sm:$0xff] }
 0x51b   :  { %v2927_v21 = vadd.f32 %v2926_v3, %v2740_v63  ;;  %v2744_v63 = vmul.f32 %v7274_v41, %v7274_v41  ;;  %11661 = vst [vmem:[#allocation154_spill] sm:$0xff] %v7298_v33  ;;  %v7304_v41 = vsub.f32 %v11662_v7, %v6695_v5  ;;  %v11668_v7 = vld [vmem:[#allocation44_spill] sm:$0xff] }
 0x51d   :  { %v2928_v16 = vadd.f32 %v2927_v21, %v2741_v44  ;;  %v2745_v44 = vmul.f32 %v7280_v1, %v7280_v1  ;;  %11663 = vst [vmem:[#allocation155_spill] sm:$0xff] %v7304_v41  ;;  %v7310_v1 = vsub.f32 %v11664_v62, %v6695_v5  ;;  %v11670_v62 = vld [vmem:[#allocation46_spill] sm:$0xff] }
 0x51f   :  { %v2929_v20 = vadd.f32 %v2928_v16, %v2742_v49  ;;  %v2746_v49 = vmul.f32 %v7286_v40, %v7286_v40  ;;  %11665 = vst [vmem:[#allocation24_spill] sm:$0xff] %v7310_v1  ;;  %v7316_v40 = vsub.f32 %v11666_v18, %v6695_v5  ;;  %v11672_v18 = vld [vmem:[#allocation48_spill] sm:$0xff] }
 0x521   :  { %v2930_v3 = vadd.f32 %v2929_v20, %v2743_v55  ;;  %v2747_v55 = vmul.f32 %v7292_v17, %v7292_v17  ;;  %11667 = vst [vmem:[#allocation26_spill] sm:$0xff] %v7316_v40  ;;  %v7322_v17 = vsub.f32 %v11668_v7, %v6695_v5  ;;  %v11674_v7 = vld [vmem:[#allocation50_spill] sm:$0xff] }
 0x523   :  { %v2931_v21 = vadd.f32 %v2930_v3, %v2744_v63  ;;  %v2748_v63 = vmul.f32 %v7298_v33, %v7298_v33  ;;  %11669 = vst [vmem:[#allocation28_spill] sm:$0xff] %v7322_v17  ;;  %v7328_v33 = vsub.f32 %v11670_v62, %v6695_v5  ;;  %v11676_v62 = vld [vmem:[#allocation52_spill] sm:$0xff] }
 0x525   :  { %v2932_v16 = vadd.f32 %v2931_v21, %v2745_v44  ;;  %v2749_v44 = vmul.f32 %v7304_v41, %v7304_v41  ;;  %11671 = vst [vmem:[#allocation30_spill] sm:$0xff] %v7328_v33  ;;  %v7334_v41 = vsub.f32 %v11672_v18, %v6695_v5  ;;  %v11678_v18 = vld [vmem:[#allocation54_spill] sm:$0xff] }
 0x527   :  { %v2933_v20 = vadd.f32 %v2932_v16, %v2746_v49  ;;  %v2750_v49 = vmul.f32 %v7310_v1, %v7310_v1  ;;  %11673 = vst [vmem:[#allocation32_spill] sm:$0xff] %v7334_v41  ;;  %v7340_v1 = vsub.f32 %v11674_v7, %v6695_v5  ;;  %v11680_v7 = vld [vmem:[#allocation56_spill] sm:$0xff] }
 0x529   :  { %v2934_v3 = vadd.f32 %v2933_v20, %v2747_v55  ;;  %v2751_v55 = vmul.f32 %v7316_v40, %v7316_v40  ;;  %11675 = vst [vmem:[#allocation34_spill] sm:$0xff] %v7340_v1  ;;  %v7346_v40 = vsub.f32 %v11676_v62, %v6695_v5  ;;  %v11682_v62 = vld [vmem:[#allocation58_spill] sm:$0xff] }
 0x52b   :  { %v2935_v21 = vadd.f32 %v2934_v3, %v2748_v63  ;;  %v2752_v63 = vmul.f32 %v7322_v17, %v7322_v17  ;;  %11677 = vst [vmem:[#allocation36_spill] sm:$0xff] %v7346_v40  ;;  %v7352_v17 = vsub.f32 %v11678_v18, %v6695_v5  ;;  %v11684_v18 = vld [vmem:[#allocation60_spill] sm:$0xff] }
 0x52d   :  { %v2936_v16 = vadd.f32 %v2935_v21, %v2749_v44  ;;  %v2753_v44 = vmul.f32 %v7328_v33, %v7328_v33  ;;  %11679 = vst [vmem:[#allocation38_spill] sm:$0xff] %v7352_v17  ;;  %v7358_v33 = vsub.f32 %v11680_v7, %v6695_v5  ;;  %v11686_v7 = vld [vmem:[#allocation62_spill] sm:$0xff] }
 0x52f   :  { %v2937_v20 = vadd.f32 %v2936_v16, %v2750_v49  ;;  %v2754_v49 = vmul.f32 %v7334_v41, %v7334_v41  ;;  %11681 = vst [vmem:[#allocation40_spill] sm:$0xff] %v7358_v33  ;;  %v7364_v41 = vsub.f32 %v11682_v62, %v6695_v5  ;;  %v11688_v62 = vld [vmem:[#allocation64_spill] sm:$0xff] }
 0x531   :  { %v2938_v3 = vadd.f32 %v2937_v20, %v2751_v55  ;;  %v2755_v55 = vmul.f32 %v7340_v1, %v7340_v1  ;;  %11683 = vst [vmem:[#allocation42_spill] sm:$0xff] %v7364_v41  ;;  %v7370_v1 = vsub.f32 %v11684_v18, %v6695_v5  ;;  %v11690_v18 = vld [vmem:[#allocation66_spill] sm:$0xff] }
 0x533   :  { %v2939_v21 = vadd.f32 %v2938_v3, %v2752_v63  ;;  %v2756_v63 = vmul.f32 %v7346_v40, %v7346_v40  ;;  %11685 = vst [vmem:[#allocation44_spill] sm:$0xff] %v7370_v1  ;;  %v7376_v40 = vsub.f32 %v11686_v7, %v6695_v5  ;;  %v11692_v7 = vld [vmem:[#allocation68_spill] sm:$0xff] }
 0x535   :  { %v2940_v16 = vadd.f32 %v2939_v21, %v2753_v44  ;;  %v2757_v44 = vmul.f32 %v7352_v17, %v7352_v17  ;;  %11687 = vst [vmem:[#allocation46_spill] sm:$0xff] %v7376_v40  ;;  %v7382_v17 = vsub.f32 %v11688_v62, %v6695_v5  ;;  %v11694_v62 = vld [vmem:[#allocation70_spill] sm:$0xff] }
 0x537   :  { %v2941_v20 = vadd.f32 %v2940_v16, %v2754_v49  ;;  %v2758_v49 = vmul.f32 %v7358_v33, %v7358_v33  ;;  %11689 = vst [vmem:[#allocation48_spill] sm:$0xff] %v7382_v17  ;;  %v7388_v33 = vsub.f32 %v11690_v18, %v6695_v5  ;;  %v11696_v18 = vld [vmem:[#allocation72_spill] sm:$0xff] }
 0x539   :  { %v2942_v3 = vadd.f32 %v2941_v20, %v2755_v55  ;;  %v2759_v55 = vmul.f32 %v7364_v41, %v7364_v41  ;;  %11691 = vst [vmem:[#allocation50_spill] sm:$0xff] %v7388_v33  ;;  %v7394_v41 = vsub.f32 %v11692_v7, %v6695_v5  ;;  %v11698_v7 = vld [vmem:[#allocation74_spill] sm:$0xff] }
 0x53b   :  { %v2943_v21 = vadd.f32 %v2942_v3, %v2756_v63  ;;  %v2760_v63 = vmul.f32 %v7370_v1, %v7370_v1  ;;  %11693 = vst [vmem:[#allocation52_spill] sm:$0xff] %v7394_v41  ;;  %v7400_v1 = vsub.f32 %v11694_v62, %v6695_v5  ;;  %v11700_v62 = vld [vmem:[#allocation76_spill] sm:$0xff] }
 0x53d   :  { %v2944_v16 = vadd.f32 %v2943_v21, %v2757_v44  ;;  %v2761_v44 = vmul.f32 %v7376_v40, %v7376_v40  ;;  %11695 = vst [vmem:[#allocation54_spill] sm:$0xff] %v7400_v1  ;;  %v7406_v40 = vsub.f32 %v11696_v18, %v6695_v5  ;;  %v11702_v18 = vld [vmem:[#allocation78_spill] sm:$0xff] }
 0x53f   :  { %v2945_v20 = vadd.f32 %v2944_v16, %v2758_v49  ;;  %v2762_v49 = vmul.f32 %v7382_v17, %v7382_v17  ;;  %11697 = vst [vmem:[#allocation56_spill] sm:$0xff] %v7406_v40  ;;  %v7412_v17 = vsub.f32 %v11698_v7, %v6695_v5  ;;  %v11704_v7 = vld [vmem:[#allocation80_spill] sm:$0xff] }
 0x541   :  { %v2946_v3 = vadd.f32 %v2945_v20, %v2759_v55  ;;  %v2763_v55 = vmul.f32 %v7388_v33, %v7388_v33  ;;  %11699 = vst [vmem:[#allocation58_spill] sm:$0xff] %v7412_v17  ;;  %v7418_v33 = vsub.f32 %v11700_v62, %v6695_v5  ;;  %v11706_v62 = vld [vmem:[#allocation82_spill] sm:$0xff] }
 0x543   :  { %v2947_v21 = vadd.f32 %v2946_v3, %v2760_v63  ;;  %v2764_v63 = vmul.f32 %v7394_v41, %v7394_v41  ;;  %11701 = vst [vmem:[#allocation60_spill] sm:$0xff] %v7418_v33  ;;  %v7424_v41 = vsub.f32 %v11702_v18, %v6695_v5  ;;  %v11708_v18 = vld [vmem:[#allocation84_spill] sm:$0xff] }
 0x545   :  { %v2948_v16 = vadd.f32 %v2947_v21, %v2761_v44  ;;  %v2765_v44 = vmul.f32 %v7400_v1, %v7400_v1  ;;  %11703 = vst [vmem:[#allocation62_spill] sm:$0xff] %v7424_v41  ;;  %v7430_v1 = vsub.f32 %v11704_v7, %v6695_v5  ;;  %v11710_v7 = vld [vmem:[#allocation86_spill] sm:$0xff] }
 0x547   :  { %v2949_v20 = vadd.f32 %v2948_v16, %v2762_v49  ;;  %v2766_v49 = vmul.f32 %v7406_v40, %v7406_v40  ;;  %11705 = vst [vmem:[#allocation64_spill] sm:$0xff] %v7430_v1  ;;  %v7436_v40 = vsub.f32 %v11706_v62, %v6695_v5  ;;  %v11712_v62 = vld [vmem:[#allocation88_spill] sm:$0xff] }
 0x549   :  { %v2950_v3 = vadd.f32 %v2949_v20, %v2763_v55  ;;  %v2767_v55 = vmul.f32 %v7412_v17, %v7412_v17  ;;  %11707 = vst [vmem:[#allocation66_spill] sm:$0xff] %v7436_v40  ;;  %v7442_v17 = vsub.f32 %v11708_v18, %v6695_v5  ;;  %v11714_v18 = vld [vmem:[#allocation90_spill] sm:$0xff] }
 0x54b   :  { %v2951_v21 = vadd.f32 %v2950_v3, %v2764_v63  ;;  %v2768_v63 = vmul.f32 %v7418_v33, %v7418_v33  ;;  %11709 = vst [vmem:[#allocation68_spill] sm:$0xff] %v7442_v17  ;;  %v7448_v33 = vsub.f32 %v11710_v7, %v6695_v5  ;;  %v11716_v7 = vld [vmem:[#allocation92_spill] sm:$0xff] }
 0x54d   :  { %v2952_v16 = vadd.f32 %v2951_v21, %v2765_v44  ;;  %v2769_v44 = vmul.f32 %v7424_v41, %v7424_v41  ;;  %11711 = vst [vmem:[#allocation70_spill] sm:$0xff] %v7448_v33  ;;  %v7454_v41 = vsub.f32 %v11712_v62, %v6695_v5  ;;  %v11718_v62 = vld [vmem:[#allocation94_spill] sm:$0xff] }
 0x54f   :  { %v2953_v20 = vadd.f32 %v2952_v16, %v2766_v49  ;;  %v2770_v49 = vmul.f32 %v7430_v1, %v7430_v1  ;;  %11713 = vst [vmem:[#allocation72_spill] sm:$0xff] %v7454_v41  ;;  %v7460_v1 = vsub.f32 %v11714_v18, %v6695_v5  ;;  %v11720_v18 = vld [vmem:[#allocation96_spill] sm:$0xff] }
 0x551   :  { %v2954_v3 = vadd.f32 %v2953_v20, %v2767_v55  ;;  %v2771_v55 = vmul.f32 %v7436_v40, %v7436_v40  ;;  %11715 = vst [vmem:[#allocation74_spill] sm:$0xff] %v7460_v1  ;;  %v7466_v40 = vsub.f32 %v11716_v7, %v6695_v5  ;;  %v11721_v7 = vld [vmem:[#allocation98_spill] sm:$0xff] }
 0x553   :  { %v2955_v21 = vadd.f32 %v2954_v3, %v2768_v63  ;;  %v2772_v63 = vmul.f32 %v7442_v17, %v7442_v17  ;;  %11717 = vst [vmem:[#allocation76_spill] sm:$0xff] %v7466_v40  ;;  %v7472_v17 = vsub.f32 %v11718_v62, %v6695_v5  ;;  %v11722_v62 = vld [vmem:[#allocation100_spill] sm:$0xff] }
 0x555   :  { %v2956_v16 = vadd.f32 %v2955_v21, %v2769_v44  ;;  %v2773_v44 = vmul.f32 %v7448_v33, %v7448_v33  ;;  %11719 = vst [vmem:[#allocation78_spill] sm:$0xff] %v7472_v17  ;;  %v7478_v33 = vsub.f32 %v11720_v18, %v6695_v5  ;;  %v11723_v18 = vld [vmem:[#allocation102_spill] sm:$0xff] }
 0x557   :  { %v2957_v20 = vadd.f32 %v2956_v16, %v2770_v49  ;;  %v2774_v49 = vmul.f32 %v7454_v41, %v7454_v41  ;;  %v7484_v41 = vsub.f32 %v11721_v7, %v6695_v5  ;;  %v11725_v7 = vld [vmem:[#allocation104_spill] sm:$0xff] }
 0x559   :  { %v2958_v3 = vadd.f32 %v2957_v20, %v2771_v55  ;;  %v2775_v55 = vmul.f32 %v7460_v1, %v7460_v1  ;;  %v7490_v1 = vsub.f32 %v11722_v62, %v6695_v5  ;;  %v7508_v62 = vsub.f32 %v11470_v32, %v6695_v5 }
 0x55b   :  { %v2959_v21 = vadd.f32 %v2958_v3, %v2772_v63  ;;  %v2776_v63 = vmul.f32 %v7466_v40, %v7466_v40  ;;  %v7496_v40 = vsub.f32 %v11723_v18, %v6695_v5  ;;  %v7514_v18 = vsub.f32 %v11471_v22, %v6695_v5 }
 0x55c   :  { %v2783_v32 = vmul.f32 %v7508_v62, %v7508_v62 }
 0x55d   :  { %v2960_v16 = vadd.f32 %v2959_v21, %v2773_v44  ;;  %v2777_v44 = vmul.f32 %v7472_v17, %v7472_v17  ;;  %11724 = vst [vmem:[#allocation80_spill] sm:$0xff] %v7496_v40  ;;  %v7502_v17 = vsub.f32 %v11725_v7, %v6695_v5  ;;  %v7520_v7 = vsub.f32 %v11472_v25, %v6695_v5 }
 0x55e   :  { %v2784_v22 = vmul.f32 %v7514_v18, %v7514_v18 }
 0x55f   :  { %v2961_v20 = vadd.f32 %v2960_v16, %v2774_v49  ;;  %v2778_v49 = vmul.f32 %v7478_v33, %v7478_v33  ;;  %v2785_v25 = vmul.f32 %v7520_v7, %v7520_v7 }
 0x561   :  { %v2962_v3 = vadd.f32 %v2961_v20, %v2775_v55  ;;  %v2779_v55 = vmul.f32 %v7484_v41, %v7484_v41 }
 0x563   :  { %v2963_v21 = vadd.f32 %v2962_v3, %v2776_v63  ;;  %v2780_v63 = vmul.f32 %v7490_v1, %v7490_v1 }
 0x565   :  { %v2964_v16 = vadd.f32 %v2963_v21, %v2777_v44  ;;  %v2781_v44 = vmul.f32 %v7496_v40, %v7496_v40 }
 0x567   :  { %v2965_v20 = vadd.f32 %v2964_v16, %v2778_v49  ;;  %v2782_v49 = vmul.f32 %v7502_v17, %v7502_v17 }
 0x569   :  { %v2966_v3 = vadd.f32 %v2965_v20, %v2779_v55  ;;  %v11726_v20 = vld [vmem:[#allocation112_spill] sm:$0xff] }
 0x56a   :  { %v7526_v40 = vsub.f32 %v11726_v20, %v6695_v5  ;;  %v7544_v20 = vsub.f32 %v11476_v13, %v6695_v5 }
 0x56b   :  { %v2967_v21 = vadd.f32 %v2966_v3, %v2780_v63  ;;  %v7532_v3 = vsub.f32 %v11474_v46, %v6695_v5 }
 0x56c   :  { %v2789_v13 = vmul.f32 %v7544_v20, %v7544_v20 }
 0x56d   :  { %v2968_v16 = vadd.f32 %v2967_v21, %v2781_v44  ;;  %11727 = vst [vmem:[#allocation82_spill] sm:$0xff] %v7532_v3  ;;  %v7538_v21 = vsub.f32 %v11475_v2, %v6695_v5  ;;  %v2787_v46 = vmul.f32 %v7532_v3, %v7532_v3 }
 0x56f   :  { %v2969_v55 = vadd.f32 %v2968_v16, %v2782_v49  ;;  %v2786_v49 = vmul.f32 %v7526_v40, %v7526_v40  ;;  %v2788_v2 = vmul.f32 %v7538_v21, %v7538_v21 }
 0x571   :  { %v2970_v63 = vadd.f32 %v2969_v55, %v2783_v32  ;;  %v7550_v55 = vsub.f32 %v11477_v35, %v6695_v5 }
 0x573   :  { %v2971_v44 = vadd.f32 %v2970_v63, %v2784_v22  ;;  %v7556_v63 = vsub.f32 %v11478_v52, %v6695_v5  ;;  %v2790_v35 = vmul.f32 %v7550_v55, %v7550_v55 }
 0x575   :  { %v2972_v16 = vadd.f32 %v2971_v44, %v2785_v25  ;;  %11728 = vst [vmem:[#allocation84_spill] sm:$0xff] %v7556_v63  ;;  %v11729_v44 = vld [vmem:[#allocation123_spill] sm:$0xff]  ;;  %v2791_v52 = vmul.f32 %v7556_v63, %v7556_v63 }
 0x576   :  { %v7562_v3 = vsub.f32 %v11729_v44, %v6695_v5  ;;  %v7580_v44 = vsub.f32 %v6366_v12, %v6695_v5 }
 0x577   :  { %v2973_v32 = vadd.f32 %v2972_v16, %v2786_v49  ;;  %v7568_v16 = vsub.f32 %v11480_v38, %v6695_v5 }
 0x578   :  { %11730 = vst [vmem:[#allocation86_spill] sm:$0xff] %v7562_v3  ;;  %v2795_v12 = vmul.f32 %v7580_v44, %v7580_v44 }
 0x579   :  { %v2974_v22 = vadd.f32 %v2973_v32, %v2787_v46  ;;  %v7574_v32 = vsub.f32 %v6358_v45, %v6695_v5  ;;  %v2793_v38 = vmul.f32 %v7568_v16, %v7568_v16 }
 0x57b   :  { %v2975_v25 = vadd.f32 %v2974_v22, %v2788_v2  ;;  %v2792_v2 = vmul.f32 %v7562_v3, %v7562_v3  ;;  %v2794_v45 = vmul.f32 %v7574_v32, %v7574_v32 }
 0x57d   :  { %v2976_v49 = vadd.f32 %v2975_v25, %v2789_v13  ;;  %v11731_v25 = vld [vmem:[#allocation128_spill] sm:$0xff] }
 0x57e   :  { %v7586_v63 = vsub.f32 %v11731_v25, %v6695_v5  ;;  %v7604_v25 = vsub.f32 %v6398_v50, %v6695_v5 }
 0x57f   :  { %v2977_v46 = vadd.f32 %v2976_v49, %v2790_v35  ;;  %v11733_v49 = vld [vmem:[#allocation130_spill] sm:$0xff] }
 0x580   :  { %11732 = vst [vmem:[#allocation88_spill] sm:$0xff] %v7586_v63  ;;  %v7592_v3 = vsub.f32 %v11733_v49, %v6695_v5  ;;  %v7610_v49 = vsub.f32 %v6406_v31, %v6695_v5  ;;  %v2799_v50 = vmul.f32 %v7604_v25, %v7604_v25 }
 0x581   :  { %v2978_v22 = vadd.f32 %v2977_v46, %v2791_v52  ;;  %v7598_v46 = vsub.f32 %v6390_v34, %v6695_v5 }
 0x582   :  { %11734 = vst [vmem:[#allocation90_spill] sm:$0xff] %v7592_v3  ;;  %v2800_v31 = vmul.f32 %v7610_v49, %v7610_v49 }
 0x583   :  { %v2979_v13 = vadd.f32 %v2978_v22, %v2792_v2  ;;  %v2796_v2 = vmul.f32 %v7586_v63, %v7586_v63  ;;  %v2798_v34 = vmul.f32 %v7598_v46, %v7598_v46 }
 0x585   :  { %v2980_v35 = vadd.f32 %v2979_v13, %v2793_v38  ;;  %v2797_v38 = vmul.f32 %v7592_v3, %v7592_v3 }
 0x587   :  { %v2981_v52 = vadd.f32 %v2980_v35, %v2794_v45  ;;  %v11735_v35 = vld [vmem:[#allocation133_spill] sm:$0xff] }
 0x588   :  { %v7616_v63 = vsub.f32 %v11735_v35, %v6695_v5  ;;  %v7634_v35 = vsub.f32 %v6438_v0, %v6695_v5 }
 0x589   :  { %v2982_v22 = vadd.f32 %v2981_v52, %v2795_v12  ;;  %v11737_v52 = vld [vmem:[#allocation134_spill] sm:$0xff] }
 0x58a   :  { %11736 = vst [vmem:[#allocation92_spill] sm:$0xff] %v7616_v63  ;;  %v7622_v3 = vsub.f32 %v11737_v52, %v6695_v5  ;;  %v7640_v52 = vsub.f32 %v6446_v51, %v6695_v5  ;;  %v2804_v0 = vmul.f32 %v7634_v35, %v7634_v35 }
 0x58b   :  { %v2983_v13 = vadd.f32 %v2982_v22, %v2796_v2  ;;  %v7628_v22 = vsub.f32 %v6430_v29, %v6695_v5 }
 0x58c   :  { %11738 = vst [vmem:[#allocation94_spill] sm:$0xff] %v7622_v3  ;;  %v2805_v51 = vmul.f32 %v7640_v52, %v7640_v52 }
 0x58d   :  { %v2984_v45 = vadd.f32 %v2983_v13, %v2797_v38  ;;  %v2801_v38 = vmul.f32 %v7616_v63, %v7616_v63  ;;  %11739 = vst [vmem:[#allocation96_spill] sm:$0xff] %v7640_v52  ;;  %v2803_v29 = vmul.f32 %v7628_v22, %v7628_v22 }
 0x58f   :  { %v2985_v12 = vadd.f32 %v2984_v45, %v2798_v34  ;;  %v2802_v34 = vmul.f32 %v7622_v3, %v7622_v3 }
 0x591   :  { %v2986_v2 = vadd.f32 %v2985_v12, %v2799_v50  ;;  %v11740_v12 = vld [vmem:[#allocation139_spill] sm:$0xff] }
 0x592   :  { %v7646_v63 = vsub.f32 %v11740_v12, %v6695_v5  ;;  %v7664_v12 = vsub.f32 %v6484_v61, %v6695_v5 }
 0x593   :  { %v2987_v13 = vadd.f32 %v2986_v2, %v2800_v31  ;;  %v11742_v2 = vld [vmem:[#allocation140_spill] sm:$0xff] }
 0x594   :  { %11741 = vst [vmem:[#allocation98_spill] sm:$0xff] %v7646_v63  ;;  %v7652_v3 = vsub.f32 %v11742_v2, %v6695_v5  ;;  %v11744_v2 = vld [vmem:[#allocation141_spill] sm:$0xff]  ;;  %v2809_v61 = vmul.f32 %v7664_v12, %v7664_v12 }
 0x595   :  { %v2988_v45 = vadd.f32 %v2987_v13, %v2801_v38  ;;  %v7658_v13 = vsub.f32 %v6474_v36, %v6695_v5  ;;  %11743 = vst [vmem:[#allocation100_spill] sm:$0xff] %v7664_v12  ;;  %v7670_v52 = vsub.f32 %v11744_v2, %v6695_v5  ;;  %v7688_v2 = vsub.f32 %v6512_v42, %v6695_v5 }
 0x597   :  { %v2989_v50 = vadd.f32 %v2988_v45, %v2802_v34  ;;  %v2806_v34 = vmul.f32 %v7646_v63, %v7646_v63  ;;  %11745 = vst [vmem:[#allocation102_spill] sm:$0xff] %v7670_v52  ;;  %v2808_v36 = vmul.f32 %v7658_v13, %v7658_v13  ;;  %v2813_v42 = vmul.f32 %v7688_v2, %v7688_v2 }
 0x599   :  { %v2990_v31 = vadd.f32 %v2989_v50, %v2803_v29  ;;  %v2807_v29 = vmul.f32 %v7652_v3, %v7652_v3 }
 0x59b   :  { %v2991_v38 = vadd.f32 %v2990_v31, %v2804_v0  ;;  %v11746_v31 = vld [vmem:[#allocation142_spill] sm:$0xff] }
 0x59c   :  { %v7676_v63 = vsub.f32 %v11746_v31, %v6695_v5  ;;  %v11748_v31 = vld [vmem:[#allocation148_spill] sm:$0xff] }
 0x59d   :  { %v2992_v45 = vadd.f32 %v2991_v38, %v2805_v51  ;;  %v7682_v38 = vsub.f32 %v6506_v57, %v6695_v5  ;;  %v7694_v12 = vsub.f32 %v11748_v31, %v6695_v5  ;;  %v7712_v31 = vsub.f32 %v6566_v58, %v6695_v5 }
 0x59e   :  { %11747 = vst [vmem:[#allocation104_spill] sm:$0xff] %v7676_v63 }
 0x59f   :  { %v2993_v50 = vadd.f32 %v2992_v45, %v2806_v34  ;;  %v2810_v34 = vmul.f32 %v7670_v52, %v7670_v52  ;;  %11749 = vst [vmem:[#allocation112_spill] sm:$0xff] %v7694_v12  ;;  %v2812_v57 = vmul.f32 %v7682_v38, %v7682_v38  ;;  %v2817_v58 = vmul.f32 %v7712_v31, %v7712_v31 }
 0x5a1   :  { %v2994_v0 = vadd.f32 %v2993_v50, %v2807_v29  ;;  %v2811_v29 = vmul.f32 %v7676_v63, %v7676_v63 }
 0x5a3   :  { %v2995_v51 = vadd.f32 %v2994_v0, %v2808_v36  ;;  %v11750_v0 = vld [vmem:[#allocation150_spill] sm:$0xff] }
 0x5a4   :  { %v7700_v52 = vsub.f32 %v11750_v0, %v6695_v5  ;;  %v7718_v0 = vsub.f32 %v6575_v39, %v6695_v5 }
 0x5a5   :  { %v2996_v45 = vadd.f32 %v2995_v51, %v2809_v61  ;;  %v11752_v51 = vld [vmem:[#allocation156_spill] sm:$0xff] }
 0x5a6   :  { %11751 = vst [vmem:[#allocation123_spill] sm:$0xff] %v7700_v52  ;;  %v7706_v63 = vsub.f32 %v11752_v51, %v6695_v5  ;;  %v11754_v51 = vld [vmem:[#allocation157_spill] sm:$0xff]  ;;  %v2818_v39 = vmul.f32 %v7718_v0, %v7718_v0 }
 0x5a7   :  { %v2997_v50 = vadd.f32 %v2996_v45, %v2810_v34  ;;  %v2814_v34 = vmul.f32 %v7694_v12, %v7694_v12  ;;  %11753 = vst [vmem:[#allocation128_spill] sm:$0xff] %v7718_v0  ;;  %v7724_v12 = vsub.f32 %v11754_v51, %v6695_v5  ;;  %v7742_v51 = vsub.f32 %v6599_v54, %v6695_v5 }
 0x5a9   :  { %v2998_v36 = vadd.f32 %v2997_v50, %v2811_v29  ;;  %v2815_v29 = vmul.f32 %v7700_v52, %v7700_v52  ;;  %v2822_v54 = vmul.f32 %v7742_v51, %v7742_v51 }
 0x5ab   :  { %v2999_v61 = vadd.f32 %v2998_v36, %v2812_v57  ;;  %v2816_v57 = vmul.f32 %v7706_v63, %v7706_v63 }
 0x5ad   :  { %v3000_v45 = vadd.f32 %v2999_v61, %v2813_v42  ;;  %v11755_v61 = vld [vmem:[#allocation158_spill] sm:$0xff] }
 0x5ae   :  { %v7730_v52 = vsub.f32 %v11755_v61, %v6695_v5  ;;  %v11756_v61 = vld [vmem:[#allocation159_spill] sm:$0xff] }
 0x5af   :  { %v3001_v50 = vadd.f32 %v3000_v45, %v2814_v34  ;;  %v7736_v45 = vsub.f32 %v6590_v56, %v6695_v5  ;;  %v7748_v0 = vsub.f32 %v11756_v61, %v6695_v5  ;;  %v7766_v61 = vsub.f32 %v6667_v14, %v6695_v5 }
 0x5b1   :  { %v3002_v36 = vadd.f32 %v3001_v50, %v2815_v29  ;;  %v2819_v29 = vmul.f32 %v7724_v12, %v7724_v12  ;;  %v2821_v56 = vmul.f32 %v7736_v45, %v7736_v45  ;;  %11758 = vst [vmem:[#allocation133_spill] sm:$0xff] %v7766_v61  ;;  %v2826_v14 = vmul.f32 %v7766_v61, %v7766_v61 }
 0x5b3   :  { %v3003_v42 = vadd.f32 %v3002_v36, %v2816_v57  ;;  %v2820_v57 = vmul.f32 %v7730_v52, %v7730_v52 }
 0x5b5   :  { %v3004_v34 = vadd.f32 %v3003_v42, %v2817_v58  ;;  %v7754_v42 = vsub.f32 %v6611_v47, %v6695_v5 }
 0x5b7   :  { %v3005_v50 = vadd.f32 %v3004_v34, %v2818_v39  ;;  %v7760_v34 = vsub.f32 %v6664_v28, %v6695_v5  ;;  %v2824_v47 = vmul.f32 %v7754_v42, %v7754_v42 }
 0x5b9   :  { %v3006_v36 = vadd.f32 %v3005_v50, %v2819_v29  ;;  %11757 = vst [vmem:[#allocation130_spill] sm:$0xff] %v7760_v34  ;;  %v2823_v29 = vmul.f32 %v7748_v0, %v7748_v0  ;;  %v2825_v28 = vmul.f32 %v7760_v34, %v7760_v34 }
 0x5bb   :  { %v3007_v58 = vadd.f32 %v3006_v36, %v2820_v57  ;;  %v7772_v36 = vsub.f32 %v6670_v19, %v6695_v5 }
 0x5bd   :  { %v3008_v39 = vadd.f32 %v3007_v58, %v2821_v56  ;;  %11759 = vst [vmem:[#allocation134_spill] sm:$0xff] %v7772_v36  ;;  %v7778_v58 = vsub.f32 %v6673_v60, %v6695_v5  ;;  %v2827_v19 = vmul.f32 %v7772_v36, %v7772_v36 }
 0x5bf   :  { %v3009_v50 = vadd.f32 %v3008_v39, %v2822_v54  ;;  %11760 = vst [vmem:[#allocation139_spill] sm:$0xff] %v7778_v58  ;;  %v7784_v39 = vsub.f32 %v6676_v11, %v6695_v5  ;;  %v2828_v60 = vmul.f32 %v7778_v58, %v7778_v58 }
 0x5c1   :  { %v3010_v57 = vadd.f32 %v3009_v50, %v2823_v29  ;;  %11761 = vst [vmem:[#allocation140_spill] sm:$0xff] %v7784_v39  ;;  %v7790_v50 = vsub.f32 %v6679_v53, %v6695_v5  ;;  %v2829_v11 = vmul.f32 %v7784_v39, %v7784_v39 }
 0x5c3   :  { %v3011_v56 = vadd.f32 %v3010_v57, %v2824_v47  ;;  %11762 = vst [vmem:[#allocation141_spill] sm:$0xff] %v7790_v50  ;;  %v7796_v57 = vsub.f32 %v6682_v59, %v6695_v5  ;;  %v2830_v53 = vmul.f32 %v7790_v50, %v7790_v50 }
 0x5c5   :  { %v3012_v54 = vadd.f32 %v3011_v56, %v2825_v28  ;;  %11763 = vst [vmem:[#allocation142_spill] sm:$0xff] %v7796_v57  ;;  %v7802_v56 = vsub.f32 %v6685_v6, %v6695_v5  ;;  %v2831_v59 = vmul.f32 %v7796_v57, %v7796_v57 }
 0x5c7   :  { %v3013_v29 = vadd.f32 %v3012_v54, %v2826_v14  ;;  %11764 = vst [vmem:[#allocation148_spill] sm:$0xff] %v7802_v56  ;;  %v7808_v54 = vsub.f32 %v6688_v23, %v6695_v5  ;;  %v2834_v23 = vmul.f32 %v6698_v27, %v6698_v27 }
 0x5c9   :  { %v3014_v47 = vadd.f32 %v3013_v29, %v2827_v19  ;;  %11765 = vst [vmem:[#allocation150_spill] sm:$0xff] %v7808_v54  ;;  %v2647_v29 = vsub.f32 %v6691_v8, %v6695_v5 }
 0x5cb   :  { %v3015_v28 = vadd.f32 %v3014_v47, %v2828_v60  ;;  %v2832_v60 = vmul.f32 %v7802_v56, %v7802_v56  ;;  %v2833_v47 = vmul.f32 %v7808_v54, %v7808_v54 }
 0x5cd   :  { %v3016_v14 = vadd.f32 %v3015_v28, %v2829_v11  ;;  %v2835_v11 = vmul.f32 %v2647_v29, %v2647_v29 }
 0x5cf   :  { %v3017_v19 = vadd.f32 %v3016_v14, %v2830_v53  ;;  %v3022_v57 = vsel %vm2450_vm0, %v2835_v11, 0.0 }
 0x5d1   :  { %v3018_v6 = vadd.f32 %v3017_v19, %v2831_v59 }
 0x5d3   :  { %v3019_v50 = vadd.f32 %v3018_v6, %v2832_v60 }
 0x5d5   :  { %v3020_v28 = vadd.f32 %v3019_v50, %v2833_v47  ;;  %v3031_v50 = vld [vmem:[%s10792_s2] sm:$0x1]  ;;  %s6074_s2 = smov [#allocation7]  }
 0x5d7   :  { %v3021_v39 = vadd.f32 %v3020_v28, %v2834_v23 }
 0x5d9   :  { %v3023_v53 = vadd.f32 %v3022_v57, %v3021_v39 }
 0x5db   :  { %v3024_v14 = vrot.slane %v3023_v53, 4 }
 0x5dd   :  { %v3025_v58 = vadd.f32 %v3024_v14, %v3023_v53  ;;  %v11767_v14 = vld [vmem:[#allocation108_spill] sm:$0xff] }
 0x5df   :  { %v3026_v8 = vrot.slane %v3025_v58, 2 }
 0x5e1   :  { %v3027_v5 = vadd.f32 %v3026_v8, %v3025_v58 }
 0x5e3   :  { %v3028_v36 = vrot.slane %v3027_v5, 1 }
 0x5e5   :  { %v3029_v56 = vadd.f32 %v3028_v36, %v3027_v5  ;;  %v7827_v36 = vld [vmem:[%s10793_s3] ss:$0 sm:$0xff]  ;;  %s4371_s3 = sshll.u32 %s6074_s2, 4  ;;  %s4372_s3 = int_to_ptr.vmem [resolvable:$true] %s4371_s3 }
 0x5e7   :  { %v3030_v59 = vmul.f32 0.00066666666, %v3029_v56 }
 0x5e9   :  { %v3032_v19 = vadd.f32 1e-05, %v3030_v59  ;;  %v11768_v59 = vld [vmem:[#allocation110_spill] sm:$0xff] }
 0x5eb   :  { %5988 = vrsqrt.f32 %v3032_v19  ;;  %vm3039_vm2 = vweird.f32 %v3032_v19 }
 0x5f1   :  { %v5989_v54 = vpop.eup %5988 }
 0x5f2   :  { %v3034_v60 = vmul.f32 %v5989_v54, %v3032_v19  ;;  %vm3040_vm1 = vweird.f32 %v5989_v54  ;;  %v11769_v19 = vld [vmem:[#allocation114_spill] sm:$0xff] }
 0x5f3   :  { %vm3041_vm3 = vmor %vm3039_vm2, %vm3040_vm1 }
 0x5f4   :  { %v3035_v6 = vmul.f32 %v5989_v54, %v3034_v60 }
 0x5f6   :  { %v3036_v61 = vmul.f32 0.5, %v3035_v6  ;;  %v11770_v6 = vld [vmem:[#allocation116_spill] sm:$0xff] }
 0x5f8   :  { %v3037_v34 = vsub.f32 1.5, %v3036_v61 }
 0x5fa   :  { %v3038_v39 = vmul.f32 %v5989_v54, %v3037_v34 }
 0x5fc   :  { %v3042_v57 = vsel %vm3041_vm3, %v5989_v54, %v3038_v39  ;;  %v11766_v54 = vld [vmem:[#allocation106_spill] sm:$0xff] }
 0x5fd   :  { %v3043_v58 = vmul.f32 %v3042_v57, %v3031_v50  ;;  %v11771_v39 = vld [vmem:[#allocation118_spill] sm:$0xff] }
 0x5ff   :  { %v7829_v56 = vperm.slane %v3043_v58, 0  ;;  %v11772_v58 = vld [vmem:[#allocation120_spill] sm:$0xff] }
 0x601   :  { %v3234_v47 = vmul.f32 %v7829_v56, %v2647_v29  ;;  %v7835_v34 = vmul.f32 %v7829_v56, %v6702_v10  ;;  %v7839_v53 = vmul.f32 %v7829_v56, %v11766_v54  ;;  %v7843_v8 = vmul.f32 %v7829_v56, %v11767_v14  ;;  %v11775_v54 = vld [vmem:[#allocation11_spill] sm:$0xff]  ;;  %v11777_v14 = vld [vmem:[#allocation12_spill] sm:$0xff] }
 0x602   :  { %v7847_v29 = vmul.f32 %v7829_v56, %v6718_v4  ;;  %v7851_v5 = vmul.f32 %v7829_v56, %v6722_v30  ;;  %v7855_v10 = vmul.f32 %v7829_v56, %v11768_v59  ;;  %v7859_v60 = vmul.f32 %v7829_v56, %v11769_v19  ;;  %v11779_v59 = vld [vmem:[#allocation13_spill] sm:$0xff] }
 0x603   :  { %v3426_v61 = vadd.f32 %v7827_v36, %v3234_v47  ;;  %v7863_v50 = vmul.f32 %v7829_v56, %v11770_v6  ;;  %v7867_v4 = vmul.f32 %v7829_v56, %v11771_v39  ;;  %v7871_v30 = vmul.f32 %v7829_v56, %v6752_v26  ;;  %v11781_v6 = vld [vmem:[#allocation14_spill] sm:$0xff] }
 0x604   :  { %v7875_v57 = vmul.f32 %v7829_v56, %v6758_v37  ;;  %v7879_v47 = vmul.f32 %v7829_v56, %v11772_v58  ;;  %v7891_v26 = vmul.f32 %v7829_v56, %v11775_v54  ;;  %v7895_v37 = vmul.f32 %v7829_v56, %v11777_v14  ;;  %v11783_v58 = vld [vmem:[#allocation15_spill] sm:$0xff] }
 0x605   :  { %vm3614_vm4 = vcmp.gt.f32.partialorder %v3426_v61, 0.0  ;;  %v3802_v11 = vmul.f32 0.01, %v3426_v61  ;;  %v7899_v19 = vmul.f32 %v7829_v56, %v11779_v59  ;;  %v7903_v39 = vmul.f32 %v7829_v56, %v11781_v6 }
 0x606   :  { %11776 = vst [vmem:[#allocation156_spill] sm:$0xff] %v7891_v26  ;;  %v11787_v26 = vld [vmem:[#allocation17_spill] sm:$0xff] }
 0x607   :  { %v3990_v23 = vsel %vm3614_vm4, %v3426_v61, %v3802_v11  ;;  %v11773_v61 = vld [vmem:[#allocation122_spill] sm:$0xff]  ;;  %11778 = vst [vmem:[#allocation157_spill] sm:$0xff] %v7895_v37  ;;  %v7915_v14 = vmul.f32 %v7829_v56, %v11787_v26 }
 0x608   :  { %v4178_v28 = vpack.c.bf16 %v3990_v23, %v3990_v23  ;;  %v7883_v11 = vmul.f32 %v7829_v56, %v11773_v61  ;;  %v11774_v23 = vld [vmem:[#allocation125_spill] sm:$0xff]  ;;  %11780 = vst [vmem:[#allocation158_spill] sm:$0xff] %v7899_v19  ;;  %v7907_v61 = vmul.f32 %v7829_v56, %v11783_v58  ;;  %v11789_v37 = vld [vmem:[#allocation18_spill] sm:$0xff]  ;;  %v11791_v19 = vld [vmem:[#allocation19_spill] sm:$0xff] }
 0x609   :  { %11782 = vst [vmem:[#allocation159_spill] sm:$0xff] %v7903_v39  ;;  %v7919_v59 = vmul.f32 %v7829_v56, %v11789_v37  ;;  %v7923_v6 = vmul.f32 %v7829_v56, %v11791_v19  ;;  %v11793_v39 = vld [vmem:[#allocation20_spill] sm:$0xff] }
 0x60a   :  { %4366 = vst [vmem:[#allocation7 + $0x2ec] sm:$0x3] %v4178_v28  ;;  %v7887_v28 = vmul.f32 %v7829_v56, %v11774_v23  ;;  %v11785_v23 = vld [vmem:[#allocation16_spill] sm:$0xff]  ;;  %v7927_v58 = vmul.f32 %v7829_v56, %v11793_v39 }
 0x60b   :  { %11784 = vst [vmem:[#allocation106_spill] sm:$0xff] %v7907_v61  ;;  %v7911_v54 = vmul.f32 %v7829_v56, %v11785_v23  ;;  %v11795_v61 = vld [vmem:[#allocation21_spill] sm:$0xff] }
 0x60c   :  { %11788 = vst [vmem:[#allocation110_spill] sm:$0xff] %v7915_v14  ;;  %v7931_v23 = vmul.f32 %v7829_v56, %v11795_v61  ;;  %v11799_v14 = vld [vmem:[#allocation23_spill] sm:$0xff] }
 0x60d   :  { %11786 = vst [vmem:[#allocation108_spill] sm:$0xff] %v7911_v54  ;;  %v11797_v54 = vld [vmem:[#allocation22_spill] sm:$0xff]  ;;  %v7939_v37 = vmul.f32 %v7829_v56, %v11799_v14 }
 0x60e   :  { %11790 = vst [vmem:[#allocation114_spill] sm:$0xff] %v7919_v59  ;;  %v7935_v26 = vmul.f32 %v7829_v56, %v11797_v54  ;;  %v11801_v59 = vld [vmem:[#allocation25_spill] sm:$0xff] }
 0x60f   :  { %11792 = vst [vmem:[#allocation116_spill] sm:$0xff] %v7923_v6  ;;  %v7943_v19 = vmul.f32 %v7829_v56, %v11801_v59  ;;  %v11803_v6 = vld [vmem:[#allocation27_spill] sm:$0xff] }
 0x610   :  { %11794 = vst [vmem:[#allocation118_spill] sm:$0xff] %v7927_v58  ;;  %v7947_v39 = vmul.f32 %v7829_v56, %v11803_v6  ;;  %v11805_v58 = vld [vmem:[#allocation29_spill] sm:$0xff] }
 0x611   :  { %11796 = vst [vmem:[#allocation120_spill] sm:$0xff] %v7931_v23  ;;  %v7951_v61 = vmul.f32 %v7829_v56, %v11805_v58  ;;  %v11807_v23 = vld [vmem:[#allocation31_spill] sm:$0xff] }
 0x612   :  { %11798 = vst [vmem:[#allocation122_spill] sm:$0xff] %v7935_v26  ;;  %v7955_v54 = vmul.f32 %v7829_v56, %v11807_v23  ;;  %v11809_v26 = vld [vmem:[#allocation33_spill] sm:$0xff] }
 0x613   :  { %11800 = vst [vmem:[#allocation125_spill] sm:$0xff] %v7939_v37  ;;  %v7959_v14 = vmul.f32 %v7829_v56, %v11809_v26  ;;  %v11811_v37 = vld [vmem:[#allocation35_spill] sm:$0xff] }
 0x614   :  { %11802 = vst [vmem:[#allocation11_spill] sm:$0xff] %v7943_v19  ;;  %v7963_v59 = vmul.f32 %v7829_v56, %v11811_v37  ;;  %v11813_v19 = vld [vmem:[#allocation37_spill] sm:$0xff] }
 0x615   :  { %11804 = vst [vmem:[#allocation12_spill] sm:$0xff] %v7947_v39  ;;  %v7967_v6 = vmul.f32 %v7829_v56, %v11813_v19  ;;  %v11815_v39 = vld [vmem:[#allocation39_spill] sm:$0xff] }
 0x616   :  { %11806 = vst [vmem:[#allocation13_spill] sm:$0xff] %v7951_v61  ;;  %v7971_v58 = vmul.f32 %v7829_v56, %v11815_v39  ;;  %v11817_v61 = vld [vmem:[#allocation41_spill] sm:$0xff] }
 0x617   :  { %11808 = vst [vmem:[#allocation14_spill] sm:$0xff] %v7955_v54  ;;  %v7975_v23 = vmul.f32 %v7829_v56, %v11817_v61  ;;  %v11819_v54 = vld [vmem:[#allocation43_spill] sm:$0xff] }
 0x618   :  { %11810 = vst [vmem:[#allocation15_spill] sm:$0xff] %v7959_v14  ;;  %v7979_v26 = vmul.f32 %v7829_v56, %v11819_v54  ;;  %v11821_v14 = vld [vmem:[#allocation45_spill] sm:$0xff] }
 0x619   :  { %11812 = vst [vmem:[#allocation16_spill] sm:$0xff] %v7963_v59  ;;  %v7983_v37 = vmul.f32 %v7829_v56, %v11821_v14  ;;  %v11823_v59 = vld [vmem:[#allocation47_spill] sm:$0xff] }
 0x61a   :  { %11814 = vst [vmem:[#allocation17_spill] sm:$0xff] %v7967_v6  ;;  %v7987_v19 = vmul.f32 %v7829_v56, %v11823_v59  ;;  %v11825_v6 = vld [vmem:[#allocation49_spill] sm:$0xff] }
 0x61b   :  { %11816 = vst [vmem:[#allocation18_spill] sm:$0xff] %v7971_v58  ;;  %v7991_v39 = vmul.f32 %v7829_v56, %v11825_v6  ;;  %v11827_v58 = vld [vmem:[#allocation51_spill] sm:$0xff] }
 0x61c   :  { %11818 = vst [vmem:[#allocation19_spill] sm:$0xff] %v7975_v23  ;;  %v7995_v61 = vmul.f32 %v7829_v56, %v11827_v58  ;;  %v11829_v23 = vld [vmem:[#allocation53_spill] sm:$0xff] }
 0x61d   :  { %11820 = vst [vmem:[#allocation20_spill] sm:$0xff] %v7979_v26  ;;  %v7999_v54 = vmul.f32 %v7829_v56, %v11829_v23  ;;  %v11831_v26 = vld [vmem:[#allocation55_spill] sm:$0xff] }
 0x61e   :  { %11822 = vst [vmem:[#allocation21_spill] sm:$0xff] %v7983_v37  ;;  %v8003_v14 = vmul.f32 %v7829_v56, %v11831_v26  ;;  %v11833_v37 = vld [vmem:[#allocation57_spill] sm:$0xff] }
 0x61f   :  { %11824 = vst [vmem:[#allocation22_spill] sm:$0xff] %v7987_v19  ;;  %v8007_v59 = vmul.f32 %v7829_v56, %v11833_v37  ;;  %v11835_v19 = vld [vmem:[#allocation59_spill] sm:$0xff] }
 0x620   :  { %11826 = vst [vmem:[#allocation23_spill] sm:$0xff] %v7991_v39  ;;  %v8011_v6 = vmul.f32 %v7829_v56, %v11835_v19  ;;  %v11837_v39 = vld [vmem:[#allocation61_spill] sm:$0xff] }
 0x621   :  { %11828 = vst [vmem:[#allocation25_spill] sm:$0xff] %v7995_v61  ;;  %v8015_v58 = vmul.f32 %v7829_v56, %v11837_v39  ;;  %v11839_v61 = vld [vmem:[#allocation63_spill] sm:$0xff] }
 0x622   :  { %11830 = vst [vmem:[#allocation27_spill] sm:$0xff] %v7999_v54  ;;  %v8019_v23 = vmul.f32 %v7829_v56, %v11839_v61  ;;  %v11841_v54 = vld [vmem:[#allocation65_spill] sm:$0xff] }
 0x623   :  { %11832 = vst [vmem:[#allocation29_spill] sm:$0xff] %v8003_v14  ;;  %v8023_v26 = vmul.f32 %v7829_v56, %v11841_v54  ;;  %v11843_v14 = vld [vmem:[#allocation67_spill] sm:$0xff] }
 0x624   :  { %11834 = vst [vmem:[#allocation31_spill] sm:$0xff] %v8007_v59  ;;  %v8027_v37 = vmul.f32 %v7829_v56, %v11843_v14  ;;  %v11845_v59 = vld [vmem:[#allocation69_spill] sm:$0xff] }
 0x625   :  { %11836 = vst [vmem:[#allocation33_spill] sm:$0xff] %v8011_v6  ;;  %v8031_v19 = vmul.f32 %v7829_v56, %v11845_v59  ;;  %v11847_v6 = vld [vmem:[#allocation71_spill] sm:$0xff] }
 0x626   :  { %11838 = vst [vmem:[#allocation35_spill] sm:$0xff] %v8015_v58  ;;  %v8035_v39 = vmul.f32 %v7829_v56, %v11847_v6  ;;  %v11849_v58 = vld [vmem:[#allocation73_spill] sm:$0xff] }
 0x627   :  { %11840 = vst [vmem:[#allocation37_spill] sm:$0xff] %v8019_v23  ;;  %v8039_v61 = vmul.f32 %v7829_v56, %v11849_v58  ;;  %v11851_v23 = vld [vmem:[#allocation75_spill] sm:$0xff] }
 0x628   :  { %11842 = vst [vmem:[#allocation39_spill] sm:$0xff] %v8023_v26  ;;  %v8043_v54 = vmul.f32 %v7829_v56, %v11851_v23  ;;  %v11853_v26 = vld [vmem:[#allocation77_spill] sm:$0xff] }
 0x629   :  { %11844 = vst [vmem:[#allocation41_spill] sm:$0xff] %v8027_v37  ;;  %v8047_v14 = vmul.f32 %v7829_v56, %v11853_v26  ;;  %v11855_v37 = vld [vmem:[#allocation79_spill] sm:$0xff] }
 0x62a   :  { %11846 = vst [vmem:[#allocation43_spill] sm:$0xff] %v8031_v19  ;;  %v8051_v59 = vmul.f32 %v7829_v56, %v11855_v37  ;;  %v11857_v19 = vld [vmem:[#allocation81_spill] sm:$0xff] }
 0x62b   :  { %11848 = vst [vmem:[#allocation45_spill] sm:$0xff] %v8035_v39  ;;  %v8055_v6 = vmul.f32 %v7829_v56, %v11857_v19  ;;  %v11859_v39 = vld [vmem:[#allocation83_spill] sm:$0xff] }
 0x62c   :  { %11850 = vst [vmem:[#allocation47_spill] sm:$0xff] %v8039_v61  ;;  %v8059_v58 = vmul.f32 %v7829_v56, %v11859_v39  ;;  %v11861_v61 = vld [vmem:[#allocation85_spill] sm:$0xff] }
 0x62d   :  { %11852 = vst [vmem:[#allocation49_spill] sm:$0xff] %v8043_v54  ;;  %v8063_v23 = vmul.f32 %v7829_v56, %v11861_v61  ;;  %v11862_v54 = vld [vmem:[#allocation87_spill] sm:$0xff] }
 0x62e   :  { %11854 = vst [vmem:[#allocation51_spill] sm:$0xff] %v8047_v14  ;;  %v8067_v26 = vmul.f32 %v7829_v56, %v11862_v54  ;;  %v11864_v14 = vld [vmem:[#allocation89_spill] sm:$0xff]  ;;  %v8087_v54 = vmul.f32 %v7829_v56, %v7076_v15 }
 0x62f   :  { %11856 = vst [vmem:[#allocation53_spill] sm:$0xff] %v8051_v59  ;;  %v8071_v37 = vmul.f32 %v7829_v56, %v11864_v14  ;;  %v11866_v59 = vld [vmem:[#allocation91_spill] sm:$0xff] }
 0x630   :  { %11858 = vst [vmem:[#allocation55_spill] sm:$0xff] %v8055_v6  ;;  %v8075_v19 = vmul.f32 %v7829_v56, %v11866_v59  ;;  %v11867_v6 = vld [vmem:[#allocation93_spill] sm:$0xff] }
 0x631   :  { %11860 = vst [vmem:[#allocation57_spill] sm:$0xff] %v8059_v58  ;;  %v8079_v39 = vmul.f32 %v7829_v56, %v11867_v6  ;;  %v11869_v58 = vld [vmem:[#allocation95_spill] sm:$0xff]  ;;  %v8099_v6 = vmul.f32 %v7829_v56, %v7094_v43  ;;  %v8119_v43 = vmul.f32 %v7829_v56, %v7124_v48 }
 0x632   :  { %11863 = vst [vmem:[#allocation59_spill] sm:$0xff] %v8067_v26  ;;  %v8083_v61 = vmul.f32 %v7829_v56, %v11869_v58  ;;  %v11872_v26 = vld [vmem:[#allocation97_spill] sm:$0xff] }
 0x633   :  { %11865 = vst [vmem:[#allocation61_spill] sm:$0xff] %v8071_v37  ;;  %v8091_v14 = vmul.f32 %v7829_v56, %v11872_v26  ;;  %v11874_v37 = vld [vmem:[#allocation99_spill] sm:$0xff] }
 0x634   :  { %11868 = vst [vmem:[#allocation63_spill] sm:$0xff] %v8079_v39  ;;  %v8095_v59 = vmul.f32 %v7829_v56, %v11874_v37  ;;  %v11875_v39 = vld [vmem:[#allocation101_spill] sm:$0xff] }
 0x635   :  { %11870 = vst [vmem:[#allocation65_spill] sm:$0xff] %v8083_v61  ;;  %v8103_v58 = vmul.f32 %v7829_v56, %v11875_v39  ;;  %v11876_v61 = vld [vmem:[#allocation103_spill] sm:$0xff]  ;;  %v8123_v39 = vmul.f32 %v7829_v56, %v7130_v24 }
 0x636   :  { %11871 = vst [vmem:[#allocation67_spill] sm:$0xff] %v8087_v54  ;;  %v8107_v15 = vmul.f32 %v7829_v56, %v11876_v61  ;;  %v11878_v54 = vld [vmem:[#allocation105_spill] sm:$0xff]  ;;  %v8127_v61 = vmul.f32 %v7829_v56, %v7136_v9 }
 0x637   :  { %11873 = vst [vmem:[#allocation69_spill] sm:$0xff] %v8091_v14  ;;  %v8111_v26 = vmul.f32 %v7829_v56, %v11878_v54  ;;  %v11880_v14 = vld [vmem:[#allocation107_spill] sm:$0xff] }
 0x638   :  { %11877 = vst [vmem:[#allocation71_spill] sm:$0xff] %v8107_v15  ;;  %v8115_v37 = vmul.f32 %v7829_v56, %v11880_v14  ;;  %v11885_v15 = vld [vmem:[#allocation109_spill] sm:$0xff] }
 0x639   :  { %11879 = vst [vmem:[#allocation73_spill] sm:$0xff] %v8111_v26  ;;  %v8131_v54 = vmul.f32 %v7829_v56, %v11885_v15  ;;  %v11887_v26 = vld [vmem:[#allocation111_spill] sm:$0xff] }
 0x63a   :  { %11881 = vst [vmem:[#allocation75_spill] sm:$0xff] %v8115_v37  ;;  %v8135_v14 = vmul.f32 %v7829_v56, %v11887_v26  ;;  %v11889_v37 = vld [vmem:[#allocation113_spill] sm:$0xff] }
 0x63b   :  { %11882 = vst [vmem:[#allocation77_spill] sm:$0xff] %v8119_v43  ;;  %v8139_v48 = vmul.f32 %v7829_v56, %v11889_v37  ;;  %v11891_v43 = vld [vmem:[#allocation115_spill] sm:$0xff] }
 0x63c   :  { %11883 = vst [vmem:[#allocation79_spill] sm:$0xff] %v8123_v39  ;;  %v8143_v24 = vmul.f32 %v7829_v56, %v11891_v43  ;;  %v11893_v39 = vld [vmem:[#allocation117_spill] sm:$0xff] }
 0x63d   :  { %11884 = vst [vmem:[#allocation81_spill] sm:$0xff] %v8127_v61  ;;  %v8147_v9 = vmul.f32 %v7829_v56, %v11893_v39  ;;  %v11895_v61 = vld [vmem:[#allocation119_spill] sm:$0xff] }
 0x63e   :  { %11886 = vst [vmem:[#allocation83_spill] sm:$0xff] %v8131_v54  ;;  %v8151_v15 = vmul.f32 %v7829_v56, %v11895_v61  ;;  %v11897_v54 = vld [vmem:[#allocation121_spill] sm:$0xff] }
 0x63f   :  { %11888 = vst [vmem:[#allocation85_spill] sm:$0xff] %v8135_v14  ;;  %v8155_v26 = vmul.f32 %v7829_v56, %v11897_v54  ;;  %v11899_v14 = vld [vmem:[#allocation124_spill] sm:$0xff] }
 0x640   :  { %11890 = vst [vmem:[#allocation87_spill] sm:$0xff] %v8139_v48  ;;  %v8159_v37 = vmul.f32 %v7829_v56, %v11899_v14  ;;  %v11901_v48 = vld [vmem:[#allocation126_spill] sm:$0xff] }
 0x641   :  { %11892 = vst [vmem:[#allocation89_spill] sm:$0xff] %v8143_v24  ;;  %v8163_v43 = vmul.f32 %v7829_v56, %v11901_v48  ;;  %v11903_v24 = vld [vmem:[#allocation127_spill] sm:$0xff] }
 0x642   :  { %11894 = vst [vmem:[#allocation91_spill] sm:$0xff] %v8147_v9  ;;  %v8167_v39 = vmul.f32 %v7829_v56, %v11903_v24  ;;  %v11905_v9 = vld [vmem:[#allocation129_spill] sm:$0xff] }
 0x643   :  { %11896 = vst [vmem:[#allocation93_spill] sm:$0xff] %v8151_v15  ;;  %v8171_v61 = vmul.f32 %v7829_v56, %v11905_v9  ;;  %v11907_v15 = vld [vmem:[#allocation131_spill] sm:$0xff] }
 0x644   :  { %11898 = vst [vmem:[#allocation95_spill] sm:$0xff] %v8155_v26  ;;  %v8175_v54 = vmul.f32 %v7829_v56, %v11907_v15  ;;  %v11909_v26 = vld [vmem:[#allocation132_spill] sm:$0xff] }
 0x645   :  { %11900 = vst [vmem:[#allocation97_spill] sm:$0xff] %v8159_v37  ;;  %v8179_v14 = vmul.f32 %v7829_v56, %v11909_v26  ;;  %v11911_v37 = vld [vmem:[#allocation135_spill] sm:$0xff] }
 0x646   :  { %11902 = vst [vmem:[#allocation99_spill] sm:$0xff] %v8163_v43  ;;  %v8183_v48 = vmul.f32 %v7829_v56, %v11911_v37  ;;  %v11913_v43 = vld [vmem:[#allocation136_spill] sm:$0xff] }
 0x647   :  { %11904 = vst [vmem:[#allocation101_spill] sm:$0xff] %v8167_v39  ;;  %v8187_v24 = vmul.f32 %v7829_v56, %v11913_v43  ;;  %v11915_v39 = vld [vmem:[#allocation137_spill] sm:$0xff] }
 0x648   :  { %11906 = vst [vmem:[#allocation103_spill] sm:$0xff] %v8171_v61  ;;  %v8191_v9 = vmul.f32 %v7829_v56, %v11915_v39  ;;  %v11917_v61 = vld [vmem:[#allocation138_spill] sm:$0xff] }
 0x649   :  { %11908 = vst [vmem:[#allocation105_spill] sm:$0xff] %v8175_v54  ;;  %v8195_v15 = vmul.f32 %v7829_v56, %v11917_v61  ;;  %v11919_v54 = vld [vmem:[#allocation143_spill] sm:$0xff] }
 0x64a   :  { %11910 = vst [vmem:[#allocation107_spill] sm:$0xff] %v8179_v14  ;;  %v8199_v26 = vmul.f32 %v7829_v56, %v11919_v54  ;;  %v11921_v14 = vld [vmem:[#allocation144_spill] sm:$0xff] }
 0x64b   :  { %11912 = vst [vmem:[#allocation109_spill] sm:$0xff] %v8183_v48  ;;  %v8203_v37 = vmul.f32 %v7829_v56, %v11921_v14  ;;  %v11923_v48 = vld [vmem:[#allocation145_spill] sm:$0xff] }
 0x64c   :  { %11914 = vst [vmem:[#allocation111_spill] sm:$0xff] %v8187_v24  ;;  %v8207_v43 = vmul.f32 %v7829_v56, %v11923_v48  ;;  %v11925_v24 = vld [vmem:[#allocation146_spill] sm:$0xff] }
 0x64d   :  { %11916 = vst [vmem:[#allocation113_spill] sm:$0xff] %v8191_v9  ;;  %v8211_v39 = vmul.f32 %v7829_v56, %v11925_v24  ;;  %v11927_v9 = vld [vmem:[#allocation147_spill] sm:$0xff] }
 0x64e   :  { %11918 = vst [vmem:[#allocation115_spill] sm:$0xff] %v8195_v15  ;;  %v8215_v61 = vmul.f32 %v7829_v56, %v11927_v9  ;;  %v11929_v15 = vld [vmem:[#allocation149_spill] sm:$0xff] }
 0x64f   :  { %11920 = vst [vmem:[#allocation117_spill] sm:$0xff] %v8199_v26  ;;  %v8219_v54 = vmul.f32 %v7829_v56, %v11929_v15  ;;  %v11931_v26 = vld [vmem:[#allocation151_spill] sm:$0xff] }
 0x650   :  { %11922 = vst [vmem:[#allocation119_spill] sm:$0xff] %v8203_v37  ;;  %v8223_v14 = vmul.f32 %v7829_v56, %v11931_v26  ;;  %v11933_v37 = vld [vmem:[#allocation152_spill] sm:$0xff] }
 0x651   :  { %11924 = vst [vmem:[#allocation121_spill] sm:$0xff] %v8207_v43  ;;  %v8227_v48 = vmul.f32 %v7829_v56, %v11933_v37  ;;  %v11935_v43 = vld [vmem:[#allocation153_spill] sm:$0xff] }
 0x652   :  { %11926 = vst [vmem:[#allocation124_spill] sm:$0xff] %v8211_v39  ;;  %v8231_v24 = vmul.f32 %v7829_v56, %v11935_v43  ;;  %v11937_v39 = vld [vmem:[#allocation154_spill] sm:$0xff] }
 0x653   :  { %11928 = vst [vmem:[#allocation126_spill] sm:$0xff] %v8215_v61  ;;  %v8235_v9 = vmul.f32 %v7829_v56, %v11937_v39  ;;  %v11939_v61 = vld [vmem:[#allocation155_spill] sm:$0xff] }
 0x654   :  { %11930 = vst [vmem:[#allocation127_spill] sm:$0xff] %v8219_v54  ;;  %v8239_v15 = vmul.f32 %v7829_v56, %v11939_v61  ;;  %v11941_v54 = vld [vmem:[#allocation24_spill] sm:$0xff] }
 0x655   :  { %11932 = vst [vmem:[#allocation129_spill] sm:$0xff] %v8223_v14  ;;  %v8243_v26 = vmul.f32 %v7829_v56, %v11941_v54  ;;  %v11943_v14 = vld [vmem:[#allocation26_spill] sm:$0xff] }
 0x656   :  { %11934 = vst [vmem:[#allocation131_spill] sm:$0xff] %v8227_v48  ;;  %v8247_v37 = vmul.f32 %v7829_v56, %v11943_v14  ;;  %v11945_v48 = vld [vmem:[#allocation28_spill] sm:$0xff] }
 0x657   :  { %11936 = vst [vmem:[#allocation132_spill] sm:$0xff] %v8231_v24  ;;  %v8251_v43 = vmul.f32 %v7829_v56, %v11945_v48  ;;  %v11947_v24 = vld [vmem:[#allocation30_spill] sm:$0xff] }
 0x658   :  { %11938 = vst [vmem:[#allocation135_spill] sm:$0xff] %v8235_v9  ;;  %v8255_v39 = vmul.f32 %v7829_v56, %v11947_v24  ;;  %v11949_v9 = vld [vmem:[#allocation32_spill] sm:$0xff] }
 0x659   :  { %11940 = vst [vmem:[#allocation136_spill] sm:$0xff] %v8239_v15  ;;  %v8259_v61 = vmul.f32 %v7829_v56, %v11949_v9  ;;  %v11951_v15 = vld [vmem:[#allocation34_spill] sm:$0xff] }
 0x65a   :  { %11942 = vst [vmem:[#allocation137_spill] sm:$0xff] %v8243_v26  ;;  %v8263_v54 = vmul.f32 %v7829_v56, %v11951_v15  ;;  %v11953_v26 = vld [vmem:[#allocation36_spill] sm:$0xff] }
 0x65b   :  { %11944 = vst [vmem:[#allocation138_spill] sm:$0xff] %v8247_v37  ;;  %v8267_v14 = vmul.f32 %v7829_v56, %v11953_v26  ;;  %v11955_v37 = vld [vmem:[#allocation38_spill] sm:$0xff] }
 0x65c   :  { %11946 = vst [vmem:[#allocation143_spill] sm:$0xff] %v8251_v43  ;;  %v8271_v48 = vmul.f32 %v7829_v56, %v11955_v37  ;;  %v11957_v43 = vld [vmem:[#allocation40_spill] sm:$0xff] }
 0x65d   :  { %11948 = vst [vmem:[#allocation144_spill] sm:$0xff] %v8255_v39  ;;  %v8275_v24 = vmul.f32 %v7829_v56, %v11957_v43  ;;  %v11959_v39 = vld [vmem:[#allocation42_spill] sm:$0xff] }
 0x65e   :  { %11950 = vst [vmem:[#allocation145_spill] sm:$0xff] %v8259_v61  ;;  %v8279_v9 = vmul.f32 %v7829_v56, %v11959_v39  ;;  %v11961_v61 = vld [vmem:[#allocation44_spill] sm:$0xff] }
 0x65f   :  { %11952 = vst [vmem:[#allocation146_spill] sm:$0xff] %v8263_v54  ;;  %v8283_v15 = vmul.f32 %v7829_v56, %v11961_v61  ;;  %v11963_v54 = vld [vmem:[#allocation46_spill] sm:$0xff] }
 0x660   :  { %11954 = vst [vmem:[#allocation147_spill] sm:$0xff] %v8267_v14  ;;  %v8287_v26 = vmul.f32 %v7829_v56, %v11963_v54  ;;  %v11965_v14 = vld [vmem:[#allocation48_spill] sm:$0xff] }
 0x661   :  { %11956 = vst [vmem:[#allocation149_spill] sm:$0xff] %v8271_v48  ;;  %v8291_v37 = vmul.f32 %v7829_v56, %v11965_v14  ;;  %v11967_v48 = vld [vmem:[#allocation50_spill] sm:$0xff] }
 0x662   :  { %11958 = vst [vmem:[#allocation151_spill] sm:$0xff] %v8275_v24  ;;  %v8295_v43 = vmul.f32 %v7829_v56, %v11967_v48  ;;  %v11969_v24 = vld [vmem:[#allocation52_spill] sm:$0xff] }
 0x663   :  { %11960 = vst [vmem:[#allocation152_spill] sm:$0xff] %v8279_v9  ;;  %v8299_v39 = vmul.f32 %v7829_v56, %v11969_v24  ;;  %v11971_v9 = vld [vmem:[#allocation54_spill] sm:$0xff] }
 0x664   :  { %11962 = vst [vmem:[#allocation153_spill] sm:$0xff] %v8283_v15  ;;  %v8303_v61 = vmul.f32 %v7829_v56, %v11971_v9  ;;  %v11973_v15 = vld [vmem:[#allocation56_spill] sm:$0xff] }
 0x665   :  { %11964 = vst [vmem:[#allocation154_spill] sm:$0xff] %v8287_v26  ;;  %v8307_v54 = vmul.f32 %v7829_v56, %v11973_v15  ;;  %v11975_v26 = vld [vmem:[#allocation58_spill] sm:$0xff] }
 0x666   :  { %11966 = vst [vmem:[#allocation155_spill] sm:$0xff] %v8291_v37  ;;  %v8311_v14 = vmul.f32 %v7829_v56, %v11975_v26  ;;  %v11977_v37 = vld [vmem:[#allocation60_spill] sm:$0xff] }
 0x667   :  { %11968 = vst [vmem:[#allocation24_spill] sm:$0xff] %v8295_v43  ;;  %v8315_v48 = vmul.f32 %v7829_v56, %v11977_v37  ;;  %v11979_v43 = vld [vmem:[#allocation62_spill] sm:$0xff] }
 0x668   :  { %11970 = vst [vmem:[#allocation26_spill] sm:$0xff] %v8299_v39  ;;  %v8319_v24 = vmul.f32 %v7829_v56, %v11979_v43  ;;  %v11981_v39 = vld [vmem:[#allocation64_spill] sm:$0xff] }
 0x669   :  { %11972 = vst [vmem:[#allocation28_spill] sm:$0xff] %v8303_v61  ;;  %v8323_v9 = vmul.f32 %v7829_v56, %v11981_v39  ;;  %v11983_v61 = vld [vmem:[#allocation66_spill] sm:$0xff] }
 0x66a   :  { %11974 = vst [vmem:[#allocation30_spill] sm:$0xff] %v8307_v54  ;;  %v8327_v15 = vmul.f32 %v7829_v56, %v11983_v61  ;;  %v11985_v54 = vld [vmem:[#allocation68_spill] sm:$0xff] }
 0x66b   :  { %11976 = vst [vmem:[#allocation32_spill] sm:$0xff] %v8311_v14  ;;  %v8331_v26 = vmul.f32 %v7829_v56, %v11985_v54  ;;  %v11986_v14 = vld [vmem:[#allocation70_spill] sm:$0xff] }
 0x66c   :  { %11978 = vst [vmem:[#allocation34_spill] sm:$0xff] %v8315_v48  ;;  %v8335_v37 = vmul.f32 %v7829_v56, %v11986_v14  ;;  %v11987_v48 = vld [vmem:[#allocation72_spill] sm:$0xff]  ;;  %v8355_v14 = vmul.f32 %v7829_v56, %v7478_v33  ;;  %v8375_v33 = vmul.f32 %v7829_v56, %v7508_v62  ;;  %v8395_v62 = vmul.f32 %v7829_v56, %v7538_v21 }
 0x66d   :  { %11980 = vst [vmem:[#allocation36_spill] sm:$0xff] %v8319_v24  ;;  %v8339_v43 = vmul.f32 %v7829_v56, %v11987_v48  ;;  %v11988_v24 = vld [vmem:[#allocation74_spill] sm:$0xff]  ;;  %v8359_v48 = vmul.f32 %v7829_v56, %v7484_v41  ;;  %v8379_v41 = vmul.f32 %v7829_v56, %v7514_v18  ;;  %v8399_v18 = vmul.f32 %v7829_v56, %v7544_v20 }
 0x66e   :  { %11982 = vst [vmem:[#allocation38_spill] sm:$0xff] %v8323_v9  ;;  %v8343_v39 = vmul.f32 %v7829_v56, %v11988_v24  ;;  %v11990_v9 = vld [vmem:[#allocation76_spill] sm:$0xff]  ;;  %v8363_v24 = vmul.f32 %v7829_v56, %v7490_v1  ;;  %v8383_v1 = vmul.f32 %v7829_v56, %v7520_v7  ;;  %v8403_v7 = vmul.f32 %v7829_v56, %v7550_v55 }
 0x66f   :  { %11984 = vst [vmem:[#allocation40_spill] sm:$0xff] %v8327_v15  ;;  %v8347_v61 = vmul.f32 %v7829_v56, %v11990_v9  ;;  %v11991_v15 = vld [vmem:[#allocation78_spill] sm:$0xff]  ;;  %v8415_v21 = vmul.f32 %v7829_v56, %v7568_v16  ;;  %v8419_v20 = vmul.f32 %v7829_v56, %v7574_v32  ;;  %v8423_v55 = vmul.f32 %v7829_v56, %v7580_v44 }
 0x670   :  { %11989 = vst [vmem:[#allocation42_spill] sm:$0xff] %v8343_v39  ;;  %v8351_v54 = vmul.f32 %v7829_v56, %v11991_v15  ;;  %v11992_v39 = vld [vmem:[#allocation80_spill] sm:$0xff]  ;;  %v8371_v15 = vmul.f32 %v7829_v56, %v7502_v17  ;;  %v8435_v16 = vmul.f32 %v7829_v56, %v7598_v46  ;;  %v8439_v32 = vmul.f32 %v7829_v56, %v7604_v25 }
 0x671   :  { %v8367_v9 = vmul.f32 %v7829_v56, %v11992_v39  ;;  %11994 = vst [vmem:[#allocation46_spill] sm:$0xff] %v8383_v1  ;;  %v8387_v39 = vmul.f32 %v7829_v56, %v7526_v40  ;;  %v11998_v1 = vld [vmem:[#allocation84_spill] sm:$0xff]  ;;  %v8443_v44 = vmul.f32 %v7829_v56, %v7610_v49  ;;  %v8455_v46 = vmul.f32 %v7829_v56, %v7628_v22 }
 0x672   :  { %11997 = vst [vmem:[#allocation50_spill] sm:$0xff] %v8403_v7  ;;  %v8407_v40 = vmul.f32 %v7829_v56, %v11998_v1  ;;  %v12002_v7 = vld [vmem:[#allocation88_spill] sm:$0xff]  ;;  %v8459_v25 = vmul.f32 %v7829_v56, %v7634_v35  ;;  %v8475_v22 = vmul.f32 %v7829_v56, %v7658_v13  ;;  %v8495_v13 = vmul.f32 %v7829_v56, %v7688_v2 }
 0x673   :  { %11993 = vst [vmem:[#allocation44_spill] sm:$0xff] %v8367_v9  ;;  %v11996_v9 = vld [vmem:[#allocation82_spill] sm:$0xff]  ;;  %v8427_v1 = vmul.f32 %v7829_v56, %v12002_v7 }
 0x674   :  { %11995 = vst [vmem:[#allocation48_spill] sm:$0xff] %v8387_v39  ;;  %v8391_v17 = vmul.f32 %v7829_v56, %v11996_v9  ;;  %v12000_v39 = vld [vmem:[#allocation86_spill] sm:$0xff] }
 0x675   :  { %11999 = vst [vmem:[#allocation52_spill] sm:$0xff] %v8407_v40  ;;  %v8411_v9 = vmul.f32 %v7829_v56, %v12000_v39  ;;  %v12004_v40 = vld [vmem:[#allocation90_spill] sm:$0xff] }
 0x676   :  { %12001 = vst [vmem:[#allocation54_spill] sm:$0xff] %v8423_v55  ;;  %v8431_v39 = vmul.f32 %v7829_v56, %v12004_v40  ;;  %v12007_v55 = vld [vmem:[#allocation92_spill] sm:$0xff] }
 0x677   :  { %12003 = vst [vmem:[#allocation56_spill] sm:$0xff] %v8427_v1  ;;  %v8447_v7 = vmul.f32 %v7829_v56, %v12007_v55  ;;  %v12008_v1 = vld [vmem:[#allocation94_spill] sm:$0xff] }
 0x678   :  { %12005 = vst [vmem:[#allocation58_spill] sm:$0xff] %v8439_v32  ;;  %v8451_v40 = vmul.f32 %v7829_v56, %v12008_v1  ;;  %v12011_v32 = vld [vmem:[#allocation96_spill] sm:$0xff]  ;;  %v8471_v1 = vmul.f32 %v7829_v56, %v7652_v3  ;;  %v8491_v3 = vmul.f32 %v7829_v56, %v7682_v38  ;;  %v8511_v38 = vmul.f32 %v7829_v56, %v7712_v31 }
 0x679   :  { %12006 = vst [vmem:[#allocation60_spill] sm:$0xff] %v8443_v44  ;;  %v8463_v49 = vmul.f32 %v7829_v56, %v12011_v32  ;;  %v12013_v44 = vld [vmem:[#allocation98_spill] sm:$0xff]  ;;  %v8531_v31 = vmul.f32 %v7829_v56, %v7742_v51 }
 0x67a   :  { %12009 = vst [vmem:[#allocation62_spill] sm:$0xff] %v8455_v46  ;;  %v8467_v55 = vmul.f32 %v7829_v56, %v12013_v44  ;;  %v12015_v46 = vld [vmem:[#allocation100_spill] sm:$0xff] }
 0x67b   :  { %12010 = vst [vmem:[#allocation64_spill] sm:$0xff] %v8459_v25  ;;  %v8479_v35 = vmul.f32 %v7829_v56, %v12015_v46  ;;  %v12017_v25 = vld [vmem:[#allocation102_spill] sm:$0xff] }
 0x67c   :  { %12012 = vst [vmem:[#allocation66_spill] sm:$0xff] %v8463_v49  ;;  %v8483_v32 = vmul.f32 %v7829_v56, %v12017_v25  ;;  %v12018_v49 = vld [vmem:[#allocation104_spill] sm:$0xff] }
 0x67d   :  { %12014 = vst [vmem:[#allocation68_spill] sm:$0xff] %v8475_v22  ;;  %v8487_v44 = vmul.f32 %v7829_v56, %v12018_v49  ;;  %v12021_v22 = vld [vmem:[#allocation112_spill] sm:$0xff]  ;;  %v8507_v49 = vmul.f32 %v7829_v56, %v7706_v63  ;;  %v8527_v63 = vmul.f32 %v7829_v56, %v7736_v45 }
 0x67e   :  { %12016 = vst [vmem:[#allocation70_spill] sm:$0xff] %v8479_v35  ;;  %v8499_v46 = vmul.f32 %v7829_v56, %v12021_v22  ;;  %v12023_v35 = vld [vmem:[#allocation123_spill] sm:$0xff]  ;;  %v8519_v22 = vmul.f32 %v7829_v56, %v7724_v12  ;;  %v8539_v12 = vmul.f32 %v7829_v56, %v7754_v42 }
 0x67f   :  { %12019 = vst [vmem:[#allocation72_spill] sm:$0xff] %v8491_v3  ;;  %v8503_v25 = vmul.f32 %v7829_v56, %v12023_v35  ;;  %v12027_v3 = vld [vmem:[#allocation128_spill] sm:$0xff]  ;;  %v8523_v35 = vmul.f32 %v7829_v56, %v7730_v52 }
 0x680   :  { %12020 = vst [vmem:[#allocation74_spill] sm:$0xff] %v8495_v13  ;;  %v8515_v2 = vmul.f32 %v7829_v56, %v12027_v3  ;;  %v8535_v3 = vmul.f32 %v7829_v56, %v7748_v0  ;;  %v12072_v13 = vld [vmem:[#allocation11_spill] sm:$0xff] }
 0x681   :  { %12022 = vst [vmem:[#allocation76_spill] sm:$0xff] %v8499_v46  ;;  %v12070_v46 = vld [vmem:[#allocation125_spill] sm:$0xff] }
 0x682   :  { %12024 = vst [vmem:[#allocation78_spill] sm:$0xff] %v8503_v25  ;;  %v12068_v25 = vld [vmem:[#allocation122_spill] sm:$0xff] }
 0x683   :  { %12025 = vst [vmem:[#allocation80_spill] sm:$0xff] %v8507_v49  ;;  %v12066_v49 = vld [vmem:[#allocation120_spill] sm:$0xff] }
 0x684   :  { %12026 = vst [vmem:[#allocation82_spill] sm:$0xff] %v8511_v38  ;;  %v12064_v38 = vld [vmem:[#allocation118_spill] sm:$0xff] }
 0x685   :  { %12028 = vst [vmem:[#allocation84_spill] sm:$0xff] %v8515_v2  ;;  %v12062_v2 = vld [vmem:[#allocation116_spill] sm:$0xff] }
 0x686   :  { %12029 = vst [vmem:[#allocation86_spill] sm:$0xff] %v8519_v22  ;;  %v12035_v22 = vld [vmem:[#allocation130_spill] sm:$0xff] }
 0x687   :  { %12030 = vst [vmem:[#allocation88_spill] sm:$0xff] %v8523_v35  ;;  %v8543_v52 = vmul.f32 %v7829_v56, %v12035_v22  ;;  %v12037_v35 = vld [vmem:[#allocation133_spill] sm:$0xff] }
 0x688   :  { %12031 = vst [vmem:[#allocation90_spill] sm:$0xff] %v8527_v63  ;;  %v8547_v45 = vmul.f32 %v7829_v56, %v12037_v35  ;;  %v12039_v63 = vld [vmem:[#allocation134_spill] sm:$0xff] }
 0x689   :  { %12032 = vst [vmem:[#allocation92_spill] sm:$0xff] %v8531_v31  ;;  %v8551_v51 = vmul.f32 %v7829_v56, %v12039_v63  ;;  %v12041_v31 = vld [vmem:[#allocation139_spill] sm:$0xff] }
 0x68a   :  { %12033 = vst [vmem:[#allocation94_spill] sm:$0xff] %v8535_v3  ;;  %v8555_v0 = vmul.f32 %v7829_v56, %v12041_v31  ;;  %v12043_v3 = vld [vmem:[#allocation140_spill] sm:$0xff] }
 0x68b   :  { %12034 = vst [vmem:[#allocation96_spill] sm:$0xff] %v8539_v12  ;;  %v8559_v42 = vmul.f32 %v7829_v56, %v12043_v3  ;;  %v12045_v12 = vld [vmem:[#allocation141_spill] sm:$0xff]  ;;  %v8579_v3 = vmul.f32 %v7829_v56, %v6698_v27  ;;  %v8599_v27 = vadd.f32 %v7827_v36, %v7851_v5  ;;  %v8623_v5 = vadd.f32 %v7827_v36, %v7875_v57 }
 0x68c   :  { %12036 = vst [vmem:[#allocation98_spill] sm:$0xff] %v8543_v52  ;;  %v8563_v22 = vmul.f32 %v7829_v56, %v12045_v12  ;;  %v12047_v52 = vld [vmem:[#allocation142_spill] sm:$0xff]  ;;  %v8583_v12 = vadd.f32 %v7827_v36, %v7835_v34  ;;  %v8607_v34 = vadd.f32 %v7827_v36, %v7859_v60  ;;  %v8631_v60 = vadd.f32 %v7827_v36, %v7883_v11 }
 0x68d   :  { %12038 = vst [vmem:[#allocation100_spill] sm:$0xff] %v8547_v45  ;;  %v8567_v35 = vmul.f32 %v7829_v56, %v12047_v52  ;;  %v12049_v45 = vld [vmem:[#allocation148_spill] sm:$0xff]  ;;  %v8587_v52 = vadd.f32 %v7827_v36, %v7839_v53  ;;  %v8611_v53 = vadd.f32 %v7827_v36, %v7863_v50  ;;  %v8635_v50 = vadd.f32 %v7827_v36, %v7887_v28 }
 0x68e   :  { %12040 = vst [vmem:[#allocation102_spill] sm:$0xff] %v8551_v51  ;;  %v8571_v63 = vmul.f32 %v7829_v56, %v12049_v45  ;;  %v12051_v51 = vld [vmem:[#allocation150_spill] sm:$0xff]  ;;  %v8591_v45 = vadd.f32 %v7827_v36, %v7843_v8  ;;  %v8615_v8 = vadd.f32 %v7827_v36, %v7867_v4  ;;  %v12054_v4 = vld [vmem:[#allocation156_spill] sm:$0xff]  ;;  %vm3427_vm5 = vcmp.gt.f32.partialorder %v8583_v12, 0.0 }
 0x68f   :  { %12042 = vst [vmem:[#allocation104_spill] sm:$0xff] %v8555_v0  ;;  %v8575_v31 = vmul.f32 %v7829_v56, %v12051_v51  ;;  %v8595_v51 = vadd.f32 %v7827_v36, %v7847_v29  ;;  %v8603_v56 = vadd.f32 %v7827_v36, %v7855_v10  ;;  %v8619_v29 = vadd.f32 %v7827_v36, %v7871_v30  ;;  %v12061_v0 = vld [vmem:[#allocation114_spill] sm:$0xff] }
 0x690   :  { %12044 = vst [vmem:[#allocation112_spill] sm:$0xff] %v8559_v42  ;;  %v8627_v10 = vadd.f32 %v7827_v36, %v7879_v47  ;;  %v8639_v30 = vadd.f32 %v7827_v36, %v12054_v4  ;;  %v12060_v42 = vld [vmem:[#allocation110_spill] sm:$0xff]  ;;  %vm3428_vm6 = vcmp.gt.f32.partialorder %v8587_v52, 0.0  ;;  %vm3429_vm7 = vcmp.gt.f32.partialorder %v8591_v45, 0.0 }
 0x691   :  { %12046 = vst [vmem:[#allocation123_spill] sm:$0xff] %v8563_v22  ;;  %v12059_v22 = vld [vmem:[#allocation108_spill] sm:$0xff]  ;;  %vm3430_vm8 = vcmp.gt.f32.partialorder %v8595_v51, 0.0  ;;  %vm3431_vm9 = vcmp.gt.f32.partialorder %v8599_v27, 0.0  ;;  %vm3432_vm10 = vcmp.gt.f32.partialorder %v8603_v56, 0.0  ;;  %vm3433_vm11 = vcmp.gt.f32.partialorder %v8607_v34, 0.0 }
 0x692   :  { %12048 = vst [vmem:[#allocation128_spill] sm:$0xff] %v8567_v35  ;;  %v12058_v35 = vld [vmem:[#allocation106_spill] sm:$0xff]  ;;  %v8659_v4 = vadd.f32 %v7827_v36, %v12059_v22  ;;  %v8679_v22 = vadd.f32 %v7827_v36, %v12066_v49  ;;  %vm3434_vm12 = vcmp.gt.f32.partialorder %v8611_v53, 0.0  ;;  %vm3435_vm13 = vcmp.gt.f32.partialorder %v8615_v8, 0.0 }
 0x693   :  { %12050 = vst [vmem:[#allocation130_spill] sm:$0xff] %v8571_v63  ;;  %v12057_v63 = vld [vmem:[#allocation159_spill] sm:$0xff]  ;;  %v8655_v28 = vadd.f32 %v7827_v36, %v12058_v35  ;;  %v8675_v35 = vadd.f32 %v7827_v36, %v12064_v38  ;;  %vm3436_vm14 = vcmp.gt.f32.partialorder %v8619_v29, 0.0  ;;  %vm3437_vm15 = vcmp.gt.f32.partialorder %v8623_v5, 0.0 }
 0x694   :  { %12052 = vst [vmem:[#allocation133_spill] sm:$0xff] %v8575_v31  ;;  %v12056_v31 = vld [vmem:[#allocation158_spill] sm:$0xff]  ;;  %v8651_v11 = vadd.f32 %v7827_v36, %v12057_v63  ;;  %v8671_v63 = vadd.f32 %v7827_v36, %v12062_v2  ;;  %v8691_v2 = vadd.f32 %v7827_v36, %v12072_v13  ;;  %vm3438_vm0 = vcmp.gt.f32.partialorder %v8627_v10, 0.0 }
 0x695   :  { %12053 = vst [vmem:[#allocation134_spill] sm:$0xff] %v8579_v3  ;;  %v12055_v3 = vld [vmem:[#allocation157_spill] sm:$0xff]  ;;  %v8647_v47 = vadd.f32 %v7827_v36, %v12056_v31  ;;  %v8667_v31 = vadd.f32 %v7827_v36, %v12061_v0  ;;  %v8687_v0 = vadd.f32 %v7827_v36, %v12070_v46  ;;  %vm3445_vm4 = vcmp.gt.f32.partialorder %v8655_v28, 0.0 }
 0x696   :  { %v8643_v57 = vadd.f32 %v7827_v36, %v12055_v3  ;;  %v8663_v3 = vadd.f32 %v7827_v36, %v12060_v42  ;;  %12063 = vst [vmem:[#allocation139_spill] sm:$0xff] %v8671_v63  ;;  %v8683_v42 = vadd.f32 %v7827_v36, %v12068_v25  ;;  %v12074_v63 = vld [vmem:[#allocation12_spill] sm:$0xff] }
 0x697   :  { %12065 = vst [vmem:[#allocation140_spill] sm:$0xff] %v8675_v35  ;;  %v8695_v38 = vadd.f32 %v7827_v36, %v12074_v63  ;;  %v12076_v35 = vld [vmem:[#allocation13_spill] sm:$0xff]  ;;  %vm3448_vm2 = vcmp.gt.f32.partialorder %v8667_v31, 0.0 }
 0x698   :  { %12067 = vst [vmem:[#allocation141_spill] sm:$0xff] %v8679_v22  ;;  %v8699_v49 = vadd.f32 %v7827_v36, %v12076_v35  ;;  %v12078_v22 = vld [vmem:[#allocation14_spill] sm:$0xff] }
 0x699   :  { %12069 = vst [vmem:[#allocation142_spill] sm:$0xff] %v8683_v42  ;;  %v8703_v25 = vadd.f32 %v7827_v36, %v12078_v22  ;;  %v12080_v42 = vld [vmem:[#allocation15_spill] sm:$0xff] }
 0x69a   :  { %12071 = vst [vmem:[#allocation148_spill] sm:$0xff] %v8687_v0  ;;  %v8707_v46 = vadd.f32 %v7827_v36, %v12080_v42  ;;  %v12082_v0 = vld [vmem:[#allocation16_spill] sm:$0xff] }
 0x69b   :  { %12073 = vst [vmem:[#allocation150_spill] sm:$0xff] %v8691_v2  ;;  %v8711_v13 = vadd.f32 %v7827_v36, %v12082_v0  ;;  %v12084_v2 = vld [vmem:[#allocation17_spill] sm:$0xff] }
 0x69c   :  { %12075 = vst [vmem:[#allocation156_spill] sm:$0xff] %v8695_v38  ;;  %v8715_v63 = vadd.f32 %v7827_v36, %v12084_v2  ;;  %v12086_v38 = vld [vmem:[#allocation18_spill] sm:$0xff] }
 0x69d   :  { %12077 = vst [vmem:[#allocation157_spill] sm:$0xff] %v8699_v49  ;;  %v8719_v35 = vadd.f32 %v7827_v36, %v12086_v38  ;;  %v12088_v49 = vld [vmem:[#allocation19_spill] sm:$0xff] }
 0x69e   :  { %12079 = vst [vmem:[#allocation158_spill] sm:$0xff] %v8703_v25  ;;  %v8723_v22 = vadd.f32 %v7827_v36, %v12088_v49  ;;  %v12090_v25 = vld [vmem:[#allocation20_spill] sm:$0xff] }
 0x69f   :  { %12081 = vst [vmem:[#allocation159_spill] sm:$0xff] %v8707_v46  ;;  %v8727_v42 = vadd.f32 %v7827_v36, %v12090_v25  ;;  %v12092_v46 = vld [vmem:[#allocation21_spill] sm:$0xff] }
 0x6a0   :  { %12083 = vst [vmem:[#allocation106_spill] sm:$0xff] %v8711_v13  ;;  %v8731_v0 = vadd.f32 %v7827_v36, %v12092_v46  ;;  %v12094_v13 = vld [vmem:[#allocation22_spill] sm:$0xff] }
 0x6a1   :  { %12085 = vst [vmem:[#allocation108_spill] sm:$0xff] %v8715_v63  ;;  %v8735_v2 = vadd.f32 %v7827_v36, %v12094_v13  ;;  %v12096_v63 = vld [vmem:[#allocation23_spill] sm:$0xff] }
 0x6a2   :  { %12087 = vst [vmem:[#allocation110_spill] sm:$0xff] %v8719_v35  ;;  %v8739_v38 = vadd.f32 %v7827_v36, %v12096_v63  ;;  %v12098_v35 = vld [vmem:[#allocation25_spill] sm:$0xff] }
 0x6a3   :  { %12089 = vst [vmem:[#allocation114_spill] sm:$0xff] %v8723_v22  ;;  %v8743_v49 = vadd.f32 %v7827_v36, %v12098_v35  ;;  %v12100_v22 = vld [vmem:[#allocation27_spill] sm:$0xff] }
 0x6a4   :  { %12091 = vst [vmem:[#allocation116_spill] sm:$0xff] %v8727_v42  ;;  %v8747_v25 = vadd.f32 %v7827_v36, %v12100_v22  ;;  %v12102_v42 = vld [vmem:[#allocation29_spill] sm:$0xff] }
 0x6a5   :  { %12093 = vst [vmem:[#allocation118_spill] sm:$0xff] %v8731_v0  ;;  %v8751_v46 = vadd.f32 %v7827_v36, %v12102_v42  ;;  %v12104_v0 = vld [vmem:[#allocation31_spill] sm:$0xff] }
 0x6a6   :  { %12095 = vst [vmem:[#allocation120_spill] sm:$0xff] %v8735_v2  ;;  %v8755_v13 = vadd.f32 %v7827_v36, %v12104_v0  ;;  %v12106_v2 = vld [vmem:[#allocation33_spill] sm:$0xff] }
 0x6a7   :  { %12097 = vst [vmem:[#allocation122_spill] sm:$0xff] %v8739_v38  ;;  %v8759_v63 = vadd.f32 %v7827_v36, %v12106_v2  ;;  %v12108_v38 = vld [vmem:[#allocation35_spill] sm:$0xff] }
 0x6a8   :  { %12099 = vst [vmem:[#allocation125_spill] sm:$0xff] %v8743_v49  ;;  %v8763_v35 = vadd.f32 %v7827_v36, %v12108_v38  ;;  %v12110_v49 = vld [vmem:[#allocation37_spill] sm:$0xff] }
 0x6a9   :  { %12101 = vst [vmem:[#allocation11_spill] sm:$0xff] %v8747_v25  ;;  %v8767_v22 = vadd.f32 %v7827_v36, %v12110_v49  ;;  %v12112_v25 = vld [vmem:[#allocation39_spill] sm:$0xff] }
 0x6aa   :  { %12103 = vst [vmem:[#allocation12_spill] sm:$0xff] %v8751_v46  ;;  %v8771_v42 = vadd.f32 %v7827_v36, %v12112_v25  ;;  %v12114_v46 = vld [vmem:[#allocation41_spill] sm:$0xff] }
 0x6ab   :  { %12105 = vst [vmem:[#allocation13_spill] sm:$0xff] %v8755_v13  ;;  %v8775_v0 = vadd.f32 %v7827_v36, %v12114_v46  ;;  %v12116_v13 = vld [vmem:[#allocation43_spill] sm:$0xff] }
 0x6ac   :  { %12107 = vst [vmem:[#allocation14_spill] sm:$0xff] %v8759_v63  ;;  %v8779_v2 = vadd.f32 %v7827_v36, %v12116_v13  ;;  %v12118_v63 = vld [vmem:[#allocation45_spill] sm:$0xff] }
 0x6ad   :  { %12109 = vst [vmem:[#allocation15_spill] sm:$0xff] %v8763_v35  ;;  %v8783_v38 = vadd.f32 %v7827_v36, %v12118_v63  ;;  %v12120_v35 = vld [vmem:[#allocation47_spill] sm:$0xff] }
 0x6ae   :  { %12111 = vst [vmem:[#allocation16_spill] sm:$0xff] %v8767_v22  ;;  %v8787_v49 = vadd.f32 %v7827_v36, %v12120_v35  ;;  %v12121_v22 = vld [vmem:[#allocation49_spill] sm:$0xff] }
 0x6af   :  { %12113 = vst [vmem:[#allocation17_spill] sm:$0xff] %v8771_v42  ;;  %v8791_v25 = vadd.f32 %v7827_v36, %v12121_v22  ;;  %v12123_v42 = vld [vmem:[#allocation51_spill] sm:$0xff]  ;;  %v8811_v22 = vadd.f32 %v7827_v36, %v8063_v23 }
 0x6b0   :  { %12115 = vst [vmem:[#allocation18_spill] sm:$0xff] %v8775_v0  ;;  %v8795_v46 = vadd.f32 %v7827_v36, %v12123_v42  ;;  %v12125_v0 = vld [vmem:[#allocation53_spill] sm:$0xff] }
 0x6b1   :  { %12117 = vst [vmem:[#allocation19_spill] sm:$0xff] %v8779_v2  ;;  %v8799_v13 = vadd.f32 %v7827_v36, %v12125_v0  ;;  %v12126_v2 = vld [vmem:[#allocation55_spill] sm:$0xff] }
 0x6b2   :  { %12119 = vst [vmem:[#allocation20_spill] sm:$0xff] %v8783_v38  ;;  %v8803_v63 = vadd.f32 %v7827_v36, %v12126_v2  ;;  %v12128_v38 = vld [vmem:[#allocation57_spill] sm:$0xff]  ;;  %v8823_v2 = vadd.f32 %v7827_v36, %v8075_v19  ;;  %v8843_v19 = vadd.f32 %v7827_v36, %v8095_v59 }
 0x6b3   :  { %12122 = vst [vmem:[#allocation21_spill] sm:$0xff] %v8791_v25  ;;  %v8807_v35 = vadd.f32 %v7827_v36, %v12128_v38  ;;  %v12131_v25 = vld [vmem:[#allocation59_spill] sm:$0xff] }
 0x6b4   :  { %12124 = vst [vmem:[#allocation22_spill] sm:$0xff] %v8795_v46  ;;  %v8815_v42 = vadd.f32 %v7827_v36, %v12131_v25  ;;  %v12133_v46 = vld [vmem:[#allocation61_spill] sm:$0xff] }
 0x6b5   :  { %12127 = vst [vmem:[#allocation23_spill] sm:$0xff] %v8803_v63  ;;  %v8819_v0 = vadd.f32 %v7827_v36, %v12133_v46  ;;  %v12136_v63 = vld [vmem:[#allocation63_spill] sm:$0xff] }
 0x6b6   :  { %12129 = vst [vmem:[#allocation25_spill] sm:$0xff] %v8807_v35  ;;  %v8827_v38 = vadd.f32 %v7827_v36, %v12136_v63  ;;  %v12138_v35 = vld [vmem:[#allocation65_spill] sm:$0xff]  ;;  %v8847_v63 = vadd.f32 %v7827_v36, %v8099_v6 }
 0x6b7   :  { %12130 = vst [vmem:[#allocation27_spill] sm:$0xff] %v8811_v22  ;;  %v8831_v23 = vadd.f32 %v7827_v36, %v12138_v35  ;;  %v12140_v22 = vld [vmem:[#allocation67_spill] sm:$0xff]  ;;  %v8851_v35 = vadd.f32 %v7827_v36, %v8103_v58 }
 0x6b8   :  { %12132 = vst [vmem:[#allocation29_spill] sm:$0xff] %v8815_v42  ;;  %v8835_v25 = vadd.f32 %v7827_v36, %v12140_v22  ;;  %v12142_v42 = vld [vmem:[#allocation69_spill] sm:$0xff] }
 0x6b9   :  { %12134 = vst [vmem:[#allocation31_spill] sm:$0xff] %v8819_v0  ;;  %v8839_v46 = vadd.f32 %v7827_v36, %v12142_v42 }
 0x6ba   :  { %12135 = vst [vmem:[#allocation33_spill] sm:$0xff] %v8823_v2 }
 0x6bb   :  { %12137 = vst [vmem:[#allocation35_spill] sm:$0xff] %v8827_v38 }
 0x6bc   :  { %12139 = vst [vmem:[#allocation37_spill] sm:$0xff] %v8831_v23  ;;  %v12147_v23 = vld [vmem:[#allocation71_spill] sm:$0xff] }
 0x6bd   :  { %12141 = vst [vmem:[#allocation39_spill] sm:$0xff] %v8835_v25  ;;  %v8855_v22 = vadd.f32 %v7827_v36, %v12147_v23  ;;  %v12149_v25 = vld [vmem:[#allocation73_spill] sm:$0xff] }
 0x6be   :  { %12143 = vst [vmem:[#allocation41_spill] sm:$0xff] %v8839_v46  ;;  %v8859_v42 = vadd.f32 %v7827_v36, %v12149_v25  ;;  %v12151_v46 = vld [vmem:[#allocation75_spill] sm:$0xff] }
 0x6bf   :  { %12144 = vst [vmem:[#allocation43_spill] sm:$0xff] %v8843_v19  ;;  %v8863_v59 = vadd.f32 %v7827_v36, %v12151_v46  ;;  %v12153_v19 = vld [vmem:[#allocation77_spill] sm:$0xff] }
 0x6c0   :  { %12145 = vst [vmem:[#allocation45_spill] sm:$0xff] %v8847_v63  ;;  %v8867_v6 = vadd.f32 %v7827_v36, %v12153_v19  ;;  %v12155_v63 = vld [vmem:[#allocation79_spill] sm:$0xff] }
 0x6c1   :  { %12146 = vst [vmem:[#allocation47_spill] sm:$0xff] %v8851_v35  ;;  %v8871_v58 = vadd.f32 %v7827_v36, %v12155_v63  ;;  %v12157_v35 = vld [vmem:[#allocation81_spill] sm:$0xff] }
 0x6c2   :  { %12148 = vst [vmem:[#allocation49_spill] sm:$0xff] %v8855_v22  ;;  %v8875_v23 = vadd.f32 %v7827_v36, %v12157_v35  ;;  %v12159_v22 = vld [vmem:[#allocation83_spill] sm:$0xff] }
 0x6c3   :  { %12150 = vst [vmem:[#allocation51_spill] sm:$0xff] %v8859_v42  ;;  %v8879_v25 = vadd.f32 %v7827_v36, %v12159_v22  ;;  %v12161_v42 = vld [vmem:[#allocation85_spill] sm:$0xff] }
 0x6c4   :  { %12152 = vst [vmem:[#allocation53_spill] sm:$0xff] %v8863_v59  ;;  %v8883_v46 = vadd.f32 %v7827_v36, %v12161_v42  ;;  %v12163_v59 = vld [vmem:[#allocation87_spill] sm:$0xff] }
 0x6c5   :  { %12154 = vst [vmem:[#allocation55_spill] sm:$0xff] %v8867_v6  ;;  %v8887_v19 = vadd.f32 %v7827_v36, %v12163_v59  ;;  %v12165_v6 = vld [vmem:[#allocation89_spill] sm:$0xff] }
 0x6c6   :  { %12156 = vst [vmem:[#allocation57_spill] sm:$0xff] %v8871_v58  ;;  %v8891_v63 = vadd.f32 %v7827_v36, %v12165_v6  ;;  %v12167_v58 = vld [vmem:[#allocation91_spill] sm:$0xff] }
 0x6c7   :  { %12158 = vst [vmem:[#allocation59_spill] sm:$0xff] %v8875_v23  ;;  %v8895_v35 = vadd.f32 %v7827_v36, %v12167_v58  ;;  %v12169_v23 = vld [vmem:[#allocation93_spill] sm:$0xff] }
 0x6c8   :  { %12160 = vst [vmem:[#allocation61_spill] sm:$0xff] %v8879_v25  ;;  %v8899_v22 = vadd.f32 %v7827_v36, %v12169_v23  ;;  %v12171_v25 = vld [vmem:[#allocation95_spill] sm:$0xff] }
 0x6c9   :  { %12162 = vst [vmem:[#allocation63_spill] sm:$0xff] %v8883_v46  ;;  %v8903_v42 = vadd.f32 %v7827_v36, %v12171_v25  ;;  %v12173_v46 = vld [vmem:[#allocation97_spill] sm:$0xff] }
 0x6ca   :  { %12164 = vst [vmem:[#allocation65_spill] sm:$0xff] %v8887_v19  ;;  %v8907_v59 = vadd.f32 %v7827_v36, %v12173_v46  ;;  %v12175_v19 = vld [vmem:[#allocation99_spill] sm:$0xff] }
 0x6cb   :  { %12166 = vst [vmem:[#allocation67_spill] sm:$0xff] %v8891_v63  ;;  %v8911_v6 = vadd.f32 %v7827_v36, %v12175_v19  ;;  %v12177_v63 = vld [vmem:[#allocation101_spill] sm:$0xff] }
 0x6cc   :  { %12168 = vst [vmem:[#allocation69_spill] sm:$0xff] %v8895_v35  ;;  %v8915_v58 = vadd.f32 %v7827_v36, %v12177_v63  ;;  %v12179_v35 = vld [vmem:[#allocation103_spill] sm:$0xff] }
 0x6cd   :  { %12170 = vst [vmem:[#allocation71_spill] sm:$0xff] %v8899_v22  ;;  %v8919_v23 = vadd.f32 %v7827_v36, %v12179_v35  ;;  %v12181_v22 = vld [vmem:[#allocation105_spill] sm:$0xff] }
 0x6ce   :  { %12172 = vst [vmem:[#allocation73_spill] sm:$0xff] %v8903_v42  ;;  %v8923_v25 = vadd.f32 %v7827_v36, %v12181_v22  ;;  %v12183_v42 = vld [vmem:[#allocation107_spill] sm:$0xff] }
 0x6cf   :  { %12174 = vst [vmem:[#allocation75_spill] sm:$0xff] %v8907_v59  ;;  %v8927_v46 = vadd.f32 %v7827_v36, %v12183_v42  ;;  %v12185_v59 = vld [vmem:[#allocation109_spill] sm:$0xff] }
 0x6d0   :  { %12176 = vst [vmem:[#allocation77_spill] sm:$0xff] %v8911_v6  ;;  %v8931_v19 = vadd.f32 %v7827_v36, %v12185_v59  ;;  %v12187_v6 = vld [vmem:[#allocation111_spill] sm:$0xff] }
 0x6d1   :  { %12178 = vst [vmem:[#allocation79_spill] sm:$0xff] %v8915_v58  ;;  %v8935_v63 = vadd.f32 %v7827_v36, %v12187_v6  ;;  %v12189_v58 = vld [vmem:[#allocation113_spill] sm:$0xff] }
 0x6d2   :  { %12180 = vst [vmem:[#allocation81_spill] sm:$0xff] %v8919_v23  ;;  %v8939_v35 = vadd.f32 %v7827_v36, %v12189_v58  ;;  %v12191_v23 = vld [vmem:[#allocation115_spill] sm:$0xff] }
 0x6d3   :  { %12182 = vst [vmem:[#allocation83_spill] sm:$0xff] %v8923_v25  ;;  %v8943_v22 = vadd.f32 %v7827_v36, %v12191_v23  ;;  %v12193_v25 = vld [vmem:[#allocation117_spill] sm:$0xff] }
 0x6d4   :  { %12184 = vst [vmem:[#allocation85_spill] sm:$0xff] %v8927_v46  ;;  %v8947_v42 = vadd.f32 %v7827_v36, %v12193_v25  ;;  %v12195_v46 = vld [vmem:[#allocation119_spill] sm:$0xff] }
 0x6d5   :  { %12186 = vst [vmem:[#allocation87_spill] sm:$0xff] %v8931_v19  ;;  %v8951_v59 = vadd.f32 %v7827_v36, %v12195_v46  ;;  %v12197_v19 = vld [vmem:[#allocation121_spill] sm:$0xff] }
 0x6d6   :  { %12188 = vst [vmem:[#allocation89_spill] sm:$0xff] %v8935_v63  ;;  %v8955_v6 = vadd.f32 %v7827_v36, %v12197_v19  ;;  %v12199_v63 = vld [vmem:[#allocation124_spill] sm:$0xff] }
 0x6d7   :  { %12190 = vst [vmem:[#allocation91_spill] sm:$0xff] %v8939_v35  ;;  %v8959_v58 = vadd.f32 %v7827_v36, %v12199_v63  ;;  %v12201_v35 = vld [vmem:[#allocation126_spill] sm:$0xff] }
 0x6d8   :  { %12192 = vst [vmem:[#allocation93_spill] sm:$0xff] %v8943_v22  ;;  %v8963_v23 = vadd.f32 %v7827_v36, %v12201_v35  ;;  %v12203_v22 = vld [vmem:[#allocation127_spill] sm:$0xff] }
 0x6d9   :  { %12194 = vst [vmem:[#allocation95_spill] sm:$0xff] %v8947_v42  ;;  %v8967_v25 = vadd.f32 %v7827_v36, %v12203_v22  ;;  %v12205_v42 = vld [vmem:[#allocation129_spill] sm:$0xff] }
 0x6da   :  { %12196 = vst [vmem:[#allocation97_spill] sm:$0xff] %v8951_v59  ;;  %v8971_v46 = vadd.f32 %v7827_v36, %v12205_v42  ;;  %v12207_v59 = vld [vmem:[#allocation131_spill] sm:$0xff] }
 0x6db   :  { %12198 = vst [vmem:[#allocation99_spill] sm:$0xff] %v8955_v6  ;;  %v8975_v19 = vadd.f32 %v7827_v36, %v12207_v59  ;;  %v12209_v6 = vld [vmem:[#allocation132_spill] sm:$0xff] }
 0x6dc   :  { %12200 = vst [vmem:[#allocation101_spill] sm:$0xff] %v8959_v58  ;;  %v8979_v63 = vadd.f32 %v7827_v36, %v12209_v6  ;;  %v12211_v58 = vld [vmem:[#allocation135_spill] sm:$0xff] }
 0x6dd   :  { %12202 = vst [vmem:[#allocation103_spill] sm:$0xff] %v8963_v23  ;;  %v8983_v35 = vadd.f32 %v7827_v36, %v12211_v58  ;;  %v12213_v23 = vld [vmem:[#allocation136_spill] sm:$0xff] }
 0x6de   :  { %12204 = vst [vmem:[#allocation105_spill] sm:$0xff] %v8967_v25  ;;  %v8987_v22 = vadd.f32 %v7827_v36, %v12213_v23  ;;  %v12215_v25 = vld [vmem:[#allocation137_spill] sm:$0xff] }
 0x6df   :  { %12206 = vst [vmem:[#allocation107_spill] sm:$0xff] %v8971_v46  ;;  %v8991_v42 = vadd.f32 %v7827_v36, %v12215_v25  ;;  %v12217_v46 = vld [vmem:[#allocation138_spill] sm:$0xff] }
 0x6e0   :  { %12208 = vst [vmem:[#allocation109_spill] sm:$0xff] %v8975_v19  ;;  %v8995_v59 = vadd.f32 %v7827_v36, %v12217_v46  ;;  %v12219_v19 = vld [vmem:[#allocation143_spill] sm:$0xff] }
 0x6e1   :  { %12210 = vst [vmem:[#allocation111_spill] sm:$0xff] %v8979_v63  ;;  %v8999_v6 = vadd.f32 %v7827_v36, %v12219_v19  ;;  %v12221_v63 = vld [vmem:[#allocation144_spill] sm:$0xff] }
 0x6e2   :  { %12212 = vst [vmem:[#allocation113_spill] sm:$0xff] %v8983_v35  ;;  %v9003_v58 = vadd.f32 %v7827_v36, %v12221_v63  ;;  %v12223_v35 = vld [vmem:[#allocation145_spill] sm:$0xff] }
 0x6e3   :  { %12214 = vst [vmem:[#allocation115_spill] sm:$0xff] %v8987_v22  ;;  %v9007_v23 = vadd.f32 %v7827_v36, %v12223_v35  ;;  %v12225_v22 = vld [vmem:[#allocation146_spill] sm:$0xff] }
 0x6e4   :  { %12216 = vst [vmem:[#allocation117_spill] sm:$0xff] %v8991_v42  ;;  %v9011_v25 = vadd.f32 %v7827_v36, %v12225_v22  ;;  %v12227_v42 = vld [vmem:[#allocation147_spill] sm:$0xff] }
 0x6e5   :  { %12218 = vst [vmem:[#allocation119_spill] sm:$0xff] %v8995_v59  ;;  %v9015_v46 = vadd.f32 %v7827_v36, %v12227_v42  ;;  %v12229_v59 = vld [vmem:[#allocation149_spill] sm:$0xff] }
 0x6e6   :  { %12220 = vst [vmem:[#allocation121_spill] sm:$0xff] %v8999_v6  ;;  %v9019_v19 = vadd.f32 %v7827_v36, %v12229_v59  ;;  %v12231_v6 = vld [vmem:[#allocation151_spill] sm:$0xff] }
 0x6e7   :  { %12222 = vst [vmem:[#allocation124_spill] sm:$0xff] %v9003_v58  ;;  %v9023_v63 = vadd.f32 %v7827_v36, %v12231_v6  ;;  %v12233_v58 = vld [vmem:[#allocation152_spill] sm:$0xff] }
 0x6e8   :  { %12224 = vst [vmem:[#allocation126_spill] sm:$0xff] %v9007_v23  ;;  %v9027_v35 = vadd.f32 %v7827_v36, %v12233_v58  ;;  %v12235_v23 = vld [vmem:[#allocation153_spill] sm:$0xff] }
 0x6e9   :  { %12226 = vst [vmem:[#allocation127_spill] sm:$0xff] %v9011_v25  ;;  %v9031_v22 = vadd.f32 %v7827_v36, %v12235_v23  ;;  %v12237_v25 = vld [vmem:[#allocation154_spill] sm:$0xff] }
 0x6ea   :  { %12228 = vst [vmem:[#allocation129_spill] sm:$0xff] %v9015_v46  ;;  %v9035_v42 = vadd.f32 %v7827_v36, %v12237_v25  ;;  %v12239_v46 = vld [vmem:[#allocation155_spill] sm:$0xff] }
 0x6eb   :  { %12230 = vst [vmem:[#allocation131_spill] sm:$0xff] %v9019_v19  ;;  %v9039_v59 = vadd.f32 %v7827_v36, %v12239_v46  ;;  %v12241_v19 = vld [vmem:[#allocation24_spill] sm:$0xff] }
 0x6ec   :  { %12232 = vst [vmem:[#allocation132_spill] sm:$0xff] %v9023_v63  ;;  %v9043_v6 = vadd.f32 %v7827_v36, %v12241_v19  ;;  %v12243_v63 = vld [vmem:[#allocation26_spill] sm:$0xff] }
 0x6ed   :  { %12234 = vst [vmem:[#allocation135_spill] sm:$0xff] %v9027_v35  ;;  %v9047_v58 = vadd.f32 %v7827_v36, %v12243_v63  ;;  %v12245_v35 = vld [vmem:[#allocation28_spill] sm:$0xff] }
 0x6ee   :  { %12236 = vst [vmem:[#allocation136_spill] sm:$0xff] %v9031_v22  ;;  %v9051_v23 = vadd.f32 %v7827_v36, %v12245_v35  ;;  %v12247_v22 = vld [vmem:[#allocation30_spill] sm:$0xff] }
 0x6ef   :  { %12238 = vst [vmem:[#allocation137_spill] sm:$0xff] %v9035_v42  ;;  %v9055_v25 = vadd.f32 %v7827_v36, %v12247_v22  ;;  %v12249_v42 = vld [vmem:[#allocation32_spill] sm:$0xff] }
 0x6f0   :  { %12240 = vst [vmem:[#allocation138_spill] sm:$0xff] %v9039_v59  ;;  %v9059_v46 = vadd.f32 %v7827_v36, %v12249_v42  ;;  %v12251_v59 = vld [vmem:[#allocation34_spill] sm:$0xff]  ;;  %v9079_v42 = vadd.f32 %v7827_v36, %v8331_v26  ;;  %v9099_v26 = vadd.f32 %v7827_v36, %v8351_v54  ;;  %v9119_v54 = vadd.f32 %v7827_v36, %v8371_v15 }
 0x6f1   :  { %12242 = vst [vmem:[#allocation143_spill] sm:$0xff] %v9043_v6  ;;  %v9063_v19 = vadd.f32 %v7827_v36, %v12251_v59  ;;  %v12253_v6 = vld [vmem:[#allocation36_spill] sm:$0xff]  ;;  %v9083_v59 = vadd.f32 %v7827_v36, %v8335_v37  ;;  %v9103_v37 = vadd.f32 %v7827_v36, %v8355_v14  ;;  %v9123_v14 = vadd.f32 %v7827_v36, %v8375_v33 }
 0x6f2   :  { %12244 = vst [vmem:[#allocation144_spill] sm:$0xff] %v9047_v58  ;;  %v9067_v63 = vadd.f32 %v7827_v36, %v12253_v6  ;;  %v12255_v58 = vld [vmem:[#allocation38_spill] sm:$0xff]  ;;  %v9087_v6 = vadd.f32 %v7827_v36, %v8339_v43  ;;  %v9107_v43 = vadd.f32 %v7827_v36, %v8359_v48  ;;  %v9127_v48 = vadd.f32 %v7827_v36, %v8379_v41 }
 0x6f3   :  { %12246 = vst [vmem:[#allocation145_spill] sm:$0xff] %v9051_v23  ;;  %v9071_v35 = vadd.f32 %v7827_v36, %v12255_v58  ;;  %v12257_v23 = vld [vmem:[#allocation40_spill] sm:$0xff]  ;;  %v9139_v15 = vadd.f32 %v7827_v36, %v8391_v17  ;;  %v9143_v33 = vadd.f32 %v7827_v36, %v8395_v62  ;;  %v9147_v41 = vadd.f32 %v7827_v36, %v8399_v18 }
 0x6f4   :  { %12248 = vst [vmem:[#allocation146_spill] sm:$0xff] %v9055_v25  ;;  %v9075_v22 = vadd.f32 %v7827_v36, %v12257_v23  ;;  %v9095_v23 = vadd.f32 %v7827_v36, %v8347_v61  ;;  %v9159_v17 = vadd.f32 %v7827_v36, %v8411_v9  ;;  %v9163_v62 = vadd.f32 %v7827_v36, %v8415_v21 }
 0x6f5   :  { %12250 = vst [vmem:[#allocation147_spill] sm:$0xff] %v9059_v46  ;;  %v9167_v18 = vadd.f32 %v7827_v36, %v8419_v20  ;;  %v9179_v9 = vadd.f32 %v7827_v36, %v8431_v39  ;;  %v9183_v21 = vadd.f32 %v7827_v36, %v8435_v16  ;;  %v9199_v39 = vadd.f32 %v7827_v36, %v8451_v40  ;;  %v12340_v46 = vld [vmem:[#allocation76_spill] sm:$0xff] }
 0x6f6   :  { %12252 = vst [vmem:[#allocation149_spill] sm:$0xff] %v9063_v19  ;;  %v9220_v40 = vmul.f32 0.01, %v8591_v45  ;;  %v9328_v25 = vadd.f32 %v7827_v36, %v12340_v46  ;;  %v12354_v46 = vld [vmem:[#allocation106_spill] sm:$0xff] }
 0x6f7   :  { %12254 = vst [vmem:[#allocation151_spill] sm:$0xff] %v9067_v63  ;;  %v12262_v63 = vld [vmem:[#allocation42_spill] sm:$0xff] }
 0x6f8   :  { %12256 = vst [vmem:[#allocation152_spill] sm:$0xff] %v9071_v35  ;;  %v9091_v58 = vadd.f32 %v7827_v36, %v12262_v63  ;;  %v9111_v63 = vadd.f32 %v7827_v36, %v8363_v24  ;;  %v12336_v35 = vld [vmem:[#allocation142_spill] sm:$0xff] }
 0x6f9   :  { %12258 = vst [vmem:[#allocation153_spill] sm:$0xff] %v9075_v22  ;;  %v9321_v19 = vmul.f32 0.01, %v12336_v35  ;;  %vm3452_vm3 = vcmp.gt.f32.partialorder %v12336_v35, 0.0 }
 0x6fa   :  { %12259 = vst [vmem:[#allocation154_spill] sm:$0xff] %v9079_v42  ;;  %v12334_v42 = vld [vmem:[#allocation141_spill] sm:$0xff] }
 0x6fb   :  { %12260 = vst [vmem:[#allocation155_spill] sm:$0xff] %v9083_v59  ;;  %v9318_v22 = vmul.f32 0.01, %v12334_v42 }
 0x6fc   :  { %12261 = vst [vmem:[#allocation24_spill] sm:$0xff] %v9087_v6  ;;  %v12332_v6 = vld [vmem:[#allocation74_spill] sm:$0xff] }
 0x6fd   :  { %12263 = vst [vmem:[#allocation26_spill] sm:$0xff] %v9091_v58  ;;  %v12269_v58 = vld [vmem:[#allocation44_spill] sm:$0xff]  ;;  %v9315_v59 = vadd.f32 %v7827_v36, %v12332_v6  ;;  %v12346_v6 = vld [vmem:[#allocation157_spill] sm:$0xff] }
 0x6fe   :  { %12264 = vst [vmem:[#allocation28_spill] sm:$0xff] %v9095_v23  ;;  %v9115_v61 = vadd.f32 %v7827_v36, %v12269_v58 }
 0x6ff   :  { %12265 = vst [vmem:[#allocation30_spill] sm:$0xff] %v9099_v26  ;;  %v12328_v26 = vld [vmem:[#allocation139_spill] sm:$0xff] }
 0x700   :  { %12266 = vst [vmem:[#allocation32_spill] sm:$0xff] %v9103_v37  ;;  %v9305_v37 = vmul.f32 0.01, %v8667_v31  ;;  %v9308_v23 = vmul.f32 0.01, %v12328_v26 }
 0x701   :  { %12267 = vst [vmem:[#allocation34_spill] sm:$0xff] %v9107_v43  ;;  %v12274_v43 = vld [vmem:[#allocation46_spill] sm:$0xff] }
 0x702   :  { %12268 = vst [vmem:[#allocation36_spill] sm:$0xff] %v9111_v63  ;;  %v9131_v24 = vadd.f32 %v7827_v36, %v12274_v43  ;;  %v12276_v63 = vld [vmem:[#allocation48_spill] sm:$0xff] }
 0x703   :  { %12270 = vst [vmem:[#allocation38_spill] sm:$0xff] %v9115_v61  ;;  %v9135_v58 = vadd.f32 %v7827_v36, %v12276_v63 }
 0x704   :  { %12271 = vst [vmem:[#allocation40_spill] sm:$0xff] %v9119_v54  ;;  %v9295_v54 = vmul.f32 0.01, %v8659_v4 }
 0x705   :  { %12272 = vst [vmem:[#allocation42_spill] sm:$0xff] %v9123_v14  ;;  %v9292_v14 = vmul.f32 0.01, %v8655_v28 }
 0x706   :  { %12273 = vst [vmem:[#allocation44_spill] sm:$0xff] %v9127_v48  ;;  %v12281_v48 = vld [vmem:[#allocation50_spill] sm:$0xff] }
 0x707   :  { %12275 = vst [vmem:[#allocation46_spill] sm:$0xff] %v9131_v24  ;;  %v9151_v43 = vadd.f32 %v7827_v36, %v12281_v48  ;;  %v12283_v24 = vld [vmem:[#allocation52_spill] sm:$0xff] }
 0x708   :  { %12277 = vst [vmem:[#allocation48_spill] sm:$0xff] %v9135_v58  ;;  %v9155_v63 = vadd.f32 %v7827_v36, %v12283_v24  ;;  %v9282_v58 = vmul.f32 0.01, %v8647_v47 }
 0x709   :  { %12278 = vst [vmem:[#allocation160_spill] sm:$0xff] %v9139_v15  ;;  %v9279_v15 = vmul.f32 0.01, %v8643_v57 }
 0x70a   :  { %12279 = vst [vmem:[#allocation161_spill] sm:$0xff] %v9143_v33  ;;  %v9269_v33 = vmul.f32 0.01, %v8635_v50 }
 0x70b   :  { %12280 = vst [vmem:[#allocation162_spill] sm:$0xff] %v9147_v41  ;;  %v12288_v41 = vld [vmem:[#allocation54_spill] sm:$0xff] }
 0x70c   :  { %12282 = vst [vmem:[#allocation50_spill] sm:$0xff] %v9151_v43  ;;  %v9171_v48 = vadd.f32 %v7827_v36, %v12288_v41  ;;  %v12290_v43 = vld [vmem:[#allocation56_spill] sm:$0xff] }
 0x70d   :  { %12284 = vst [vmem:[#allocation52_spill] sm:$0xff] %v9155_v63  ;;  %v9175_v24 = vadd.f32 %v7827_v36, %v12290_v43  ;;  %v9195_v43 = vadd.f32 %v7827_v36, %v8447_v7  ;;  %v9217_v7 = vmul.f32 0.01, %v8587_v52  ;;  %v9266_v63 = vmul.f32 0.01, %v8631_v60 }
 0x70e   :  { %12285 = vst [vmem:[#allocation163_spill] sm:$0xff] %v9159_v17 }
 0x70f   :  { %12286 = vst [vmem:[#allocation164_spill] sm:$0xff] %v9163_v62  ;;  %v12294_v62 = vld [vmem:[#allocation58_spill] sm:$0xff] }
 0x710   :  { %12287 = vst [vmem:[#allocation165_spill] sm:$0xff] %v9167_v18  ;;  %v9187_v20 = vadd.f32 %v7827_v36, %v12294_v62  ;;  %v12296_v18 = vld [vmem:[#allocation60_spill] sm:$0xff] }
 0x711   :  { %12289 = vst [vmem:[#allocation54_spill] sm:$0xff] %v9171_v48  ;;  %v9191_v41 = vadd.f32 %v7827_v36, %v12296_v18  ;;  %v9256_v48 = vmul.f32 0.01, %v8623_v5 }
 0x712   :  { %12291 = vst [vmem:[#allocation56_spill] sm:$0xff] %v9175_v24  ;;  %v9253_v24 = vmul.f32 0.01, %v8619_v29 }
 0x713   :  { %12292 = vst [vmem:[#allocation166_spill] sm:$0xff] %v9179_v9  ;;  %v12300_v9 = vld [vmem:[#allocation62_spill] sm:$0xff] }
 0x714   :  { %12293 = vst [vmem:[#allocation167_spill] sm:$0xff] %v9183_v21  ;;  %v9203_v16 = vadd.f32 %v7827_v36, %v12300_v9  ;;  %v12302_v21 = vld [vmem:[#allocation64_spill] sm:$0xff]  ;;  %v9224_v9 = vadd.f32 %v7827_v36, %v8467_v55  ;;  %v9246_v55 = vmul.f32 0.01, %v8615_v8 }
 0x715   :  { %12295 = vst [vmem:[#allocation58_spill] sm:$0xff] %v9187_v20  ;;  %v9207_v62 = vadd.f32 %v7827_v36, %v12302_v21  ;;  %v12304_v20 = vld [vmem:[#allocation66_spill] sm:$0xff]  ;;  %v9227_v21 = vmul.f32 0.01, %v8595_v51 }
 0x716   :  { %12297 = vst [vmem:[#allocation60_spill] sm:$0xff] %v9191_v41  ;;  %v9211_v18 = vadd.f32 %v7827_v36, %v12304_v20  ;;  %v9214_v41 = vmul.f32 0.01, %v8583_v12  ;;  %v9233_v20 = vmul.f32 0.01, %v8603_v56 }
 0x717   :  { %12298 = vst [vmem:[#allocation168_spill] sm:$0xff] %v9195_v43 }
 0x718   :  { %12299 = vst [vmem:[#allocation169_spill] sm:$0xff] %v9199_v39  ;;  %v9243_v39 = vmul.f32 0.01, %v8611_v53 }
 0x719   :  { %12301 = vst [vmem:[#allocation62_spill] sm:$0xff] %v9203_v16  ;;  %v9240_v16 = vmul.f32 0.01, %v8607_v34 }
 0x71a   :  { %12303 = vst [vmem:[#allocation64_spill] sm:$0xff] %v9207_v62  ;;  %v9230_v62 = vmul.f32 0.01, %v8599_v27 }
 0x71b   :  { %12305 = vst [vmem:[#allocation66_spill] sm:$0xff] %v9211_v18  ;;  %v9237_v18 = vadd.f32 %v7827_v36, %v8471_v1  ;;  %v9259_v1 = vmul.f32 0.01, %v8627_v10 }
 0x71c   :  { %12306 = vst [vmem:[#allocation170_spill] sm:$0xff] %v9224_v9  ;;  %v12308_v9 = vld [vmem:[#allocation68_spill] sm:$0xff] }
 0x71d   :  { %12307 = vst [vmem:[#allocation171_spill] sm:$0xff] %v9237_v18  ;;  %v9250_v43 = vadd.f32 %v7827_v36, %v12308_v9  ;;  %v12312_v18 = vld [vmem:[#allocation70_spill] sm:$0xff]  ;;  %v9272_v9 = vmul.f32 0.01, %v8639_v30 }
 0x71e   :  { %12310 = vst [vmem:[#allocation172_spill] sm:$0xff] %v9256_v48  ;;  %v9263_v17 = vadd.f32 %v7827_v36, %v12312_v18  ;;  %v9285_v18 = vmul.f32 0.01, %v8651_v11 }
 0x71f   :  { %12309 = vst [vmem:[#allocation68_spill] sm:$0xff] %v9250_v43  ;;  %v9276_v43 = vadd.f32 %v7827_v36, %v8483_v32  ;;  %v9298_v32 = vmul.f32 0.01, %v8663_v3 }
 0x720   :  { %12311 = vst [vmem:[#allocation173_spill] sm:$0xff] %v9259_v1 }
 0x721   :  { %12313 = vst [vmem:[#allocation70_spill] sm:$0xff] %v9263_v17  ;;  %v9289_v17 = vadd.f32 %v7827_v36, %v8487_v44  ;;  %v12330_v44 = vld [vmem:[#allocation140_spill] sm:$0xff] }
 0x722   :  { %12314 = vst [vmem:[#allocation174_spill] sm:$0xff] %v9266_v63  ;;  %vm3450_vm1 = vcmp.gt.f32.partialorder %v12330_v44, 0.0 }
 0x723   :  { %12315 = vst [vmem:[#allocation175_spill] sm:$0xff] %v9269_v33 }
 0x724   :  { %12316 = vst [vmem:[#allocation176_spill] sm:$0xff] %v9272_v9 }
 0x725   :  { %12317 = vst [vmem:[#allocation177_spill] sm:$0xff] %v9276_v43  ;;  %v12325_v43 = vld [vmem:[#allocation72_spill] sm:$0xff] }
 0x726   :  { %12318 = vst [vmem:[#allocation178_spill] sm:$0xff] %v9279_v15  ;;  %v9302_v61 = vadd.f32 %v7827_v36, %v12325_v43  ;;  %v12338_v43 = vld [vmem:[#allocation148_spill] sm:$0xff] }
 0x727   :  { %12319 = vst [vmem:[#allocation179_spill] sm:$0xff] %v9282_v58 }
 0x728   :  { %12320 = vst [vmem:[#allocation180_spill] sm:$0xff] %v9285_v18 }
 0x729   :  { %12321 = vst [vmem:[#allocation181_spill] sm:$0xff] %v9289_v17  ;;  %v9311_v17 = vmul.f32 0.01, %v12330_v44 }
 0x72a   :  { %12322 = vst [vmem:[#allocation182_spill] sm:$0xff] %v9292_v14 }
 0x72b   :  { %12323 = vst [vmem:[#allocation183_spill] sm:$0xff] %v9295_v54 }
 0x72c   :  { %12324 = vst [vmem:[#allocation184_spill] sm:$0xff] %v9298_v32 }
 0x72d   :  { %12326 = vst [vmem:[#allocation72_spill] sm:$0xff] %v9302_v61  ;;  %v9324_v61 = vmul.f32 0.01, %v12338_v43 }
 0x72e   :  { %12327 = vst [vmem:[#allocation185_spill] sm:$0xff] %v9305_v37 }
 0x72f   :  { %12329 = vst [vmem:[#allocation139_spill] sm:$0xff] %v9308_v23  ;;  %v12342_v23 = vld [vmem:[#allocation150_spill] sm:$0xff] }
 0x730   :  { %12331 = vst [vmem:[#allocation140_spill] sm:$0xff] %v9311_v17  ;;  %v9331_v37 = vmul.f32 0.01, %v12342_v23  ;;  %v12344_v17 = vld [vmem:[#allocation156_spill] sm:$0xff] }
 0x731   :  { %12333 = vst [vmem:[#allocation74_spill] sm:$0xff] %v9315_v59  ;;  %v9334_v32 = vmul.f32 0.01, %v12344_v17  ;;  %v9337_v59 = vmul.f32 0.01, %v12346_v6 }
 0x732   :  { %12335 = vst [vmem:[#allocation141_spill] sm:$0xff] %v9318_v22  ;;  %v12348_v22 = vld [vmem:[#allocation78_spill] sm:$0xff] }
 0x733   :  { %12337 = vst [vmem:[#allocation142_spill] sm:$0xff] %v9321_v19  ;;  %v9341_v54 = vadd.f32 %v7827_v36, %v12348_v22  ;;  %v12350_v19 = vld [vmem:[#allocation158_spill] sm:$0xff] }
 0x734   :  { %12339 = vst [vmem:[#allocation148_spill] sm:$0xff] %v9324_v61  ;;  %v9344_v14 = vmul.f32 0.01, %v12350_v19  ;;  %v12352_v61 = vld [vmem:[#allocation159_spill] sm:$0xff]  ;;  %v12362_v22 = vld [vmem:[#allocation114_spill] sm:$0xff] }
 0x735   :  { %12341 = vst [vmem:[#allocation76_spill] sm:$0xff] %v9328_v25  ;;  %v9347_v18 = vmul.f32 0.01, %v12352_v61  ;;  %v9350_v25 = vmul.f32 0.01, %v12354_v46 }
 0x736   :  { %12343 = vst [vmem:[#allocation150_spill] sm:$0xff] %v9331_v37  ;;  %v12356_v37 = vld [vmem:[#allocation80_spill] sm:$0xff] }
 0x737   :  { %12345 = vst [vmem:[#allocation156_spill] sm:$0xff] %v9334_v32  ;;  %v9354_v58 = vadd.f32 %v7827_v36, %v12356_v37  ;;  %v12358_v32 = vld [vmem:[#allocation108_spill] sm:$0xff] }
 0x738   :  { %12347 = vst [vmem:[#allocation157_spill] sm:$0xff] %v9337_v59  ;;  %v9357_v15 = vmul.f32 0.01, %v12358_v32  ;;  %v12360_v59 = vld [vmem:[#allocation110_spill] sm:$0xff]  ;;  %v12370_v37 = vld [vmem:[#allocation120_spill] sm:$0xff] }
 0x739   :  { %12349 = vst [vmem:[#allocation78_spill] sm:$0xff] %v9341_v54  ;;  %v9360_v9 = vmul.f32 0.01, %v12360_v59  ;;  %v9363_v54 = vmul.f32 0.01, %v12362_v22 }
 0x73a   :  { %12351 = vst [vmem:[#allocation158_spill] sm:$0xff] %v9344_v14  ;;  %v12364_v14 = vld [vmem:[#allocation82_spill] sm:$0xff] }
 0x73b   :  { %12353 = vst [vmem:[#allocation159_spill] sm:$0xff] %v9347_v18  ;;  %v9367_v33 = vadd.f32 %v7827_v36, %v12364_v14  ;;  %v12366_v18 = vld [vmem:[#allocation116_spill] sm:$0xff]  ;;  %v12378_v14 = vld [vmem:[#allocation11_spill] sm:$0xff] }
 0x73c   :  { %12355 = vst [vmem:[#allocation106_spill] sm:$0xff] %v9350_v25  ;;  %v9370_v63 = vmul.f32 0.01, %v12366_v18  ;;  %v12368_v25 = vld [vmem:[#allocation118_spill] sm:$0xff] }
 0x73d   :  { %12357 = vst [vmem:[#allocation80_spill] sm:$0xff] %v9354_v58  ;;  %v9373_v1 = vmul.f32 0.01, %v12368_v25  ;;  %v9376_v58 = vmul.f32 0.01, %v12370_v37 }
 0x73e   :  { %12359 = vst [vmem:[#allocation108_spill] sm:$0xff] %v9357_v15  ;;  %v12372_v15 = vld [vmem:[#allocation84_spill] sm:$0xff] }
 0x73f   :  { %12361 = vst [vmem:[#allocation186_spill] sm:$0xff] %v9360_v9  ;;  %v9380_v59 = vadd.f32 %v7827_v36, %v12372_v15  ;;  %v12374_v9 = vld [vmem:[#allocation122_spill] sm:$0xff] }
 0x740   :  { %12363 = vst [vmem:[#allocation187_spill] sm:$0xff] %v9363_v54  ;;  %v9383_v22 = vmul.f32 0.01, %v12374_v9  ;;  %v12376_v54 = vld [vmem:[#allocation125_spill] sm:$0xff]  ;;  %v12386_v15 = vld [vmem:[#allocation14_spill] sm:$0xff] }
 0x741   :  { %12365 = vst [vmem:[#allocation82_spill] sm:$0xff] %v9367_v33  ;;  %v9386_v48 = vmul.f32 0.01, %v12376_v54  ;;  %v9389_v33 = vmul.f32 0.01, %v12378_v14 }
 0x742   :  { %12367 = vst [vmem:[#allocation188_spill] sm:$0xff] %v9370_v63  ;;  %v12380_v63 = vld [vmem:[#allocation86_spill] sm:$0xff] }
 0x743   :  { %12369 = vst [vmem:[#allocation189_spill] sm:$0xff] %v9373_v1  ;;  %v9393_v25 = vadd.f32 %v7827_v36, %v12380_v63  ;;  %v12382_v1 = vld [vmem:[#allocation12_spill] sm:$0xff]  ;;  %v12394_v63 = vld [vmem:[#allocation17_spill] sm:$0xff] }
 0x744   :  { %12371 = vst [vmem:[#allocation190_spill] sm:$0xff] %v9376_v58  ;;  %v9396_v37 = vmul.f32 0.01, %v12382_v1  ;;  %v12384_v58 = vld [vmem:[#allocation13_spill] sm:$0xff] }
 0x745   :  { %12373 = vst [vmem:[#allocation84_spill] sm:$0xff] %v9380_v59  ;;  %v9399_v18 = vmul.f32 0.01, %v12384_v58  ;;  %v9402_v59 = vmul.f32 0.01, %v12386_v15 }
 0x746   :  { %12375 = vst [vmem:[#allocation191_spill] sm:$0xff] %v9383_v22  ;;  %v12388_v22 = vld [vmem:[#allocation88_spill] sm:$0xff] }
 0x747   :  { %12377 = vst [vmem:[#allocation192_spill] sm:$0xff] %v9386_v48  ;;  %v9406_v54 = vadd.f32 %v7827_v36, %v12388_v22  ;;  %v12390_v48 = vld [vmem:[#allocation15_spill] sm:$0xff]  ;;  %v12402_v22 = vld [vmem:[#allocation20_spill] sm:$0xff] }
 0x748   :  { %12379 = vst [vmem:[#allocation193_spill] sm:$0xff] %v9389_v33  ;;  %v9409_v14 = vmul.f32 0.01, %v12390_v48  ;;  %v12392_v33 = vld [vmem:[#allocation16_spill] sm:$0xff] }
 0x749   :  { %12381 = vst [vmem:[#allocation86_spill] sm:$0xff] %v9393_v25  ;;  %v9412_v9 = vmul.f32 0.01, %v12392_v33  ;;  %v9415_v25 = vmul.f32 0.01, %v12394_v63 }
 0x74a   :  { %12383 = vst [vmem:[#allocation194_spill] sm:$0xff] %v9396_v37  ;;  %v12396_v37 = vld [vmem:[#allocation90_spill] sm:$0xff] }
 0x74b   :  { %12385 = vst [vmem:[#allocation195_spill] sm:$0xff] %v9399_v18  ;;  %v9419_v58 = vadd.f32 %v7827_v36, %v12396_v37  ;;  %v12398_v18 = vld [vmem:[#allocation18_spill] sm:$0xff] }
 0x74c   :  { %12387 = vst [vmem:[#allocation196_spill] sm:$0xff] %v9402_v59  ;;  %v9422_v15 = vmul.f32 0.01, %v12398_v18  ;;  %v12400_v59 = vld [vmem:[#allocation19_spill] sm:$0xff]  ;;  %v12409_v37 = vld [vmem:[#allocation22_spill] sm:$0xff] }
 0x74d   :  { %12389 = vst [vmem:[#allocation88_spill] sm:$0xff] %v9406_v54  ;;  %v9425_v1 = vmul.f32 0.01, %v12400_v59  ;;  %v9428_v54 = vmul.f32 0.01, %v12402_v22 }
 0x74e   :  { %12391 = vst [vmem:[#allocation15_spill] sm:$0xff] %v9409_v14  ;;  %v12404_v14 = vld [vmem:[#allocation92_spill] sm:$0xff] }
 0x74f   :  { %12393 = vst [vmem:[#allocation197_spill] sm:$0xff] %v9412_v9  ;;  %v9432_v33 = vadd.f32 %v7827_v36, %v12404_v14  ;;  %v9435_v9 = vmul.f32 0.01, %v8787_v49  ;;  %v12416_v14 = vld [vmem:[#allocation25_spill] sm:$0xff] }
 0x750   :  { %12395 = vst [vmem:[#allocation198_spill] sm:$0xff] %v9415_v25  ;;  %v12407_v25 = vld [vmem:[#allocation21_spill] sm:$0xff] }
 0x751   :  { %12397 = vst [vmem:[#allocation90_spill] sm:$0xff] %v9419_v58  ;;  %v9438_v63 = vmul.f32 0.01, %v12407_v25  ;;  %v9441_v58 = vmul.f32 0.01, %v12409_v37 }
 0x752   :  { %12399 = vst [vmem:[#allocation18_spill] sm:$0xff] %v9422_v15  ;;  %v12411_v15 = vld [vmem:[#allocation94_spill] sm:$0xff] }
 0x753   :  { %12401 = vst [vmem:[#allocation199_spill] sm:$0xff] %v9425_v1  ;;  %v9445_v59 = vadd.f32 %v7827_v36, %v12411_v15  ;;  %v9448_v1 = vmul.f32 0.01, %v8799_v13  ;;  %v12422_v15 = vld [vmem:[#allocation29_spill] sm:$0xff] }
 0x754   :  { %12403 = vst [vmem:[#allocation200_spill] sm:$0xff] %v9428_v54  ;;  %v12414_v54 = vld [vmem:[#allocation23_spill] sm:$0xff] }
 0x755   :  { %12405 = vst [vmem:[#allocation92_spill] sm:$0xff] %v9432_v33  ;;  %v9451_v22 = vmul.f32 0.01, %v12414_v54  ;;  %v9454_v33 = vmul.f32 0.01, %v12416_v14  ;;  %v12425_v54 = vld [vmem:[#allocation98_spill] sm:$0xff] }
 0x756   :  { %12406 = vst [vmem:[#allocation201_spill] sm:$0xff] %v9435_v9  ;;  %v12418_v9 = vld [vmem:[#allocation96_spill] sm:$0xff] }
 0x757   :  { %12408 = vst [vmem:[#allocation202_spill] sm:$0xff] %v9438_v63  ;;  %v9458_v25 = vadd.f32 %v7827_v36, %v12418_v9  ;;  %v9476_v9 = vmul.f32 0.01, %v8823_v2  ;;  %v12437_v2 = vld [vmem:[#allocation43_spill] sm:$0xff] }
 0x758   :  { %12410 = vst [vmem:[#allocation22_spill] sm:$0xff] %v9441_v58  ;;  %v12420_v58 = vld [vmem:[#allocation27_spill] sm:$0xff] }
 0x759   :  { %12412 = vst [vmem:[#allocation94_spill] sm:$0xff] %v9445_v59  ;;  %v9462_v63 = vmul.f32 0.01, %v12420_v58  ;;  %v9465_v59 = vmul.f32 0.01, %v12422_v15  ;;  %v12431_v15 = vld [vmem:[#allocation100_spill] sm:$0xff] }
 0x75a   :  { %12413 = vst [vmem:[#allocation203_spill] sm:$0xff] %v9448_v1  ;;  %v9468_v1 = vmul.f32 0.01, %v8819_v0 }
 0x75b   :  { %12415 = vst [vmem:[#allocation204_spill] sm:$0xff] %v9451_v22  ;;  %v9472_v22 = vadd.f32 %v7827_v36, %v12425_v54 }
 0x75c   :  { %12417 = vst [vmem:[#allocation25_spill] sm:$0xff] %v9454_v33  ;;  %v12429_v33 = vld [vmem:[#allocation37_spill] sm:$0xff] }
 0x75d   :  { %12419 = vst [vmem:[#allocation96_spill] sm:$0xff] %v9458_v25  ;;  %v9479_v25 = vmul.f32 0.01, %v8827_v38  ;;  %v12439_v38 = vld [vmem:[#allocation102_spill] sm:$0xff] }
 0x75e   :  { %12421 = vst [vmem:[#allocation27_spill] sm:$0xff] %v9462_v63  ;;  %v9482_v63 = vmul.f32 0.01, %v12429_v33 }
 0x75f   :  { %12423 = vst [vmem:[#allocation205_spill] sm:$0xff] %v9465_v59  ;;  %v9486_v59 = vadd.f32 %v7827_v36, %v12431_v15 }
 0x760   :  { %12424 = vst [vmem:[#allocation206_spill] sm:$0xff] %v9468_v1  ;;  %v12433_v1 = vld [vmem:[#allocation39_spill] sm:$0xff] }
 0x761   :  { %12426 = vst [vmem:[#allocation98_spill] sm:$0xff] %v9472_v22  ;;  %v9490_v54 = vmul.f32 0.01, %v12433_v1  ;;  %v12435_v22 = vld [vmem:[#allocation41_spill] sm:$0xff] }
 0x762   :  { %12427 = vst [vmem:[#allocation207_spill] sm:$0xff] %v9476_v9  ;;  %v9493_v0 = vmul.f32 0.01, %v12435_v22  ;;  %v9496_v9 = vmul.f32 0.01, %v12437_v2  ;;  %v12445_v1 = vld [vmem:[#allocation49_spill] sm:$0xff] }
 0x763   :  { %12428 = vst [vmem:[#allocation208_spill] sm:$0xff] %v9479_v25  ;;  %v9500_v25 = vadd.f32 %v7827_v36, %v12439_v38  ;;  %v12447_v22 = vld [vmem:[#allocation104_spill] sm:$0xff]  ;;  %v12449_v38 = vld [vmem:[#allocation51_spill] sm:$0xff] }
 0x764   :  { %12430 = vst [vmem:[#allocation209_spill] sm:$0xff] %v9482_v63  ;;  %v12441_v63 = vld [vmem:[#allocation45_spill] sm:$0xff] }
 0x765   :  { %12432 = vst [vmem:[#allocation100_spill] sm:$0xff] %v9486_v59  ;;  %v9504_v15 = vmul.f32 0.01, %v12441_v63  ;;  %v12443_v59 = vld [vmem:[#allocation47_spill] sm:$0xff] }
 0x766   :  { %12434 = vst [vmem:[#allocation210_spill] sm:$0xff] %v9490_v54  ;;  %v9507_v33 = vmul.f32 0.01, %v12443_v59  ;;  %v9510_v54 = vmul.f32 0.01, %v12445_v1  ;;  %v12455_v1 = vld [vmem:[#allocation112_spill] sm:$0xff] }
 0x767   :  { %12436 = vst [vmem:[#allocation211_spill] sm:$0xff] %v9493_v0  ;;  %v9514_v0 = vadd.f32 %v7827_v36, %v12447_v22  ;;  %v9531_v22 = vadd.f32 %v7827_v36, %v12455_v1  ;;  %v12459_v63 = vld [vmem:[#allocation59_spill] sm:$0xff] }
 0x768   :  { %12438 = vst [vmem:[#allocation43_spill] sm:$0xff] %v9496_v9  ;;  %v12453_v9 = vld [vmem:[#allocation55_spill] sm:$0xff] }
 0x769   :  { %12440 = vst [vmem:[#allocation102_spill] sm:$0xff] %v9500_v25  ;;  %v9521_v25 = vmul.f32 0.01, %v12449_v38  ;;  %v9539_v38 = vmul.f32 0.01, %v12459_v63  ;;  %v12465_v1 = vld [vmem:[#allocation63_spill] sm:$0xff] }
 0x76a   :  { %12442 = vst [vmem:[#allocation212_spill] sm:$0xff] %v9504_v15  ;;  %v12451_v15 = vld [vmem:[#allocation53_spill] sm:$0xff] }
 0x76b   :  { %12444 = vst [vmem:[#allocation213_spill] sm:$0xff] %v9507_v33  ;;  %v9524_v33 = vmul.f32 0.01, %v12451_v15 }
 0x76c   :  { %12446 = vst [vmem:[#allocation214_spill] sm:$0xff] %v9510_v54  ;;  %v9527_v54 = vmul.f32 0.01, %v12453_v9  ;;  %v12467_v9 = vld [vmem:[#allocation65_spill] sm:$0xff] }
 0x76d   :  { %12448 = vst [vmem:[#allocation104_spill] sm:$0xff] %v9514_v0  ;;  %v12457_v0 = vld [vmem:[#allocation57_spill] sm:$0xff] }
 0x76e   :  { %12450 = vst [vmem:[#allocation215_spill] sm:$0xff] %v9521_v25  ;;  %v9536_v59 = vmul.f32 0.01, %v12457_v0  ;;  %v12461_v25 = vld [vmem:[#allocation61_spill] sm:$0xff]  ;;  %v9554_v0 = vmul.f32 0.01, %v12467_v9 }
 0x76f   :  { %12452 = vst [vmem:[#allocation216_spill] sm:$0xff] %v9524_v33  ;;  %v9542_v15 = vmul.f32 0.01, %v12461_v25  ;;  %v12463_v33 = vld [vmem:[#allocation123_spill] sm:$0xff] }
 0x770   :  { %12454 = vst [vmem:[#allocation217_spill] sm:$0xff] %v9527_v54  ;;  %v9546_v54 = vadd.f32 %v7827_v36, %v12463_v33  ;;  %v12473_v33 = vld [vmem:[#allocation69_spill] sm:$0xff]  ;;  %v12475_v25 = vld [vmem:[#allocation71_spill] sm:$0xff] }
 0x771   :  { %12456 = vst [vmem:[#allocation112_spill] sm:$0xff] %v9531_v22  ;;  %v9551_v22 = vmul.f32 0.01, %v12465_v1  ;;  %v9569_v1 = vmul.f32 0.01, %v12475_v25 }
 0x772   :  { %12458 = vst [vmem:[#allocation218_spill] sm:$0xff] %v9536_v59  ;;  %v12469_v59 = vld [vmem:[#allocation67_spill] sm:$0xff] }
 0x773   :  { %12460 = vst [vmem:[#allocation219_spill] sm:$0xff] %v9539_v38  ;;  %v9557_v63 = vmul.f32 0.01, %v12469_v59  ;;  %v12471_v38 = vld [vmem:[#allocation128_spill] sm:$0xff]  ;;  %v12483_v59 = vld [vmem:[#allocation77_spill] sm:$0xff] }
 0x774   :  { %12462 = vst [vmem:[#allocation220_spill] sm:$0xff] %v9542_v15  ;;  %v9561_v15 = vadd.f32 %v7827_v36, %v12471_v38  ;;  %v12481_v38 = vld [vmem:[#allocation75_spill] sm:$0xff] }
 0x775   :  { %12464 = vst [vmem:[#allocation123_spill] sm:$0xff] %v9546_v54  ;;  %v9566_v54 = vmul.f32 0.01, %v12473_v33  ;;  %v9584_v33 = vmul.f32 0.01, %v12483_v59 }
 0x776   :  { %12466 = vst [vmem:[#allocation221_spill] sm:$0xff] %v9551_v22  ;;  %v12477_v22 = vld [vmem:[#allocation73_spill] sm:$0xff] }
 0x777   :  { %12468 = vst [vmem:[#allocation222_spill] sm:$0xff] %v9554_v0  ;;  %v9572_v9 = vmul.f32 0.01, %v12477_v22  ;;  %v12479_v0 = vld [vmem:[#allocation130_spill] sm:$0xff]  ;;  %v12491_v22 = vld [vmem:[#allocation83_spill] sm:$0xff] }
 0x778   :  { %12470 = vst [vmem:[#allocation223_spill] sm:$0xff] %v9557_v63  ;;  %v9576_v63 = vadd.f32 %v7827_v36, %v12479_v0  ;;  %v12489_v0 = vld [vmem:[#allocation81_spill] sm:$0xff] }
 0x779   :  { %12472 = vst [vmem:[#allocation128_spill] sm:$0xff] %v9561_v15  ;;  %v9581_v15 = vmul.f32 0.01, %v12481_v38  ;;  %v9599_v38 = vmul.f32 0.01, %v12491_v22 }
 0x77a   :  { %12474 = vst [vmem:[#allocation224_spill] sm:$0xff] %v9566_v54  ;;  %v12485_v54 = vld [vmem:[#allocation79_spill] sm:$0xff] }
 0x77b   :  { %12476 = vst [vmem:[#allocation225_spill] sm:$0xff] %v9569_v1  ;;  %v9587_v25 = vmul.f32 0.01, %v12485_v54  ;;  %v12487_v1 = vld [vmem:[#allocation133_spill] sm:$0xff] }
 0x77c   :  { %12478 = vst [vmem:[#allocation226_spill] sm:$0xff] %v9572_v9  ;;  %v9591_v9 = vadd.f32 %v7827_v36, %v12487_v1  ;;  %v12497_v1 = vld [vmem:[#allocation87_spill] sm:$0xff]  ;;  %v12499_v54 = vld [vmem:[#allocation89_spill] sm:$0xff] }
 0x77d   :  { %12480 = vst [vmem:[#allocation130_spill] sm:$0xff] %v9576_v63  ;;  %v9596_v63 = vmul.f32 0.01, %v12489_v0  ;;  %v9614_v0 = vmul.f32 0.01, %v12499_v54 }
 0x77e   :  { %12482 = vst [vmem:[#allocation227_spill] sm:$0xff] %v9581_v15  ;;  %v12493_v15 = vld [vmem:[#allocation85_spill] sm:$0xff] }
 0x77f   :  { %12484 = vst [vmem:[#allocation228_spill] sm:$0xff] %v9584_v33  ;;  %v9602_v59 = vmul.f32 0.01, %v12493_v15  ;;  %v12495_v33 = vld [vmem:[#allocation134_spill] sm:$0xff] }
 0x780   :  { %12486 = vst [vmem:[#allocation229_spill] sm:$0xff] %v9587_v25  ;;  %v9606_v25 = vadd.f32 %v7827_v36, %v12495_v33  ;;  %v12505_v33 = vld [vmem:[#allocation95_spill] sm:$0xff] }
 0x781   :  { %12488 = vst [vmem:[#allocation133_spill] sm:$0xff] %v9591_v9  ;;  %v9611_v9 = vmul.f32 0.01, %v12497_v1 }
 0x782   :  { %12490 = vst [vmem:[#allocation230_spill] sm:$0xff] %v9596_v63  ;;  %v12501_v63 = vld [vmem:[#allocation91_spill] sm:$0xff] }
 0x783   :  { %12492 = vst [vmem:[#allocation231_spill] sm:$0xff] %v9599_v38  ;;  %v9617_v22 = vmul.f32 0.01, %v12501_v63  ;;  %v12507_v38 = vld [vmem:[#allocation97_spill] sm:$0xff] }
 0x784   :  { %12494 = vst [vmem:[#allocation232_spill] sm:$0xff] %v9602_v59  ;;  %v12503_v59 = vld [vmem:[#allocation93_spill] sm:$0xff]  ;;  %v9628_v15 = vmul.f32 0.01, %v12507_v38 }
 0x785   :  { %12496 = vst [vmem:[#allocation134_spill] sm:$0xff] %v9606_v25  ;;  %v9622_v36 = vmul.f32 0.01, %v12503_v59  ;;  %v9625_v25 = vmul.f32 0.01, %v12505_v33  ;;  %v12511_v59 = vld [vmem:[#allocation101_spill] sm:$0xff] }
 0x786   :  { %12498 = vst [vmem:[#allocation87_spill] sm:$0xff] %v9611_v9  ;;  %v12513_v33 = vld [vmem:[#allocation103_spill] sm:$0xff] }
 0x787   :  { %12500 = vst [vmem:[#allocation89_spill] sm:$0xff] %v9614_v0  ;;  %v3803_v0 = vsel %vm3427_vm5, %v8583_v12, %v9214_v41  ;;  %v12515_v12 = vld [vmem:[#allocation105_spill] sm:$0xff]  ;;  %vm3454_vm5 = vcmp.gt.f32.partialorder %v12342_v23, 0.0 }
 0x788   :  { %12502 = vst [vmem:[#allocation91_spill] sm:$0xff] %v9617_v22  ;;  %v12509_v22 = vld [vmem:[#allocation99_spill] sm:$0xff]  ;;  %v9652_v41 = vmul.f32 0.01, %v12515_v12  ;;  %v12523_v12 = vld [vmem:[#allocation113_spill] sm:$0xff] }
 0x789   :  { %12504 = vst [vmem:[#allocation233_spill] sm:$0xff] %v9622_v36  ;;  %v9637_v9 = vmul.f32 0.01, %v12509_v22  ;;  %v9640_v36 = vmul.f32 0.01, %v12511_v59  ;;  %v12517_v22 = vld [vmem:[#allocation107_spill] sm:$0xff] }
 0x78a   :  { %12506 = vst [vmem:[#allocation234_spill] sm:$0xff] %v9625_v25  ;;  %v9643_v25 = vmul.f32 0.01, %v12513_v33  ;;  %v12519_v59 = vld [vmem:[#allocation109_spill] sm:$0xff] }
 0x78b   :  { %12508 = vst [vmem:[#allocation97_spill] sm:$0xff] %v9628_v15  ;;  %v3804_v15 = vsel %vm3428_vm6, %v8587_v52, %v9217_v7  ;;  %v12521_v52 = vld [vmem:[#allocation111_spill] sm:$0xff]  ;;  %vm3458_vm6 = vcmp.gt.f32.partialorder %v12352_v61, 0.0 }
 0x78c   :  { %12510 = vst [vmem:[#allocation235_spill] sm:$0xff] %v9637_v9  ;;  %v9655_v9 = vmul.f32 0.01, %v12517_v22  ;;  %v9667_v7 = vmul.f32 0.01, %v12521_v52  ;;  %v12525_v22 = vld [vmem:[#allocation115_spill] sm:$0xff] }
 0x78d   :  { %12512 = vst [vmem:[#allocation236_spill] sm:$0xff] %v9640_v36  ;;  %v9658_v36 = vmul.f32 0.01, %v12519_v59 }
 0x78e   :  { %12514 = vst [vmem:[#allocation103_spill] sm:$0xff] %v9643_v25  ;;  %v3805_v25 = vsel %vm3429_vm7, %v8591_v45, %v9220_v40  ;;  %vm3455_vm7 = vcmp.gt.f32.partialorder %v12344_v17, 0.0  ;;  %v3807_v45 = vsel %vm3431_vm9, %v8599_v27, %v9230_v62  ;;  %v3808_v40 = vsel %vm3432_vm10, %v8603_v56, %v9233_v20  ;;  %v12527_v27 = vld [vmem:[#allocation117_spill] sm:$0xff] }
 0x78f   :  { %12516 = vst [vmem:[#allocation237_spill] sm:$0xff] %v9652_v41  ;;  %v9670_v41 = vmul.f32 0.01, %v12523_v12  ;;  %v9700_v62 = vmul.f32 0.01, %v12527_v27  ;;  %v3811_v56 = vsel %vm3435_vm13, %v8615_v8, %v9246_v55  ;;  %vm3459_vm9 = vcmp.gt.f32.partialorder %v12354_v46, 0.0 }
 0x790   :  { %12518 = vst [vmem:[#allocation238_spill] sm:$0xff] %v9655_v9  ;;  %v9673_v9 = vmul.f32 0.01, %v12525_v22  ;;  %vm3460_vm10 = vcmp.gt.f32.partialorder %v12358_v32, 0.0  ;;  %v5410_v8 = vpack.c.bf16 %v3804_v15, %v3803_v0  ;;  %vm12536_vm13 = vcmp.gt.f32.partialorder %v8631_v60, 0.0  ;;  %v12539_v27 = vld [vmem:[#allocation116_spill] sm:$0xff] }
 0x791   :  { %12520 = vst [vmem:[#allocation109_spill] sm:$0xff] %v9658_v36  ;;  %v3806_v36 = vsel %vm3430_vm8, %v8595_v51, %v9227_v21  ;;  %v3810_v51 = vsel %vm3434_vm12, %v8611_v53, %v9243_v39  ;;  %vm3457_vm8 = vcmp.gt.f32.partialorder %v12350_v19, 0.0  ;;  %v12529_v21 = vld [vmem:[#allocation119_spill] sm:$0xff]  ;;  %v12531_v53 = vld [vmem:[#allocation172_spill] sm:$0xff]  ;;  %vm12544_vm12 = vcmp.gt.f32.partialorder %v8639_v30, 0.0 }
 0x792   :  { %12522 = vst [vmem:[#allocation111_spill] sm:$0xff] %v9667_v7  ;;  %v3813_v39 = vsel %vm3437_vm15, %v8623_v5, %v12531_v53  ;;  %v5415_v55 = vpack.c.bf16 %v3806_v36, %v3805_v25  ;;  %v12537_v7 = vld [vmem:[#allocation175_spill] sm:$0xff]  ;;  %v5420_v53 = vpack.c.bf16 %v3808_v40, %v3807_v45  ;;  %v12541_v25 = vld [vmem:[#allocation121_spill] sm:$0xff]  ;;  %v12543_v0 = vld [vmem:[#allocation176_spill] sm:$0xff] }
 0x793   :  { %12524 = vst [vmem:[#allocation113_spill] sm:$0xff] %v9670_v41  ;;  %v9703_v41 = vmul.f32 0.01, %v12529_v21  ;;  %v9736_v15 = vmul.f32 0.01, %v12541_v25  ;;  %v3817_v36 = vsel %vm12544_vm12, %v8639_v30, %v12543_v0  ;;  %v12549_v45 = vld [vmem:[#allocation124_spill] sm:$0xff] }
 0x794   :  { %12526 = vst [vmem:[#allocation115_spill] sm:$0xff] %v9673_v9  ;;  %v3809_v9 = vsel %vm3433_vm11, %v8607_v34, %v9240_v16  ;;  %v3812_v34 = vsel %vm3436_vm14, %v8619_v29, %v9253_v24  ;;  %v12532_v16 = vld [vmem:[#allocation173_spill] sm:$0xff]  ;;  %v12535_v29 = vld [vmem:[#allocation174_spill] sm:$0xff]  ;;  %vm12538_vm14 = vcmp.gt.f32.partialorder %v8635_v50, 0.0  ;;  %v9749_v40 = vmul.f32 0.01, %v12549_v45 }
 0x795   :  { %12528 = vst [vmem:[#allocation239_spill] sm:$0xff] %v9700_v62  ;;  %v3814_v20 = vsel %vm3438_vm0, %v8627_v10, %v12532_v16  ;;  %v12534_v62 = vld [vmem:[#allocation114_spill] sm:$0xff]  ;;  %v3815_v24 = vsel %vm12536_vm13, %v8631_v60, %v12535_v29  ;;  %v3816_v5 = vsel %vm12538_vm14, %v8635_v50, %v12537_v7  ;;  %v5425_v21 = vpack.c.bf16 %v3810_v51, %v3809_v9  ;;  %v12547_v9 = vld [vmem:[#allocation120_spill] sm:$0xff]  ;;  %v12551_v51 = vld [vmem:[#allocation179_spill] sm:$0xff] }
 0x796   :  { %12530 = vst [vmem:[#allocation240_spill] sm:$0xff] %v9703_v41  ;;  %v12533_v41 = vld [vmem:[#allocation110_spill] sm:$0xff]  ;;  %vm12546_vm13 = vcmp.gt.f32.partialorder %v8643_v57, 0.0  ;;  %v5430_v50 = vpack.c.bf16 %v3812_v34, %v3811_v56  ;;  %vm12552_vm0 = vcmp.gt.f32.partialorder %v8647_v47, 0.0  ;;  %v12553_v30 = vld [vmem:[#allocation180_spill] sm:$0xff]  ;;  %vm12554_vm12 = vcmp.gt.f32.partialorder %v8651_v11, 0.0 }
 0x797   :  { %vm3461_vm11 = vcmp.gt.f32.partialorder %v12533_v41, 0.0  ;;  %v12540_v10 = vld [vmem:[#allocation118_spill] sm:$0xff]  ;;  %12542 = vst [vmem:[#allocation172_spill] sm:$0xff] %v9736_v15  ;;  %v3819_v29 = vsel %vm12552_vm0, %v8647_v47, %v12551_v51  ;;  %v3820_v0 = vsel %vm12554_vm12, %v8651_v11, %v12553_v30  ;;  %v12555_v56 = vld [vmem:[#allocation125_spill] sm:$0xff]  ;;  %v12556_v34 = vld [vmem:[#allocation11_spill] sm:$0xff]  ;;  %vm12561_vm0 = vcmp.gt.f32.partialorder %v8659_v4, 0.0 }
 0x798   :  { %v12545_v60 = vld [vmem:[#allocation178_spill] sm:$0xff]  ;;  %5411 = vst [vmem:[#allocation7] sm:$0xff] %v5410_v8   ;;  %v12560_v47 = vld [vmem:[#allocation183_spill] sm:$0xff]  ;;  %v5440_v11 = vpack.c.bf16 %v3816_v5, %v3815_v24  ;;  %vm12567_vm14 = vcmp.gt.f32.partialorder %v8663_v3, 0.0  ;;  %v12570_v5 = vld [vmem:[#allocation129_spill] sm:$0xff] }
 0x799   :  { %v3818_v16 = vsel %vm12546_vm13, %v8643_v57, %v12545_v60  ;;  %v12548_v7 = vld [vmem:[#allocation122_spill] sm:$0xff]  ;;  %12550 = vst [vmem:[#allocation173_spill] sm:$0xff] %v9749_v40  ;;  %v5435_v57 = vpack.c.bf16 %v3814_v20, %v3813_v39  ;;  %v3822_v51 = vsel %vm12561_vm0, %v8659_v4, %v12560_v47  ;;  %v12562_v39 = vld [vmem:[#allocation12_spill] sm:$0xff]  ;;  %v12563_v20 = vld [vmem:[#allocation13_spill] sm:$0xff]  ;;  %vm12573_vm13 = vcmp.gt.f32.partialorder %v12328_v26, 0.0 }
 0x79a   :  { %vm3466_vm15 = vcmp.gt.f32.partialorder %v12548_v7, 0.0  ;;  %5872 = vst [vmem:[#allocation7 + $0x8] sm:$0xff] %v5415_v55   ;;  %v12557_v8 = vld [vmem:[#allocation126_spill] sm:$0xff]  ;;  %vm3469_vm12 = vcmp.gt.f32.partialorder %v12562_v39, 0.0  ;;  %v12564_v55 = vld [vmem:[#allocation127_spill] sm:$0xff]  ;;  %v5445_v4 = vpack.c.bf16 %v3818_v16, %v3817_v36  ;;  %v12576_v36 = vld [vmem:[#allocation17_spill] sm:$0xff] }
 0x79b   :  { %v9762_v60 = vmul.f32 0.01, %v12557_v8  ;;  %v12559_v40 = vld [vmem:[#allocation182_spill] sm:$0xff]  ;;  %5873 = vst [vmem:[#allocation7 + $0x10] sm:$0xff] %v5420_v53   ;;  %v9775_v30 = vmul.f32 0.01, %v12564_v55 }
 0x79c   :  { %v3821_v15 = vsel %vm3445_vm4, %v8655_v28, %v12559_v40  ;;  %v12568_v28 = vld [vmem:[#allocation185_spill] sm:$0xff]  ;;  %5874 = vst [vmem:[#allocation7 + $0x18] sm:$0xff] %v5425_v21   ;;  %v12569_v24 = vld [vmem:[#allocation14_spill] sm:$0xff]  ;;  %v9788_v53 = vmul.f32 0.01, %v12570_v5  ;;  %v12572_v47 = vld [vmem:[#allocation139_spill] sm:$0xff] }
 0x79d   :  { %12558 = vst [vmem:[#allocation110_spill] sm:$0xff] %v9762_v60  ;;  %v12566_v60 = vld [vmem:[#allocation184_spill] sm:$0xff]  ;;  %v3824_v40 = vsel %vm3448_vm2, %v8667_v31, %v12568_v28  ;;  %vm3471_vm4 = vcmp.gt.f32.partialorder %v12569_v24, 0.0  ;;  %v5450_v31 = vpack.c.bf16 %v3820_v0, %v3819_v29  ;;  %v12577_v16 = vld [vmem:[#allocation131_spill] sm:$0xff]  ;;  %vm12580_vm0 = vcmp.gt.f32.partialorder %v12334_v42, 0.0 }
 0x79e   :  { %12565 = vst [vmem:[#allocation114_spill] sm:$0xff] %v9775_v30  ;;  %v3823_v8 = vsel %vm12567_vm14, %v8663_v3, %v12566_v60  ;;  %v3825_v30 = vsel %vm12573_vm13, %v12328_v26, %v12572_v47  ;;  %v12574_v3 = vld [vmem:[#allocation140_spill] sm:$0xff]  ;;  %v9801_v28 = vmul.f32 0.01, %v12577_v16  ;;  %v12581_v26 = vld [vmem:[#allocation142_spill] sm:$0xff]  ;;  %vm12586_vm14 = vcmp.gt.f32.partialorder %v12338_v43, 0.0 }
 0x79f   :  { %12571 = vst [vmem:[#allocation174_spill] sm:$0xff] %v9788_v53  ;;  %v3826_v60 = vsel %vm3450_vm1, %v12330_v44, %v12574_v3  ;;  %v12575_v21 = vld [vmem:[#allocation16_spill] sm:$0xff]  ;;  %v12579_v53 = vld [vmem:[#allocation141_spill] sm:$0xff]  ;;  %v3828_v47 = vsel %vm3452_vm3, %v12336_v35, %v12581_v26  ;;  %v5455_v44 = vpack.c.bf16 %v3822_v51, %v3821_v15  ;;  %vm3475_vm1 = vcmp.gt.f32.partialorder %v12398_v18, 0.0 }
 0x7a0   :  { %5875 = vst [vmem:[#allocation7 + $0x20] sm:$0xff] %v5430_v50   ;;  %vm3473_vm2 = vcmp.gt.f32.partialorder %v12575_v21, 0.0  ;;  %v3827_v5 = vsel %vm12580_vm0, %v12334_v42, %v12579_v53  ;;  %v12582_v50 = vld [vmem:[#allocation19_spill] sm:$0xff]  ;;  %v12583_v29 = vld [vmem:[#allocation132_spill] sm:$0xff]  ;;  %v12587_v42 = vld [vmem:[#allocation150_spill] sm:$0xff]  ;;  %v5460_v35 = vpack.c.bf16 %v3824_v40, %v3823_v8  ;;  %vm3478_vm0 = vcmp.gt.f32.partialorder %v8787_v49, 0.0 }
 0x7a1   :  { %12578 = vst [vmem:[#allocation175_spill] sm:$0xff] %v9801_v28  ;;  %vm3476_vm13 = vcmp.gt.f32.partialorder %v12582_v50, 0.0  ;;  %v9814_v0 = vmul.f32 0.01, %v12583_v29  ;;  %v12585_v3 = vld [vmem:[#allocation148_spill] sm:$0xff]  ;;  %v3830_v53 = vsel %vm3454_vm5, %v12342_v23, %v12587_v42  ;;  %v5465_v23 = vpack.c.bf16 %v3826_v60, %v3825_v30  ;;  %v12594_v8 = vld [vmem:[#allocation21_spill] sm:$0xff] }
 0x7a2   :  { %5876 = vst [vmem:[#allocation7 + $0x28] sm:$0xff] %v5435_v57   ;;  %v3829_v28 = vsel %vm12586_vm14, %v12338_v43, %v12585_v3  ;;  %v12588_v15 = vld [vmem:[#allocation20_spill] sm:$0xff]  ;;  %v12589_v57 = vld [vmem:[#allocation135_spill] sm:$0xff]  ;;  %v12592_v43 = vld [vmem:[#allocation157_spill] sm:$0xff]  ;;  %vm12593_vm14 = vcmp.gt.f32.partialorder %v12346_v6, 0.0  ;;  %vm3479_vm5 = vcmp.gt.f32.partialorder %v12594_v8, 0.0 }
 0x7a3   :  { %12584 = vst [vmem:[#allocation116_spill] sm:$0xff] %v9814_v0  ;;  %v9827_v51 = vmul.f32 0.01, %v12589_v57  ;;  %v12591_v26 = vld [vmem:[#allocation156_spill] sm:$0xff]  ;;  %v3832_v3 = vsel %vm12593_vm14, %v12346_v6, %v12592_v43  ;;  %vm3480_vm3 = vcmp.gt.f32.partialorder %v12409_v37, 0.0  ;;  %v12597_v42 = vld [vmem:[#allocation158_spill] sm:$0xff]  ;;  %v5470_v6 = vpack.c.bf16 %v3828_v47, %v3827_v5 }
 0x7a4   :  { %5877 = vst [vmem:[#allocation7 + $0x30] sm:$0xff] %v5440_v11   ;;  %v3831_v0 = vsel %vm3455_vm7, %v12344_v17, %v12591_v26  ;;  %v12595_v11 = vld [vmem:[#allocation136_spill] sm:$0xff]  ;;  %v12598_v17 = vld [vmem:[#allocation159_spill] sm:$0xff]  ;;  %vm3481_vm7 = vcmp.gt.f32.partialorder %v8799_v13, 0.0  ;;  %v12602_v43 = vld [vmem:[#allocation106_spill] sm:$0xff] }
 0x7a5   :  { %12590 = vst [vmem:[#allocation118_spill] sm:$0xff] %v9827_v51  ;;  %v9840_v40 = vmul.f32 0.01, %v12595_v11  ;;  %v3833_v51 = vsel %vm3457_vm8, %v12350_v19, %v12597_v42  ;;  %v3834_v26 = vsel %vm3458_vm6, %v12352_v61, %v12598_v17  ;;  %v12599_v30 = vld [vmem:[#allocation23_spill] sm:$0xff]  ;;  %v12603_v19 = vld [vmem:[#allocation108_spill] sm:$0xff]  ;;  %v5475_v61 = vpack.c.bf16 %v3830_v53, %v3829_v28  ;;  %v12604_v5 = vld [vmem:[#allocation138_spill] sm:$0xff] }
 0x7a6   :  { %5878 = vst [vmem:[#allocation7 + $0x38] sm:$0xff] %v5445_v4   ;;  %vm3482_vm14 = vcmp.gt.f32.partialorder %v12599_v30, 0.0  ;;  %v12600_v4 = vld [vmem:[#allocation137_spill] sm:$0xff]  ;;  %v3836_v42 = vsel %vm3460_vm10, %v12358_v32, %v12603_v19  ;;  %v12606_v47 = vld [vmem:[#allocation186_spill] sm:$0xff]  ;;  %v5480_v32 = vpack.c.bf16 %v3832_v3, %v3831_v0  ;;  %v12611_v53 = vld [vmem:[#allocation143_spill] sm:$0xff]  ;;  %vm12614_vm8 = vcmp.gt.f32.partialorder %v12539_v27, 0.0 }
 0x7a7   :  { %12596 = vst [vmem:[#allocation121_spill] sm:$0xff] %v9840_v40  ;;  %v9853_v60 = vmul.f32 0.01, %v12600_v4  ;;  %v3835_v40 = vsel %vm3459_vm9, %v12354_v46, %v12602_v43  ;;  %v3837_v17 = vsel %vm3461_vm11, %v12533_v41, %v12606_v47  ;;  %v12607_v46 = vld [vmem:[#allocation187_spill] sm:$0xff]  ;;  %vm12608_vm9 = vcmp.gt.f32.partialorder %v12534_v62, 0.0  ;;  %v12609_v28 = vld [vmem:[#allocation29_spill] sm:$0xff] }
 0x7a8   :  { %5879 = vst [vmem:[#allocation7 + $0x40] sm:$0xff] %v5450_v31   ;;  %v9866_v31 = vmul.f32 0.01, %v12604_v5  ;;  %v3838_v43 = vsel %vm12608_vm9, %v12534_v62, %v12607_v46  ;;  %v9879_v19 = vmul.f32 0.01, %v12611_v53  ;;  %v12615_v41 = vld [vmem:[#allocation189_spill] sm:$0xff]  ;;  %v5485_v62 = vpack.c.bf16 %v3834_v26, %v3833_v51 }
 0x7a9   :  { %12601 = vst [vmem:[#allocation176_spill] sm:$0xff] %v9853_v60  ;;  %vm12616_vm11 = vcmp.gt.f32.partialorder %v12540_v10, 0.0  ;;  %v12617_v0 = vld [vmem:[#allocation33_spill] sm:$0xff]  ;;  %v12619_v3 = vld [vmem:[#allocation144_spill] sm:$0xff]  ;;  %vm12622_vm6 = vcmp.gt.f32.partialorder %v12547_v9, 0.0  ;;  %vm12629_vm10 = vcmp.gt.f32.partialorder %v12555_v56, 0.0 }
 0x7aa   :  { %5880 = vst [vmem:[#allocation7 + $0x48] sm:$0xff] %v5455_v44   ;;  %v12610_v44 = vld [vmem:[#allocation31_spill] sm:$0xff]  ;;  %v3840_v47 = vsel %vm12616_vm11, %v12540_v10, %v12615_v41  ;;  %vm3487_vm9 = vcmp.gt.f32.partialorder %v12617_v0, 0.0  ;;  %v9892_v46 = vmul.f32 0.01, %v12619_v3  ;;  %v5490_v10 = vpack.c.bf16 %v3836_v42, %v3835_v40  ;;  %v12624_v51 = vld [vmem:[#allocation37_spill] sm:$0xff] }
 0x7ab   :  { %12605 = vst [vmem:[#allocation178_spill] sm:$0xff] %v9866_v31  ;;  %v12613_v31 = vld [vmem:[#allocation188_spill] sm:$0xff]  ;;  %v12626_v26 = vld [vmem:[#allocation145_spill] sm:$0xff] }
 0x7ac   :  { %5881 = vst [vmem:[#allocation7 + $0x50] sm:$0xff] %v5460_v35   ;;  %v3839_v60 = vsel %vm12614_vm8, %v12539_v27, %v12613_v31  ;;  %v12618_v35 = vld [vmem:[#allocation35_spill] sm:$0xff]  ;;  %v9905_v41 = vmul.f32 0.01, %v12626_v26  ;;  %v12632_v40 = vld [vmem:[#allocation41_spill] sm:$0xff]  ;;  %vm3492_vm8 = vcmp.gt.f32.partialorder %v12437_v2, 0.0 }
 0x7ad   :  { %12612 = vst [vmem:[#allocation120_spill] sm:$0xff] %v9879_v19  ;;  %v12621_v19 = vld [vmem:[#allocation190_spill] sm:$0xff]  ;;  %v12623_v27 = vld [vmem:[#allocation191_spill] sm:$0xff] }
 0x7ae   :  { %5882 = vst [vmem:[#allocation7 + $0x58] sm:$0xff] %v5465_v23   ;;  %v3841_v53 = vsel %vm12622_vm6, %v12547_v9, %v12621_v19  ;;  %v3842_v31 = vsel %vm3466_vm15, %v12548_v7, %v12623_v27  ;;  %v12625_v23 = vld [vmem:[#allocation39_spill] sm:$0xff]  ;;  %v12630_v9 = vld [vmem:[#allocation193_spill] sm:$0xff]  ;;  %vm12631_vm6 = vcmp.gt.f32.partialorder %v12556_v34, 0.0  ;;  %v5495_v7 = vpack.c.bf16 %v3838_v43, %v3837_v17  ;;  %v12635_v27 = vld [vmem:[#allocation194_spill] sm:$0xff] }
 0x7af   :  { %12620 = vst [vmem:[#allocation122_spill] sm:$0xff] %v9892_v46  ;;  %vm3490_vm11 = vcmp.gt.f32.partialorder %v12625_v23, 0.0  ;;  %v12628_v46 = vld [vmem:[#allocation192_spill] sm:$0xff]  ;;  %v3844_v19 = vsel %vm12631_vm6, %v12556_v34, %v12630_v9  ;;  %v5500_v34 = vpack.c.bf16 %v3840_v47, %v3839_v60  ;;  %v12639_v17 = vld [vmem:[#allocation47_spill] sm:$0xff]  ;;  %v12645_v60 = vld [vmem:[#allocation49_spill] sm:$0xff] }
 0x7b0   :  { %5883 = vst [vmem:[#allocation7 + $0x60] sm:$0xff] %v5470_v6   ;;  %v3843_v3 = vsel %vm12629_vm10, %v12555_v56, %v12628_v46  ;;  %v12633_v6 = vld [vmem:[#allocation146_spill] sm:$0xff]  ;;  %v12636_v56 = vld [vmem:[#allocation195_spill] sm:$0xff]  ;;  %vm12637_vm10 = vcmp.gt.f32.partialorder %v12563_v20, 0.0  ;;  %vm3494_vm15 = vcmp.gt.f32.partialorder %v12639_v17, 0.0  ;;  %v12647_v47 = vld [vmem:[#allocation149_spill] sm:$0xff] }
 0x7b1   :  { %12627 = vst [vmem:[#allocation124_spill] sm:$0xff] %v9905_v41  ;;  %v9918_v42 = vmul.f32 0.01, %v12633_v6  ;;  %v3845_v41 = vsel %vm3469_vm12, %v12562_v39, %v12635_v27  ;;  %v3846_v46 = vsel %vm12637_vm10, %v12563_v20, %v12636_v56  ;;  %v12640_v43 = vld [vmem:[#allocation147_spill] sm:$0xff]  ;;  %vm12644_vm12 = vcmp.gt.f32.partialorder %v12390_v48, 0.0 }
 0x7b2   :  { %5884 = vst [vmem:[#allocation7 + $0x68] sm:$0xff] %v5475_v61   ;;  %v12638_v61 = vld [vmem:[#allocation45_spill] sm:$0xff]  ;;  %v9931_v9 = vmul.f32 0.01, %v12640_v43  ;;  %v12643_v39 = vld [vmem:[#allocation15_spill] sm:$0xff]  ;;  %v5505_v20 = vpack.c.bf16 %v3842_v31, %v3841_v53  ;;  %vm12663_vm10 = vcmp.gt.f32.partialorder %v12588_v15, 0.0 }
 0x7b3   :  { %12634 = vst [vmem:[#allocation179_spill] sm:$0xff] %v9918_v42  ;;  %v12642_v42 = vld [vmem:[#allocation196_spill] sm:$0xff]  ;;  %v3848_v27 = vsel %vm12644_vm12, %v12390_v48, %v12643_v39  ;;  %v9944_v56 = vmul.f32 0.01, %v12647_v47  ;;  %v5510_v48 = vpack.c.bf16 %v3844_v19, %v3843_v3  ;;  %v12652_v53 = vld [vmem:[#allocation53_spill] sm:$0xff]  ;;  %v12654_v31 = vld [vmem:[#allocation151_spill] sm:$0xff] }
 0x7b4   :  { %5885 = vst [vmem:[#allocation7 + $0x70] sm:$0xff] %v5480_v32   ;;  %v3847_v6 = vsel %vm3471_vm4, %v12569_v24, %v12642_v42  ;;  %v12646_v32 = vld [vmem:[#allocation51_spill] sm:$0xff]  ;;  %v12650_v24 = vld [vmem:[#allocation198_spill] sm:$0xff]  ;;  %vm12651_vm4 = vcmp.gt.f32.partialorder %v12576_v36, 0.0  ;;  %vm3497_vm12 = vcmp.gt.f32.partialorder %v12652_v53, 0.0  ;;  %v12658_v3 = vld [vmem:[#allocation57_spill] sm:$0xff] }
 0x7b5   :  { %12641 = vst [vmem:[#allocation180_spill] sm:$0xff] %v9931_v9  ;;  %vm3496_vm6 = vcmp.gt.f32.partialorder %v12646_v32, 0.0  ;;  %v12649_v9 = vld [vmem:[#allocation197_spill] sm:$0xff]  ;;  %v3850_v42 = vsel %vm12651_vm4, %v12576_v36, %v12650_v24  ;;  %v9957_v39 = vmul.f32 0.01, %v12654_v31  ;;  %v5515_v36 = vpack.c.bf16 %v3846_v46, %v3845_v41  ;;  %v12660_v19 = vld [vmem:[#allocation152_spill] sm:$0xff] }
 0x7b6   :  { %5886 = vst [vmem:[#allocation7 + $0x78] sm:$0xff] %v5485_v62   ;;  %v3849_v43 = vsel %vm3473_vm2, %v12575_v21, %v12649_v9  ;;  %v12653_v62 = vld [vmem:[#allocation55_spill] sm:$0xff]  ;;  %vm3499_vm2 = vcmp.gt.f32.partialorder %v12658_v3, 0.0  ;;  %v9970_v24 = vmul.f32 0.01, %v12660_v19  ;;  %v12665_v41 = vld [vmem:[#allocation61_spill] sm:$0xff] }
 0x7b7   :  { %12648 = vst [vmem:[#allocation125_spill] sm:$0xff] %v9944_v56  ;;  %v12656_v56 = vld [vmem:[#allocation18_spill] sm:$0xff]  ;;  %v12657_v21 = vld [vmem:[#allocation199_spill] sm:$0xff]  ;;  %v12667_v46 = vld [vmem:[#allocation153_spill] sm:$0xff] }
 0x7b8   :  { %5887 = vst [vmem:[#allocation7 + $0x80] sm:$0xff] %v5490_v10   ;;  %v3851_v47 = vsel %vm3475_vm1, %v12398_v18, %v12656_v56  ;;  %v3852_v9 = vsel %vm3476_vm13, %v12582_v50, %v12657_v21  ;;  %v12659_v10 = vld [vmem:[#allocation59_spill] sm:$0xff]  ;;  %v12664_v18 = vld [vmem:[#allocation201_spill] sm:$0xff]  ;;  %v5520_v50 = vpack.c.bf16 %v3848_v27, %v3847_v6  ;;  %vm3501_vm1 = vcmp.gt.f32.partialorder %v12665_v41, 0.0  ;;  %v12673_v27 = vld [vmem:[#allocation154_spill] sm:$0xff] }
 0x7b9   :  { %12655 = vst [vmem:[#allocation11_spill] sm:$0xff] %v9957_v39  ;;  %vm3500_vm4 = vcmp.gt.f32.partialorder %v12659_v10, 0.0  ;;  %v12662_v39 = vld [vmem:[#allocation200_spill] sm:$0xff]  ;;  %v3854_v56 = vsel %vm3478_vm0, %v8787_v49, %v12664_v18  ;;  %v9983_v21 = vmul.f32 0.01, %v12667_v46  ;;  %v5525_v49 = vpack.c.bf16 %v3850_v42, %v3849_v43  ;;  %v12671_v6 = vld [vmem:[#allocation65_spill] sm:$0xff] }
 0x7ba   :  { %5888 = vst [vmem:[#allocation7 + $0x88] sm:$0xff] %v5495_v7   ;;  %v3853_v31 = vsel %vm12663_vm10, %v12588_v15, %v12662_v39  ;;  %v12666_v7 = vld [vmem:[#allocation63_spill] sm:$0xff]  ;;  %v12670_v15 = vld [vmem:[#allocation22_spill] sm:$0xff]  ;;  %vm3503_vm0 = vcmp.gt.f32.partialorder %v12671_v6, 0.0  ;;  %v9996_v18 = vmul.f32 0.01, %v12673_v27 }
 0x7bb   :  { %12661 = vst [vmem:[#allocation182_spill] sm:$0xff] %v9970_v24  ;;  %vm3502_vm13 = vcmp.gt.f32.partialorder %v12666_v7, 0.0  ;;  %v12669_v24 = vld [vmem:[#allocation202_spill] sm:$0xff]  ;;  %v3856_v39 = vsel %vm3480_vm3, %v12409_v37, %v12670_v15  ;;  %v5530_v37 = vpack.c.bf16 %v3852_v9, %v3851_v47  ;;  %v12677_v43 = vld [vmem:[#allocation69_spill] sm:$0xff]  ;;  %v12679_v42 = vld [vmem:[#allocation155_spill] sm:$0xff]  ;;  %vm12682_vm10 = vcmp.gt.f32.partialorder %v12416_v14, 0.0 }
 0x7bc   :  { %5889 = vst [vmem:[#allocation7 + $0x90] sm:$0xff] %v5500_v34   ;;  %v3855_v19 = vsel %vm3479_vm5, %v12594_v8, %v12669_v24  ;;  %v12672_v34 = vld [vmem:[#allocation67_spill] sm:$0xff]  ;;  %v12676_v8 = vld [vmem:[#allocation204_spill] sm:$0xff]  ;;  %v10009_v15 = vmul.f32 0.01, %v12679_v42  ;;  %v12685_v47 = vld [vmem:[#allocation73_spill] sm:$0xff] }
 0x7bd   :  { %12668 = vst [vmem:[#allocation183_spill] sm:$0xff] %v9983_v21  ;;  %v12675_v21 = vld [vmem:[#allocation203_spill] sm:$0xff]  ;;  %v3858_v24 = vsel %vm3482_vm14, %v12599_v30, %v12676_v8  ;;  %v5535_v30 = vpack.c.bf16 %v3854_v56, %v3853_v31  ;;  %v12687_v9 = vld [vmem:[#allocation24_spill] sm:$0xff]  ;;  %vm12690_vm5 = vcmp.gt.f32.partialorder %v12609_v28, 0.0  ;;  %v12693_v31 = vld [vmem:[#allocation77_spill] sm:$0xff]  ;;  %vm12705_vm14 = vcmp.gt.f32.partialorder %v12624_v51, 0.0 }
 0x7be   :  { %5890 = vst [vmem:[#allocation7 + $0x98] sm:$0xff] %v5505_v20   ;;  %v3857_v46 = vsel %vm3481_vm7, %v8799_v13, %v12675_v21  ;;  %v12678_v20 = vld [vmem:[#allocation71_spill] sm:$0xff]  ;;  %vm12684_vm7 = vcmp.gt.f32.partialorder %v12420_v58, 0.0  ;;  %v10022_v8 = vmul.f32 0.01, %v12687_v9  ;;  %v12695_v56 = vld [vmem:[#allocation26_spill] sm:$0xff] }
 0x7bf   :  { %12674 = vst [vmem:[#allocation12_spill] sm:$0xff] %v9996_v18  ;;  %v12681_v18 = vld [vmem:[#allocation25_spill] sm:$0xff]  ;;  %v12683_v13 = vld [vmem:[#allocation27_spill] sm:$0xff] }
 0x7c0   :  { %5891 = vst [vmem:[#allocation7 + $0xa0] sm:$0xff] %v5510_v48   ;;  %v3859_v27 = vsel %vm12682_vm10, %v12416_v14, %v12681_v18  ;;  %v3860_v21 = vsel %vm12684_vm7, %v12420_v58, %v12683_v13  ;;  %v12686_v48 = vld [vmem:[#allocation75_spill] sm:$0xff]  ;;  %v12691_v14 = vld [vmem:[#allocation206_spill] sm:$0xff]  ;;  %vm12692_vm10 = vcmp.gt.f32.partialorder %v12610_v44, 0.0  ;;  %v5540_v58 = vpack.c.bf16 %v3856_v39, %v3855_v19  ;;  %v12700_v19 = vld [vmem:[#allocation81_spill] sm:$0xff] }
 0x7c1   :  { %12680 = vst [vmem:[#allocation13_spill] sm:$0xff] %v10009_v15  ;;  %vm3508_vm3 = vcmp.gt.f32.partialorder %v12686_v48, 0.0  ;;  %v12689_v15 = vld [vmem:[#allocation205_spill] sm:$0xff]  ;;  %v3862_v18 = vsel %vm12692_vm10, %v12610_v44, %v12691_v14  ;;  %v10035_v13 = vmul.f32 0.01, %v12695_v56  ;;  %v5545_v44 = vpack.c.bf16 %v3858_v24, %v3857_v46  ;;  %v12702_v39 = vld [vmem:[#allocation28_spill] sm:$0xff] }
 0x7c2   :  { %5892 = vst [vmem:[#allocation7 + $0xa8] sm:$0xff] %v5515_v36   ;;  %v3861_v42 = vsel %vm12690_vm5, %v12609_v28, %v12689_v15  ;;  %v12694_v36 = vld [vmem:[#allocation79_spill] sm:$0xff]  ;;  %v12698_v28 = vld [vmem:[#allocation208_spill] sm:$0xff]  ;;  %vm12699_vm5 = vcmp.gt.f32.partialorder %v12618_v35, 0.0  ;;  %vm3511_vm10 = vcmp.gt.f32.partialorder %v12700_v19, 0.0  ;;  %v12707_v46 = vld [vmem:[#allocation85_spill] sm:$0xff] }
 0x7c3   :  { %12688 = vst [vmem:[#allocation127_spill] sm:$0xff] %v10022_v8  ;;  %v12697_v8 = vld [vmem:[#allocation207_spill] sm:$0xff]  ;;  %v3864_v15 = vsel %vm12699_vm5, %v12618_v35, %v12698_v28  ;;  %v10048_v14 = vmul.f32 0.01, %v12702_v39  ;;  %v5550_v35 = vpack.c.bf16 %v3860_v21, %v3859_v27  ;;  %vm12711_vm7 = vcmp.gt.f32.partialorder %v12632_v40, 0.0  ;;  %v12713_v27 = vld [vmem:[#allocation32_spill] sm:$0xff] }
 0x7c4   :  { %5893 = vst [vmem:[#allocation7 + $0xb0] sm:$0xff] %v5520_v50   ;;  %v3863_v9 = vsel %vm3487_vm9, %v12617_v0, %v12697_v8  ;;  %v12701_v50 = vld [vmem:[#allocation83_spill] sm:$0xff]  ;;  %v12706_v0 = vld [vmem:[#allocation210_spill] sm:$0xff]  ;;  %vm3513_vm9 = vcmp.gt.f32.partialorder %v12707_v46, 0.0  ;;  %v12715_v21 = vld [vmem:[#allocation212_spill] sm:$0xff]  ;;  %vm12716_vm5 = vcmp.gt.f32.partialorder %v12638_v61, 0.0 }
 0x7c5   :  { %12696 = vst [vmem:[#allocation184_spill] sm:$0xff] %v10035_v13  ;;  %v12704_v13 = vld [vmem:[#allocation209_spill] sm:$0xff]  ;;  %v3866_v8 = vsel %vm3490_vm11, %v12625_v23, %v12706_v0  ;;  %v12710_v28 = vld [vmem:[#allocation211_spill] sm:$0xff]  ;;  %v5555_v23 = vpack.c.bf16 %v3862_v18, %v3861_v42  ;;  %vm3515_vm11 = vcmp.gt.f32.partialorder %v12499_v54, 0.0  ;;  %v3869_v0 = vsel %vm12716_vm5, %v12638_v61, %v12715_v21  ;;  %v12720_v18 = vld [vmem:[#allocation34_spill] sm:$0xff] }
 0x7c6   :  { %5894 = vst [vmem:[#allocation7 + $0xb8] sm:$0xff] %v5525_v49   ;;  %v3865_v56 = vsel %vm12705_vm14, %v12624_v51, %v12704_v13  ;;  %v12708_v49 = vld [vmem:[#allocation30_spill] sm:$0xff]  ;;  %v12712_v51 = vld [vmem:[#allocation43_spill] sm:$0xff]  ;;  %v12718_v42 = vld [vmem:[#allocation93_spill] sm:$0xff]  ;;  %vm12723_vm14 = vcmp.gt.f32.partialorder %v12645_v60, 0.0 }
 0x7c7   :  { %12703 = vst [vmem:[#allocation185_spill] sm:$0xff] %v10048_v14  ;;  %v10061_v24 = vmul.f32 0.01, %v12708_v49  ;;  %v3867_v14 = vsel %vm12711_vm7, %v12632_v40, %v12710_v28  ;;  %v3868_v13 = vsel %vm3492_vm8, %v12437_v2, %v12712_v51  ;;  %v12717_v40 = vld [vmem:[#allocation213_spill] sm:$0xff]  ;;  %v5560_v2 = vpack.c.bf16 %v3864_v15, %v3863_v9  ;;  %v12724_v61 = vld [vmem:[#allocation215_spill] sm:$0xff] }
 0x7c8   :  { %5895 = vst [vmem:[#allocation7 + $0xc0] sm:$0xff] %v5530_v37   ;;  %v10074_v37 = vmul.f32 0.01, %v12713_v27  ;;  %v3870_v28 = vsel %vm3494_vm15, %v12639_v17, %v12717_v40  ;;  %vm3517_vm8 = vcmp.gt.f32.partialorder %v12718_v42, 0.0  ;;  %v10087_v51 = vmul.f32 0.01, %v12720_v18 }
 0x7c9   :  { %12709 = vst [vmem:[#allocation14_spill] sm:$0xff] %v10061_v24  ;;  %v3872_v21 = vsel %vm3496_vm6, %v12646_v32, %v12724_v61  ;;  %v5565_v17 = vpack.c.bf16 %v3866_v8, %v3865_v56  ;;  %v12725_v9 = vld [vmem:[#allocation99_spill] sm:$0xff]  ;;  %v12728_v40 = vld [vmem:[#allocation216_spill] sm:$0xff]  ;;  %v5570_v32 = vpack.c.bf16 %v3868_v13, %v3867_v14  ;;  %v12731_v56 = vld [vmem:[#allocation101_spill] sm:$0xff]  ;;  %vm3522_vm15 = vcmp.gt.f32.partialorder %v12513_v33, 0.0 }
 0x7ca   :  { %5896 = vst [vmem:[#allocation7 + $0xc8] sm:$0xff] %v5535_v30   ;;  %v12719_v30 = vld [vmem:[#allocation95_spill] sm:$0xff]  ;;  %vm3520_vm5 = vcmp.gt.f32.partialorder %v12725_v9, 0.0  ;;  %vm3521_vm6 = vcmp.gt.f32.partialorder %v12731_v56, 0.0  ;;  %v12734_v61 = vld [vmem:[#allocation218_spill] sm:$0xff]  ;;  %v12736_v14 = vld [vmem:[#allocation105_spill] sm:$0xff] }
 0x7cb   :  { %12714 = vst [vmem:[#allocation139_spill] sm:$0xff] %v10074_v37  ;;  %vm3518_vm7 = vcmp.gt.f32.partialorder %v12719_v30, 0.0  ;;  %v12722_v37 = vld [vmem:[#allocation214_spill] sm:$0xff]  ;;  %v12738_v13 = vld [vmem:[#allocation40_spill] sm:$0xff] }
 0x7cc   :  { %5897 = vst [vmem:[#allocation7 + $0xd0] sm:$0xff] %v5540_v58   ;;  %v3871_v24 = vsel %vm12723_vm14, %v12645_v60, %v12722_v37  ;;  %v12726_v58 = vld [vmem:[#allocation36_spill] sm:$0xff]  ;;  %v12729_v60 = vld [vmem:[#allocation217_spill] sm:$0xff]  ;;  %vm12730_vm14 = vcmp.gt.f32.partialorder %v12653_v62, 0.0 }
 0x7cd   :  { %12721 = vst [vmem:[#allocation140_spill] sm:$0xff] %v10087_v51  ;;  %v10100_v15 = vmul.f32 0.01, %v12726_v58  ;;  %v3873_v51 = vsel %vm3497_vm12, %v12652_v53, %v12728_v40  ;;  %v3874_v37 = vsel %vm12730_vm14, %v12653_v62, %v12729_v60  ;;  %v12735_v53 = vld [vmem:[#allocation219_spill] sm:$0xff]  ;;  %v5575_v62 = vpack.c.bf16 %v3870_v28, %v3869_v0  ;;  %v12744_v28 = vld [vmem:[#allocation222_spill] sm:$0xff] }
 0x7ce   :  { %5898 = vst [vmem:[#allocation7 + $0xd8] sm:$0xff] %v5545_v44   ;;  %v12732_v44 = vld [vmem:[#allocation38_spill] sm:$0xff]  ;;  %v3876_v40 = vsel %vm3500_vm4, %v12659_v10, %v12735_v53  ;;  %vm3523_vm12 = vcmp.gt.f32.partialorder %v12736_v14, 0.0  ;;  %v10126_v60 = vmul.f32 0.01, %v12738_v13  ;;  %v5580_v10 = vpack.c.bf16 %v3872_v21, %v3871_v24  ;;  %v12747_v24 = vld [vmem:[#allocation44_spill] sm:$0xff] }
 0x7cf   :  { %12727 = vst [vmem:[#allocation16_spill] sm:$0xff] %v10100_v15  ;;  %v10113_v8 = vmul.f32 0.01, %v12732_v44  ;;  %v3875_v15 = vsel %vm3499_vm2, %v12658_v3, %v12734_v61  ;;  %v12741_v3 = vld [vmem:[#allocation221_spill] sm:$0xff]  ;;  %v3879_v53 = vsel %vm3503_vm0, %v12671_v6, %v12744_v28  ;;  %v12749_v21 = vld [vmem:[#allocation224_spill] sm:$0xff]  ;;  %vm12750_vm4 = vcmp.gt.f32.partialorder %v12677_v43, 0.0 }
 0x7d0   :  { %5899 = vst [vmem:[#allocation7 + $0xe0] sm:$0xff] %v5550_v35   ;;  %v12737_v35 = vld [vmem:[#allocation107_spill] sm:$0xff]  ;;  %v3878_v61 = vsel %vm3502_vm13, %v12666_v7, %v12741_v3  ;;  %v5585_v7 = vpack.c.bf16 %v3874_v37, %v3873_v51  ;;  %v3881_v3 = vsel %vm12750_vm4, %v12677_v43, %v12749_v21  ;;  %v12751_v6 = vld [vmem:[#allocation225_spill] sm:$0xff]  ;;  %vm12752_vm0 = vcmp.gt.f32.partialorder %v12678_v20, 0.0  ;;  %v12755_v37 = vld [vmem:[#allocation46_spill] sm:$0xff] }
 0x7d1   :  { %12733 = vst [vmem:[#allocation17_spill] sm:$0xff] %v10113_v8  ;;  %vm3524_vm14 = vcmp.gt.f32.partialorder %v12737_v35, 0.0  ;;  %v12740_v8 = vld [vmem:[#allocation220_spill] sm:$0xff]  ;;  %v3882_v28 = vsel %vm12752_vm0, %v12678_v20, %v12751_v6  ;;  %v12753_v51 = vld [vmem:[#allocation117_spill] sm:$0xff]  ;;  %vm12758_vm2 = vcmp.gt.f32.partialorder %v12685_v47, 0.0  ;;  %v12759_v43 = vld [vmem:[#allocation227_spill] sm:$0xff] }
 0x7d2   :  { %5900 = vst [vmem:[#allocation7 + $0xe8] sm:$0xff] %v5555_v23   ;;  %v3877_v44 = vsel %vm3501_vm1, %v12665_v41, %v12740_v8  ;;  %v12742_v23 = vld [vmem:[#allocation42_spill] sm:$0xff]  ;;  %v12745_v41 = vld [vmem:[#allocation223_spill] sm:$0xff]  ;;  %vm12746_vm1 = vcmp.gt.f32.partialorder %v12672_v34, 0.0  ;;  %v3884_v21 = vsel %vm3508_vm3, %v12686_v48, %v12759_v43  ;;  %vm3532_vm0 = vcmp.gt.f32.partialorder %v12549_v45, 0.0 }
 0x7d3   :  { %12739 = vst [vmem:[#allocation131_spill] sm:$0xff] %v10126_v60  ;;  %v10139_v0 = vmul.f32 0.01, %v12742_v23  ;;  %v3880_v8 = vsel %vm12746_vm1, %v12672_v34, %v12745_v41  ;;  %v5590_v34 = vpack.c.bf16 %v3876_v40, %v3875_v15  ;;  %vm3529_vm1 = vcmp.gt.f32.partialorder %v12753_v51, 0.0  ;;  %v12760_v15 = vld [vmem:[#allocation48_spill] sm:$0xff]  ;;  %v12769_v43 = vld [vmem:[#allocation230_spill] sm:$0xff] }
 0x7d4   :  { %5901 = vst [vmem:[#allocation7 + $0xf0] sm:$0xff] %v5560_v2   ;;  %v10152_v2 = vmul.f32 0.01, %v12747_v24  ;;  %v10165_v41 = vmul.f32 0.01, %v12755_v37  ;;  %v5595_v20 = vpack.c.bf16 %v3878_v61, %v3877_v44  ;;  %v12762_v40 = vld [vmem:[#allocation228_spill] sm:$0xff]  ;;  %v5600_v48 = vpack.c.bf16 %v3880_v8, %v3879_v53 }
 0x7d5   :  { %12743 = vst [vmem:[#allocation141_spill] sm:$0xff] %v10139_v0  ;;  %vm12763_vm13 = vcmp.gt.f32.partialorder %v12693_v31, 0.0  ;;  %v12766_v44 = vld [vmem:[#allocation126_spill] sm:$0xff]  ;;  %vm3534_vm4 = vcmp.gt.f32.partialorder %v12564_v55, 0.0  ;;  %vm3536_vm3 = vcmp.gt.f32.partialorder %v12577_v16, 0.0  ;;  %v12773_v53 = vld [vmem:[#allocation161_spill] sm:$0xff] }
 0x7d6   :  { %5902 = vst [vmem:[#allocation7 + $0xf8] sm:$0xff] %v5565_v17   ;;  %v12754_v17 = vld [vmem:[#allocation119_spill] sm:$0xff]  ;;  %v3885_v6 = vsel %vm12763_vm13, %v12693_v31, %v12762_v40  ;;  %vm12771_vm13 = vcmp.gt.f32.partialorder %v12701_v50, 0.0  ;;  %v10204_v8 = vmul.f32 0.01, %v12773_v53 }
 0x7d7   :  { %12748 = vst [vmem:[#allocation142_spill] sm:$0xff] %v10152_v2  ;;  %v12757_v2 = vld [vmem:[#allocation226_spill] sm:$0xff]  ;;  %v12770_v31 = vld [vmem:[#allocation231_spill] sm:$0xff] }
 0x7d8   :  { %5903 = vst [vmem:[#allocation7 + $0x100] sm:$0xff] %v5570_v32   ;;  %v3883_v0 = vsel %vm12758_vm2, %v12685_v47, %v12757_v2  ;;  %v10178_v32 = vmul.f32 0.01, %v12760_v15  ;;  %v12764_v47 = vld [vmem:[#allocation229_spill] sm:$0xff]  ;;  %vm12765_vm2 = vcmp.gt.f32.partialorder %v12694_v36, 0.0  ;;  %v3888_v40 = vsel %vm12771_vm13, %v12701_v50, %v12770_v31 }
 0x7d9   :  { %12756 = vst [vmem:[#allocation19_spill] sm:$0xff] %v10165_v41  ;;  %v3886_v2 = vsel %vm12765_vm2, %v12694_v36, %v12764_v47  ;;  %v5605_v36 = vpack.c.bf16 %v3882_v28, %v3881_v3  ;;  %v12775_v47 = vld [vmem:[#allocation232_spill] sm:$0xff]  ;;  %v5610_v50 = vpack.c.bf16 %v3884_v21, %v3883_v0  ;;  %vm3538_vm2 = vcmp.gt.f32.partialorder %v12589_v57, 0.0  ;;  %v12780_v28 = vld [vmem:[#allocation89_spill] sm:$0xff]  ;;  %v12783_v0 = vld [vmem:[#allocation50_spill] sm:$0xff] }
 0x7da   :  { %5904 = vst [vmem:[#allocation7 + $0x108] sm:$0xff] %v5575_v62   ;;  %v12767_v62 = vld [vmem:[#allocation160_spill] sm:$0xff]  ;;  %v3891_v31 = vsel %vm3515_vm11, %v12499_v54, %v12780_v28  ;;  %v12785_v21 = vld [vmem:[#allocation233_spill] sm:$0xff]  ;;  %v12786_v54 = vld [vmem:[#allocation234_spill] sm:$0xff]  ;;  %vm3541_vm11 = vcmp.gt.f32.partialorder %v12604_v5, 0.0  ;;  %vm12791_vm13 = vcmp.gt.f32.partialorder %v12507_v38, 0.0 }
 0x7db   :  { %12761 = vst [vmem:[#allocation132_spill] sm:$0xff] %v10178_v32  ;;  %v10191_v61 = vmul.f32 0.01, %v12767_v62  ;;  %v3887_v32 = vsel %vm3511_vm10, %v12700_v19, %v12769_v43  ;;  %v12776_v19 = vld [vmem:[#allocation87_spill] sm:$0xff]  ;;  %vm12777_vm10 = vcmp.gt.f32.partialorder %v12497_v1, 0.0  ;;  %v3894_v28 = vsel %vm3518_vm7, %v12719_v30, %v12786_v54  ;;  %v12796_v54 = vld [vmem:[#allocation236_spill] sm:$0xff] }
 0x7dc   :  { %5905 = vst [vmem:[#allocation7 + $0x110] sm:$0xff] %v5580_v10   ;;  %v12772_v10 = vld [vmem:[#allocation129_spill] sm:$0xff]  ;;  %v3890_v43 = vsel %vm12777_vm10, %v12497_v1, %v12776_v19  ;;  %v5615_v1 = vpack.c.bf16 %v3886_v2, %v3885_v6  ;;  %vm3539_vm10 = vcmp.gt.f32.partialorder %v12595_v11, 0.0  ;;  %v3893_v19 = vsel %vm3517_vm8, %v12718_v42, %v12785_v21  ;;  %v12788_v6 = vld [vmem:[#allocation52_spill] sm:$0xff]  ;;  %v12792_v42 = vld [vmem:[#allocation235_spill] sm:$0xff] }
 0x7dd   :  { %12768 = vst [vmem:[#allocation148_spill] sm:$0xff] %v10191_v61  ;;  %v3889_v61 = vsel %vm3513_vm9, %v12707_v46, %v12775_v47  ;;  %v12781_v46 = vld [vmem:[#allocation91_spill] sm:$0xff]  ;;  %vm12782_vm9 = vcmp.gt.f32.partialorder %v12501_v63, 0.0  ;;  %v10243_v2 = vmul.f32 0.01, %v12788_v6  ;;  %v3896_v21 = vsel %vm3520_vm5, %v12725_v9, %v12792_v42 }
 0x7de   :  { %5906 = vst [vmem:[#allocation7 + $0x118] sm:$0xff] %v5585_v7   ;;  %v12778_v7 = vld [vmem:[#allocation162_spill] sm:$0xff]  ;;  %v3892_v47 = vsel %vm12782_vm9, %v12501_v63, %v12781_v46  ;;  %v5620_v63 = vpack.c.bf16 %v3888_v40, %v3887_v32  ;;  %v12790_v46 = vld [vmem:[#allocation97_spill] sm:$0xff]  ;;  %v5625_v30 = vpack.c.bf16 %v3890_v43, %v3889_v61  ;;  %v12793_v32 = vld [vmem:[#allocation144_spill] sm:$0xff]  ;;  %vm3544_vm7 = vcmp.gt.f32.partialorder %v12626_v26, 0.0 }
 0x7df   :  { %12774 = vst [vmem:[#allocation150_spill] sm:$0xff] %v10204_v8  ;;  %v10217_v3 = vmul.f32 0.01, %v12778_v7  ;;  %vm3543_vm8 = vcmp.gt.f32.partialorder %v12793_v32, 0.0  ;;  %v5630_v9 = vpack.c.bf16 %v3892_v47, %v3891_v31  ;;  %v12798_v61 = vld [vmem:[#allocation146_spill] sm:$0xff]  ;;  %v12800_v43 = vld [vmem:[#allocation164_spill] sm:$0xff] }
 0x7e0   :  { %5907 = vst [vmem:[#allocation7 + $0x120] sm:$0xff] %v5590_v34   ;;  %v10230_v34 = vmul.f32 0.01, %v12783_v0  ;;  %vm3545_vm5 = vcmp.gt.f32.partialorder %v12798_v61, 0.0  ;;  %v10269_v42 = vmul.f32 0.01, %v12800_v43 }
 0x7e1   :  { %12779 = vst [vmem:[#allocation20_spill] sm:$0xff] %v10217_v3  ;;  %v12805_v31 = vld [vmem:[#allocation151_spill] sm:$0xff]  ;;  %v12806_v47 = vld [vmem:[#allocation165_spill] sm:$0xff] }
 0x7e2   :  { %5908 = vst [vmem:[#allocation7 + $0x128] sm:$0xff] %v5595_v20   ;;  %v12787_v20 = vld [vmem:[#allocation143_spill] sm:$0xff] }
 0x7e3   :  { %12784 = vst [vmem:[#allocation135_spill] sm:$0xff] %v10230_v34  ;;  %vm3542_vm9 = vcmp.gt.f32.partialorder %v12787_v20, 0.0  ;;  %v3895_v34 = vsel %vm12791_vm13, %v12507_v38, %v12790_v46  ;;  %v12797_v38 = vld [vmem:[#allocation103_spill] sm:$0xff]  ;;  %vm12809_vm13 = vcmp.gt.f32.partialorder %v12519_v59, 0.0 }
 0x7e4   :  { %5909 = vst [vmem:[#allocation7 + $0x130] sm:$0xff] %v5600_v48   ;;  %v12794_v48 = vld [vmem:[#allocation163_spill] sm:$0xff]  ;;  %v3898_v46 = vsel %vm3522_vm15, %v12513_v33, %v12797_v38  ;;  %v5635_v33 = vpack.c.bf16 %v3894_v28, %v3893_v19  ;;  %v10282_v38 = vmul.f32 0.01, %v12806_v47  ;;  %v12813_v19 = vld [vmem:[#allocation153_spill] sm:$0xff]  ;;  %v12814_v28 = vld [vmem:[#allocation54_spill] sm:$0xff] }
 0x7e5   :  { %12789 = vst [vmem:[#allocation156_spill] sm:$0xff] %v10243_v2  ;;  %v10256_v40 = vmul.f32 0.01, %v12794_v48  ;;  %v3897_v2 = vsel %vm3521_vm6, %v12731_v56, %v12796_v54  ;;  %v12803_v56 = vld [vmem:[#allocation238_spill] sm:$0xff]  ;;  %vm3550_vm15 = vcmp.gt.f32.partialorder %v12813_v19, 0.0  ;;  %vm12817_vm6 = vcmp.gt.f32.partialorder %v12523_v12, 0.0 }
 0x7e6   :  { %5910 = vst [vmem:[#allocation7 + $0x138] sm:$0xff] %v5605_v36   ;;  %v12799_v36 = vld [vmem:[#allocation147_spill] sm:$0xff]  ;;  %v3900_v54 = vsel %vm3524_vm14, %v12737_v35, %v12803_v56  ;;  %v5640_v35 = vpack.c.bf16 %v3896_v21, %v3895_v34  ;;  %v10295_v56 = vmul.f32 0.01, %v12814_v28  ;;  %v12820_v34 = vld [vmem:[#allocation154_spill] sm:$0xff]  ;;  %v12822_v21 = vld [vmem:[#allocation56_spill] sm:$0xff] }
 0x7e7   :  { %12795 = vst [vmem:[#allocation157_spill] sm:$0xff] %v10256_v40  ;;  %v12802_v40 = vld [vmem:[#allocation237_spill] sm:$0xff]  ;;  %vm12831_vm14 = vcmp.gt.f32.partialorder %v12541_v25, 0.0 }
 0x7e8   :  { %5911 = vst [vmem:[#allocation7 + $0x140] sm:$0xff] %v5610_v50   ;;  %v3899_v3 = vsel %vm3523_vm12, %v12736_v14, %v12802_v40  ;;  %v12804_v50 = vld [vmem:[#allocation149_spill] sm:$0xff]  ;;  %v12810_v14 = vld [vmem:[#allocation111_spill] sm:$0xff]  ;;  %vm12811_vm12 = vcmp.gt.f32.partialorder %v12521_v52, 0.0 }
 0x7e9   :  { %12801 = vst [vmem:[#allocation21_spill] sm:$0xff] %v10269_v42  ;;  %v12808_v42 = vld [vmem:[#allocation109_spill] sm:$0xff]  ;;  %v3902_v40 = vsel %vm12811_vm12, %v12521_v52, %v12810_v14  ;;  %v5645_v52 = vpack.c.bf16 %v3898_v46, %v3897_v2  ;;  %v10308_v14 = vmul.f32 0.01, %v12822_v21  ;;  %v12827_v2 = vld [vmem:[#allocation24_spill] sm:$0xff]  ;;  %v12829_v46 = vld [vmem:[#allocation166_spill] sm:$0xff] }
 0x7ea   :  { %5912 = vst [vmem:[#allocation7 + $0x148] sm:$0xff] %v5615_v1   ;;  %v3901_v8 = vsel %vm12809_vm13, %v12519_v59, %v12808_v42  ;;  %v12812_v1 = vld [vmem:[#allocation152_spill] sm:$0xff]  ;;  %v12818_v59 = vld [vmem:[#allocation115_spill] sm:$0xff]  ;;  %vm12819_vm13 = vcmp.gt.f32.partialorder %v12525_v22, 0.0  ;;  %vm12835_vm12 = vcmp.gt.f32.partialorder %v12766_v44, 0.0 }
 0x7eb   :  { %12807 = vst [vmem:[#allocation136_spill] sm:$0xff] %v10282_v38  ;;  %v12816_v38 = vld [vmem:[#allocation113_spill] sm:$0xff]  ;;  %v3904_v42 = vsel %vm12819_vm13, %v12525_v22, %v12818_v59  ;;  %v5650_v22 = vpack.c.bf16 %v3900_v54, %v3899_v3  ;;  %vm3553_vm13 = vcmp.gt.f32.partialorder %v12827_v2, 0.0  ;;  %v10321_v59 = vmul.f32 0.01, %v12829_v46  ;;  %v12833_v3 = vld [vmem:[#allocation167_spill] sm:$0xff] }
 0x7ec   :  { %5913 = vst [vmem:[#allocation7 + $0x150] sm:$0xff] %v5620_v63   ;;  %v3903_v41 = vsel %vm12817_vm6, %v12523_v12, %v12816_v38  ;;  %v12821_v63 = vld [vmem:[#allocation155_spill] sm:$0xff]  ;;  %v12825_v12 = vld [vmem:[#allocation240_spill] sm:$0xff]  ;;  %vm12826_vm6 = vcmp.gt.f32.partialorder %v12754_v17, 0.0  ;;  %v12834_v54 = vld [vmem:[#allocation110_spill] sm:$0xff] }
 0x7ed   :  { %12815 = vst [vmem:[#allocation158_spill] sm:$0xff] %v10295_v56  ;;  %v12824_v56 = vld [vmem:[#allocation239_spill] sm:$0xff]  ;;  %v3906_v38 = vsel %vm12826_vm6, %v12754_v17, %v12825_v12  ;;  %v5655_v17 = vpack.c.bf16 %v3902_v40, %v3901_v8  ;;  %v3909_v12 = vsel %vm12835_vm12, %v12766_v44, %v12834_v54  ;;  %v12837_v8 = vld [vmem:[#allocation58_spill] sm:$0xff]  ;;  %vm12840_vm6 = vcmp.gt.f32.partialorder %v12772_v10, 0.0 }
 0x7ee   :  { %5914 = vst [vmem:[#allocation7 + $0x158] sm:$0xff] %v5625_v30   ;;  %v3905_v60 = vsel %vm3529_vm1, %v12753_v51, %v12824_v56  ;;  %v12828_v30 = vld [vmem:[#allocation26_spill] sm:$0xff]  ;;  %v12832_v51 = vld [vmem:[#allocation173_spill] sm:$0xff]  ;;  %vm3555_vm1 = vcmp.gt.f32.partialorder %v12702_v39, 0.0  ;;  %v12841_v44 = vld [vmem:[#allocation175_spill] sm:$0xff] }
 0x7ef   :  { %12823 = vst [vmem:[#allocation159_spill] sm:$0xff] %v10308_v14  ;;  %v12830_v14 = vld [vmem:[#allocation172_spill] sm:$0xff]  ;;  %v3908_v56 = vsel %vm3532_vm0, %v12549_v45, %v12832_v51  ;;  %v5660_v45 = vpack.c.bf16 %v3904_v42, %v3903_v41  ;;  %vm3557_vm0 = vcmp.gt.f32.partialorder %v12713_v27, 0.0  ;;  %v12839_v40 = vld [vmem:[#allocation174_spill] sm:$0xff]  ;;  %v3912_v54 = vsel %vm3536_vm3, %v12577_v16, %v12841_v44 }
 0x7f0   :  { %5915 = vst [vmem:[#allocation7 + $0x160] sm:$0xff] %v5630_v9   ;;  %v3907_v21 = vsel %vm12831_vm14, %v12541_v25, %v12830_v14  ;;  %v10334_v9 = vmul.f32 0.01, %v12833_v3  ;;  %v12836_v25 = vld [vmem:[#allocation114_spill] sm:$0xff]  ;;  %v3911_v51 = vsel %vm12840_vm6, %v12772_v10, %v12839_v40  ;;  %vm12845_vm14 = vcmp.gt.f32.partialorder %v12583_v29, 0.0 }
 0x7f1   :  { %5916 = vst [vmem:[#allocation7 + $0x168] sm:$0xff] %v5635_v33   ;;  %v3910_v14 = vsel %vm3534_vm4, %v12564_v55, %v12836_v25  ;;  %v10347_v33 = vmul.f32 0.01, %v12837_v8  ;;  %v5665_v55 = vpack.c.bf16 %v3906_v38, %v3905_v60  ;;  %vm3559_vm4 = vcmp.gt.f32.partialorder %v12726_v58, 0.0  ;;  %v12842_v41 = vld [vmem:[#allocation38_spill] sm:$0xff]  ;;  %v12844_v25 = vld [vmem:[#allocation116_spill] sm:$0xff] }
 0x7f2   :  { %5917 = vst [vmem:[#allocation7 + $0x170] sm:$0xff] %v5640_v35   ;;  %vm3560_vm12 = vcmp.gt.f32.partialorder %v12842_v41, 0.0  ;;  %v12843_v35 = vld [vmem:[#allocation60_spill] sm:$0xff]  ;;  %v12846_v10 = vld [vmem:[#allocation118_spill] sm:$0xff]  ;;  %v5670_v16 = vpack.c.bf16 %v3908_v56, %v3907_v21  ;;  %vm3562_vm6 = vcmp.gt.f32.partialorder %v12742_v23, 0.0  ;;  %v12848_v38 = vld [vmem:[#allocation121_spill] sm:$0xff] }
 0x7f3   :  { %12838 = vst [vmem:[#allocation23_spill] sm:$0xff] %v10347_v33  ;;  %v10360_v42 = vmul.f32 0.01, %v12843_v35  ;;  %v3913_v33 = vsel %vm12845_vm14, %v12583_v29, %v12844_v25  ;;  %v3914_v40 = vsel %vm3538_vm2, %v12589_v57, %v12846_v10  ;;  %v12847_v60 = vld [vmem:[#allocation168_spill] sm:$0xff]  ;;  %v3915_v44 = vsel %vm3539_vm10, %v12595_v11, %v12848_v38  ;;  %v12851_v21 = vld [vmem:[#allocation169_spill] sm:$0xff]  ;;  %v12852_v56 = vld [vmem:[#allocation178_spill] sm:$0xff] }
 0x7f4   :  { %5918 = vst [vmem:[#allocation7 + $0x178] sm:$0xff] %v5645_v52   ;;  %v10373_v52 = vmul.f32 0.01, %v12847_v60  ;;  %v12849_v29 = vld [vmem:[#allocation176_spill] sm:$0xff]  ;;  %vm12850_vm14 = vcmp.gt.f32.partialorder %v12600_v4, 0.0  ;;  %v5675_v57 = vpack.c.bf16 %v3910_v14, %v3909_v12  ;;  %vm3563_vm2 = vcmp.gt.f32.partialorder %v12747_v24, 0.0 }
 0x7f5   :  { %5919 = vst [vmem:[#allocation7 + $0x180] sm:$0xff] %v5650_v22   ;;  %v3916_v25 = vsel %vm12850_vm14, %v12600_v4, %v12849_v29  ;;  %vm3564_vm3 = vcmp.gt.f32.partialorder %v12755_v37, 0.0  ;;  %v10386_v22 = vmul.f32 0.01, %v12851_v21  ;;  %v3917_v10 = vsel %vm3541_vm11, %v12604_v5, %v12852_v56  ;;  %v12853_v11 = vld [vmem:[#allocation120_spill] sm:$0xff]  ;;  %v12855_v14 = vld [vmem:[#allocation122_spill] sm:$0xff] }
 0x7f6   :  { %5920 = vst [vmem:[#allocation7 + $0x188] sm:$0xff] %v5655_v17   ;;  %v3918_v38 = vsel %vm3542_vm9, %v12787_v20, %v12853_v11  ;;  %v5680_v4 = vpack.c.bf16 %v3912_v54, %v3911_v51  ;;  %vm3565_vm10 = vcmp.gt.f32.partialorder %v12760_v15, 0.0  ;;  %vm3566_vm14 = vcmp.gt.f32.partialorder %v12767_v62, 0.0  ;;  %v12854_v17 = vld [vmem:[#allocation62_spill] sm:$0xff]  ;;  %v12856_v5 = vld [vmem:[#allocation124_spill] sm:$0xff]  ;;  %v12858_v54 = vld [vmem:[#allocation179_spill] sm:$0xff] }
 0x7f7   :  { %5921 = vst [vmem:[#allocation7 + $0x190] sm:$0xff] %v5660_v45   ;;  %v10399_v12 = vmul.f32 0.01, %v12854_v17  ;;  %v3919_v29 = vsel %vm3543_vm8, %v12793_v32, %v12855_v14  ;;  %v3920_v56 = vsel %vm3544_vm7, %v12626_v26, %v12856_v5  ;;  %v5685_v20 = vpack.c.bf16 %v3914_v40, %v3913_v33  ;;  %v12857_v45 = vld [vmem:[#allocation64_spill] sm:$0xff]  ;;  %v12861_v33 = vld [vmem:[#allocation66_spill] sm:$0xff]  ;;  %v12862_v40 = vld [vmem:[#allocation125_spill] sm:$0xff] }
 0x7f8   :  { %5922 = vst [vmem:[#allocation7 + $0x198] sm:$0xff] %v5665_v55   ;;  %v10412_v51 = vmul.f32 0.01, %v12857_v45  ;;  %v3921_v11 = vsel %vm3545_vm5, %v12798_v61, %v12858_v54  ;;  %v12859_v32 = vld [vmem:[#allocation180_spill] sm:$0xff]  ;;  %vm12860_vm8 = vcmp.gt.f32.partialorder %v12799_v36, 0.0  ;;  %v5690_v26 = vpack.c.bf16 %v3916_v25, %v3915_v44  ;;  %v12864_v61 = vld [vmem:[#allocation11_spill] sm:$0xff] }
 0x7f9   :  { %v3922_v14 = vsel %vm12860_vm8, %v12799_v36, %v12859_v32  ;;  %5923 = vst [vmem:[#allocation7 + $0x1a0] sm:$0xff] %v5670_v16   ;;  %v10425_v55 = vmul.f32 0.01, %v12861_v33  ;;  %vm12863_vm9 = vcmp.gt.f32.partialorder %v12804_v50, 0.0  ;;  %vm12865_vm5 = vcmp.gt.f32.partialorder %v12805_v31, 0.0  ;;  %v12866_v16 = vld [vmem:[#allocation170_spill] sm:$0xff] }
 0x7fa   :  { %v3923_v5 = vsel %vm12863_vm9, %v12804_v50, %v12862_v40  ;;  %v3924_v54 = vsel %vm12865_vm5, %v12805_v31, %v12864_v61  ;;  %5924 = vst [vmem:[#allocation7 + $0x1a8] sm:$0xff] %v5675_v57   ;;  %v5695_v36 = vpack.c.bf16 %v3918_v38, %v3917_v10  ;;  %vm3571_vm8 = vcmp.gt.f32.partialorder %v12794_v48, 0.0  ;;  %v12867_v25 = vld [vmem:[#allocation182_spill] sm:$0xff]  ;;  %v12869_v50 = vld [vmem:[#allocation183_spill] sm:$0xff]  ;;  %v12872_v38 = vld [vmem:[#allocation12_spill] sm:$0xff] }
 0x7fb   :  { %v10438_v44 = vmul.f32 0.01, %v12866_v16  ;;  %vm12868_vm11 = vcmp.gt.f32.partialorder %v12812_v1, 0.0  ;;  %v3926_v40 = vsel %vm3550_vm15, %v12813_v19, %v12869_v50  ;;  %5925 = vst [vmem:[#allocation7 + $0x1b0] sm:$0xff] %v5680_v4   ;;  %v5700_v31 = vpack.c.bf16 %v3920_v56, %v3919_v29  ;;  %v12870_v57 = vld [vmem:[#allocation171_spill] sm:$0xff]  ;;  %v12876_v4 = vld [vmem:[#allocation56_spill] sm:$0xff] }
 0x7fc   :  { %v3925_v32 = vsel %vm12868_vm11, %v12812_v1, %v12867_v25  ;;  %vm3574_vm5 = vcmp.gt.f32.partialorder %v12814_v28, 0.0  ;;  %v10451_v10 = vmul.f32 0.01, %v12870_v57  ;;  %vm12873_vm7 = vcmp.gt.f32.partialorder %v12820_v34, 0.0  ;;  %v12874_v1 = vld [vmem:[#allocation13_spill] sm:$0xff]  ;;  %5926 = vst [vmem:[#allocation7 + $0x1b8] sm:$0xff] %v5685_v20  }
 0x7fd   :  { %v3927_v61 = vsel %vm12873_vm7, %v12820_v34, %v12872_v38  ;;  %vm12875_vm11 = vcmp.gt.f32.partialorder %v12821_v63, 0.0  ;;  %v5705_v19 = vpack.c.bf16 %v3922_v14, %v3921_v11  ;;  %vm3576_vm9 = vcmp.gt.f32.partialorder %v12829_v46, 0.0  ;;  %v12877_v29 = vld [vmem:[#allocation68_spill] sm:$0xff]  ;;  %v12878_v50 = vld [vmem:[#allocation127_spill] sm:$0xff]  ;;  %5927 = vst [vmem:[#allocation7 + $0x1c0] sm:$0xff] %v5690_v26   ;;  %v12881_v20 = vld [vmem:[#allocation70_spill] sm:$0xff] }
 0x7fe   :  { %12871 = vst [vmem:[#allocation137_spill] sm:$0xff] %v10451_v10  ;;  %v3928_v25 = vsel %vm12875_vm11, %v12821_v63, %v12874_v1  ;;  %v10464_v56 = vmul.f32 0.01, %v12877_v29  ;;  %v3929_v10 = vsel %vm3553_vm13, %v12827_v2, %v12878_v50  ;;  %v12879_v34 = vld [vmem:[#allocation184_spill] sm:$0xff]  ;;  %vm12880_vm7 = vcmp.gt.f32.partialorder %v12828_v30, 0.0  ;;  %v12882_v14 = vld [vmem:[#allocation185_spill] sm:$0xff] }
 0x7ff   :  { %v3930_v38 = vsel %vm12880_vm7, %v12828_v30, %v12879_v34  ;;  %v5710_v63 = vpack.c.bf16 %v3924_v54, %v3923_v5  ;;  %vm3578_vm15 = vcmp.gt.f32.partialorder %v12837_v8, 0.0  ;;  %v10477_v11 = vmul.f32 0.01, %v12881_v20  ;;  %v12883_v2 = vld [vmem:[#allocation14_spill] sm:$0xff]  ;;  %5928 = vst [vmem:[#allocation7 + $0x1c8] sm:$0xff] %v5695_v36   ;;  %v12885_v26 = vld [vmem:[#allocation177_spill] sm:$0xff] }
 0x800   :  { %v3931_v1 = vsel %vm3555_vm1, %v12702_v39, %v12882_v14  ;;  %vm12884_vm13 = vcmp.gt.f32.partialorder %v12708_v49, 0.0  ;;  %v5715_v30 = vpack.c.bf16 %v3926_v40, %v3925_v32  ;;  %vm3580_vm11 = vcmp.gt.f32.partialorder %v12847_v60, 0.0  ;;  %v12886_v54 = vld [vmem:[#allocation139_spill] sm:$0xff]  ;;  %v12887_v39 = vld [vmem:[#allocation140_spill] sm:$0xff]  ;;  %5929 = vst [vmem:[#allocation7 + $0x1d0] sm:$0xff] %v5700_v31   ;;  %v12889_v36 = vld [vmem:[#allocation181_spill] sm:$0xff] }
 0x801   :  { %v3932_v50 = vsel %vm12884_vm13, %v12708_v49, %v12883_v2  ;;  %v10490_v5 = vmul.f32 0.01, %v12885_v26  ;;  %v3933_v34 = vsel %vm3557_vm0, %v12713_v27, %v12886_v54  ;;  %vm12888_vm1 = vcmp.gt.f32.partialorder %v12720_v18, 0.0  ;;  %v12890_v40 = vld [vmem:[#allocation16_spill] sm:$0xff]  ;;  %v12891_v27 = vld [vmem:[#allocation17_spill] sm:$0xff]  ;;  %5930 = vst [vmem:[#allocation7 + $0x1d8] sm:$0xff] %v5705_v19  }
 0x802   :  { %v3934_v14 = vsel %vm12888_vm1, %v12720_v18, %v12887_v39  ;;  %v5720_v49 = vpack.c.bf16 %v3928_v25, %v3927_v61  ;;  %vm3581_vm13 = vcmp.gt.f32.partialorder %v12851_v21, 0.0  ;;  %v10503_v32 = vmul.f32 0.01, %v12889_v36  ;;  %v12892_v31 = vld [vmem:[#allocation72_spill] sm:$0xff]  ;;  %v12893_v25 = vld [vmem:[#allocation131_spill] sm:$0xff]  ;;  %5931 = vst [vmem:[#allocation7 + $0x1e0] sm:$0xff] %v5710_v63  }
 0x803   :  { %v3935_v2 = vsel %vm3559_vm4, %v12726_v58, %v12890_v40  ;;  %v3936_v54 = vsel %vm3560_vm12, %v12842_v41, %v12891_v27  ;;  %v5725_v18 = vpack.c.bf16 %v3930_v38, %v3929_v10  ;;  %vm3583_vm0 = vcmp.gt.f32.partialorder %v12857_v45, 0.0  ;;  %v12895_v58 = vld [vmem:[#allocation141_spill] sm:$0xff]  ;;  %v12896_v10 = vld [vmem:[#allocation74_spill] sm:$0xff]  ;;  %5932 = vst [vmem:[#allocation7 + $0x1e8] sm:$0xff] %v5715_v30   ;;  %v12899_v63 = vld [vmem:[#allocation76_spill] sm:$0xff] }
 0x804   :  { %vm3584_vm1 = vcmp.gt.f32.partialorder %v12861_v33, 0.0  ;;  %v10516_v61 = vmul.f32 0.01, %v12892_v31  ;;  %vm12894_vm7 = vcmp.gt.f32.partialorder %v12738_v13, 0.0  ;;  %v3938_v40 = vsel %vm3562_vm6, %v12742_v23, %v12895_v58  ;;  %v12897_v38 = vld [vmem:[#allocation142_spill] sm:$0xff]  ;;  %5933 = vst [vmem:[#allocation7 + $0x1f0] sm:$0xff] %v5720_v49  }
 0x805   :  { %v3937_v39 = vsel %vm12894_vm7, %v12738_v13, %v12893_v25  ;;  %v5730_v41 = vpack.c.bf16 %v3932_v50, %v3931_v1  ;;  %vm3585_vm4 = vcmp.gt.f32.partialorder %v12866_v16, 0.0  ;;  %vm3586_vm12 = vcmp.gt.f32.partialorder %v12870_v57, 0.0  ;;  %v12898_v13 = vld [vmem:[#allocation19_spill] sm:$0xff]  ;;  %v12900_v50 = vld [vmem:[#allocation132_spill] sm:$0xff]  ;;  %v12902_v30 = vld [vmem:[#allocation78_spill] sm:$0xff]  ;;  %5934 = vst [vmem:[#allocation7 + $0x1f8] sm:$0xff] %v5725_v18  }
 0x806   :  { %v10529_v19 = vmul.f32 0.01, %v12896_v10  ;;  %v3939_v27 = vsel %vm3563_vm2, %v12747_v24, %v12897_v38  ;;  %v3940_v25 = vsel %vm3564_vm3, %v12755_v37, %v12898_v13  ;;  %v5735_v23 = vpack.c.bf16 %v3934_v14, %v3933_v34  ;;  %v12901_v24 = vld [vmem:[#allocation148_spill] sm:$0xff]  ;;  %v12903_v14 = vld [vmem:[#allocation150_spill] sm:$0xff] }
 0x807   :  { %vm3587_vm6 = vcmp.gt.f32.partialorder %v12877_v29, 0.0  ;;  %v10542_v1 = vmul.f32 0.01, %v12899_v63  ;;  %v3941_v58 = vsel %vm3565_vm10, %v12760_v15, %v12900_v50  ;;  %v3942_v38 = vsel %vm3566_vm14, %v12767_v62, %v12901_v24  ;;  %v12905_v15 = vld [vmem:[#allocation20_spill] sm:$0xff]  ;;  %5935 = vst [vmem:[#allocation7 + $0x200] sm:$0xff] %v5730_v41   ;;  %v12912_v18 = vld [vmem:[#allocation82_spill] sm:$0xff] }
 0x808   :  { %v5740_v37 = vpack.c.bf16 %v3936_v54, %v3935_v2  ;;  %v10555_v34 = vmul.f32 0.01, %v12902_v30  ;;  %vm12904_vm7 = vcmp.gt.f32.partialorder %v12773_v53, 0.0  ;;  %vm12906_vm10 = vcmp.gt.f32.partialorder %v12778_v7, 0.0  ;;  %v12907_v49 = vld [vmem:[#allocation80_spill] sm:$0xff]  ;;  %v12908_v54 = vld [vmem:[#allocation135_spill] sm:$0xff] }
 0x809   :  { %v3943_v13 = vsel %vm12904_vm7, %v12773_v53, %v12903_v14  ;;  %v3944_v50 = vsel %vm12906_vm10, %v12778_v7, %v12905_v15  ;;  %v5745_v62 = vpack.c.bf16 %v3938_v40, %v3937_v39  ;;  %vm3592_vm3 = vcmp.gt.f32.partialorder %v12896_v10, 0.0  ;;  %v12910_v53 = vld [vmem:[#allocation156_spill] sm:$0xff]  ;;  %v12913_v40 = vld [vmem:[#allocation157_spill] sm:$0xff]  ;;  %5936 = vst [vmem:[#allocation7 + $0x208] sm:$0xff] %v5735_v23   ;;  %v12920_v23 = vld [vmem:[#allocation86_spill] sm:$0xff] }
 0x80a   :  { %v10568_v2 = vmul.f32 0.01, %v12907_v49  ;;  %vm12909_vm2 = vcmp.gt.f32.partialorder %v12783_v0, 0.0  ;;  %vm12911_vm7 = vcmp.gt.f32.partialorder %v12788_v6, 0.0  ;;  %v5750_v7 = vpack.c.bf16 %v3940_v25, %v3939_v27  ;;  %v12916_v41 = vld [vmem:[#allocation84_spill] sm:$0xff]  ;;  %5937 = vst [vmem:[#allocation7 + $0x210] sm:$0xff] %v5740_v37  }
 0x80b   :  { %v3945_v24 = vsel %vm12909_vm2, %v12783_v0, %v12908_v54  ;;  %v3946_v14 = vsel %vm12911_vm7, %v12788_v6, %v12910_v53  ;;  %v10581_v39 = vmul.f32 0.01, %v12912_v18  ;;  %v3947_v15 = vsel %vm3571_vm8, %v12794_v48, %v12913_v40  ;;  %v12914_v0 = vld [vmem:[#allocation21_spill] sm:$0xff]  ;;  %v12917_v25 = vld [vmem:[#allocation136_spill] sm:$0xff]  ;;  %v12919_v48 = vld [vmem:[#allocation158_spill] sm:$0xff]  ;;  %5938 = vst [vmem:[#allocation7 + $0x218] sm:$0xff] %v5745_v62  }
 0x80c   :  { %vm12915_vm2 = vcmp.gt.f32.partialorder %v12800_v43, 0.0  ;;  %v5755_v6 = vpack.c.bf16 %v3942_v38, %v3941_v58  ;;  %vm3595_vm7 = vcmp.gt.f32.partialorder %v12907_v49, 0.0  ;;  %v10594_v27 = vmul.f32 0.01, %v12916_v41  ;;  %v12921_v38 = vld [vmem:[#allocation159_spill] sm:$0xff]  ;;  %v12923_v37 = vld [vmem:[#allocation88_spill] sm:$0xff] }
 0x80d   :  { %v3948_v54 = vsel %vm12915_vm2, %v12800_v43, %v12914_v0  ;;  %vm12918_vm14 = vcmp.gt.f32.partialorder %v12806_v47, 0.0  ;;  %v3950_v40 = vsel %vm3574_vm5, %v12814_v28, %v12919_v48  ;;  %v5760_v43 = vpack.c.bf16 %v3944_v50, %v3943_v13  ;;  %v12924_v13 = vld [vmem:[#allocation90_spill] sm:$0xff]  ;;  %5939 = vst [vmem:[#allocation7 + $0x220] sm:$0xff] %v5750_v7  }
 0x80e   :  { %v3949_v53 = vsel %vm12918_vm14, %v12806_v47, %v12917_v25  ;;  %vm3597_vm8 = vcmp.gt.f32.partialorder %v12916_v41, 0.0  ;;  %v10607_v58 = vmul.f32 0.01, %v12920_v23  ;;  %vm12922_vm10 = vcmp.gt.f32.partialorder %v12876_v4, 0.0  ;;  %v12928_v62 = vld [vmem:[#allocation94_spill] sm:$0xff]  ;;  %5940 = vst [vmem:[#allocation7 + $0x228] sm:$0xff] %v5755_v6  }
 0x80f   :  { %v3951_v0 = vsel %vm12922_vm10, %v12876_v4, %v12921_v38  ;;  %v3952_v47 = vsel %vm3576_vm9, %v12829_v46, %v10321_v59  ;;  %v5765_v28 = vpack.c.bf16 %v3946_v14, %v3945_v24  ;;  %vm3599_vm5 = vcmp.gt.f32.partialorder %v12923_v37, 0.0  ;;  %v12926_v4 = vld [vmem:[#allocation23_spill] sm:$0xff]  ;;  %v12927_v59 = vld [vmem:[#allocation92_spill] sm:$0xff]  ;;  %v12931_v7 = vld [vmem:[#allocation98_spill] sm:$0xff]  ;;  %5941 = vst [vmem:[#allocation7 + $0x230] sm:$0xff] %v5760_v43  }
 0x810   :  { %v10620_v50 = vmul.f32 0.01, %v12923_v37  ;;  %vm12925_vm2 = vcmp.gt.f32.partialorder %v12833_v3, 0.0  ;;  %v3954_v48 = vsel %vm3578_vm15, %v12837_v8, %v12926_v4  ;;  %v5770_v46 = vpack.c.bf16 %v3948_v54, %v3947_v15  ;;  %v12930_v8 = vld [vmem:[#allocation96_spill] sm:$0xff]  ;;  %v12937_v38 = vld [vmem:[#allocation137_spill] sm:$0xff] }
 0x811   :  { %v3953_v25 = vsel %vm12925_vm2, %v12833_v3, %v10334_v9  ;;  %vm3601_vm9 = vcmp.gt.f32.partialorder %v12927_v59, 0.0  ;;  %vm3602_vm10 = vcmp.gt.f32.partialorder %v12928_v62, 0.0  ;;  %v10633_v24 = vmul.f32 0.01, %v12924_v13  ;;  %5942 = vst [vmem:[#allocation7 + $0x238] sm:$0xff] %v5765_v28   ;;  %v12942_v28 = vld [vmem:[#allocation133_spill] sm:$0xff] }
 0x812   :  { %vm12929_vm14 = vcmp.gt.f32.partialorder %v12843_v35, 0.0  ;;  %v3956_v3 = vsel %vm3580_vm11, %v12847_v60, %v10373_v52  ;;  %v5775_v9 = vpack.c.bf16 %v3950_v40, %v3949_v53  ;;  %vm3604_vm2 = vcmp.gt.f32.partialorder %v12931_v7, 0.0  ;;  %v12933_v60 = vld [vmem:[#allocation100_spill] sm:$0xff]  ;;  %v12934_v52 = vld [vmem:[#allocation102_spill] sm:$0xff]  ;;  %5943 = vst [vmem:[#allocation7 + $0x240] sm:$0xff] %v5770_v46  }
 0x813   :  { %v3955_v14 = vsel %vm12929_vm14, %v12843_v35, %v10360_v42  ;;  %v3789_v15 = vmul.f32 0.01, %v12927_v59  ;;  %v3957_v54 = vsel %vm3581_vm13, %v12851_v21, %v10386_v22  ;;  %vm12932_vm14 = vcmp.gt.f32.partialorder %v12854_v17, 0.0 }
 0x814   :  { %v3958_v35 = vsel %vm12932_vm14, %v12854_v17, %v10399_v12  ;;  %v5780_v42 = vpack.c.bf16 %v3952_v47, %v3951_v0  ;;  %vm3605_vm11 = vcmp.gt.f32.partialorder %v12933_v60, 0.0  ;;  %vm3606_vm15 = vcmp.gt.f32.partialorder %v12934_v52, 0.0  ;;  %v12935_v17 = vld [vmem:[#allocation104_spill] sm:$0xff]  ;;  %5944 = vst [vmem:[#allocation7 + $0x248] sm:$0xff] %v5775_v9  }
 0x815   :  { %v3790_v6 = vmul.f32 0.01, %v12928_v62  ;;  %v3959_v53 = vsel %vm3583_vm0, %v12857_v45, %v10412_v51  ;;  %v3960_v21 = vsel %vm3584_vm1, %v12861_v33, %v10425_v55  ;;  %v5785_v22 = vpack.c.bf16 %v3954_v48, %v3953_v25  ;;  %v12936_v12 = vld [vmem:[#allocation112_spill] sm:$0xff]  ;;  %v12938_v33 = vld [vmem:[#allocation123_spill] sm:$0xff] }
 0x816   :  { %vm3607_vm13 = vcmp.gt.f32.partialorder %v12935_v17, 0.0  ;;  %vm3608_vm14 = vcmp.gt.f32.partialorder %v12936_v12, 0.0  ;;  %v3791_v40 = vmul.f32 0.01, %v12930_v8  ;;  %v3961_v43 = vsel %vm3585_vm4, %v12866_v16, %v10438_v44  ;;  %v12939_v55 = vld [vmem:[#allocation128_spill] sm:$0xff]  ;;  %5945 = vst [vmem:[#allocation7 + $0x250] sm:$0xff] %v5780_v42  }
 0x817   :  { %v3962_v45 = vsel %vm3586_vm12, %v12870_v57, %v12937_v38  ;;  %v5790_v51 = vpack.c.bf16 %v3956_v3, %v3955_v14  ;;  %v3792_v0 = vmul.f32 0.01, %v12931_v7  ;;  %v3963_v47 = vsel %vm3587_vm6, %v12877_v29, %v10464_v56  ;;  %v12941_v57 = vld [vmem:[#allocation130_spill] sm:$0xff]  ;;  %5946 = vst [vmem:[#allocation7 + $0x258] sm:$0xff] %v5785_v22  }
 0x818   :  { %vm12940_vm4 = vcmp.gt.f32.partialorder %v12881_v20, 0.0  ;;  %v5795_v44 = vpack.c.bf16 %v3958_v35, %v3957_v54  ;;  %vm3611_vm12 = vcmp.gt.f32.partialorder %v12941_v57, 0.0  ;;  %vm3612_vm0 = vcmp.gt.f32.partialorder %v12942_v28, 0.0  ;;  %v12952_v14 = vld [vmem:[#allocation134_spill] sm:$0xff] }
 0x819   :  { %v3964_v16 = vsel %vm12940_vm4, %v12881_v20, %v10477_v11  ;;  %v3793_v25 = vmul.f32 0.01, %v12933_v60  ;;  %vm12943_vm1 = vcmp.gt.f32.partialorder %v12885_v26, 0.0  ;;  %vm12944_vm6 = vcmp.gt.f32.partialorder %v12889_v36, 0.0  ;;  %5947 = vst [vmem:[#allocation7 + $0x260] sm:$0xff] %v5790_v51  }
 0x81a   :  { %v3965_v4 = vsel %vm12943_vm1, %v12885_v26, %v10490_v5  ;;  %v3966_v29 = vsel %vm12944_vm6, %v12889_v36, %v10503_v32  ;;  %v5800_v56 = vpack.c.bf16 %v3960_v21, %v3959_v53  ;;  %v3794_v20 = vmul.f32 0.01, %v12934_v52  ;;  %5948 = vst [vmem:[#allocation7 + $0x268] sm:$0xff] %v5795_v44  }
 0x81b   :  { %vm12945_vm4 = vcmp.gt.f32.partialorder %v12892_v31, 0.0  ;;  %v3968_v48 = vsel %vm3592_vm3, %v12896_v10, %v10529_v19  ;;  %v5805_v26 = vpack.c.bf16 %v3962_v45, %v3961_v43  ;;  %v3795_v5 = vmul.f32 0.01, %v12935_v17 }
 0x81c   :  { %v3967_v11 = vsel %vm12945_vm4, %v12892_v31, %v10516_v61  ;;  %vm12946_vm1 = vcmp.gt.f32.partialorder %v12899_v63, 0.0  ;;  %vm12947_vm6 = vcmp.gt.f32.partialorder %v12902_v30, 0.0  ;;  %v5810_v31 = vpack.c.bf16 %v3964_v16, %v3963_v47  ;;  %5949 = vst [vmem:[#allocation7 + $0x270] sm:$0xff] %v5800_v56  }
 0x81d   :  { %v3969_v36 = vsel %vm12946_vm1, %v12899_v63, %v10542_v1  ;;  %v3970_v32 = vsel %vm12947_vm6, %v12902_v30, %v10555_v34  ;;  %v3796_v61 = vmul.f32 0.01, %v12936_v12  ;;  %v3971_v10 = vsel %vm3595_vm7, %v12907_v49, %v10568_v2  ;;  %5950 = vst [vmem:[#allocation7 + $0x278] sm:$0xff] %v5805_v26  }
 0x81e   :  { %vm12948_vm3 = vcmp.gt.f32.partialorder %v12912_v18, 0.0  ;;  %v5815_v63 = vpack.c.bf16 %v3966_v29, %v3965_v4  ;;  %v3797_v1 = vmul.f32 0.01, %v12938_v33  ;;  %v3973_v30 = vsel %vm3597_vm8, %v12916_v41, %v10594_v27  ;;  %5951 = vst [vmem:[#allocation7 + $0x280] sm:$0xff] %v5810_v31  }
 0x81f   :  { %v3972_v19 = vsel %vm12948_vm3, %v12912_v18, %v10581_v39  ;;  %vm12949_vm4 = vcmp.gt.f32.partialorder %v12920_v23, 0.0  ;;  %v5820_v49 = vpack.c.bf16 %v3968_v48, %v3967_v11  ;;  %v3798_v2 = vmul.f32 0.01, %v12939_v55 }
 0x820   :  { %v3974_v34 = vsel %vm12949_vm4, %v12920_v23, %v10607_v58  ;;  %v3975_v18 = vsel %vm3599_vm5, %v12923_v37, %v10620_v50  ;;  %vm12950_vm7 = vcmp.gt.f32.partialorder %v12924_v13, 0.0  ;;  %v5825_v41 = vpack.c.bf16 %v3970_v32, %v3969_v36  ;;  %5952 = vst [vmem:[#allocation7 + $0x288] sm:$0xff] %v5815_v63  }
 0x821   :  { %v3976_v39 = vsel %vm12950_vm7, %v12924_v13, %v10633_v24  ;;  %v3799_v27 = vmul.f32 0.01, %v12941_v57  ;;  %v3977_v23 = vsel %vm3601_vm9, %v12927_v59, %v3789_v15  ;;  %v3978_v58 = vsel %vm3602_vm10, %v12928_v62, %v3790_v6  ;;  %5953 = vst [vmem:[#allocation7 + $0x290] sm:$0xff] %v5820_v49  }
 0x822   :  { %v5830_v46 = vpack.c.bf16 %v3972_v19, %v3971_v10  ;;  %v3800_v37 = vmul.f32 0.01, %v12942_v28  ;;  %vm12951_vm8 = vcmp.gt.f32.partialorder %v12930_v8, 0.0  ;;  %v3980_v50 = vsel %vm3604_vm2, %v12931_v7, %v3792_v0  ;;  %5954 = vst [vmem:[#allocation7 + $0x298] sm:$0xff] %v5825_v41  }
 0x823   :  { %v3979_v13 = vsel %vm12951_vm8, %v12930_v8, %v3791_v40  ;;  %v5835_v24 = vpack.c.bf16 %v3974_v34, %v3973_v30  ;;  %v3801_v59 = vmul.f32 0.01, %v12952_v14  ;;  %v3981_v62 = vsel %vm3605_vm11, %v12933_v60, %v3793_v25 }
 0x824   :  { %v3982_v3 = vsel %vm3606_vm15, %v12934_v52, %v3794_v20  ;;  %v5840_v9 = vpack.c.bf16 %v3976_v39, %v3975_v18  ;;  %vm3613_vm5 = vcmp.gt.f32.partialorder %v12952_v14, 0.0  ;;  %v3983_v8 = vsel %vm3607_vm13, %v12935_v17, %v3795_v5  ;;  %5955 = vst [vmem:[#allocation7 + $0x2a0] sm:$0xff] %v5830_v46  }
 0x825   :  { %v3984_v7 = vsel %vm3608_vm14, %v12936_v12, %v3796_v61  ;;  %v5845_v15 = vpack.c.bf16 %v3978_v58, %v3977_v23  ;;  %vm12953_vm9 = vcmp.gt.f32.partialorder %v12938_v33, 0.0  ;;  %vm12954_vm10 = vcmp.gt.f32.partialorder %v12939_v55, 0.0  ;;  %5956 = vst [vmem:[#allocation7 + $0x2a8] sm:$0xff] %v5835_v24  }
 0x826   :  { %v3985_v54 = vsel %vm12953_vm9, %v12938_v33, %v3797_v1  ;;  %v3986_v35 = vsel %vm12954_vm10, %v12939_v55, %v3798_v2  ;;  %v5850_v42 = vpack.c.bf16 %v3980_v50, %v3979_v13  ;;  %v3987_v60 = vsel %vm3611_vm12, %v12941_v57, %v3799_v27  ;;  %5957 = vst [vmem:[#allocation7 + $0x2b0] sm:$0xff] %v5840_v9  }
 0x827   :  { %v3988_v52 = vsel %vm3612_vm0, %v12942_v28, %v3800_v37  ;;  %v5855_v6 = vpack.c.bf16 %v3982_v3, %v3981_v62  ;;  %v3989_v53 = vsel %vm3613_vm5, %v12952_v14, %v3801_v59  ;;  %v5860_v21 = vpack.c.bf16 %v3984_v7, %v3983_v8  ;;  %5958 = vst [vmem:[#allocation7 + $0x2b8] sm:$0xff] %v5845_v15  }
 0x828   :  { %v5865_v22 = vpack.c.bf16 %v3986_v35, %v3985_v54  ;;  %5959 = vst [vmem:[#allocation7 + $0x2c0] sm:$0xff] %v5850_v42   ;;  %v5870_v17 = vpack.c.bf16 %v3988_v52, %v3987_v60  ;;  %v4177_v12 = vpack.c.bf16 %v3989_v53, %v3989_v53 }
 0x829   :  { %5960 = vst [vmem:[#allocation7 + $0x2c8] sm:$0xff] %v5855_v6  }
 0x82a   :  { %5961 = vst [vmem:[#allocation7 + $0x2d0] sm:$0xff] %v5860_v21  }
 0x82b   :  { %5962 = vst [vmem:[#allocation7 + $0x2d8] sm:$0xff] %v5865_v22  }
 0x82c   :  { %5963 = vst [vmem:[#allocation7 + $0x2e0] sm:$0xff] %v5870_v17  }
 0x82d   :  { %4365 = vst [vmem:[#allocation7 + $0x2e8] sm:$0xf] %v4177_v12 }
 0x82e   :  { %4379 = dma.vmem_to_hbm [thread:$0]  %s4372_s3, 12032, %s4374_s7, [#allocation4], %s6072_s27, %s6072_s27, %s6073_s28  }
 0x82f   :  { %6066 = dma.done.wait [#allocation4], 12032  }
 0x830   :  { %6067 = vsyncadd [#allocation4], 4294955264 }
 0x831   :  { %4384 = vsyncpa [#allocation3], 1 }
 0x832   :  { %4385 = vsyncpa [#allocation6], 1 }
 0x833   :  { %4386 = vsyncpa [#allocation4], 1 }

</bundles_post_ra>
